<compile_context>
chip_gen: v7x
topology: tpu7x:2x2x1
jax: 0.10.0
libtpu: 0.0.40
codegen_flags: <defaults>
</compile_context>

<pallas_src>
import math
import jax
import jax.numpy as jnp
from jax.experimental import pallas as pl
from jax.experimental.pallas import tpu as pltpu

HIDDEN = 768
NUM_HEADS = 8
HEAD_DIM = HIDDEN // NUM_HEADS      # 96 (logical)
HEAD_PAD = 128                      # padded per-head width (lane-aligned)
KW = NUM_HEADS * HEAD_PAD           # 1024 (padded Q/K/V width)
PAD_OUT = 128                       # padded logits width (real classes = 2)


# ----------------------------------------------------------------------------
# Single fused kernel per batch tile:
#   CLS-query attention + (wo ∘ BN1 ∘ fc1) + ReLU + (BN2 ∘ fc2) + ReLU + fc3 + softmax
# ----------------------------------------------------------------------------
def fused_cls_kernel(xc_ref, x2_ref, wq_ref, wkv_ref, w1_ref, w2_ref, w3_ref,
                     bq_ref, bkv_ref, b1_ref, b2_ref, b3_ref, o_ref):
    BB = xc_ref.shape[0]                 # batch elements in this tile
    S = x2_ref.shape[0] // BB            # sequence length

    # Q for the CLS rows only (1/sqrt(head_dim) pre-folded into wq/bq), M = BB.
    q = (jnp.dot(xc_ref[...], wq_ref[...], preferred_element_type=jnp.float32)
         + bq_ref[...]).astype(jnp.bfloat16)                          # (BB, 1024)

    # Fused K|V projection as one 2-D matmul with M = BB*S; single bf16 cast pass.
    kv = (jnp.dot(x2_ref[...], wkv_ref[...], preferred_element_type=jnp.float32)
          + bkv_ref[...]).astype(jnp.bfloat16)                        # (BB*S, 2048)

    # Block-diagonal additive mask: query of batch b only attends to its own S keys.
    rows = jax.lax.broadcasted_iota(jnp.int32, (BB, BB * S), 0)
    cols = jax.lax.broadcasted_iota(jnp.int32, (BB, BB * S), 1)
    start = rows * S
    bias = jnp.where((cols >= start) & (cols < start + S),
                     jnp.float32(0.0), jnp.float32(-1e30))            # (BB, BB*S)

    ctxs = []
    for h in range(NUM_HEADS):                                        # static loop, 128-aligned slices
        lo = h * HEAD_PAD
        q_h = q[:, lo:lo + HEAD_PAD]                                  # (BB, 128)
        k_h = kv[:, lo:lo + HEAD_PAD]                                 # (BB*S, 128)
        v_h = kv[:, KW + lo:KW + lo + HEAD_PAD]                       # (BB*S, 128)

        s_h = jax.lax.dot_general(                                    # (BB, BB*S), q @ k^T
            q_h, k_h, (((1,), (1,)), ((), ())),
            preferred_element_type=jnp.float32) + bias
        m = jnp.max(s_h, axis=-1, keepdims=True)
        e = jnp.exp(s_h - m)                                          # off-batch cols -> exactly 0
        p = (e * pl.reciprocal(jnp.sum(e, axis=-1, keepdims=True), approx=True)
             ).astype(jnp.bfloat16)
        ctxs.append(jnp.dot(p, v_h, preferred_element_type=jnp.float32))   # (BB, 128)

    # One K=1024 fc1 matmul (wo and BN1 pre-folded into w1/b1); dropout = identity (eval).
    ctx = jnp.concatenate(ctxs, axis=-1).astype(jnp.bfloat16)         # (BB, 1024)
    h1 = jnp.maximum(jnp.dot(ctx, w1_ref[...], preferred_element_type=jnp.float32)
                     + b1_ref[...], 0.0)                              # (BB, 512)
    h2 = jnp.maximum(jnp.dot(h1.astype(jnp.bfloat16), w2_ref[...],
                             preferred_element_type=jnp.float32)
                     + b2_ref[...], 0.0)                              # (BB, 256), BN2 folded
    logits = jnp.dot(h2.astype(jnp.bfloat16), w3_ref[...],
                     preferred_element_type=jnp.float32) + b3_ref[...]   # (BB, 128), pads = -1e30
    m2 = jnp.max(logits, axis=-1, keepdims=True)
    e2 = jnp.exp(logits - m2)                                         # padded columns -> exactly 0
    o_ref[...] = e2 / jnp.sum(e2, axis=-1, keepdims=True)             # exact divide: final probs


def cls_classifier(hidden_states, packed, batch_block=8):
    """batch_block: tune per generation (VMEM): ~8 on v7x (64 MiB/TC), 16-32 on v6e/v5e."""
    B, S, H = hidden_states.shape
    hs = hidden_states.astype(jnp.bfloat16)        # bf16 activation DMA (halves HBM traffic)

    # Batch tile: keep block dims (8,128)-friendly. Tiny batches use one full-batch tile
    # (block == full array); larger batches use an 8-aligned block and zero-pad B up.
    if B <= 8:
        bb = B
    else:
        bb = max(8, (min(batch_block, B) // 8) * 8)
    steps = (B + bb - 1) // bb
    Bp = steps * bb
    if Bp != B:
        hs = jnp.pad(hs, ((0, Bp - B), (0, 0), (0, 0)))

    x_cls = hs[:, 0, :]                            # (Bp, 768)   CLS rows only
    x_all = hs.reshape(Bp * S, H)                  # (Bp*S, 768) for the fused K|V projection

    def full(a):                                   # resident weights: constant block index
        nd = a.ndim
        return pl.BlockSpec(a.shape, lambda b, _nd=nd: (0,) * _nd)

    out = pl.pallas_call(
        fused_cls_kernel,
        out_shape=jax.ShapeDtypeStruct((Bp, PAD_OUT), jnp.float32),
        grid=(steps,),
        in_specs=[pl.BlockSpec((bb, H), lambda b: (b, 0)),
                  pl.BlockSpec((bb * S, H), lambda b: (b, 0)),
                  full(packed["wq"]), full(packed["wkv"]),
                  full(packed["w1"]), full(packed["w2"]), full(packed["w3"]),
                  full(packed["bq"]), full(packed["bkv"]),
                  full(packed["b1"]), full(packed["b2"]), full(packed["b3"])],
        out_specs=pl.BlockSpec((bb, PAD_OUT), lambda b: (b, 0)),
        compiler_params=pltpu.CompilerParams(
            dimension_semantics=("parallel",),     # megacore / dual-TC sharding over batch tiles
            vmem_limit_bytes=48 << 20),            # < 64 MiB so it also fits a v7x TC
    )(x_cls, x_all,
      packed["wq"], packed["wkv"], packed["w1"], packed["w2"], packed["w3"],
      packed["bq"], packed["bkv"], packed["b1"], packed["b2"], packed["b3"])
    return out[:B, :2]                             # real class probabilities


# ----------------------------------------------------------------------------
# Host-side parameter packing (padding, fusion, folding, bf16 cast)
# ----------------------------------------------------------------------------
def pack_params(p):
    inv_sqrt_d = 1.0 / math.sqrt(float(HEAD_DIM))

    def pad_heads_cols(w):         # (768, 768) -> (768, 8*128), zero-pad each head's columns
        w = w.reshape(HIDDEN, NUM_HEADS, HEAD_DIM)
        w = jnp.pad(w, ((0, 0), (0, 0), (0, HEAD_PAD - HEAD_DIM)))
        return w.reshape(HIDDEN, NUM_HEADS * HEAD_PAD)

    def pad_heads_bias(b):         # (768,) -> (1024,)
        b = b.reshape(NUM_HEADS, HEAD_DIM)
        b = jnp.pad(b, ((0, 0), (0, HEAD_PAD - HEAD_DIM)))
        return b.reshape(NUM_HEADS * HEAD_PAD)

    # Q (scale folded), K, V (fused) — all head-padded.
    # NOTE: head padding 96->128 adds ~33% FLOPs to the KV projection; acceptable while
    # latency-bound, revisit if a large-batch deployment becomes MXU-bound.
    wq_p = pad_heads_cols(p["wq"] * inv_sqrt_d)
    bq_p = pad_heads_bias(p["bq"] * inv_sqrt_d)
    wkv_p = jnp.concatenate([pad_heads_cols(p["wk"]), pad_heads_cols(p["wv"])], axis=1)  # (768, 2048)
    bkv_p = jnp.concatenate([pad_heads_bias(p["bk"]), pad_heads_bias(p["bv"])], axis=0)  # (2048,)

    # wo: pad its (ctx) input dim per head: (768, 768) -> (1024, 768)
    wo_p = jnp.pad(p["wo"].reshape(NUM_HEADS, HEAD_DIM, HIDDEN),
                   ((0, 0), (0, HEAD_PAD - HEAD_DIM), (0, 0))
                   ).reshape(NUM_HEADS * HEAD_PAD, HIDDEN)

    # Fold BN1 (eval, running stats) into fc1, then fold wo into fc1 (no nonlinearity between).
    # NOTE: for a trained checkpoint, pack the real running_mean/var; and if accuracy drifts,
    # keep w1f in f32 (~2 MiB) instead of bf16.
    w1s = p["w1"] * p["bn1_scale"][None, :]                 # (768, 512)
    b1s = p["b1"] * p["bn1_scale"] + p["bn1_shift"]         # (512,)
    w1f = wo_p @ w1s                                        # (1024, 512)
    b1f = p["bo"] @ w1s + b1s                               # (512,)

    # Fold BN2 (eval) into fc2.
    w2f = p["w2"] * p["bn2_scale"][None, :]
    b2f = p["b2"] * p["bn2_scale"] + p["bn2_shift"]

    # fc3 padded to 128 output columns; padded bias = -1e30 (kept f32) so softmax ignores them.
    w3p = jnp.pad(p["w3"], ((0, 0), (0, PAD_OUT - 2)))
    b3p = jnp.concatenate([p["b3"], jnp.full((PAD_OUT - 2,), -1e30, jnp.float32)])

    bf = lambda a: a.astype(jnp.bfloat16)
    return dict(
        wq=bf(wq_p), wkv=bf(wkv_p), w1=bf(w1f), w2=bf(w2f), w3=bf(w3p),
        bq=bq_p.reshape(1, -1).astype(jnp.float32),
        bkv=bkv_p.reshape(1, -1).astype(jnp.float32),
        b1=b1f.reshape(1, -1).astype(jnp.float32),
        b2=b2f.reshape(1, -1).astype(jnp.float32),
        b3=b3p.reshape(1, -1).astype(jnp.float32),
    )


# ----------------------------------------------------------------------------
# Parameter init (matches nn.Linear transposed layout + BatchNorm1d init stats)
# ----------------------------------------------------------------------------
def init_params(key):
    ks = jax.random.split(key, 14)
    std = 0.02

    def lin(kw, kb, d_in, d_out):
        # PyTorch nn.Linear stores (out,in); we store transposed (in,out) for y = x @ W + b.
        w = jax.random.normal(kw, (d_in, d_out), jnp.float32) * std
        b = jax.random.normal(kb, (d_out,), jnp.float32) * std
        return w, b

    p = {}
    p["wq"], p["bq"] = lin(ks[0], ks[1], HIDDEN, HIDDEN)
    p["wk"], p["bk"] = lin(ks[2], ks[3], HIDDEN, HIDDEN)
    p["wv"], p["bv"] = lin(ks[4], ks[5], HIDDEN, HIDDEN)
    p["wo"], p["bo"] = lin(ks[6], ks[7], HIDDEN, HIDDEN)
    p["w1"], p["b1"] = lin(ks[8], ks[9], HIDDEN, 512)
    p["w2"], p["b2"] = lin(ks[10], ks[11], 512, 256)
    p["w3"], p["b3"] = lin(ks[12], ks[13], 256, 2)

    eps = 1e-5
    for name, dim in (("bn1", 512), ("bn2", 256)):
        gamma = jnp.ones((dim,), jnp.float32)       # nn.BatchNorm1d default init / running stats
        beta = jnp.zeros((dim,), jnp.float32)
        running_mean = jnp.zeros((dim,), jnp.float32)
        running_var = jnp.ones((dim,), jnp.float32)
        scale = gamma / jnp.sqrt(running_var + eps)
        shift = beta - running_mean * scale
        p[name + "_scale"] = scale
        p[name + "_shift"] = shift
    return p


# ----------------------------------------------------------------------------
# Pure-JAX reference of the original module (for correctness check)
# ----------------------------------------------------------------------------
def reference_forward(x, p):
    q = x @ p["wq"] + p["bq"]
    k = x @ p["wk"] + p["bk"]
    v = x @ p["wv"] + p["bv"]
    B, S, H = x.shape

    def heads(t):
        return t.reshape(B, S, NUM_HEADS, HEAD_DIM).transpose(0, 2, 1, 3)

    qh, kh, vh = heads(q), heads(k), heads(v)
    sc = jnp.einsum("bhqd,bhkd->bhqk", qh, kh) / jnp.sqrt(jnp.float32(HEAD_DIM))
    w = jax.nn.softmax(sc, axis=-1)
    ctx = jnp.einsum("bhqk,bhkd->bhqd", w, vh).transpose(0, 2, 1, 3).reshape(B, S, H)
    out = (ctx @ p["wo"] + p["bo"])[:, 0]
    h1 = jnp.maximum((out @ p["w1"] + p["b1"]) * p["bn1_scale"] + p["bn1_shift"], 0.0)
    h2 = jnp.maximum((h1 @ p["w2"] + p["b2"]) * p["bn2_scale"] + p["bn2_shift"], 0.0)
    logits = h2 @ p["w3"] + p["b3"]
    return jax.nn.softmax(logits, axis=-1)


@jax.jit
def model_forward(hidden_states, packed):
    # TODO(synk): the pretrained BERT encoder (`pretrained(...)`) is an external checkpoint
    # and is not translated; `hidden_states` stands in for `pretrained(...).last_hidden_state`.
    return cls_classifier(hidden_states, packed)


if __name__ == "__main__":
    key = jax.random.PRNGKey(0)
    k_x, k_p = jax.random.split(key)

    # B=12 exercises the batch-tiled path: block of 8, 2 grid steps, batch zero-padding.
    B, S = 12, 8
    hidden_states = jax.random.normal(k_x, (B, S, HIDDEN), jnp.float32)
    params = init_params(k_p)
    packed = pack_params(params)

    probs = model_forward(hidden_states, packed)
    jax.block_until_ready(probs)

    ref = reference_forward(hidden_states, params)

    assert probs.shape == (B, 2)
    assert bool(jnp.all(jnp.isfinite(probs)))
    assert bool(jnp.allclose(jnp.sum(probs, axis=1), 1.0, atol=1e-5))
    assert bool(jnp.max(jnp.abs(probs - ref)) < 5e-2)   # bf16 matmul tolerance
    print("KERNEL_OK")
</pallas_src>

<mosaic_0001>
module attributes {stable_mosaic.version = 11 : i64} {
  func.func @fused_cls_kernel(%arg0: i32, %arg1: memref<8x768xbf16, #tpu.memory_space<vmem>>, %arg2: memref<64x768xbf16, #tpu.memory_space<vmem>>, %arg3: memref<768x1024xbf16, #tpu.memory_space<vmem>>, %arg4: memref<768x2048xbf16, #tpu.memory_space<vmem>>, %arg5: memref<1024x512xbf16, #tpu.memory_space<vmem>>, %arg6: memref<512x256xbf16, #tpu.memory_space<vmem>>, %arg7: memref<256x128xbf16, #tpu.memory_space<vmem>>, %arg8: memref<1x1024xf32, #tpu.memory_space<vmem>>, %arg9: memref<1x2048xf32, #tpu.memory_space<vmem>>, %arg10: memref<1x512xf32, #tpu.memory_space<vmem>>, %arg11: memref<1x256xf32, #tpu.memory_space<vmem>>, %arg12: memref<1x128xf32, #tpu.memory_space<vmem>>, %arg13: memref<8x128xf32, #tpu.memory_space<vmem>>) attributes {dimension_semantics = [#tpu.dimension_semantics<parallel>], iteration_bounds = array<i64: 2>, scalar_prefetch = 0 : i64, scratch_operands = 0 : i64, tpu.core_type = #tpu.core_type<tc>, window_params = [{transform_indices = @transform_0, window_bounds = array<i64: 8, 768>}, {transform_indices = @transform_1, window_bounds = array<i64: 64, 768>}, {pipeline_mode = #tpu.pipeline_mode<synchronous>, transform_indices = @transform_2, window_bounds = array<i64: 768, 1024>}, {pipeline_mode = #tpu.pipeline_mode<synchronous>, transform_indices = @transform_3, window_bounds = array<i64: 768, 2048>}, {pipeline_mode = #tpu.pipeline_mode<synchronous>, transform_indices = @transform_4, window_bounds = array<i64: 1024, 512>}, {pipeline_mode = #tpu.pipeline_mode<synchronous>, transform_indices = @transform_5, window_bounds = array<i64: 512, 256>}, {pipeline_mode = #tpu.pipeline_mode<synchronous>, transform_indices = @transform_6, window_bounds = array<i64: 256, 128>}, {pipeline_mode = #tpu.pipeline_mode<synchronous>, transform_indices = @transform_7, window_bounds = array<i64: 1, 1024>}, {pipeline_mode = #tpu.pipeline_mode<synchronous>, transform_indices = @transform_8, window_bounds = array<i64: 1, 2048>}, {pipeline_mode = #tpu.pipeline_mode<synchronous>, transform_indices = @transform_9, window_bounds = array<i64: 1, 512>}, {pipeline_mode = #tpu.pipeline_mode<synchronous>, transform_indices = @transform_10, window_bounds = array<i64: 1, 256>}, {pipeline_mode = #tpu.pipeline_mode<synchronous>, transform_indices = @transform_11, window_bounds = array<i64: 1, 128>}, {transform_indices = @transform_12, window_bounds = array<i64: 8, 128>}]} {
    %c0 = arith.constant 0 : index
    %c0_0 = arith.constant 0 : index
    %0 = vector.load %arg1[%c0, %c0_0] : memref<8x768xbf16, #tpu.memory_space<vmem>>, vector<8x768xbf16>
    %c0_1 = arith.constant 0 : index
    %c0_2 = arith.constant 0 : index
    %1 = vector.load %arg3[%c0_1, %c0_2] : memref<768x1024xbf16, #tpu.memory_space<vmem>>, vector<768x1024xbf16>
    %cst = arith.constant dense<0.000000e+00> : vector<8x1024xf32>
    %2 = tpu.matmul %0, %1, %cst {dimension_numbers = #tpu.dot_dimension_numbers<[1], [0], [0], [1], [0, 0, 1, 1], [], []>} : vector<8x768xbf16>, vector<768x1024xbf16>, vector<8x1024xf32> -> vector<8x1024xf32>
    %c0_3 = arith.constant 0 : index
    %c0_4 = arith.constant 0 : index
    %3 = vector.load %arg8[%c0_3, %c0_4] : memref<1x1024xf32, #tpu.memory_space<vmem>>, vector<1x1024xf32>
    %4 = vector.broadcast %3 : vector<1x1024xf32> to vector<8x1024xf32>
    %5 = arith.addf %2, %4 : vector<8x1024xf32>
    %6 = arith.truncf %5 : vector<8x1024xf32> to vector<8x1024xbf16>
    %c0_5 = arith.constant 0 : index
    %c0_6 = arith.constant 0 : index
    %7 = vector.load %arg2[%c0_5, %c0_6] : memref<64x768xbf16, #tpu.memory_space<vmem>>, vector<64x768xbf16>
    %c0_7 = arith.constant 0 : index
    %c0_8 = arith.constant 0 : index
    %8 = vector.load %arg4[%c0_7, %c0_8] : memref<768x2048xbf16, #tpu.memory_space<vmem>>, vector<768x2048xbf16>
    %cst_9 = arith.constant dense<0.000000e+00> : vector<64x2048xf32>
    %9 = tpu.matmul %7, %8, %cst_9 {dimension_numbers = #tpu.dot_dimension_numbers<[1], [0], [0], [1], [0, 0, 1, 1], [], []>} : vector<64x768xbf16>, vector<768x2048xbf16>, vector<64x2048xf32> -> vector<64x2048xf32>
    %c0_10 = arith.constant 0 : index
    %c0_11 = arith.constant 0 : index
    %10 = vector.load %arg9[%c0_10, %c0_11] : memref<1x2048xf32, #tpu.memory_space<vmem>>, vector<1x2048xf32>
    %11 = vector.broadcast %10 : vector<1x2048xf32> to vector<64x2048xf32>
    %12 = arith.addf %9, %11 : vector<64x2048xf32>
    %13 = arith.truncf %12 : vector<64x2048xf32> to vector<64x2048xbf16>
    %14 = tpu.iota {dimensions = array<i32: 0>} : vector<8x64xi32>
    %15 = tpu.iota {dimensions = array<i32: 1>} : vector<8x64xi32>
    %c8_i32 = arith.constant 8 : i32
    %16 = vector.broadcast %c8_i32 : i32 to vector<8x64xi32>
    %17 = arith.muli %14, %16 : vector<8x64xi32>
    %18 = arith.cmpi sge, %15, %17 : vector<8x64xi32>
    %c8_i32_12 = arith.constant 8 : i32
    %19 = vector.broadcast %c8_i32_12 : i32 to vector<8x64xi32>
    %20 = arith.addi %17, %19 : vector<8x64xi32>
    %21 = arith.cmpi slt, %15, %20 : vector<8x64xi32>
    %22 = arith.andi %18, %21 : vector<8x64xi1>
    %cst_13 = arith.constant 0.000000e+00 : f32
    %cst_14 = arith.constant -1.000000e+30 : f32
    %23 = vector.broadcast %cst_13 : f32 to vector<8x64xf32>
    %24 = vector.broadcast %cst_14 : f32 to vector<8x64xf32>
    %25 = arith.select %22, %23, %24 : vector<8x64xi1>, vector<8x64xf32>
    %26 = vector.extract_strided_slice %6 {offsets = [0, 0], sizes = [8, 128], strides = [1, 1]} : vector<8x1024xbf16> to vector<8x128xbf16>
    %27 = vector.extract_strided_slice %13 {offsets = [0, 0], sizes = [64, 128], strides = [1, 1]} : vector<64x2048xbf16> to vector<64x128xbf16>
    %28 = vector.extract_strided_slice %13 {offsets = [0, 1024], sizes = [64, 128], strides = [1, 1]} : vector<64x2048xbf16> to vector<64x128xbf16>
    %cst_15 = arith.constant dense<0.000000e+00> : vector<8x64xf32>
    %29 = tpu.matmul %26, %27, %cst_15 {dimension_numbers = #tpu.dot_dimension_numbers<[1], [1], [0], [0], [0, 0, 1, 0], [], []>} : vector<8x128xbf16>, vector<64x128xbf16>, vector<8x64xf32> -> vector<8x64xf32>
    %30 = arith.addf %29, %25 : vector<8x64xf32>
    %cst_16 = arith.constant dense<0xFF800000> : vector<8xf32>
    %31 = vector.multi_reduction <maximumf>, %30, %cst_16 [1] : vector<8x64xf32> to vector<8xf32>
    %32 = vector.shape_cast %31 : vector<8xf32> to vector<8x1xf32>
    %33 = vector.broadcast %32 : vector<8x1xf32> to vector<8x64xf32>
    %34 = arith.subf %30, %33 : vector<8x64xf32>
    %35 = math.exp %34 : vector<8x64xf32>
    %cst_17 = arith.constant dense<0.000000e+00> : vector<8xf32>
    %36 = vector.multi_reduction <add>, %35, %cst_17 [1] : vector<8x64xf32> to vector<8xf32>
    %37 = vector.shape_cast %36 : vector<8xf32> to vector<8x1xf32>
    %38 = tpu.reciprocal %37 {approx = true} : vector<8x1xf32> -> vector<8x1xf32>
    %39 = vector.broadcast %38 : vector<8x1xf32> to vector<8x64xf32>
    %40 = arith.mulf %35, %39 : vector<8x64xf32>
    %41 = arith.truncf %40 : vector<8x64xf32> to vector<8x64xbf16>
    %cst_18 = arith.constant dense<0.000000e+00> : vector<8x128xf32>
    %42 = tpu.matmul %41, %28, %cst_18 {dimension_numbers = #tpu.dot_dimension_numbers<[1], [0], [0], [1], [0, 0, 1, 1], [], []>} : vector<8x64xbf16>, vector<64x128xbf16>, vector<8x128xf32> -> vector<8x128xf32>
    %43 = vector.extract_strided_slice %6 {offsets = [0, 128], sizes = [8, 128], strides = [1, 1]} : vector<8x1024xbf16> to vector<8x128xbf16>
    %44 = vector.extract_strided_slice %13 {offsets = [0, 128], sizes = [64, 128], strides = [1, 1]} : vector<64x2048xbf16> to vector<64x128xbf16>
    %45 = vector.extract_strided_slice %13 {offsets = [0, 1152], sizes = [64, 128], strides = [1, 1]} : vector<64x2048xbf16> to vector<64x128xbf16>
    %cst_19 = arith.constant dense<0.000000e+00> : vector<8x64xf32>
    %46 = tpu.matmul %43, %44, %cst_19 {dimension_numbers = #tpu.dot_dimension_numbers<[1], [1], [0], [0], [0, 0, 1, 0], [], []>} : vector<8x128xbf16>, vector<64x128xbf16>, vector<8x64xf32> -> vector<8x64xf32>
    %47 = arith.addf %46, %25 : vector<8x64xf32>
    %cst_20 = arith.constant dense<0xFF800000> : vector<8xf32>
    %48 = vector.multi_reduction <maximumf>, %47, %cst_20 [1] : vector<8x64xf32> to vector<8xf32>
    %49 = vector.shape_cast %48 : vector<8xf32> to vector<8x1xf32>
    %50 = vector.broadcast %49 : vector<8x1xf32> to vector<8x64xf32>
    %51 = arith.subf %47, %50 : vector<8x64xf32>
    %52 = math.exp %51 : vector<8x64xf32>
    %cst_21 = arith.constant dense<0.000000e+00> : vector<8xf32>
    %53 = vector.multi_reduction <add>, %52, %cst_21 [1] : vector<8x64xf32> to vector<8xf32>
    %54 = vector.shape_cast %53 : vector<8xf32> to vector<8x1xf32>
    %55 = tpu.reciprocal %54 {approx = true} : vector<8x1xf32> -> vector<8x1xf32>
    %56 = vector.broadcast %55 : vector<8x1xf32> to vector<8x64xf32>
    %57 = arith.mulf %52, %56 : vector<8x64xf32>
    %58 = arith.truncf %57 : vector<8x64xf32> to vector<8x64xbf16>
    %cst_22 = arith.constant dense<0.000000e+00> : vector<8x128xf32>
    %59 = tpu.matmul %58, %45, %cst_22 {dimension_numbers = #tpu.dot_dimension_numbers<[1], [0], [0], [1], [0, 0, 1, 1], [], []>} : vector<8x64xbf16>, vector<64x128xbf16>, vector<8x128xf32> -> vector<8x128xf32>
    %60 = vector.extract_strided_slice %6 {offsets = [0, 256], sizes = [8, 128], strides = [1, 1]} : vector<8x1024xbf16> to vector<8x128xbf16>
    %61 = vector.extract_strided_slice %13 {offsets = [0, 256], sizes = [64, 128], strides = [1, 1]} : vector<64x2048xbf16> to vector<64x128xbf16>
    %62 = vector.extract_strided_slice %13 {offsets = [0, 1280], sizes = [64, 128], strides = [1, 1]} : vector<64x2048xbf16> to vector<64x128xbf16>
    %cst_23 = arith.constant dense<0.000000e+00> : vector<8x64xf32>
    %63 = tpu.matmul %60, %61, %cst_23 {dimension_numbers = #tpu.dot_dimension_numbers<[1], [1], [0], [0], [0, 0, 1, 0], [], []>} : vector<8x128xbf16>, vector<64x128xbf16>, vector<8x64xf32> -> vector<8x64xf32>
    %64 = arith.addf %63, %25 : vector<8x64xf32>
    %cst_24 = arith.constant dense<0xFF800000> : vector<8xf32>
    %65 = vector.multi_reduction <maximumf>, %64, %cst_24 [1] : vector<8x64xf32> to vector<8xf32>
    %66 = vector.shape_cast %65 : vector<8xf32> to vector<8x1xf32>
    %67 = vector.broadcast %66 : vector<8x1xf32> to vector<8x64xf32>
    %68 = arith.subf %64, %67 : vector<8x64xf32>
    %69 = math.exp %68 : vector<8x64xf32>
    %cst_25 = arith.constant dense<0.000000e+00> : vector<8xf32>
    %70 = vector.multi_reduction <add>, %69, %cst_25 [1] : vector<8x64xf32> to vector<8xf32>
    %71 = vector.shape_cast %70 : vector<8xf32> to vector<8x1xf32>
    %72 = tpu.reciprocal %71 {approx = true} : vector<8x1xf32> -> vector<8x1xf32>
    %73 = vector.broadcast %72 : vector<8x1xf32> to vector<8x64xf32>
    %74 = arith.mulf %69, %73 : vector<8x64xf32>
    %75 = arith.truncf %74 : vector<8x64xf32> to vector<8x64xbf16>
    %cst_26 = arith.constant dense<0.000000e+00> : vector<8x128xf32>
    %76 = tpu.matmul %75, %62, %cst_26 {dimension_numbers = #tpu.dot_dimension_numbers<[1], [0], [0], [1], [0, 0, 1, 1], [], []>} : vector<8x64xbf16>, vector<64x128xbf16>, vector<8x128xf32> -> vector<8x128xf32>
    %77 = vector.extract_strided_slice %6 {offsets = [0, 384], sizes = [8, 128], strides = [1, 1]} : vector<8x1024xbf16> to vector<8x128xbf16>
    %78 = vector.extract_strided_slice %13 {offsets = [0, 384], sizes = [64, 128], strides = [1, 1]} : vector<64x2048xbf16> to vector<64x128xbf16>
    %79 = vector.extract_strided_slice %13 {offsets = [0, 1408], sizes = [64, 128], strides = [1, 1]} : vector<64x2048xbf16> to vector<64x128xbf16>
    %cst_27 = arith.constant dense<0.000000e+00> : vector<8x64xf32>
    %80 = tpu.matmul %77, %78, %cst_27 {dimension_numbers = #tpu.dot_dimension_numbers<[1], [1], [0], [0], [0, 0, 1, 0], [], []>} : vector<8x128xbf16>, vector<64x128xbf16>, vector<8x64xf32> -> vector<8x64xf32>
    %81 = arith.addf %80, %25 : vector<8x64xf32>
    %cst_28 = arith.constant dense<0xFF800000> : vector<8xf32>
    %82 = vector.multi_reduction <maximumf>, %81, %cst_28 [1] : vector<8x64xf32> to vector<8xf32>
    %83 = vector.shape_cast %82 : vector<8xf32> to vector<8x1xf32>
    %84 = vector.broadcast %83 : vector<8x1xf32> to vector<8x64xf32>
    %85 = arith.subf %81, %84 : vector<8x64xf32>
    %86 = math.exp %85 : vector<8x64xf32>
    %cst_29 = arith.constant dense<0.000000e+00> : vector<8xf32>
    %87 = vector.multi_reduction <add>, %86, %cst_29 [1] : vector<8x64xf32> to vector<8xf32>
    %88 = vector.shape_cast %87 : vector<8xf32> to vector<8x1xf32>
    %89 = tpu.reciprocal %88 {approx = true} : vector<8x1xf32> -> vector<8x1xf32>
    %90 = vector.broadcast %89 : vector<8x1xf32> to vector<8x64xf32>
    %91 = arith.mulf %86, %90 : vector<8x64xf32>
    %92 = arith.truncf %91 : vector<8x64xf32> to vector<8x64xbf16>
    %cst_30 = arith.constant dense<0.000000e+00> : vector<8x128xf32>
    %93 = tpu.matmul %92, %79, %cst_30 {dimension_numbers = #tpu.dot_dimension_numbers<[1], [0], [0], [1], [0, 0, 1, 1], [], []>} : vector<8x64xbf16>, vector<64x128xbf16>, vector<8x128xf32> -> vector<8x128xf32>
    %94 = vector.extract_strided_slice %6 {offsets = [0, 512], sizes = [8, 128], strides = [1, 1]} : vector<8x1024xbf16> to vector<8x128xbf16>
    %95 = vector.extract_strided_slice %13 {offsets = [0, 512], sizes = [64, 128], strides = [1, 1]} : vector<64x2048xbf16> to vector<64x128xbf16>
    %96 = vector.extract_strided_slice %13 {offsets = [0, 1536], sizes = [64, 128], strides = [1, 1]} : vector<64x2048xbf16> to vector<64x128xbf16>
    %cst_31 = arith.constant dense<0.000000e+00> : vector<8x64xf32>
    %97 = tpu.matmul %94, %95, %cst_31 {dimension_numbers = #tpu.dot_dimension_numbers<[1], [1], [0], [0], [0, 0, 1, 0], [], []>} : vector<8x128xbf16>, vector<64x128xbf16>, vector<8x64xf32> -> vector<8x64xf32>
    %98 = arith.addf %97, %25 : vector<8x64xf32>
    %cst_32 = arith.constant dense<0xFF800000> : vector<8xf32>
    %99 = vector.multi_reduction <maximumf>, %98, %cst_32 [1] : vector<8x64xf32> to vector<8xf32>
    %100 = vector.shape_cast %99 : vector<8xf32> to vector<8x1xf32>
    %101 = vector.broadcast %100 : vector<8x1xf32> to vector<8x64xf32>
    %102 = arith.subf %98, %101 : vector<8x64xf32>
    %103 = math.exp %102 : vector<8x64xf32>
    %cst_33 = arith.constant dense<0.000000e+00> : vector<8xf32>
    %104 = vector.multi_reduction <add>, %103, %cst_33 [1] : vector<8x64xf32> to vector<8xf32>
    %105 = vector.shape_cast %104 : vector<8xf32> to vector<8x1xf32>
    %106 = tpu.reciprocal %105 {approx = true} : vector<8x1xf32> -> vector<8x1xf32>
    %107 = vector.broadcast %106 : vector<8x1xf32> to vector<8x64xf32>
    %108 = arith.mulf %103, %107 : vector<8x64xf32>
    %109 = arith.truncf %108 : vector<8x64xf32> to vector<8x64xbf16>
    %cst_34 = arith.constant dense<0.000000e+00> : vector<8x128xf32>
    %110 = tpu.matmul %109, %96, %cst_34 {dimension_numbers = #tpu.dot_dimension_numbers<[1], [0], [0], [1], [0, 0, 1, 1], [], []>} : vector<8x64xbf16>, vector<64x128xbf16>, vector<8x128xf32> -> vector<8x128xf32>
    %111 = vector.extract_strided_slice %6 {offsets = [0, 640], sizes = [8, 128], strides = [1, 1]} : vector<8x1024xbf16> to vector<8x128xbf16>
    %112 = vector.extract_strided_slice %13 {offsets = [0, 640], sizes = [64, 128], strides = [1, 1]} : vector<64x2048xbf16> to vector<64x128xbf16>
    %113 = vector.extract_strided_slice %13 {offsets = [0, 1664], sizes = [64, 128], strides = [1, 1]} : vector<64x2048xbf16> to vector<64x128xbf16>
    %cst_35 = arith.constant dense<0.000000e+00> : vector<8x64xf32>
    %114 = tpu.matmul %111, %112, %cst_35 {dimension_numbers = #tpu.dot_dimension_numbers<[1], [1], [0], [0], [0, 0, 1, 0], [], []>} : vector<8x128xbf16>, vector<64x128xbf16>, vector<8x64xf32> -> vector<8x64xf32>
    %115 = arith.addf %114, %25 : vector<8x64xf32>
    %cst_36 = arith.constant dense<0xFF800000> : vector<8xf32>
    %116 = vector.multi_reduction <maximumf>, %115, %cst_36 [1] : vector<8x64xf32> to vector<8xf32>
    %117 = vector.shape_cast %116 : vector<8xf32> to vector<8x1xf32>
    %118 = vector.broadcast %117 : vector<8x1xf32> to vector<8x64xf32>
    %119 = arith.subf %115, %118 : vector<8x64xf32>
    %120 = math.exp %119 : vector<8x64xf32>
    %cst_37 = arith.constant dense<0.000000e+00> : vector<8xf32>
    %121 = vector.multi_reduction <add>, %120, %cst_37 [1] : vector<8x64xf32> to vector<8xf32>
    %122 = vector.shape_cast %121 : vector<8xf32> to vector<8x1xf32>
    %123 = tpu.reciprocal %122 {approx = true} : vector<8x1xf32> -> vector<8x1xf32>
    %124 = vector.broadcast %123 : vector<8x1xf32> to vector<8x64xf32>
    %125 = arith.mulf %120, %124 : vector<8x64xf32>
    %126 = arith.truncf %125 : vector<8x64xf32> to vector<8x64xbf16>
    %cst_38 = arith.constant dense<0.000000e+00> : vector<8x128xf32>
    %127 = tpu.matmul %126, %113, %cst_38 {dimension_numbers = #tpu.dot_dimension_numbers<[1], [0], [0], [1], [0, 0, 1, 1], [], []>} : vector<8x64xbf16>, vector<64x128xbf16>, vector<8x128xf32> -> vector<8x128xf32>
    %128 = vector.extract_strided_slice %6 {offsets = [0, 768], sizes = [8, 128], strides = [1, 1]} : vector<8x1024xbf16> to vector<8x128xbf16>
    %129 = vector.extract_strided_slice %13 {offsets = [0, 768], sizes = [64, 128], strides = [1, 1]} : vector<64x2048xbf16> to vector<64x128xbf16>
    %130 = vector.extract_strided_slice %13 {offsets = [0, 1792], sizes = [64, 128], strides = [1, 1]} : vector<64x2048xbf16> to vector<64x128xbf16>
    %cst_39 = arith.constant dense<0.000000e+00> : vector<8x64xf32>
    %131 = tpu.matmul %128, %129, %cst_39 {dimension_numbers = #tpu.dot_dimension_numbers<[1], [1], [0], [0], [0, 0, 1, 0], [], []>} : vector<8x128xbf16>, vector<64x128xbf16>, vector<8x64xf32> -> vector<8x64xf32>
    %132 = arith.addf %131, %25 : vector<8x64xf32>
    %cst_40 = arith.constant dense<0xFF800000> : vector<8xf32>
    %133 = vector.multi_reduction <maximumf>, %132, %cst_40 [1] : vector<8x64xf32> to vector<8xf32>
    %134 = vector.shape_cast %133 : vector<8xf32> to vector<8x1xf32>
    %135 = vector.broadcast %134 : vector<8x1xf32> to vector<8x64xf32>
    %136 = arith.subf %132, %135 : vector<8x64xf32>
    %137 = math.exp %136 : vector<8x64xf32>
    %cst_41 = arith.constant dense<0.000000e+00> : vector<8xf32>
    %138 = vector.multi_reduction <add>, %137, %cst_41 [1] : vector<8x64xf32> to vector<8xf32>
    %139 = vector.shape_cast %138 : vector<8xf32> to vector<8x1xf32>
    %140 = tpu.reciprocal %139 {approx = true} : vector<8x1xf32> -> vector<8x1xf32>
    %141 = vector.broadcast %140 : vector<8x1xf32> to vector<8x64xf32>
    %142 = arith.mulf %137, %141 : vector<8x64xf32>
    %143 = arith.truncf %142 : vector<8x64xf32> to vector<8x64xbf16>
    %cst_42 = arith.constant dense<0.000000e+00> : vector<8x128xf32>
    %144 = tpu.matmul %143, %130, %cst_42 {dimension_numbers = #tpu.dot_dimension_numbers<[1], [0], [0], [1], [0, 0, 1, 1], [], []>} : vector<8x64xbf16>, vector<64x128xbf16>, vector<8x128xf32> -> vector<8x128xf32>
    %145 = vector.extract_strided_slice %6 {offsets = [0, 896], sizes = [8, 128], strides = [1, 1]} : vector<8x1024xbf16> to vector<8x128xbf16>
    %146 = vector.extract_strided_slice %13 {offsets = [0, 896], sizes = [64, 128], strides = [1, 1]} : vector<64x2048xbf16> to vector<64x128xbf16>
    %147 = vector.extract_strided_slice %13 {offsets = [0, 1920], sizes = [64, 128], strides = [1, 1]} : vector<64x2048xbf16> to vector<64x128xbf16>
    %cst_43 = arith.constant dense<0.000000e+00> : vector<8x64xf32>
    %148 = tpu.matmul %145, %146, %cst_43 {dimension_numbers = #tpu.dot_dimension_numbers<[1], [1], [0], [0], [0, 0, 1, 0], [], []>} : vector<8x128xbf16>, vector<64x128xbf16>, vector<8x64xf32> -> vector<8x64xf32>
    %149 = arith.addf %148, %25 : vector<8x64xf32>
    %cst_44 = arith.constant dense<0xFF800000> : vector<8xf32>
    %150 = vector.multi_reduction <maximumf>, %149, %cst_44 [1] : vector<8x64xf32> to vector<8xf32>
    %151 = vector.shape_cast %150 : vector<8xf32> to vector<8x1xf32>
    %152 = vector.broadcast %151 : vector<8x1xf32> to vector<8x64xf32>
    %153 = arith.subf %149, %152 : vector<8x64xf32>
    %154 = math.exp %153 : vector<8x64xf32>
    %cst_45 = arith.constant dense<0.000000e+00> : vector<8xf32>
    %155 = vector.multi_reduction <add>, %154, %cst_45 [1] : vector<8x64xf32> to vector<8xf32>
    %156 = vector.shape_cast %155 : vector<8xf32> to vector<8x1xf32>
    %157 = tpu.reciprocal %156 {approx = true} : vector<8x1xf32> -> vector<8x1xf32>
    %158 = vector.broadcast %157 : vector<8x1xf32> to vector<8x64xf32>
    %159 = arith.mulf %154, %158 : vector<8x64xf32>
    %160 = arith.truncf %159 : vector<8x64xf32> to vector<8x64xbf16>
    %cst_46 = arith.constant dense<0.000000e+00> : vector<8x128xf32>
    %161 = tpu.matmul %160, %147, %cst_46 {dimension_numbers = #tpu.dot_dimension_numbers<[1], [0], [0], [1], [0, 0, 1, 1], [], []>} : vector<8x64xbf16>, vector<64x128xbf16>, vector<8x128xf32> -> vector<8x128xf32>
    %162 = tpu.concatenate %42, %59, %76, %93, %110, %127, %144, %161 in 1 : vector<8x128xf32>, vector<8x128xf32>, vector<8x128xf32>, vector<8x128xf32>, vector<8x128xf32>, vector<8x128xf32>, vector<8x128xf32>, vector<8x128xf32> -> vector<8x1024xf32>
    %163 = arith.truncf %162 : vector<8x1024xf32> to vector<8x1024xbf16>
    %c0_47 = arith.constant 0 : index
    %c0_48 = arith.constant 0 : index
    %164 = vector.load %arg5[%c0_47, %c0_48] : memref<1024x512xbf16, #tpu.memory_space<vmem>>, vector<1024x512xbf16>
    %cst_49 = arith.constant dense<0.000000e+00> : vector<8x512xf32>
    %165 = tpu.matmul %163, %164, %cst_49 {dimension_numbers = #tpu.dot_dimension_numbers<[1], [0], [0], [1], [0, 0, 1, 1], [], []>} : vector<8x1024xbf16>, vector<1024x512xbf16>, vector<8x512xf32> -> vector<8x512xf32>
    %c0_50 = arith.constant 0 : index
    %c0_51 = arith.constant 0 : index
    %166 = vector.load %arg10[%c0_50, %c0_51] : memref<1x512xf32, #tpu.memory_space<vmem>>, vector<1x512xf32>
    %167 = vector.broadcast %166 : vector<1x512xf32> to vector<8x512xf32>
    %168 = arith.addf %165, %167 : vector<8x512xf32>
    %cst_52 = arith.constant 0.000000e+00 : f32
    %169 = vector.broadcast %cst_52 : f32 to vector<8x512xf32>
    %170 = arith.maximumf %168, %169 : vector<8x512xf32>
    %171 = arith.truncf %170 : vector<8x512xf32> to vector<8x512xbf16>
    %c0_53 = arith.constant 0 : index
    %c0_54 = arith.constant 0 : index
    %172 = vector.load %arg6[%c0_53, %c0_54] : memref<512x256xbf16, #tpu.memory_space<vmem>>, vector<512x256xbf16>
    %cst_55 = arith.constant dense<0.000000e+00> : vector<8x256xf32>
    %173 = tpu.matmul %171, %172, %cst_55 {dimension_numbers = #tpu.dot_dimension_numbers<[1], [0], [0], [1], [0, 0, 1, 1], [], []>} : vector<8x512xbf16>, vector<512x256xbf16>, vector<8x256xf32> -> vector<8x256xf32>
    %c0_56 = arith.constant 0 : index
    %c0_57 = arith.constant 0 : index
    %174 = vector.load %arg11[%c0_56, %c0_57] : memref<1x256xf32, #tpu.memory_space<vmem>>, vector<1x256xf32>
    %175 = vector.broadcast %174 : vector<1x256xf32> to vector<8x256xf32>
    %176 = arith.addf %173, %175 : vector<8x256xf32>
    %cst_58 = arith.constant 0.000000e+00 : f32
    %177 = vector.broadcast %cst_58 : f32 to vector<8x256xf32>
    %178 = arith.maximumf %176, %177 : vector<8x256xf32>
    %179 = arith.truncf %178 : vector<8x256xf32> to vector<8x256xbf16>
    %c0_59 = arith.constant 0 : index
    %c0_60 = arith.constant 0 : index
    %180 = vector.load %arg7[%c0_59, %c0_60] : memref<256x128xbf16, #tpu.memory_space<vmem>>, vector<256x128xbf16>
    %cst_61 = arith.constant dense<0.000000e+00> : vector<8x128xf32>
    %181 = tpu.matmul %179, %180, %cst_61 {dimension_numbers = #tpu.dot_dimension_numbers<[1], [0], [0], [1], [0, 0, 1, 1], [], []>} : vector<8x256xbf16>, vector<256x128xbf16>, vector<8x128xf32> -> vector<8x128xf32>
    %c0_62 = arith.constant 0 : index
    %c0_63 = arith.constant 0 : index
    %182 = vector.load %arg12[%c0_62, %c0_63] : memref<1x128xf32, #tpu.memory_space<vmem>>, vector<1x128xf32>
    %183 = vector.broadcast %182 : vector<1x128xf32> to vector<8x128xf32>
    %184 = arith.addf %181, %183 : vector<8x128xf32>
    %cst_64 = arith.constant dense<0xFF800000> : vector<8xf32>
    %185 = vector.multi_reduction <maximumf>, %184, %cst_64 [1] : vector<8x128xf32> to vector<8xf32>
    %186 = vector.shape_cast %185 : vector<8xf32> to vector<8x1xf32>
    %187 = vector.broadcast %186 : vector<8x1xf32> to vector<8x128xf32>
    %188 = arith.subf %184, %187 : vector<8x128xf32>
    %189 = math.exp %188 : vector<8x128xf32>
    %cst_65 = arith.constant dense<0.000000e+00> : vector<8xf32>
    %190 = vector.multi_reduction <add>, %189, %cst_65 [1] : vector<8x128xf32> to vector<8xf32>
    %191 = vector.shape_cast %190 : vector<8xf32> to vector<8x1xf32>
    %192 = vector.broadcast %191 : vector<8x1xf32> to vector<8x128xf32>
    %193 = arith.divf %189, %192 : vector<8x128xf32>
    %c0_66 = arith.constant 0 : index
    %c0_67 = arith.constant 0 : index
    %194 = vector.load %arg13[%c0_66, %c0_67] : memref<8x128xf32, #tpu.memory_space<vmem>>, vector<8x128xf32>
    tpu.vector_store %arg13[%c0_66, %c0_67], %193 {strides = array<i32>} : memref<8x128xf32, #tpu.memory_space<vmem>>, vector<8x128xf32>,
    return
  }
  func.func @transform_0(%arg0: i32) -> (i32, i32) {
    %c0_i32 = arith.constant 0 : i32
    %c0_i32_0 = arith.constant 0 : i32
    return %arg0, %c0_i32 : i32, i32
  }
  func.func @transform_1(%arg0: i32) -> (i32, i32) {
    %c0_i32 = arith.constant 0 : i32
    %c0_i32_0 = arith.constant 0 : i32
    return %arg0, %c0_i32 : i32, i32
  }
  func.func @transform_2(%arg0: i32) -> (i32, i32) {
    %c0_i32 = arith.constant 0 : i32
    %c0_i32_0 = arith.constant 0 : i32
    %c0_i32_1 = arith.constant 0 : i32
    return %c0_i32, %c0_i32_0 : i32, i32
  }
  func.func @transform_3(%arg0: i32) -> (i32, i32) {
    %c0_i32 = arith.constant 0 : i32
    %c0_i32_0 = arith.constant 0 : i32
    %c0_i32_1 = arith.constant 0 : i32
    return %c0_i32, %c0_i32_0 : i32, i32
  }
  func.func @transform_4(%arg0: i32) -> (i32, i32) {
    %c0_i32 = arith.constant 0 : i32
    %c0_i32_0 = arith.constant 0 : i32
    %c0_i32_1 = arith.constant 0 : i32
    return %c0_i32, %c0_i32_0 : i32, i32
  }
  func.func @transform_5(%arg0: i32) -> (i32, i32) {
    %c0_i32 = arith.constant 0 : i32
    %c0_i32_0 = arith.constant 0 : i32
    %c0_i32_1 = arith.constant 0 : i32
    return %c0_i32, %c0_i32_0 : i32, i32
  }
  func.func @transform_6(%arg0: i32) -> (i32, i32) {
    %c0_i32 = arith.constant 0 : i32
    %c0_i32_0 = arith.constant 0 : i32
    %c0_i32_1 = arith.constant 0 : i32
    return %c0_i32, %c0_i32_0 : i32, i32
  }
  func.func @transform_7(%arg0: i32) -> (i32, i32) {
    %c0_i32 = arith.constant 0 : i32
    %c0_i32_0 = arith.constant 0 : i32
    %c0_i32_1 = arith.constant 0 : i32
    return %c0_i32, %c0_i32_0 : i32, i32
  }
  func.func @transform_8(%arg0: i32) -> (i32, i32) {
    %c0_i32 = arith.constant 0 : i32
    %c0_i32_0 = arith.constant 0 : i32
    %c0_i32_1 = arith.constant 0 : i32
    return %c0_i32, %c0_i32_0 : i32, i32
  }
  func.func @transform_9(%arg0: i32) -> (i32, i32) {
    %c0_i32 = arith.constant 0 : i32
    %c0_i32_0 = arith.constant 0 : i32
    %c0_i32_1 = arith.constant 0 : i32
    return %c0_i32, %c0_i32_0 : i32, i32
  }
  func.func @transform_10(%arg0: i32) -> (i32, i32) {
    %c0_i32 = arith.constant 0 : i32
    %c0_i32_0 = arith.constant 0 : i32
    %c0_i32_1 = arith.constant 0 : i32
    return %c0_i32, %c0_i32_0 : i32, i32
  }
  func.func @transform_11(%arg0: i32) -> (i32, i32) {
    %c0_i32 = arith.constant 0 : i32
    %c0_i32_0 = arith.constant 0 : i32
    %c0_i32_1 = arith.constant 0 : i32
    return %c0_i32, %c0_i32_0 : i32, i32
  }
  func.func @transform_12(%arg0: i32) -> (i32, i32) {
    %c0_i32 = arith.constant 0 : i32
    %c0_i32_0 = arith.constant 0 : i32
    return %arg0, %c0_i32 : i32, i32
  }
}

</mosaic_0001>

<bundles_post_ra>
// kernel: model_forward.1
= control target key start
LH: loop header
LB: loop body
LE: loop exit
PB: predicated region body
PF: predicated region fallthrough
CT: control target
= control target key end

     0   :  { %s18407_s0 = inlined_call_operand.vmem [shape: bf16[16,768], index: 0, kind: input, shape index: {}]   ;;  %s18408_s1 = inlined_call_operand.vmem [shape: bf16[128,768], index: 1, kind: input, shape index: {}]   ;;  %s18409_s2 = inlined_call_operand.hbm [shape: bf16[768,1024], index: 2, kind: input, shape index: {}]   ;;  %s18410_s3 = inlined_call_operand.hbm [shape: bf16[768,2048], index: 3, kind: input, shape index: {}]   ;;  %s18411_s4 = inlined_call_operand.hbm [shape: bf16[1024,512], index: 4, kind: input, shape index: {}]   ;;  %s18412_s5 = inlined_call_operand.hbm [shape: bf16[512,256], index: 5, kind: input, shape index: {}]   ;;  %s18413_s6 = inlined_call_operand.hbm [shape: bf16[256,128], index: 6, kind: input, shape index: {}]   ;;  %s18414_s7 = inlined_call_operand.hbm [shape: f32[1,1024], index: 7, kind: input, shape index: {}]   ;;  %s18415_s8 = inlined_call_operand.hbm [shape: f32[1,2048], index: 8, kind: input, shape index: {}]   ;;  %s18416_s9 = inlined_call_operand.hbm [shape: f32[1,512], index: 9, kind: input, shape index: {}]   ;;  %s18417_s10 = inlined_call_operand.hbm [shape: f32[1,256], index: 10, kind: input, shape index: {}]   ;;  %s18418_s11 = inlined_call_operand.hbm [shape: f32[1,128], index: 11, kind: input, shape index: {}]   ;;  %s18419_s12 = inlined_call_operand.vmem [shape: f32[16,128], index: 12, kind: output, shape index: {}]  }
   0x1   :  { %18475 = sst [smem:[#allocation76_spill]] %s18410_s3 }
   0x2   :  { %17 = vsyncpa [#allocation3], 0 }
   0x3   :  { %18 = vsyncpa [#allocation5], 0 }
   0x4   :  { %19 = vsyncpa [#allocation8], 0 }
   0x5   :  { %20 = vsyncpa [#allocation11], 0 }
   0x6   :  { %21 = vsyncpa [#allocation14], 0 }
   0x7   :  { %22 = vsyncpa [#allocation17], 0  ;;  %s17081_s21 = smov 0  }
   0x8 LB: > { %18476 = sst [smem:[#allocation24_spill]] %s16992_s21  ;;  %s16994_s22 = smov [#allocation4]   ;;  %s16992_s21 = sphi %s17081_s21, %s28_s21  }
   0x9   : > { %s346_s23 = sshll.u32 %s16994_s22, 4  ;;  %s17087_s24 = sadd.s32 4294967295, %s16992_s21   ;;  %s17092_s23 = int_to_ptr.vmem [resolvable:$true] %s346_s23 }
   0xa   : > { %p13601_p0 = scmp.ge.s32.totalorder %s16992_s21, 1  ;;  %p321_p1 = scmp.lt.s32.totalorder %s16992_s21, 3 }
   0xb   : > { %p18422_p2 = scmp.eq.s32.totalorder %s17087_s24, 0  ;;  %s16995_s26 = smov [#allocation7]  }
   0xc   : > { %p17094_p3 = pnand %p13601_p0, %p321_p1  ;;  %s372_s27 = sshll.u32 %s16995_s26, 4  ;;  %s17100_s27 = int_to_ptr.vmem [resolvable:$true] %s372_s27 }
   0xd   : > { %s16996_s29 = smov [#allocation10]   ;;  %s18479_s3 = sld [smem:[#allocation76_spill]] }
   0xe   : > { %s18477_s25 = scalar_select %p17094_p3, 1, 0 }
   0xf   : > { %p15951_p4 = pneg %p17094_p3  ;;  %s17108_s30 = sshll.u32 %s16996_s29, 4  ;;  %s400_s30 = int_to_ptr.vmem [resolvable:$true] %s17108_s30 }
  0x11   : > { %p17104_p5 = pnand %p18422_p2, %p15951_p4 }
  0x13   : > { %s16682_s15 = scalar_lea.hbm %s18479_s3, 98304  ;;  %p17118_p7 = pneg %p17104_p5 }
  0x14   : > { %p16683_p6 = scmp.ne.s32.totalorder %s18479_s3, %s16682_s15  ;;  %p16689_p10 = scmp.lt.u32.totalorder %s16682_s15, %s18479_s3 }
  0x16   : > { %p16685_p8 = pnand %p17118_p7, %p16683_p6 }
  0x18   : > { %p16686_p9 = pneg %p16685_p8 }
  0x1a   : > { %p16691_p11 = pnand %p16689_p10, %p16686_p9 }
  0x1c   : > { %16694 = shalt.err (!%p16691_p11)
}
  0x1d   : > { %s16695_s22 = scalar_lea.vmem %s17092_s23, 98304  ;;  %p16703_p1 = scmp.lt.s32.totalorder %s17092_s23, %s17092_s23 }
  0x1e   : > { %p16696_p12 = scmp.ne.s32.totalorder %s17092_s23, %s16695_s22  ;;  %p16704_p4 = scmp.lt.s32.totalorder %s16695_s22, %s16695_s22 }
  0x20   : > { %p16698_p13 = pnand %p16696_p12, %p17118_p7  ;;  %p16705_p6 = por %p16704_p4, %p16703_p1 }
  0x22   : > { %p16699_p0 = pneg %p16698_p13 }
  0x24   : > { %p16706_p8 = pnand %p16705_p6, %p16699_p0 }
  0x26   : > { %16709 = shalt.err (!%p16706_p8)
}
  0x27   : > { %s16997_s26 = smov 1024   ;;  %s18421_s29 = smov 64  }
  0x28   : > { %15957 = dma.hbm_to_vmem [thread:$0]  (!%p17104_p5), %s18479_s3, 98304, %s17092_s23, [#allocation5], %s16997_s26, %s16997_s26, %s18421_s29  }
  0x29   : > { %s16710_s17 = scalar_lea.hbm %s18412_s5, 8192 }
  0x2a   : > { %p16711_p9 = scmp.ne.s32.totalorder %s18412_s5, %s16710_s17  ;;  %p16717_p12 = scmp.lt.u32.totalorder %s16710_s17, %s18412_s5 }
  0x2c   : > { %p16713_p10 = pnand %p16711_p9, %p17118_p7 }
  0x2e   : > { %p16714_p11 = pneg %p16713_p10 }
  0x30   : > { %p16719_p13 = pnand %p16717_p12, %p16714_p11 }
  0x32   : > { %16722 = shalt.err (!%p16719_p13)
}
  0x33   : > { %s16723_s23 = scalar_lea.vmem %s17100_s27, 8192  ;;  %p16731_p6 = scmp.lt.s32.totalorder %s17100_s27, %s17100_s27 }
  0x34   : > { %p16724_p0 = scmp.ne.s32.totalorder %s17100_s27, %s16723_s23  ;;  %p16732_p8 = scmp.lt.s32.totalorder %s16723_s23, %s16723_s23 }
  0x36   : > { %p16726_p1 = pnand %p16724_p0, %p17118_p7  ;;  %p16733_p9 = por %p16732_p8, %p16731_p6 }
  0x38   : > { %p16727_p4 = pneg %p16726_p1 }
  0x3a   : > { %p16734_p10 = pnand %p16733_p9, %p16727_p4 }
  0x3c   : > { %16737 = shalt.err (!%p16734_p10)
}
  0x3d   : > { %s16999_s26 = smov 128   ;;  %s17000_s21 = smov 8  }
  0x3e   : > { %15963 = dma.hbm_to_vmem [thread:$0]  (!%p17104_p5), %s18412_s5, 8192, %s17100_s27, [#allocation8], %s16999_s26, %s16999_s26, %s17000_s21  }
  0x3f   : > { %s17001_s15 = smov [#allocation13]   ;;  %s16738_s20 = scalar_lea.hbm %s18414_s7, 128 }
  0x40   : > { %s421_s16 = sshll.u32 %s17001_s15, 4  ;;  %p16739_p11 = scmp.ne.s32.totalorder %s18414_s7, %s16738_s20  ;;  %s422_s16 = int_to_ptr.vmem [resolvable:$true] %s421_s16 }
  0x41   : > { %p16745_p0 = scmp.lt.u32.totalorder %s16738_s20, %s18414_s7 }
  0x42   : > { %p16741_p12 = pnand %p16739_p11, %p17118_p7 }
  0x44   : > { %p16742_p13 = pneg %p16741_p12 }
  0x46   : > { %p16747_p1 = pnand %p16745_p0, %p16742_p13 }
  0x48   : > { %16750 = shalt.err (!%p16747_p1)
}
  0x49   : > { %s16751_s27 = scalar_lea.vmem %s400_s30, 128  ;;  %p16759_p9 = scmp.lt.s32.totalorder %s400_s30, %s400_s30 }
  0x4a   : > { %p16752_p4 = scmp.ne.s32.totalorder %s400_s30, %s16751_s27  ;;  %p16760_p10 = scmp.lt.s32.totalorder %s16751_s27, %s16751_s27 }
  0x4c   : > { %p16754_p6 = pnand %p16752_p4, %p17118_p7  ;;  %p16761_p2 = por %p16760_p10, %p16759_p9 }
  0x4e   : > { %p16755_p8 = pneg %p16754_p6 }
  0x50   : > { %p16762_p3 = pnand %p16761_p2, %p16755_p8 }
  0x52   : > { %16765 = shalt.err (!%p16762_p3)
}
  0x53   : > { %15969 = dma.hbm_to_vmem [thread:$0]  (!%p17104_p5), %s18414_s7, 128, %s400_s30, [#allocation11]  }
  0x54   : > { %s16766_s13 = scalar_lea.hbm %s18416_s9, 64 }
  0x55   : > { %p16767_p11 = scmp.ne.s32.totalorder %s18416_s9, %s16766_s13  ;;  %p16773_p3 = scmp.lt.u32.totalorder %s16766_s13, %s18416_s9 }
  0x57   : > { %p16769_p12 = pnand %p16767_p11, %p17118_p7 }
  0x59   : > { %p16770_p2 = pneg %p16769_p12 }
  0x5b   : > { %p16775_p13 = pnand %p16773_p3, %p16770_p2 }
  0x5d   : > { %16778 = shalt.err (!%p16775_p13)
}
  0x5e   : > { %s16779_s20 = scalar_lea.vmem %s422_s16, 64  ;;  %p16787_p6 = scmp.lt.s32.totalorder %s422_s16, %s422_s16 }
  0x5f   : > { %p16780_p0 = scmp.ne.s32.totalorder %s422_s16, %s16779_s20  ;;  %p16788_p8 = scmp.lt.s32.totalorder %s16779_s20, %s16779_s20 }
  0x61   : > { %p16782_p1 = pnand %p16780_p0, %p17118_p7  ;;  %p16789_p9 = por %p16788_p8, %p16787_p6 }
  0x63   : > { %p16783_p4 = pneg %p16782_p1 }
  0x65   : > { %p16790_p10 = pnand %p16789_p9, %p16783_p4 }
  0x67   : > { %16793 = shalt.err (!%p16790_p10)
}
  0x68   : > { %15975 = dma.hbm_to_vmem [thread:$0]  (!%p17104_p5), %s18416_s9, 64, %s422_s16, [#allocation14]  }
  0x69   : > { %s17002_s23 = smov [#allocation2]   ;;  %s16794_s3 = scalar_lea.hbm %s18409_s2, 49152 }
  0x6a   : > { %s333_s27 = sshll.u32 %s17002_s23, 4  ;;  %p16795_p11 = scmp.ne.s32.totalorder %s18409_s2, %s16794_s3  ;;  %s334_s27 = int_to_ptr.vmem [resolvable:$true] %s333_s27 }
  0x6b   : > { %p16801_p3 = scmp.lt.u32.totalorder %s16794_s3, %s18409_s2 }
  0x6c   : > { %p16797_p12 = pnand %p16795_p11, %p17118_p7 }
  0x6e   : > { %p16798_p2 = pneg %p16797_p12 }
  0x70   : > { %p16803_p13 = pnand %p16801_p3, %p16798_p2 }
  0x72   : > { %16806 = shalt.err (!%p16803_p13)
}
  0x73   : > { %s16807_s16 = scalar_lea.vmem %s334_s27, 49152  ;;  %p16815_p6 = scmp.lt.s32.totalorder %s334_s27, %s334_s27 }
  0x74   : > { %p16808_p0 = scmp.ne.s32.totalorder %s334_s27, %s16807_s16  ;;  %p16816_p8 = scmp.lt.s32.totalorder %s16807_s16, %s16807_s16 }
  0x76   : > { %p16810_p1 = pnand %p16808_p0, %p17118_p7  ;;  %p16817_p9 = por %p16816_p8, %p16815_p6 }
  0x78   : > { %p16811_p4 = pneg %p16810_p1 }
  0x7a   : > { %p16818_p10 = pnand %p16817_p9, %p16811_p4 }
  0x7c   : > { %16821 = shalt.err (!%p16818_p10)
}
  0x7d   : > { %s17003_s17 = smov 512   ;;  %s17004_s19 = smov 32  }
  0x7e   : > { %15954 = dma.hbm_to_vmem [thread:$0]  (!%p17104_p5), %s18409_s2, 49152, %s334_s27, [#allocation3], %s17003_s17, %s17003_s17, %s17004_s19  }
  0x7f   : > { %s17005_s22 = smov [#allocation6]   ;;  %s16822_s3 = scalar_lea.hbm %s18411_s4, 32768 }
  0x80   : > { %s359_s23 = sshll.u32 %s17005_s22, 4  ;;  %p16823_p11 = scmp.ne.s32.totalorder %s18411_s4, %s16822_s3  ;;  %s360_s23 = int_to_ptr.vmem [resolvable:$true] %s359_s23 }
  0x81   : > { %p16829_p3 = scmp.lt.u32.totalorder %s16822_s3, %s18411_s4 }
  0x82   : > { %p16825_p12 = pnand %p16823_p11, %p17118_p7 }
  0x84   : > { %p16826_p2 = pneg %p16825_p12 }
  0x86   : > { %p16831_p13 = pnand %p16829_p3, %p16826_p2 }
  0x88   : > { %16834 = shalt.err (!%p16831_p13)
}
  0x89   : > { %s16835_s27 = scalar_lea.vmem %s360_s23, 32768  ;;  %p16843_p6 = scmp.lt.s32.totalorder %s360_s23, %s360_s23 }
  0x8a   : > { %p16836_p0 = scmp.ne.s32.totalorder %s360_s23, %s16835_s27  ;;  %p16844_p8 = scmp.lt.s32.totalorder %s16835_s27, %s16835_s27 }
  0x8c   : > { %p16838_p1 = pnand %p16836_p0, %p17118_p7  ;;  %p16845_p9 = por %p16844_p8, %p16843_p6 }
  0x8e   : > { %p16839_p4 = pneg %p16838_p1 }
  0x90   : > { %p16846_p10 = pnand %p16845_p9, %p16839_p4 }
  0x92   : > { %16849 = shalt.err (!%p16846_p10)
}
  0x93   : > { %s17006_s16 = smov 256   ;;  %s17007_s17 = smov 16  }
  0x94   : > { %15960 = dma.hbm_to_vmem [thread:$0]  (!%p17104_p5), %s18411_s4, 32768, %s360_s23, [#allocation5], %s17006_s16, %s17006_s16, %s17007_s17  }
  0x95   : > { %s17008_s30 = smov [#allocation9]   ;;  %s16850_s3 = scalar_lea.hbm %s18413_s6, 2048 }
  0x96   : > { %s385_s22 = sshll.u32 %s17008_s30, 4  ;;  %p16851_p11 = scmp.ne.s32.totalorder %s18413_s6, %s16850_s3  ;;  %s386_s22 = int_to_ptr.vmem [resolvable:$true] %s385_s22 }
  0x97   : > { %p16857_p3 = scmp.lt.u32.totalorder %s16850_s3, %s18413_s6 }
  0x98   : > { %p16853_p12 = pnand %p16851_p11, %p17118_p7 }
  0x9a   : > { %p16854_p2 = pneg %p16853_p12 }
  0x9c   : > { %p16859_p13 = pnand %p16857_p3, %p16854_p2 }
  0x9e   : > { %16862 = shalt.err (!%p16859_p13)
}
  0x9f   : > { %s16863_s23 = scalar_lea.vmem %s386_s22, 2048  ;;  %p16871_p6 = scmp.lt.s32.totalorder %s386_s22, %s386_s22 }
  0xa0   : > { %p16864_p0 = scmp.ne.s32.totalorder %s386_s22, %s16863_s23  ;;  %p16872_p8 = scmp.lt.s32.totalorder %s16863_s23, %s16863_s23 }
  0xa2   : > { %p16866_p1 = pnand %p16864_p0, %p17118_p7  ;;  %p16873_p9 = por %p16872_p8, %p16871_p6 }
  0xa4   : > { %p16867_p4 = pneg %p16866_p1 }
  0xa6   : > { %p16874_p10 = pnand %p16873_p9, %p16867_p4 }
  0xa8   : > { %16877 = shalt.err (!%p16874_p10)
}
  0xa9   : > { %s17009_s27 = smov 4   ;;  %s18481_s16 = smov 64  }
  0xaa   : > { %15966 = dma.hbm_to_vmem [thread:$0]  (!%p17104_p5), %s18413_s6, 2048, %s386_s22, [#allocation8], %s18481_s16, %s18481_s16, %s17009_s27  }
  0xab   : > { %s17010_s20 = smov [#allocation12]   ;;  %s17011_s26 = smov [#allocation15]  }
  0xac   : > { %s410_s30 = sshll.u32 %s17010_s20, 4  ;;  %s432_s21 = sshll.u32 %s17011_s26, 4  ;;  %s411_s30 = int_to_ptr.vmem [resolvable:$true] %s410_s30  ;;  %s433_s21 = int_to_ptr.vmem [resolvable:$true] %s432_s21 }
  0xad   : > { %s16878_s13 = scalar_lea.hbm %s18415_s8, 256 }
  0xae   : > { %p16879_p11 = scmp.ne.s32.totalorder %s18415_s8, %s16878_s13  ;;  %p16885_p3 = scmp.lt.u32.totalorder %s16878_s13, %s18415_s8 }
  0xb0   : > { %p16881_p12 = pnand %p16879_p11, %p17118_p7 }
  0xb2   : > { %p16882_p2 = pneg %p16881_p12 }
  0xb4   : > { %p16887_p13 = pnand %p16885_p3, %p16882_p2 }
  0xb6   : > { %16890 = shalt.err (!%p16887_p13)
}
  0xb7   : > { %s16891_s22 = scalar_lea.vmem %s411_s30, 256  ;;  %p16899_p6 = scmp.lt.s32.totalorder %s411_s30, %s411_s30 }
  0xb8   : > { %p16892_p0 = scmp.ne.s32.totalorder %s411_s30, %s16891_s22  ;;  %p16900_p8 = scmp.lt.s32.totalorder %s16891_s22, %s16891_s22 }
  0xba   : > { %p16894_p1 = pnand %p16892_p0, %p17118_p7  ;;  %p16901_p9 = por %p16900_p8, %p16899_p6 }
  0xbc   : > { %p16895_p4 = pneg %p16894_p1 }
  0xbe   : > { %p16902_p10 = pnand %p16901_p9, %p16895_p4 }
  0xc0   : > { %16905 = shalt.err (!%p16902_p10)
}
  0xc1   : > { %15972 = dma.hbm_to_vmem [thread:$0]  (!%p17104_p5), %s18415_s8, 256, %s411_s30, [#allocation11]  }
  0xc2   : > { %s16906_s26 = scalar_lea.hbm %s18417_s10, 32 }
  0xc3   : > { %p16907_p11 = scmp.ne.s32.totalorder %s18417_s10, %s16906_s26  ;;  %p16913_p3 = scmp.lt.u32.totalorder %s16906_s26, %s18417_s10 }
  0xc5   : > { %p16909_p12 = pnand %p16907_p11, %p17118_p7 }
  0xc7   : > { %p16910_p2 = pneg %p16909_p12 }
  0xc9   : > { %p16915_p13 = pnand %p16913_p3, %p16910_p2 }
  0xcb   : > { %16918 = shalt.err (!%p16915_p13)
}
  0xcc   : > { %s16919_s15 = scalar_lea.vmem %s433_s21, 32  ;;  %p16927_p6 = scmp.lt.s32.totalorder %s433_s21, %s433_s21 }
  0xcd   : > { %p16920_p0 = scmp.ne.s32.totalorder %s433_s21, %s16919_s15  ;;  %p16928_p8 = scmp.lt.s32.totalorder %s16919_s15, %s16919_s15 }
  0xcf   : > { %p16922_p1 = pnand %p16920_p0, %p17118_p7  ;;  %p16929_p9 = por %p16928_p8, %p16927_p6 }
  0xd1   : > { %p16923_p4 = pneg %p16922_p1 }
  0xd3   : > { %p16930_p10 = pnand %p16929_p9, %p16923_p4 }
  0xd5   : > { %16933 = shalt.err (!%p16930_p10)
}
  0xd6   : > { %15978 = dma.hbm_to_vmem [thread:$0]  (!%p17104_p5), %s18417_s10, 32, %s433_s21, [#allocation14]  }
  0xd7   : > { %s17012_s17 = smov [#allocation16]   ;;  %s16934_s19 = scalar_lea.hbm %s18418_s11, 16 }
  0xd8   : > { %s443_s22 = sshll.u32 %s17012_s17, 4  ;;  %p16935_p11 = scmp.ne.s32.totalorder %s18418_s11, %s16934_s19  ;;  %s444_s22 = int_to_ptr.vmem [resolvable:$true] %s443_s22 }
  0xd9   : > { %p16941_p3 = scmp.lt.u32.totalorder %s16934_s19, %s18418_s11 }
  0xda   : > { %p16937_p12 = pnand %p16935_p11, %p17118_p7 }
  0xdc   : > { %p16938_p2 = pneg %p16937_p12 }
  0xde   : > { %p16943_p13 = pnand %p16941_p3, %p16938_p2 }
  0xe0   : > { %16946 = shalt.err (!%p16943_p13)
}
  0xe1   : > { %s16947_s21 = scalar_lea.vmem %s444_s22, 16  ;;  %s16954_s13 = scalar_lea.vmem %s444_s22, 32 }
  0xe2   : > { %p16948_p0 = scmp.ne.s32.totalorder %s444_s22, %s16947_s21  ;;  %p16955_p6 = scmp.lt.s32.totalorder %s444_s22, %s444_s22 }
  0xe3   : > { %p16956_p8 = scmp.lt.s32.totalorder %s16954_s13, %s16947_s21 }
  0xe4   : > { %p16950_p1 = pnand %p16948_p0, %p17118_p7 }
  0xe5   : > { %p16957_p9 = por %p16956_p8, %p16955_p6 }
  0xe6   : > { %p16951_p4 = pneg %p16950_p1 }
  0xe8   : > { %p16958_p10 = pnand %p16957_p9, %p16951_p4 }
  0xea   : > { %16961 = shalt.err (!%p16958_p10)
}
  0xeb   : > { %15981 = dma.hbm_to_vmem [thread:$0]  (!%p17104_p5), %s18418_s11, 16, %s444_s22, [#allocation17]  }
  0xec   : > { %p18482_p11 = scmp.ne.s32.totalorder %s18477_s25, 0 }
  0xee   : > { %474 = sbr.rel (%p18482_p11) target bundleno = 6151 (0x1807), region = 68 }
  0xf5   : > { %p18483_p12 = scmp.eq.s32.totalorder %s17087_s24, 0 }
  0xf7   : > { %16967 = dma.done.wait (%p18483_p12), [#allocation3], 49152   ;;  %p18484_p7 = pmov %p18483_p12 }
  0xf9   : > { %16969 = vsyncadd (%p18484_p7), [#allocation3], 4294918144  ;;  %p18485_p2 = pmov %p18484_p7 }
  0xfb   : > { %16971 = dma.done.wait (%p18485_p2), [#allocation5], 131072   ;;  %p18486_p3 = pmov %p18485_p2 }
  0xfc   : > { %p18487_p13 = pmov %p18485_p2 }
  0xfd   : > { %16973 = vsyncadd (%p18486_p3), [#allocation5], 4294836224 }
  0xfe   : > { %16975 = dma.done.wait (%p18487_p13), [#allocation8], 10240   ;;  %p18488_p5 = pmov %p18485_p2 }
  0xff   : > { %p18489_p0 = pmov %p18485_p2 }
 0x100   : > { %16977 = vsyncadd (%p18488_p5), [#allocation8], 4294957056 }
 0x101   : > { %16979 = dma.done.wait (%p18489_p0), [#allocation11], 384   ;;  %p18490_p1 = pmov %p18489_p0 }
 0x102   : > { %p18491_p4 = pmov %p18489_p0 }
 0x103   : > { %16981 = vsyncadd (%p18490_p1), [#allocation11], 4294966912 }
 0x104   : > { %16983 = dma.done.wait (%p18491_p4), [#allocation14], 96   ;;  %p18492_p6 = pmov %p18489_p0 }
 0x105   : > { %p18493_p8 = pmov %p18489_p0 }
 0x106   : > { %16985 = vsyncadd (%p18492_p6), [#allocation14], 4294967200 }
 0x107   : > { %16987 = dma.done.wait (%p18493_p8), [#allocation17], 16   ;;  %p18494_p9 = pmov %p18489_p0 }
 0x108   : > { %v577_v0 = vld [vmem:[#allocation2] sm:$0xff]  ;;  %p557_p10 = scmp.lt.s32.totalorder %s17087_s24, 1  ;;  %v578_v10 = vld [vmem:[#allocation2 + $0x8] sm:$0xff]  ;;  %s13625_s17 = sshll.u32 %s17087_s24, 3  ;;  %vm17014_vm0 = vmmov 0   ;;  %vm10146_vm4 = vcmask 523264  }
 0x109   : > { %16989 = vsyncadd (%p18494_p9), [#allocation17], 4294967280  ;;  %v581_v1 = vld [vmem:[#allocation2 + $0x20] sm:$0xff]  ;;  %v582_v13 = vld [vmem:[#allocation2 + $0x28] sm:$0xff]  ;;  %p563_p11 = scmp.lt.s32.totalorder %s13625_s17, 15 }
 0x10a   : > { %v585_v2 = vld [vmem:[#allocation2 + $0x40] sm:$0xff]  ;;  %v13635_v3 = vcombine.high %v577_v0, %v581_v1  ;;  %v13634_v4 = vcombine.low %v577_v0, %v581_v1  ;;  %v13637_v15 = vcombine.high %v578_v10, %v582_v13  ;;  %v13636_v16 = vcombine.low %v578_v10, %v582_v13  ;;  %v586_v17 = vld [vmem:[#allocation2 + $0x48] sm:$0xff]  ;;  %s17340_s25 = scalar_select %p557_p10, %s17087_s24, 1 }
 0x10b   : > { %v589_v5 = vld [vmem:[#allocation2 + $0x60] sm:$0xff]  ;;  %v590_v18 = vld [vmem:[#allocation2 + $0x68] sm:$0xff]  ;;  %s18654_s17 = smov (!%p563_p11, %s13625_s17), 15 }
 0x10c   : > { %v13643_v6 = vcombine.high %v585_v2, %v589_v5  ;;  %v593_v7 = vld [vmem:[#allocation2 + $0x80] sm:$0xff]  ;;  %2944 = vmatprep.subr.bf16.mxu0 %v13635_v3  ;;  %v13642_v9 = vcombine.low %v585_v2, %v589_v5  ;;  %v13645_v19 = vcombine.high %v586_v17, %v590_v18  ;;  %v594_v20 = vld [vmem:[#allocation2 + $0x88] sm:$0xff]  ;;  %3067 = vmatprep.subr.bf16.mxu1 %v13637_v15  ;;  %s15909_s28 = smul.u32 24, %s17340_s25  ;;  %s13627_s19 = sshll.u32 %s17340_s25, 3 }
 0x10d   : > { %v597_v8 = vld [vmem:[#allocation2 + $0xa0] sm:$0xff]  ;;  %2945 = vmatpush1.bf16.msra.mxu0 %v13634_v4  ;;  %v598_v21 = vld [vmem:[#allocation2 + $0xa8] sm:$0xff]  ;;  %3068 = vmatpush1.bf16.msra.mxu1 %v13636_v16  ;;  %v13644_v24 = vcombine.low %v586_v17, %v590_v18  ;;  %s15910_s22 = smul.u32 24, %s18654_s17  ;;  %s572_s3 = scalar_lea.vmem %s18419_s12, %s13627_s19 }
 0x10e   : > { %2946 = vmatprep.subr.bf16.mxu0 %v13643_v6  ;;  %v13651_v11 = vcombine.high %v593_v7, %v597_v8  ;;  %v601_v12 = vld [vmem:[#allocation2 + $0xc0] sm:$0xff]  ;;  %v13650_v22 = vcombine.low %v593_v7, %v597_v8  ;;  %3069 = vmatprep.subr.bf16.mxu1 %v13645_v19  ;;  %v13653_v27 = vcombine.high %v594_v20, %v598_v21  ;;  %v602_v28 = vld [vmem:[#allocation2 + $0xc8] sm:$0xff]  ;;  %s17346_s23 = scalar_lea.vmem %s18407_s0, %s15909_s28 }
 0x10f   : > { %v605_v14 = vld [vmem:[#allocation2 + $0xe0] sm:$0xff]  ;;  %v606_v29 = vld [vmem:[#allocation2 + $0xe8] sm:$0xff]  ;;  %v13652_v32 = vcombine.low %v594_v20, %v598_v21  ;;  %s17403_s16 = scalar_lea.vmem %s18408_s1, %s15910_s22 }
 0x110   : > { %v13659_v23 = vcombine.high %v601_v12, %v605_v14  ;;  %v609_v25 = vld [vmem:[#allocation2 + $0x100] sm:$0xff]  ;;  %v13658_v30 = vcombine.low %v601_v12, %v605_v14  ;;  %v13661_v35 = vcombine.high %v602_v28, %v606_v29  ;;  %v610_v36 = vld [vmem:[#allocation2 + $0x108] sm:$0xff]  ;;  %v13660_v40 = vcombine.low %v602_v28, %v606_v29 }
 0x111   : > { %2947 = vmatpush1.bf16.msra.mxu0 %v13642_v9  ;;  %v613_v26 = vld [vmem:[#allocation2 + $0x120] sm:$0xff]  ;;  %3070 = vmatpush1.bf16.msra.mxu1 %v13644_v24  ;;  %v614_v37 = vld [vmem:[#allocation2 + $0x128] sm:$0xff] }
 0x112   : > { %2948 = vmatprep.subr.bf16.mxu0 %v13651_v11  ;;  %v13667_v31 = vcombine.high %v609_v25, %v613_v26  ;;  %v617_v33 = vld [vmem:[#allocation2 + $0x140] sm:$0xff]  ;;  %3071 = vmatprep.subr.bf16.mxu1 %v13653_v27  ;;  %v13666_v38 = vcombine.low %v609_v25, %v613_v26  ;;  %v13669_v44 = vcombine.high %v610_v36, %v614_v37  ;;  %v618_v46 = vld [vmem:[#allocation2 + $0x148] sm:$0xff] }
 0x113   : > { %v621_v34 = vld [vmem:[#allocation2 + $0x160] sm:$0xff]  ;;  %v622_v47 = vld [vmem:[#allocation2 + $0x168] sm:$0xff]  ;;  %v13668_v50 = vcombine.low %v610_v36, %v614_v37 }
 0x114   : > { %v13675_v39 = vcombine.high %v617_v33, %v621_v34  ;;  %v17349_v41 = vld [vmem:[%s17346_s23] sm:$0xff]  ;;  %v13674_v48 = vcombine.low %v617_v33, %v621_v34  ;;  %v13677_v53 = vcombine.high %v618_v46, %v622_v47  ;;  %v626_v54 = vld [vmem:[#allocation2 + $0x188] sm:$0xff]  ;;  %v13676_v58 = vcombine.low %v618_v46, %v622_v47 }
 0x115   : > { %2949 = vmatpush1.bf16.msra.mxu0 %v13650_v22  ;;  %3072 = vmatpush1.bf16.msra.mxu1 %v13652_v32  ;;  %v625_v42 = vld [vmem:[#allocation2 + $0x180] sm:$0xff]  ;;  %v17353_v45 = vcombine.high %v17349_v41, %v17349_v41  ;;  %v630_v55 = vld [vmem:[#allocation2 + $0x1a8] sm:$0xff] }
 0x116   : > { %2950 = vmatprep.subr.bf16.mxu0 %v13659_v23  ;;  %v629_v43 = vld [vmem:[#allocation2 + $0x1a0] sm:$0xff]  ;;  %3073 = vmatprep.subr.bf16.mxu1 %v13661_v35  ;;  %v13685_v61 = vcombine.high %v626_v54, %v630_v55  ;;  %v634_v62 = vld [vmem:[#allocation2 + $0x1c8] sm:$0xff]  ;;  %v13684_v2 = vcombine.low %v626_v54, %v630_v55 }
 0x117   : > { %2976 = vmatprep.mubr.bf16.mxu0 %v17353_v45  ;;  %v13683_v49 = vcombine.high %v625_v42, %v629_v43  ;;  %v633_v51 = vld [vmem:[#allocation2 + $0x1c0] sm:$0xff]  ;;  %3099 = vmatprep.mubr.bf16.mxu1 %v17353_v45  ;;  %v13682_v56 = vcombine.low %v625_v42, %v629_v43  ;;  %v638_v63 = vld [vmem:[#allocation2 + $0x1e8] sm:$0xff] }
 0x118   : > { %v637_v52 = vld [vmem:[#allocation2 + $0x1e0] sm:$0xff]  ;;  %v13693_v5 = vcombine.high %v634_v62, %v638_v63  ;;  %v642_v6 = vld [vmem:[#allocation2 + $0x208] sm:$0xff]  ;;  %v13692_v10 = vcombine.low %v634_v62, %v638_v63 }
 0x119   : > { %2951 = vmatpush1.bf16.msra.mxu0 %v13658_v30  ;;  %3074 = vmatpush1.bf16.msra.mxu1 %v13660_v40  ;;  %v13691_v57 = vcombine.high %v633_v51, %v637_v52  ;;  %v641_v59 = vld [vmem:[#allocation2 + $0x200] sm:$0xff]  ;;  %v13690_v0 = vcombine.low %v633_v51, %v637_v52  ;;  %v646_v7 = vld [vmem:[#allocation2 + $0x228] sm:$0xff] }
 0x11a   : > { %2952 = vmatprep.subr.bf16.mxu0 %v13667_v31  ;;  %3075 = vmatprep.subr.bf16.mxu1 %v13669_v44  ;;  %v645_v60 = vld [vmem:[#allocation2 + $0x220] sm:$0xff]  ;;  %v13701_v13 = vcombine.high %v642_v6, %v646_v7  ;;  %v650_v14 = vld [vmem:[#allocation2 + $0x248] sm:$0xff]  ;;  %v13700_v18 = vcombine.low %v642_v6, %v646_v7 }
 0x11b   : > { %v13699_v1 = vcombine.high %v641_v59, %v645_v60  ;;  %v649_v3 = vld [vmem:[#allocation2 + $0x240] sm:$0xff]  ;;  %v13698_v8 = vcombine.low %v641_v59, %v645_v60  ;;  %v654_v15 = vld [vmem:[#allocation2 + $0x268] sm:$0xff] }
 0x11c   : > { %v653_v4 = vld [vmem:[#allocation2 + $0x260] sm:$0xff]  ;;  %v13709_v21 = vcombine.high %v650_v14, %v654_v15  ;;  %v658_v22 = vld [vmem:[#allocation2 + $0x288] sm:$0xff]  ;;  %v13708_v26 = vcombine.low %v650_v14, %v654_v15 }
 0x11d   : > { %2953 = vmatpush1.bf16.msra.mxu0 %v13666_v38  ;;  %3076 = vmatpush1.bf16.msra.mxu1 %v13668_v50  ;;  %v13707_v9 = vcombine.high %v649_v3, %v653_v4  ;;  %v657_v11 = vld [vmem:[#allocation2 + $0x280] sm:$0xff]  ;;  %v13706_v16 = vcombine.low %v649_v3, %v653_v4  ;;  %v662_v23 = vld [vmem:[#allocation2 + $0x2a8] sm:$0xff] }
 0x11e   : > { %2954 = vmatprep.subr.bf16.mxu0 %v13675_v39  ;;  %3077 = vmatprep.subr.bf16.mxu1 %v13677_v53  ;;  %v661_v12 = vld [vmem:[#allocation2 + $0x2a0] sm:$0xff]  ;;  %v13717_v29 = vcombine.high %v658_v22, %v662_v23  ;;  %v666_v30 = vld [vmem:[#allocation2 + $0x2c8] sm:$0xff]  ;;  %v13716_v34 = vcombine.low %v658_v22, %v662_v23 }
 0x11f   : > { %v13715_v17 = vcombine.high %v657_v11, %v661_v12  ;;  %v665_v19 = vld [vmem:[#allocation2 + $0x2c0] sm:$0xff]  ;;  %v13714_v24 = vcombine.low %v657_v11, %v661_v12  ;;  %v670_v31 = vld [vmem:[#allocation2 + $0x2e8] sm:$0xff] }
 0x120   : > { %v669_v20 = vld [vmem:[#allocation2 + $0x2e0] sm:$0xff]  ;;  %v13725_v37 = vcombine.high %v666_v30, %v670_v31  ;;  %v674_v38 = vld [vmem:[#allocation2 + $0x308] sm:$0xff]  ;;  %v13724_v43 = vcombine.low %v666_v30, %v670_v31 }
 0x121   : > { %2955 = vmatpush1.bf16.msra.mxu0 %v13674_v48  ;;  %3078 = vmatpush1.bf16.msra.mxu1 %v13676_v58  ;;  %v13723_v25 = vcombine.high %v665_v19, %v669_v20  ;;  %v673_v27 = vld [vmem:[#allocation2 + $0x300] sm:$0xff]  ;;  %v13722_v32 = vcombine.low %v665_v19, %v669_v20  ;;  %v678_v39 = vld [vmem:[#allocation2 + $0x328] sm:$0xff] }
 0x122   : > { %2956 = vmatprep.subr.bf16.mxu0 %v13683_v49  ;;  %3079 = vmatprep.subr.bf16.mxu1 %v13685_v61  ;;  %v677_v28 = vld [vmem:[#allocation2 + $0x320] sm:$0xff]  ;;  %v13733_v47 = vcombine.high %v674_v38, %v678_v39  ;;  %v682_v48 = vld [vmem:[#allocation2 + $0x348] sm:$0xff]  ;;  %v13732_v52 = vcombine.low %v674_v38, %v678_v39 }
 0x123   : > { %v13731_v33 = vcombine.high %v673_v27, %v677_v28  ;;  %v681_v35 = vld [vmem:[#allocation2 + $0x340] sm:$0xff]  ;;  %v13730_v40 = vcombine.low %v673_v27, %v677_v28  ;;  %v686_v49 = vld [vmem:[#allocation2 + $0x368] sm:$0xff] }
 0x124   : > { %v685_v36 = vld [vmem:[#allocation2 + $0x360] sm:$0xff]  ;;  %v13741_v55 = vcombine.high %v682_v48, %v686_v49  ;;  %v13740_v60 = vcombine.low %v682_v48, %v686_v49  ;;  %v706_v7 = vld [vmem:[#allocation2 + $0x408] sm:$0xff] }
 0x125   : > { %2957 = vmatpush1.bf16.msra.mxu0 %v13682_v56  ;;  %3080 = vmatpush1.bf16.msra.mxu1 %v13684_v2  ;;  %v13739_v42 = vcombine.high %v681_v35, %v685_v36  ;;  %v689_v44 = vld [vmem:[#allocation2 + $0x380] sm:$0xff]  ;;  %v13738_v50 = vcombine.low %v681_v35, %v685_v36  ;;  %v690_v56 = vld [vmem:[#allocation2 + $0x388] sm:$0xff] }
 0x126   : > { %2958 = vmatprep.subr.bf16.mxu0 %v13691_v57  ;;  %3081 = vmatprep.subr.bf16.mxu1 %v13693_v5  ;;  %v693_v46 = vld [vmem:[#allocation2 + $0x3a0] sm:$0xff]  ;;  %v694_v57 = vld [vmem:[#allocation2 + $0x3a8] sm:$0xff] }
 0x127   : > { %v13747_v51 = vcombine.high %v689_v44, %v693_v46  ;;  %v697_v53 = vld [vmem:[#allocation2 + $0x3c0] sm:$0xff]  ;;  %v13746_v58 = vcombine.low %v689_v44, %v693_v46  ;;  %v13749_v63 = vcombine.high %v690_v56, %v694_v57  ;;  %v13748_v6 = vcombine.low %v690_v56, %v694_v57  ;;  %v710_v11 = vld [vmem:[#allocation2 + $0x428] sm:$0xff] }
 0x128   : > { %v701_v54 = vld [vmem:[#allocation2 + $0x3e0] sm:$0xff]  ;;  %v718_v19 = vld [vmem:[#allocation2 + $0x468] sm:$0xff]  ;;  %v13765_v20 = vcombine.high %v706_v7, %v710_v11 }
 0x129   : > { %2959 = vmatpush1.bf16.msra.mxu0 %v13690_v0  ;;  %3082 = vmatpush1.bf16.msra.mxu1 %v13692_v10  ;;  %v13755_v59 = vcombine.high %v697_v53, %v701_v54  ;;  %v705_v61 = vld [vmem:[#allocation2 + $0x400] sm:$0xff]  ;;  %v698_v0 = vld [vmem:[#allocation2 + $0x3c8] sm:$0xff]  ;;  %v13754_v2 = vcombine.low %v697_v53, %v701_v54  ;;  %v17362_v10 = vcombine.low %v17349_v41, %v17349_v41 }
 0x12a   : > { %2960 = vmatprep.subr.bf16.mxu0 %v13699_v1  ;;  %3083 = vmatprep.subr.bf16.mxu1 %v13701_v13  ;;  %v709_v62 = vld [vmem:[#allocation2 + $0x420] sm:$0xff]  ;;  %v702_v1 = vld [vmem:[#allocation2 + $0x3e8] sm:$0xff] }
 0x12b   : > { %v713_v3 = vld [vmem:[#allocation2 + $0x440] sm:$0xff]  ;;  %v13763_v5 = vcombine.high %v705_v61, %v709_v62  ;;  %v13762_v12 = vcombine.low %v705_v61, %v709_v62 }
 0x12c   : > { %v717_v4 = vld [vmem:[#allocation2 + $0x460] sm:$0xff] }
 0x12d   : > { %2961 = vmatpush1.bf16.msra.mxu0 %v13698_v8  ;;  %3084 = vmatpush1.bf16.msra.mxu1 %v13700_v18  ;;  %v17358_v8 = vld [vmem:[%s17346_s23 + $0x8] sm:$0xff]  ;;  %v721_v13 = vld [vmem:[#allocation2 + $0x480] sm:$0xff]  ;;  %v13770_v41 = vcombine.low %v713_v3, %v717_v4 }
 0x12e   : > { %2962 = vmatprep.subr.bf16.mxu0 %v13707_v9  ;;  %3085 = vmatprep.subr.bf16.mxu1 %v13709_v21  ;;  %v13757_v9 = vcombine.high %v698_v0, %v702_v1  ;;  %v725_v14 = vld [vmem:[#allocation2 + $0x4a0] sm:$0xff]  ;;  %v17366_v15 = vcombine.high %v17358_v8, %v17358_v8  ;;  %v714_v18 = vld [vmem:[#allocation2 + $0x448] sm:$0xff] }
 0x12f   : > { %v729_v21 = vld [vmem:[#allocation2 + $0x4c0] sm:$0xff]  ;;  %v13779_v23 = vcombine.high %v721_v13, %v725_v14  ;;  %v13773_v27 = vcombine.high %v714_v18, %v718_v19  ;;  %v13778_v28 = vcombine.low %v721_v13, %v725_v14  ;;  %v770_v13 = vld [vmem:[#allocation2 + $0x608] sm:$0xff] }
 0x130   : > { %v733_v22 = vld [vmem:[#allocation2 + $0x4e0] sm:$0xff]  ;;  %v774_v14 = vld [vmem:[#allocation2 + $0x628] sm:$0xff] }
 0x131   : > { %2963 = vmatpush1.bf16.msra.mxu0 %v13706_v16  ;;  %3086 = vmatpush1.bf16.msra.mxu1 %v13708_v26  ;;  %v13771_v16 = vcombine.high %v713_v3, %v717_v4  ;;  %v726_v26 = vld [vmem:[#allocation2 + $0x4a8] sm:$0xff]  ;;  %v741_v30 = vld [vmem:[#allocation2 + $0x520] sm:$0xff]  ;;  %v13787_v31 = vcombine.high %v729_v21, %v733_v22  ;;  %v13786_v36 = vcombine.low %v729_v21, %v733_v22 }
 0x132   : > { %2964 = vmatprep.subr.bf16.mxu0 %v13715_v17  ;;  %3087 = vmatprep.subr.bf16.mxu1 %v13717_v29  ;;  %v13756_v17 = vcombine.low %v698_v0, %v702_v1  ;;  %v737_v29 = vld [vmem:[#allocation2 + $0x500] sm:$0xff]  ;;  %v762_v3 = vld [vmem:[#allocation2 + $0x5c8] sm:$0xff] }
 0x133   : > { %v749_v38 = vld [vmem:[#allocation2 + $0x560] sm:$0xff]  ;;  %v13795_v39 = vcombine.high %v737_v29, %v741_v30  ;;  %v13794_v46 = vcombine.low %v737_v29, %v741_v30  ;;  %v766_v4 = vld [vmem:[#allocation2 + $0x5e8] sm:$0xff] }
 0x134   : > { %v757_v48 = vld [vmem:[#allocation2 + $0x5a0] sm:$0xff]  ;;  %v778_v21 = vld [vmem:[#allocation2 + $0x648] sm:$0xff] }
 0x135   : > { %2965 = vmatpush1.bf16.msra.mxu0 %v13714_v24  ;;  %3088 = vmatpush1.bf16.msra.mxu1 %v13716_v34  ;;  %v13764_v24 = vcombine.low %v706_v7, %v710_v11  ;;  %v734_v34 = vld [vmem:[#allocation2 + $0x4e8] sm:$0xff]  ;;  %v765_v56 = vld [vmem:[#allocation2 + $0x5e0] sm:$0xff] }
 0x136   : > { %2966 = vmatprep.subr.bf16.mxu0 %v13723_v25  ;;  %3089 = vmatprep.subr.bf16.mxu1 %v13725_v37  ;;  %v722_v25 = vld [vmem:[#allocation2 + $0x488] sm:$0xff]  ;;  %v745_v37 = vld [vmem:[#allocation2 + $0x540] sm:$0xff] }
 0x137   : > { %v13781_v35 = vcombine.high %v722_v25, %v726_v26  ;;  %v13803_v49 = vcombine.high %v745_v37, %v749_v38  ;;  %v13802_v54 = vcombine.low %v745_v37, %v749_v38  ;;  %v773_v0 = vld [vmem:[#allocation2 + $0x620] sm:$0xff]  ;;  %v782_v22 = vld [vmem:[#allocation2 + $0x668] sm:$0xff] }
 0x138   : > { %v777_v7 = vld [vmem:[#allocation2 + $0x640] sm:$0xff]  ;;  %v786_v29 = vld [vmem:[#allocation2 + $0x688] sm:$0xff] }
 0x139   : > { %2967 = vmatpush1.bf16.msra.mxu0 %v13722_v32  ;;  %3090 = vmatpush1.bf16.msra.mxu1 %v13724_v43  ;;  %v13772_v32 = vcombine.low %v714_v18, %v718_v19  ;;  %v742_v43 = vld [vmem:[#allocation2 + $0x528] sm:$0xff]  ;;  %v785_v18 = vld [vmem:[#allocation2 + $0x680] sm:$0xff] }
 0x13a   : > { %2968 = vmatprep.subr.bf16.mxu0 %v13731_v33  ;;  %3091 = vmatprep.subr.bf16.mxu1 %v13733_v47  ;;  %v730_v33 = vld [vmem:[#allocation2 + $0x4c8] sm:$0xff]  ;;  %v753_v47 = vld [vmem:[#allocation2 + $0x580] sm:$0xff] }
 0x13b   : > { %v13789_v44 = vcombine.high %v730_v33, %v734_v34  ;;  %v13811_v57 = vcombine.high %v753_v47, %v757_v48  ;;  %v13810_v62 = vcombine.low %v753_v47, %v757_v48  ;;  %v789_v19 = vld [vmem:[#allocation2 + $0x6a0] sm:$0xff]  ;;  %v790_v30 = vld [vmem:[#allocation2 + $0x6a8] sm:$0xff] }
 0x13c   : > { %v794_v37 = vld [vmem:[#allocation2 + $0x6c8] sm:$0xff] }
 0x13d   : > { %2969 = vmatpush1.bf16.msra.mxu0 %v13730_v40  ;;  %3092 = vmatpush1.bf16.msra.mxu1 %v13732_v52  ;;  %v13780_v40 = vcombine.low %v722_v25, %v726_v26  ;;  %v750_v52 = vld [vmem:[#allocation2 + $0x568] sm:$0xff]  ;;  %v793_v25 = vld [vmem:[#allocation2 + $0x6c0] sm:$0xff] }
 0x13e   : > { %2970 = vmatprep.subr.bf16.mxu0 %v13739_v42  ;;  %3093 = vmatprep.subr.bf16.mxu1 %v13741_v55  ;;  %v738_v42 = vld [vmem:[#allocation2 + $0x508] sm:$0xff]  ;;  %v761_v55 = vld [vmem:[#allocation2 + $0x5c0] sm:$0xff] }
 0x13f   : > { %v13797_v53 = vcombine.high %v738_v42, %v742_v43  ;;  %v13819_v1 = vcombine.high %v761_v55, %v765_v56  ;;  %v797_v26 = vld [vmem:[#allocation2 + $0x6e0] sm:$0xff]  ;;  %v798_v38 = vld [vmem:[#allocation2 + $0x6e8] sm:$0xff] }
 0x140   : > { %v802_v47 = vld [vmem:[#allocation2 + $0x708] sm:$0xff] }
 0x141   : > { %2971 = vmatpush1.bf16.msra.mxu0 %v13738_v50  ;;  %3094 = vmatpush1.bf16.msra.mxu1 %v13740_v60  ;;  %v13788_v50 = vcombine.low %v730_v33, %v734_v34  ;;  %v758_v60 = vld [vmem:[#allocation2 + $0x5a8] sm:$0xff]  ;;  %v801_v33 = vld [vmem:[#allocation2 + $0x700] sm:$0xff] }
 0x142   : > { %2972 = vmatprep.subr.bf16.mxu0 %v13747_v51  ;;  %3095 = vmatprep.subr.bf16.mxu1 %v13749_v63  ;;  %v746_v51 = vld [vmem:[#allocation2 + $0x548] sm:$0xff]  ;;  %v769_v63 = vld [vmem:[#allocation2 + $0x600] sm:$0xff] }
 0x143   : > { %v13805_v61 = vcombine.high %v746_v51, %v750_v52  ;;  %v13827_v11 = vcombine.high %v769_v63, %v773_v0  ;;  %v805_v34 = vld [vmem:[#allocation2 + $0x720] sm:$0xff]  ;;  %v806_v48 = vld [vmem:[#allocation2 + $0x728] sm:$0xff] }
 0x145   : > { %2973 = vmatpush1.bf16.msra.mxu0 %v13746_v58  ;;  %3096 = vmatpush1.bf16.msra.mxu1 %v13748_v6  ;;  %v13796_v58 = vcombine.low %v738_v42, %v742_v43  ;;  %v13818_v6 = vcombine.low %v761_v55, %v765_v56  ;;  %v809_v42 = vld [vmem:[#allocation2 + $0x740] sm:$0xff]  ;;  %v810_v55 = vld [vmem:[#allocation2 + $0x748] sm:$0xff] }
 0x146   : > { %2974 = vmatprep.subr.bf16.mxu0 %v13755_v59  ;;  %3097 = vmatprep.subr.bf16.mxu1 %v13757_v9  ;;  %v754_v59 = vld [vmem:[#allocation2 + $0x588] sm:$0xff]  ;;  %v781_v9 = vld [vmem:[#allocation2 + $0x660] sm:$0xff] }
 0x147   : > { %v813_v43 = vld [vmem:[#allocation2 + $0x760] sm:$0xff]  ;;  %v814_v56 = vld [vmem:[#allocation2 + $0x768] sm:$0xff] }
 0x149   : > { %2975 = vmatpush1.bf16.msra.mxu0 %v13754_v2  ;;  %3098 = vmatpush1.bf16.msra.mxu1 %v13756_v17  ;;  %v13804_v2 = vcombine.low %v746_v51, %v750_v52  ;;  %v13826_v17 = vcombine.low %v769_v63, %v773_v0  ;;  %v817_v51 = vld [vmem:[#allocation2 + $0x780] sm:$0xff]  ;;  %v818_v63 = vld [vmem:[#allocation2 + $0x788] sm:$0xff] }
 0x14a   : > { %2985 = vmatprep.subr.bf16.mxu0 %v13763_v5  ;;  %3108 = vmatprep.subr.bf16.mxu1 %v13765_v20  ;;  %v13813_v5 = vcombine.high %v754_v59, %v758_v60  ;;  %v13835_v20 = vcombine.high %v777_v7, %v781_v9  ;;  %v821_v52 = vld [vmem:[#allocation2 + $0x7a0] sm:$0xff]  ;;  %v822_v0 = vld [vmem:[#allocation2 + $0x7a8] sm:$0xff] }
 0x14c   : > { %2977 = vmatmul.mubr.bf16.vlgmr.msra.gmra.mrb[0].mxu0 %v17362_v10  ;;  %3100 = vmatmul.mubr.bf16.vlgmr.msra.gmra.mrb[0].mxu1 %v17362_v10 }
 0x14d   : > { %2986 = vmatpush1.bf16.msra.mxu0 %v13762_v12  ;;  %3017 = vmatprep.mubr.bf16.mxu0 %v17366_v15  ;;  %v13812_v12 = vcombine.low %v754_v59, %v758_v60  ;;  %v825_v59 = vld [vmem:[#allocation2 + $0x7c0] sm:$0xff] }
 0x14e   : > { %2987 = vmatprep.subr.bf16.mxu0 %v13771_v16  ;;  %3109 = vmatpush1.bf16.msra.mxu1 %v13764_v24  ;;  %v13821_v16 = vcombine.high %v762_v3, %v766_v4  ;;  %v13834_v24 = vcombine.low %v777_v7, %v781_v9  ;;  %v829_v60 = vld [vmem:[#allocation2 + $0x7e0] sm:$0xff]  ;;  %v826_v7 = vld [vmem:[#allocation2 + $0x7c8] sm:$0xff] }
 0x14f   : > { %3110 = vmatprep.subr.bf16.mxu1 %v13773_v27  ;;  %3140 = vmatprep.mubr.bf16.mxu1 %v17366_v15  ;;  %v13843_v27 = vcombine.high %v785_v18, %v789_v19  ;;  %v830_v9 = vld [vmem:[#allocation2 + $0x7e8] sm:$0xff] }
 0x151   : > { %2988 = vmatpush1.bf16.msra.mxu0 %v13770_v41  ;;  %v13820_v41 = vcombine.low %v762_v3, %v766_v4  ;;  %v833_v3 = vld [vmem:[#allocation2 + $0x800] sm:$0xff] }
 0x152   : > { %2989 = vmatprep.subr.bf16.mxu0 %v13779_v23  ;;  %3111 = vmatpush1.bf16.msra.mxu1 %v13772_v32  ;;  %v13829_v23 = vcombine.high %v770_v13, %v774_v14  ;;  %v13842_v32 = vcombine.low %v785_v18, %v789_v19  ;;  %v837_v4 = vld [vmem:[#allocation2 + $0x820] sm:$0xff]  ;;  %v834_v18 = vld [vmem:[#allocation2 + $0x808] sm:$0xff] }
 0x153   : > { %3112 = vmatprep.subr.bf16.mxu1 %v13781_v35  ;;  %v13851_v35 = vcombine.high %v793_v25, %v797_v26  ;;  %v838_v19 = vld [vmem:[#allocation2 + $0x828] sm:$0xff] }
 0x155   : > { %2990 = vmatpush1.bf16.msra.mxu0 %v13778_v28  ;;  %v13828_v28 = vcombine.low %v770_v13, %v774_v14  ;;  %v841_v13 = vld [vmem:[#allocation2 + $0x840] sm:$0xff] }
 0x156   : > { %2991 = vmatprep.subr.bf16.mxu0 %v13787_v31  ;;  %3113 = vmatpush1.bf16.msra.mxu1 %v13780_v40  ;;  %v13837_v31 = vcombine.high %v778_v21, %v782_v22  ;;  %v13850_v40 = vcombine.low %v793_v25, %v797_v26  ;;  %v845_v14 = vld [vmem:[#allocation2 + $0x860] sm:$0xff] }
 0x157   : > { %3114 = vmatprep.subr.bf16.mxu1 %v13789_v44  ;;  %v13859_v44 = vcombine.high %v801_v33, %v805_v34  ;;  %v13899_v26 = vcombine.high %v841_v13, %v845_v14 }
 0x159   : > { %2992 = vmatpush1.bf16.msra.mxu0 %v13786_v36  ;;  %v13836_v36 = vcombine.low %v778_v21, %v782_v22  ;;  %v17377_v21 = vcombine.low %v17358_v8, %v17358_v8  ;;  %v13890_v22 = vcombine.low %v833_v3, %v837_v4  ;;  %v13898_v8 = vcombine.low %v841_v13, %v845_v14 }
 0x15a   : > { %2993 = vmatprep.subr.bf16.mxu0 %v13795_v39  ;;  %3115 = vmatpush1.bf16.msra.mxu1 %v13788_v50  ;;  %v13845_v39 = vcombine.high %v786_v29, %v790_v30  ;;  %v13858_v50 = vcombine.low %v801_v33, %v805_v34  ;;  %v13892_v34 = vcombine.low %v834_v18, %v838_v19 }
 0x15b   : > { %3116 = vmatprep.subr.bf16.mxu1 %v13797_v53  ;;  %v13867_v53 = vcombine.high %v809_v42, %v813_v43 }
 0x15d   : > { %2994 = vmatpush1.bf16.msra.mxu0 %v13794_v46  ;;  %v13844_v46 = vcombine.low %v786_v29, %v790_v30  ;;  %v846_v29 = vld [vmem:[#allocation2 + $0x868] sm:$0xff]  ;;  %v13893_v30 = vcombine.high %v834_v18, %v838_v19 }
 0x15e   : > { %2995 = vmatprep.subr.bf16.mxu0 %v13803_v49  ;;  %3117 = vmatpush1.bf16.msra.mxu1 %v13796_v58  ;;  %v13853_v49 = vcombine.high %v794_v37, %v798_v38  ;;  %v13866_v58 = vcombine.low %v809_v42, %v813_v43 }
 0x15f   : > { %3118 = vmatprep.subr.bf16.mxu1 %v13805_v61  ;;  %v13875_v61 = vcombine.high %v817_v51, %v821_v52 }
 0x161   : > { %2996 = vmatpush1.bf16.msra.mxu0 %v13802_v54  ;;  %v13852_v54 = vcombine.low %v794_v37, %v798_v38 }
 0x162   : > { %2997 = vmatprep.subr.bf16.mxu0 %v13811_v57  ;;  %3119 = vmatpush1.bf16.msra.mxu1 %v13804_v2  ;;  %v13861_v57 = vcombine.high %v802_v47, %v806_v48  ;;  %v13874_v2 = vcombine.low %v817_v51, %v821_v52 }
 0x163   : > { %3120 = vmatprep.subr.bf16.mxu1 %v13813_v5  ;;  %v13883_v5 = vcombine.high %v825_v59, %v829_v60 }
 0x165   : > { %2998 = vmatpush1.bf16.msra.mxu0 %v13810_v62  ;;  %v13860_v62 = vcombine.low %v802_v47, %v806_v48 }
 0x166   : > { %2999 = vmatprep.subr.bf16.mxu0 %v13819_v1  ;;  %3121 = vmatpush1.bf16.msra.mxu1 %v13812_v12  ;;  %v13869_v1 = vcombine.high %v810_v55, %v814_v56  ;;  %v13882_v12 = vcombine.low %v825_v59, %v829_v60 }
 0x167   : > { %3122 = vmatprep.subr.bf16.mxu1 %v13821_v16  ;;  %v13891_v16 = vcombine.high %v833_v3, %v837_v4 }
 0x169   : > { %3000 = vmatpush1.bf16.msra.mxu0 %v13818_v6  ;;  %v13868_v6 = vcombine.low %v810_v55, %v814_v56 }
 0x16a   : > { %3001 = vmatprep.subr.bf16.mxu0 %v13827_v11  ;;  %3123 = vmatpush1.bf16.msra.mxu1 %v13820_v41  ;;  %v13877_v11 = vcombine.high %v818_v63, %v822_v0  ;;  %v13885_v41 = vcombine.high %v826_v7, %v830_v9 }
 0x16b   : > { %3124 = vmatprep.subr.bf16.mxu1 %v13829_v23  ;;  %v849_v23 = vld [vmem:[#allocation2 + $0x880] sm:$0xff] }
 0x16d   : > { %3002 = vmatpush1.bf16.msra.mxu0 %v13826_v17  ;;  %v13876_v17 = vcombine.low %v818_v63, %v822_v0 }
 0x16e   : > { %3003 = vmatprep.subr.bf16.mxu0 %v13835_v20  ;;  %3125 = vmatpush1.bf16.msra.mxu1 %v13828_v28  ;;  %v17373_v20 = vld [vmem:[%s17346_s23 + $0x10] sm:$0xff]  ;;  %v842_v28 = vld [vmem:[#allocation2 + $0x848] sm:$0xff] }
 0x16f   : > { %3126 = vmatprep.subr.bf16.mxu1 %v13837_v31  ;;  %v17381_v25 = vcombine.high %v17373_v20, %v17373_v20  ;;  %v857_v31 = vld [vmem:[#allocation2 + $0x8c0] sm:$0xff]  ;;  %v13901_v37 = vcombine.high %v842_v28, %v846_v29  ;;  %v13900_v43 = vcombine.low %v842_v28, %v846_v29 }
 0x171   : > { %3004 = vmatpush1.bf16.msra.mxu0 %v13834_v24  ;;  %v853_v24 = vld [vmem:[#allocation2 + $0x8a0] sm:$0xff] }
 0x172   : > { %3005 = vmatprep.subr.bf16.mxu0 %v13843_v27  ;;  %3127 = vmatpush1.bf16.msra.mxu1 %v13836_v36  ;;  %v13884_v27 = vcombine.low %v826_v7, %v830_v9  ;;  %v13907_v33 = vcombine.high %v849_v23, %v853_v24  ;;  %v854_v36 = vld [vmem:[#allocation2 + $0x8a8] sm:$0xff]  ;;  %v13906_v38 = vcombine.low %v849_v23, %v853_v24 }
 0x173   : > { %3128 = vmatprep.subr.bf16.mxu1 %v13845_v39  ;;  %v865_v39 = vld [vmem:[#allocation2 + $0x900] sm:$0xff] }
 0x175   : > { %3006 = vmatpush1.bf16.msra.mxu0 %v13842_v32  ;;  %v861_v32 = vld [vmem:[#allocation2 + $0x8e0] sm:$0xff] }
 0x176   : > { %3007 = vmatprep.subr.bf16.mxu0 %v13851_v35  ;;  %3129 = vmatpush1.bf16.msra.mxu1 %v13844_v46  ;;  %v850_v35 = vld [vmem:[#allocation2 + $0x888] sm:$0xff]  ;;  %v13915_v42 = vcombine.high %v857_v31, %v861_v32  ;;  %v13914_v48 = vcombine.low %v857_v31, %v861_v32 }
 0x177   : > { %3130 = vmatprep.subr.bf16.mxu1 %v13853_v49  ;;  %v862_v46 = vld [vmem:[#allocation2 + $0x8e8] sm:$0xff]  ;;  %v13909_v47 = vcombine.high %v850_v35, %v854_v36  ;;  %v873_v49 = vld [vmem:[#allocation2 + $0x940] sm:$0xff]  ;;  %v13908_v52 = vcombine.low %v850_v35, %v854_v36 }
 0x179   : > { %3008 = vmatpush1.bf16.msra.mxu0 %v13850_v40  ;;  %v869_v40 = vld [vmem:[#allocation2 + $0x920] sm:$0xff] }
 0x17a   : > { %3009 = vmatprep.subr.bf16.mxu0 %v13859_v44  ;;  %3131 = vmatpush1.bf16.msra.mxu1 %v13852_v54  ;;  %v858_v44 = vld [vmem:[#allocation2 + $0x8c8] sm:$0xff]  ;;  %v13923_v51 = vcombine.high %v865_v39, %v869_v40  ;;  %v13922_v56 = vcombine.low %v865_v39, %v869_v40 }
 0x17b   : > { %3132 = vmatprep.subr.bf16.mxu1 %v13861_v57  ;;  %v870_v54 = vld [vmem:[#allocation2 + $0x928] sm:$0xff]  ;;  %v13917_v55 = vcombine.high %v858_v44, %v862_v46  ;;  %v881_v57 = vld [vmem:[#allocation2 + $0x980] sm:$0xff]  ;;  %v13916_v60 = vcombine.low %v858_v44, %v862_v46 }
 0x17d   : > { %3010 = vmatpush1.bf16.msra.mxu0 %v13858_v50  ;;  %v877_v50 = vld [vmem:[#allocation2 + $0x960] sm:$0xff] }
 0x17e   : > { %3011 = vmatprep.subr.bf16.mxu0 %v13867_v53  ;;  %3133 = vmatpush1.bf16.msra.mxu1 %v13860_v62  ;;  %v866_v53 = vld [vmem:[#allocation2 + $0x908] sm:$0xff]  ;;  %v13931_v59 = vcombine.high %v873_v49, %v877_v50  ;;  %v13930_v0 = vcombine.low %v873_v49, %v877_v50 }
 0x17f   : > { %3134 = vmatprep.subr.bf16.mxu1 %v13869_v1  ;;  %v878_v62 = vld [vmem:[#allocation2 + $0x968] sm:$0xff]  ;;  %v13925_v63 = vcombine.high %v866_v53, %v870_v54  ;;  %v889_v1 = vld [vmem:[#allocation2 + $0x9c0] sm:$0xff]  ;;  %v13924_v4 = vcombine.low %v866_v53, %v870_v54 }
 0x181   : > { %3012 = vmatpush1.bf16.msra.mxu0 %v13866_v58  ;;  %v885_v58 = vld [vmem:[#allocation2 + $0x9a0] sm:$0xff] }
 0x182   : > { %3013 = vmatprep.subr.bf16.mxu0 %v13875_v61  ;;  %3135 = vmatpush1.bf16.msra.mxu1 %v13868_v6  ;;  %v874_v61 = vld [vmem:[#allocation2 + $0x948] sm:$0xff]  ;;  %v13939_v3 = vcombine.high %v881_v57, %v885_v58  ;;  %v13938_v9 = vcombine.low %v881_v57, %v885_v58 }
 0x183   : > { %3136 = vmatprep.subr.bf16.mxu1 %v13877_v11  ;;  %v886_v6 = vld [vmem:[#allocation2 + $0x9a8] sm:$0xff]  ;;  %v13933_v7 = vcombine.high %v874_v61, %v878_v62  ;;  %v897_v11 = vld [vmem:[#allocation2 + $0xa00] sm:$0xff]  ;;  %v13932_v14 = vcombine.low %v874_v61, %v878_v62 }
 0x185   : > { %3014 = vmatpush1.bf16.msra.mxu0 %v13874_v2  ;;  %v893_v2 = vld [vmem:[#allocation2 + $0x9e0] sm:$0xff] }
 0x186   : > { %3015 = vmatprep.subr.bf16.mxu0 %v13883_v5  ;;  %3137 = vmatpush1.bf16.msra.mxu1 %v13876_v17  ;;  %v882_v5 = vld [vmem:[#allocation2 + $0x988] sm:$0xff]  ;;  %v13947_v13 = vcombine.high %v889_v1, %v893_v2  ;;  %v13946_v19 = vcombine.low %v889_v1, %v893_v2 }
 0x187   : > { %3138 = vmatprep.subr.bf16.mxu1 %v13885_v41  ;;  %v894_v17 = vld [vmem:[#allocation2 + $0x9e8] sm:$0xff]  ;;  %v13941_v18 = vcombine.high %v882_v5, %v886_v6  ;;  %v905_v41 = vld [vmem:[#allocation2 + $0xa40] sm:$0xff]  ;;  %v13940_v24 = vcombine.low %v882_v5, %v886_v6 }
 0x189   : > { %3016 = vmatpush1.bf16.msra.mxu0 %v13882_v12  ;;  %v901_v12 = vld [vmem:[#allocation2 + $0xa20] sm:$0xff] }
 0x18a   : > { %3026 = vmatprep.subr.bf16.mxu0 %v13891_v16  ;;  %3139 = vmatpush1.bf16.msra.mxu1 %v13884_v27  ;;  %v890_v16 = vld [vmem:[#allocation2 + $0x9c8] sm:$0xff]  ;;  %v13955_v23 = vcombine.high %v897_v11, %v901_v12  ;;  %v13954_v29 = vcombine.low %v897_v11, %v901_v12 }
 0x18b   : > { %3149 = vmatprep.subr.bf16.mxu1 %v13893_v30  ;;  %v902_v27 = vld [vmem:[#allocation2 + $0xa28] sm:$0xff]  ;;  %v13949_v28 = vcombine.high %v890_v16, %v894_v17  ;;  %v913_v30 = vld [vmem:[#allocation2 + $0xa80] sm:$0xff]  ;;  %v13948_v32 = vcombine.low %v890_v16, %v894_v17 }
 0x18c   : > { %3018 = vmatmul.mubr.bf16.vlgmr.msra.gmra.mrb[0].mxu0 %v17377_v21 }
 0x18d   : > { %3027 = vmatpush1.bf16.msra.mxu0 %v13890_v22  ;;  %3058 = vmatprep.mubr.bf16.mxu0 %v17381_v25  ;;  %v909_v22 = vld [vmem:[#allocation2 + $0xa60] sm:$0xff] }
 0x18e   : > { %3028 = vmatprep.subr.bf16.mxu0 %v13899_v26  ;;  %3141 = vmatmul.mubr.bf16.vlgmr.msra.gmra.mrb[0].mxu1 %v17377_v21  ;;  %v898_v26 = vld [vmem:[#allocation2 + $0xa08] sm:$0xff]  ;;  %v13963_v31 = vcombine.high %v905_v41, %v909_v22  ;;  %v13962_v36 = vcombine.low %v905_v41, %v909_v22 }
 0x18f   : > { %3150 = vmatpush1.bf16.msra.mxu1 %v13892_v34  ;;  %3181 = vmatprep.mubr.bf16.mxu1 %v17381_v25  ;;  %v910_v34 = vld [vmem:[#allocation2 + $0xa68] sm:$0xff]  ;;  %v13957_v35 = vcombine.high %v898_v26, %v902_v27  ;;  %v13956_v40 = vcombine.low %v898_v26, %v902_v27 }
 0x190   : > { %3151 = vmatprep.subr.bf16.mxu1 %v13901_v37  ;;  %v921_v37 = vld [vmem:[#allocation2 + $0xac0] sm:$0xff] }
 0x191   : > { %3029 = vmatpush1.bf16.msra.mxu0 %v13898_v8  ;;  %v917_v8 = vld [vmem:[#allocation2 + $0xaa0] sm:$0xff] }
 0x192   : > { %3030 = vmatprep.subr.bf16.mxu0 %v13907_v33  ;;  %v906_v33 = vld [vmem:[#allocation2 + $0xa48] sm:$0xff]  ;;  %v13971_v39 = vcombine.high %v913_v30, %v917_v8  ;;  %v13970_v46 = vcombine.low %v913_v30, %v917_v8 }
 0x193   : > { %3152 = vmatpush1.bf16.msra.mxu1 %v13900_v43  ;;  %v918_v43 = vld [vmem:[#allocation2 + $0xaa8] sm:$0xff]  ;;  %v13965_v44 = vcombine.high %v906_v33, %v910_v34  ;;  %v13964_v50 = vcombine.low %v906_v33, %v910_v34  ;;  %v17389_v34 = vcombine.low %v17373_v20, %v17373_v20 }
 0x194   : > { %3153 = vmatprep.subr.bf16.mxu1 %v13909_v47  ;;  %v929_v47 = vld [vmem:[#allocation2 + $0xb00] sm:$0xff] }
 0x195   : > { %3031 = vmatpush1.bf16.msra.mxu0 %v13906_v38  ;;  %v925_v38 = vld [vmem:[#allocation2 + $0xae0] sm:$0xff] }
 0x196   : > { %3032 = vmatprep.subr.bf16.mxu0 %v13915_v42  ;;  %v914_v42 = vld [vmem:[#allocation2 + $0xa88] sm:$0xff]  ;;  %v13979_v49 = vcombine.high %v921_v37, %v925_v38  ;;  %v13978_v54 = vcombine.low %v921_v37, %v925_v38  ;;  %v599_v37 = vld [vmem:[#allocation2 + $0xb0] sm:$0xff] }
 0x197   : > { %3154 = vmatpush1.bf16.msra.mxu1 %v13908_v52  ;;  %v926_v52 = vld [vmem:[#allocation2 + $0xae8] sm:$0xff]  ;;  %v13973_v53 = vcombine.high %v914_v42, %v918_v43  ;;  %v13972_v58 = vcombine.low %v914_v42, %v918_v43  ;;  %v592_v42 = vld [vmem:[#allocation2 + $0x78] sm:$0xff] }
 0x198   : > { %3155 = vmatprep.subr.bf16.mxu1 %v13917_v55  ;;  %v937_v55 = vld [vmem:[#allocation2 + $0xb40] sm:$0xff] }
 0x199   : > { %3033 = vmatpush1.bf16.msra.mxu0 %v13914_v48  ;;  %v933_v48 = vld [vmem:[#allocation2 + $0xb20] sm:$0xff] }
 0x19a   : > { %3034 = vmatprep.subr.bf16.mxu0 %v13923_v51  ;;  %v922_v51 = vld [vmem:[#allocation2 + $0xac8] sm:$0xff]  ;;  %v13987_v57 = vcombine.high %v929_v47, %v933_v48  ;;  %v13986_v62 = vcombine.low %v929_v47, %v933_v48  ;;  %v607_v47 = vld [vmem:[#allocation2 + $0xf0] sm:$0xff] }
 0x19b   : > { %3156 = vmatpush1.bf16.msra.mxu1 %v13916_v60  ;;  %v934_v60 = vld [vmem:[#allocation2 + $0xb28] sm:$0xff]  ;;  %v13981_v61 = vcombine.high %v922_v51, %v926_v52  ;;  %v13980_v2 = vcombine.low %v922_v51, %v926_v52 }
 0x19c   : > { %3157 = vmatprep.subr.bf16.mxu1 %v13925_v63  ;;  %v945_v63 = vld [vmem:[#allocation2 + $0xb80] sm:$0xff] }
 0x19d   : > { %3035 = vmatpush1.bf16.msra.mxu0 %v13922_v56  ;;  %v941_v56 = vld [vmem:[#allocation2 + $0xb60] sm:$0xff] }
 0x19e   : > { %3036 = vmatprep.subr.bf16.mxu0 %v13931_v59  ;;  %v930_v59 = vld [vmem:[#allocation2 + $0xb08] sm:$0xff]  ;;  %v13995_v1 = vcombine.high %v937_v55, %v941_v56  ;;  %v13994_v6 = vcombine.low %v937_v55, %v941_v56 }
 0x19f   : > { %3158 = vmatpush1.bf16.msra.mxu1 %v13924_v4  ;;  %v942_v4 = vld [vmem:[#allocation2 + $0xb68] sm:$0xff]  ;;  %v13989_v5 = vcombine.high %v930_v59, %v934_v60  ;;  %v13988_v12 = vcombine.low %v930_v59, %v934_v60 }
 0x1a0   : > { %3159 = vmatprep.subr.bf16.mxu1 %v13933_v7  ;;  %v953_v7 = vld [vmem:[#allocation2 + $0xbc0] sm:$0xff] }
 0x1a1   : > { %3037 = vmatpush1.bf16.msra.mxu0 %v13930_v0  ;;  %v949_v0 = vld [vmem:[#allocation2 + $0xba0] sm:$0xff] }
 0x1a2   : > { %3038 = vmatprep.subr.bf16.mxu0 %v13939_v3  ;;  %v938_v3 = vld [vmem:[#allocation2 + $0xb48] sm:$0xff]  ;;  %v14003_v11 = vcombine.high %v945_v63, %v949_v0  ;;  %v14002_v17 = vcombine.low %v945_v63, %v949_v0 }
 0x1a3   : > { %3160 = vmatpush1.bf16.msra.mxu1 %v13932_v14  ;;  %v950_v14 = vld [vmem:[#allocation2 + $0xba8] sm:$0xff]  ;;  %v13997_v16 = vcombine.high %v938_v3, %v942_v4  ;;  %v13996_v22 = vcombine.low %v938_v3, %v942_v4 }
 0x1a4   : > { %3161 = vmatprep.subr.bf16.mxu1 %v13941_v18  ;;  %v579_v18 = vld [vmem:[#allocation2 + $0x10] sm:$0xff] }
 0x1a5   : > { %3039 = vmatpush1.bf16.msra.mxu0 %v13938_v9  ;;  %v957_v9 = vld [vmem:[#allocation2 + $0xbe0] sm:$0xff] }
 0x1a6   : > { %3040 = vmatprep.subr.bf16.mxu0 %v13947_v13  ;;  %v946_v13 = vld [vmem:[#allocation2 + $0xb88] sm:$0xff]  ;;  %v14011_v41 = vcombine.high %v953_v7, %v957_v9  ;;  %v14010_v27 = vcombine.low %v953_v7, %v957_v9  ;;  %v620_v9 = vld [vmem:[#allocation2 + $0x158] sm:$0xff] }
 0x1a7   : > { %3162 = vmatpush1.bf16.msra.mxu1 %v13940_v24  ;;  %v958_v24 = vld [vmem:[#allocation2 + $0xbe8] sm:$0xff]  ;;  %v14005_v26 = vcombine.high %v946_v13, %v950_v14  ;;  %v14004_v8 = vcombine.low %v946_v13, %v950_v14  ;;  %v635_v14 = vld [vmem:[#allocation2 + $0x1d0] sm:$0xff] }
 0x1a8   : > { %3163 = vmatprep.subr.bf16.mxu1 %v13949_v28  ;;  %v587_v28 = vld [vmem:[#allocation2 + $0x50] sm:$0xff] }
 0x1a9   : > { %3041 = vmatpush1.bf16.msra.mxu0 %v13946_v19  ;;  %v583_v19 = vld [vmem:[#allocation2 + $0x30] sm:$0xff] }
 0x1aa   : > { %3042 = vmatprep.subr.bf16.mxu0 %v13955_v23  ;;  %v954_v23 = vld [vmem:[#allocation2 + $0xbc8] sm:$0xff]  ;;  %v13639_v30 = vcombine.high %v579_v18, %v583_v19 }
 0x1ab   : > { %3164 = vmatpush1.bf16.msra.mxu1 %v13948_v32  ;;  %v584_v32 = vld [vmem:[#allocation2 + $0x38] sm:$0xff]  ;;  %v14013_v33 = vcombine.high %v954_v23, %v958_v24 }
 0x1ac   : > { %3165 = vmatprep.subr.bf16.mxu1 %v13957_v35  ;;  %v13638_v35 = vcombine.low %v579_v18, %v583_v19  ;;  %v628_v19 = vld [vmem:[#allocation2 + $0x198] sm:$0xff] }
 0x1ad   : > { %3043 = vmatpush1.bf16.msra.mxu0 %v13954_v29  ;;  %v591_v29 = vld [vmem:[#allocation2 + $0x70] sm:$0xff] }
 0x1ae   : > { %3044 = vmatprep.subr.bf16.mxu0 %v13963_v31  ;;  %v580_v31 = vld [vmem:[#allocation2 + $0x18] sm:$0xff]  ;;  %v13647_v38 = vcombine.high %v587_v28, %v591_v29 }
 0x1af   : > { %3166 = vmatpush1.bf16.msra.mxu1 %v13956_v40  ;;  %v588_v40 = vld [vmem:[#allocation2 + $0x58] sm:$0xff]  ;;  %v13641_v43 = vcombine.high %v580_v31, %v584_v32  ;;  %v13640_v48 = vcombine.low %v580_v31, %v584_v32  ;;  %v651_v32 = vld [vmem:[#allocation2 + $0x250] sm:$0xff] }
 0x1b0   : > { %3167 = vmatprep.subr.bf16.mxu1 %v13965_v44  ;;  %v13646_v44 = vcombine.low %v587_v28, %v591_v29  ;;  %v13649_v51 = vcombine.high %v588_v40, %v592_v42  ;;  %v13648_v56 = vcombine.low %v588_v40, %v592_v42  ;;  %v636_v29 = vld [vmem:[#allocation2 + $0x1d8] sm:$0xff]  ;;  %v659_v42 = vld [vmem:[#allocation2 + $0x290] sm:$0xff] }
 0x1b1   : > { %3045 = vmatpush1.bf16.msra.mxu0 %v13962_v36  ;;  %v595_v36 = vld [vmem:[#allocation2 + $0x90] sm:$0xff] }
 0x1b2   : > { %3046 = vmatprep.subr.bf16.mxu0 %v13971_v39  ;;  %v14012_v39 = vcombine.low %v954_v23, %v958_v24  ;;  %v13655_v20 = vcombine.high %v595_v36, %v599_v37  ;;  %v13654_v52 = vcombine.low %v595_v36, %v599_v37  ;;  %v643_v24 = vld [vmem:[#allocation2 + $0x210] sm:$0xff]  ;;  %v644_v37 = vld [vmem:[#allocation2 + $0x218] sm:$0xff] }
 0x1b3   : > { %3168 = vmatpush1.bf16.msra.mxu1 %v13964_v50  ;;  %v600_v50 = vld [vmem:[#allocation2 + $0xb8] sm:$0xff] }
 0x1b4   : > { %3169 = vmatprep.subr.bf16.mxu1 %v13973_v53  ;;  %v611_v53 = vld [vmem:[#allocation2 + $0x110] sm:$0xff] }
 0x1b5   : > { %3047 = vmatpush1.bf16.msra.mxu0 %v13970_v46  ;;  %v603_v46 = vld [vmem:[#allocation2 + $0xd0] sm:$0xff] }
 0x1b6   : > { %3048 = vmatprep.subr.bf16.mxu0 %v13979_v49  ;;  %v596_v49 = vld [vmem:[#allocation2 + $0x98] sm:$0xff]  ;;  %v13663_v55 = vcombine.high %v603_v46, %v607_v47  ;;  %v13662_v60 = vcombine.low %v603_v46, %v607_v47 }
 0x1b7   : > { %3170 = vmatpush1.bf16.msra.mxu1 %v13972_v58  ;;  %v608_v58 = vld [vmem:[#allocation2 + $0xf8] sm:$0xff]  ;;  %v13657_v59 = vcombine.high %v596_v49, %v600_v50  ;;  %v13656_v0 = vcombine.low %v596_v49, %v600_v50  ;;  %v667_v50 = vld [vmem:[#allocation2 + $0x2d0] sm:$0xff] }
 0x1b8   : > { %3171 = vmatprep.subr.bf16.mxu1 %v13981_v61  ;;  %v619_v61 = vld [vmem:[#allocation2 + $0x150] sm:$0xff]  ;;  %v652_v47 = vld [vmem:[#allocation2 + $0x258] sm:$0xff] }
 0x1b9   : > { %3049 = vmatpush1.bf16.msra.mxu0 %v13978_v54  ;;  %v615_v54 = vld [vmem:[#allocation2 + $0x130] sm:$0xff] }
 0x1ba   : > { %3050 = vmatprep.subr.bf16.mxu0 %v13987_v57  ;;  %v604_v57 = vld [vmem:[#allocation2 + $0xd8] sm:$0xff]  ;;  %v13671_v63 = vcombine.high %v611_v53, %v615_v54  ;;  %v13670_v4 = vcombine.low %v611_v53, %v615_v54 }
 0x1bb   : > { %3172 = vmatpush1.bf16.msra.mxu1 %v13980_v2  ;;  %v616_v2 = vld [vmem:[#allocation2 + $0x138] sm:$0xff]  ;;  %v13665_v3 = vcombine.high %v604_v57, %v608_v58 }
 0x1bc   : > { %3173 = vmatprep.subr.bf16.mxu1 %v13989_v5  ;;  %v627_v5 = vld [vmem:[#allocation2 + $0x190] sm:$0xff]  ;;  %v660_v54 = vld [vmem:[#allocation2 + $0x298] sm:$0xff] }
 0x1bd   : > { %3051 = vmatpush1.bf16.msra.mxu0 %v13986_v62  ;;  %v623_v62 = vld [vmem:[#allocation2 + $0x170] sm:$0xff] }
 0x1be   : > { %3052 = vmatprep.subr.bf16.mxu0 %v13995_v1  ;;  %v612_v1 = vld [vmem:[#allocation2 + $0x118] sm:$0xff]  ;;  %v13679_v7 = vcombine.high %v619_v61, %v623_v62  ;;  %v13678_v13 = vcombine.low %v619_v61, %v623_v62 }
 0x1bf   : > { %3174 = vmatpush1.bf16.msra.mxu1 %v13988_v12  ;;  %v13673_v12 = vcombine.high %v612_v1, %v616_v2  ;;  %v13672_v18 = vcombine.low %v612_v1, %v616_v2  ;;  %v668_v62 = vld [vmem:[#allocation2 + $0x2d8] sm:$0xff] }
 0x1c0   : > { %3175 = vmatprep.subr.bf16.mxu1 %v13997_v16  ;;  %v639_v16 = vld [vmem:[#allocation2 + $0x1f0] sm:$0xff] }
 0x1c1   : > { %3053 = vmatpush1.bf16.msra.mxu0 %v13994_v6  ;;  %v631_v6 = vld [vmem:[#allocation2 + $0x1b0] sm:$0xff]  ;;  %v13694_v31 = vcombine.low %v635_v14, %v639_v16 }
 0x1c2   : > { %3054 = vmatprep.subr.bf16.mxu0 %v14003_v11  ;;  %v624_v11 = vld [vmem:[#allocation2 + $0x178] sm:$0xff]  ;;  %v13686_v23 = vcombine.low %v627_v5, %v631_v6 }
 0x1c3   : > { %3176 = vmatpush1.bf16.msra.mxu1 %v13996_v22  ;;  %v13681_v22 = vcombine.high %v620_v9, %v624_v11  ;;  %v13680_v28 = vcombine.low %v620_v9, %v624_v11 }
 0x1c4   : > { %3177 = vmatprep.subr.bf16.mxu1 %v14005_v26  ;;  %v647_v26 = vld [vmem:[#allocation2 + $0x230] sm:$0xff] }
 0x1c5   : > { %3055 = vmatpush1.bf16.msra.mxu0 %v14002_v17  ;;  %v13687_v17 = vcombine.high %v627_v5, %v631_v6  ;;  %v13702_v40 = vcombine.low %v643_v24, %v647_v26  ;;  %v687_v5 = vld [vmem:[#allocation2 + $0x370] sm:$0xff] }
 0x1c6   : > { %3056 = vmatprep.subr.bf16.mxu0 %v14011_v41  ;;  %v632_v41 = vld [vmem:[#allocation2 + $0x1b8] sm:$0xff] }
 0x1c7   : > { %3178 = vmatpush1.bf16.msra.mxu1 %v14004_v8  ;;  %v13689_v8 = vcombine.high %v628_v19, %v632_v41  ;;  %v13688_v36 = vcombine.low %v628_v19, %v632_v41 }
 0x1c8   : > { %3179 = vmatprep.subr.bf16.mxu1 %v14013_v33  ;;  %v655_v33 = vld [vmem:[#allocation2 + $0x270] sm:$0xff] }
 0x1c9   : > { %3057 = vmatpush1.bf16.msra.mxu0 %v14010_v27  ;;  %v13695_v27 = vcombine.high %v635_v14, %v639_v16  ;;  %v13710_v49 = vcombine.low %v651_v32, %v655_v33  ;;  %v695_v14 = vld [vmem:[#allocation2 + $0x3b0] sm:$0xff] }
 0x1ca   : > { %3190 = vmatprep.subr.bf16.mxu0 %v13639_v30  ;;  %v640_v30 = vld [vmem:[#allocation2 + $0x1f8] sm:$0xff] }
 0x1cb   : > { %3180 = vmatpush1.bf16.msra.mxu1 %v14012_v39  ;;  %v13697_v39 = vcombine.high %v636_v29, %v640_v30  ;;  %v13696_v46 = vcombine.low %v636_v29, %v640_v30 }
 0x1cc   : > { %3059 = vmatmul.mubr.bf16.vlgmr.msra.gmra.mrb[0].mxu0 %v17389_v34  ;;  %3313 = vmatprep.subr.bf16.mxu1 %v13641_v43  ;;  %v663_v43 = vld [vmem:[#allocation2 + $0x2b0] sm:$0xff] }
 0x1cd   : > { %3191 = vmatpush1.bf16.msra.mxu0 %v13638_v35  ;;  %3222 = vmatprep.mubr.bf16.mxu0 %v17353_v45  ;;  %v13703_v35 = vcombine.high %v643_v24, %v647_v26  ;;  %v703_v24 = vld [vmem:[#allocation2 + $0x3f0] sm:$0xff] }
 0x1ce   : > { %3192 = vmatprep.subr.bf16.mxu0 %v13647_v38  ;;  %3182 = vmatmul.mubr.bf16.vlgmr.msra.gmra.mrb[0].mxu1 %v17389_v34  ;;  %v648_v38 = vld [vmem:[#allocation2 + $0x238] sm:$0xff] }
 0x1cf   : > { %3314 = vmatpush1.bf16.msra.mxu1 %v13640_v48  ;;  %3345 = vmatprep.mubr.bf16.mxu1 %v17353_v45  ;;  %v13664_v45 = vcombine.low %v604_v57, %v608_v58  ;;  %v13705_v48 = vcombine.high %v644_v37, %v648_v38  ;;  %v13704_v53 = vcombine.low %v644_v37, %v648_v38  ;;  %v675_v58 = vld [vmem:[#allocation2 + $0x310] sm:$0xff] }
 0x1d0   : > { %3315 = vmatprep.subr.bf16.mxu1 %v13649_v51  ;;  %v671_v51 = vld [vmem:[#allocation2 + $0x2f0] sm:$0xff]  ;;  %v13718_v57 = vcombine.low %v659_v42, %v663_v43 }
 0x1d1   : > { %3193 = vmatpush1.bf16.msra.mxu0 %v13646_v44  ;;  %v13711_v44 = vcombine.high %v651_v32, %v655_v33  ;;  %v13726_v1 = vcombine.low %v667_v50, %v671_v51  ;;  %v711_v32 = vld [vmem:[#allocation2 + $0x430] sm:$0xff] }
 0x1d2   : > { %3194 = vmatprep.subr.bf16.mxu0 %v13655_v20  ;;  %v656_v20 = vld [vmem:[#allocation2 + $0x278] sm:$0xff] }
 0x1d3   : > { %3316 = vmatpush1.bf16.msra.mxu1 %v13648_v56  ;;  %v13713_v56 = vcombine.high %v652_v47, %v656_v20  ;;  %v13712_v61 = vcombine.low %v652_v47, %v656_v20 }
 0x1d4   : > { %3317 = vmatprep.subr.bf16.mxu1 %v13657_v59  ;;  %v13727_v59 = vcombine.high %v667_v50, %v671_v51  ;;  %v727_v50 = vld [vmem:[#allocation2 + $0x4b0] sm:$0xff] }
 0x1d5   : > { %3195 = vmatpush1.bf16.msra.mxu0 %v13654_v52  ;;  %v13719_v52 = vcombine.high %v659_v42, %v663_v43  ;;  %v719_v42 = vld [vmem:[#allocation2 + $0x470] sm:$0xff] }
 0x1d6   : > { %3196 = vmatprep.subr.bf16.mxu0 %v13663_v55  ;;  %v664_v55 = vld [vmem:[#allocation2 + $0x2b8] sm:$0xff] }
 0x1d7   : > { %3318 = vmatpush1.bf16.msra.mxu1 %v13656_v0  ;;  %v672_v0 = vld [vmem:[#allocation2 + $0x2f8] sm:$0xff] }
 0x1d8   : > { %3319 = vmatprep.subr.bf16.mxu1 %v13665_v3  ;;  %v13720_v3 = vcombine.low %v660_v54, %v664_v55  ;;  %v13729_v6 = vcombine.high %v668_v62, %v672_v0 }
 0x1d9   : > { %3197 = vmatpush1.bf16.msra.mxu0 %v13662_v60  ;;  %v679_v60 = vld [vmem:[#allocation2 + $0x330] sm:$0xff] }
 0x1da   : > { %3198 = vmatprep.subr.bf16.mxu0 %v13671_v63  ;;  %v13721_v63 = vcombine.high %v660_v54, %v664_v55  ;;  %v13735_v2 = vcombine.high %v675_v58, %v679_v60  ;;  %v13734_v9 = vcombine.low %v675_v58, %v679_v60  ;;  %v735_v58 = vld [vmem:[#allocation2 + $0x4f0] sm:$0xff]  ;;  %v724_v60 = vld [vmem:[#allocation2 + $0x498] sm:$0xff] }
 0x1db   : > { %3320 = vmatpush1.bf16.msra.mxu1 %v13664_v45  ;;  %v680_v45 = vld [vmem:[#allocation2 + $0x338] sm:$0xff] }
 0x1dc   : > { %3321 = vmatprep.subr.bf16.mxu1 %v13673_v12  ;;  %v13728_v12 = vcombine.low %v668_v62, %v672_v0 }
 0x1dd   : > { %3199 = vmatpush1.bf16.msra.mxu0 %v13670_v4  ;;  %v683_v4 = vld [vmem:[#allocation2 + $0x350] sm:$0xff] }
 0x1de   : > { %3200 = vmatprep.subr.bf16.mxu0 %v13679_v7  ;;  %v676_v7 = vld [vmem:[#allocation2 + $0x318] sm:$0xff]  ;;  %v13743_v11 = vcombine.high %v683_v4, %v687_v5  ;;  %v13742_v19 = vcombine.low %v683_v4, %v687_v5 }
 0x1df   : > { %3322 = vmatpush1.bf16.msra.mxu1 %v13672_v18  ;;  %v13737_v16 = vcombine.high %v676_v7, %v680_v45  ;;  %v688_v18 = vld [vmem:[#allocation2 + $0x378] sm:$0xff] }
 0x1e0   : > { %3323 = vmatprep.subr.bf16.mxu1 %v13681_v22  ;;  %v13736_v22 = vcombine.low %v676_v7, %v680_v45  ;;  %v732_v4 = vld [vmem:[#allocation2 + $0x4d8] sm:$0xff] }
 0x1e1   : > { %3201 = vmatpush1.bf16.msra.mxu0 %v13678_v13  ;;  %v691_v13 = vld [vmem:[#allocation2 + $0x390] sm:$0xff]  ;;  %v736_v5 = vld [vmem:[#allocation2 + $0x4f8] sm:$0xff] }
 0x1e2   : > { %3202 = vmatprep.subr.bf16.mxu0 %v13687_v17  ;;  %v684_v17 = vld [vmem:[#allocation2 + $0x358] sm:$0xff]  ;;  %v13751_v41 = vcombine.high %v691_v13, %v695_v14  ;;  %v13750_v29 = vcombine.low %v691_v13, %v695_v14 }
 0x1e3   : > { %3324 = vmatpush1.bf16.msra.mxu1 %v13680_v28  ;;  %v13745_v26 = vcombine.high %v684_v17, %v688_v18  ;;  %v696_v28 = vld [vmem:[#allocation2 + $0x3b8] sm:$0xff] }
 0x1e4   : > { %3325 = vmatprep.subr.bf16.mxu1 %v13689_v8  ;;  %v13744_v8 = vcombine.low %v684_v17, %v688_v18  ;;  %v744_v13 = vld [vmem:[#allocation2 + $0x538] sm:$0xff]  ;;  %v755_v17 = vld [vmem:[#allocation2 + $0x590] sm:$0xff] }
 0x1e5   : > { %3203 = vmatpush1.bf16.msra.mxu0 %v13686_v23  ;;  %v699_v23 = vld [vmem:[#allocation2 + $0x3d0] sm:$0xff] }
 0x1e6   : > { %3204 = vmatprep.subr.bf16.mxu0 %v13695_v27  ;;  %v692_v27 = vld [vmem:[#allocation2 + $0x398] sm:$0xff]  ;;  %v13759_v30 = vcombine.high %v699_v23, %v703_v24  ;;  %v13758_v37 = vcombine.low %v699_v23, %v703_v24  ;;  %v759_v18 = vld [vmem:[#allocation2 + $0x5b0] sm:$0xff] }
 0x1e7   : > { %3326 = vmatpush1.bf16.msra.mxu1 %v13688_v36  ;;  %v13753_v33 = vcombine.high %v692_v27, %v696_v28  ;;  %v704_v36 = vld [vmem:[#allocation2 + $0x3f8] sm:$0xff]  ;;  %v13815_v24 = vcombine.high %v755_v17, %v759_v18 }
 0x1e8   : > { %3327 = vmatprep.subr.bf16.mxu1 %v13697_v39  ;;  %v13752_v39 = vcombine.low %v692_v27, %v696_v28  ;;  %v763_v27 = vld [vmem:[#allocation2 + $0x5d0] sm:$0xff] }
 0x1e9   : > { %3205 = vmatpush1.bf16.msra.mxu0 %v13694_v31  ;;  %v707_v31 = vld [vmem:[#allocation2 + $0x410] sm:$0xff] }
 0x1ea   : > { %3206 = vmatprep.subr.bf16.mxu0 %v13703_v35  ;;  %v700_v35 = vld [vmem:[#allocation2 + $0x3d8] sm:$0xff]  ;;  %v13767_v38 = vcombine.high %v707_v31, %v711_v32  ;;  %v13766_v47 = vcombine.low %v707_v31, %v711_v32  ;;  %v767_v28 = vld [vmem:[#allocation2 + $0x5f0] sm:$0xff]  ;;  %v13814_v31 = vcombine.low %v755_v17, %v759_v18 }
 0x1eb   : > { %3328 = vmatpush1.bf16.msra.mxu1 %v13696_v46  ;;  %v13761_v43 = vcombine.high %v700_v35, %v704_v36  ;;  %v712_v46 = vld [vmem:[#allocation2 + $0x438] sm:$0xff]  ;;  %v13823_v32 = vcombine.high %v763_v27, %v767_v28 }
 0x1ec   : > { %3329 = vmatprep.subr.bf16.mxu1 %v13705_v48  ;;  %v13760_v48 = vcombine.low %v700_v35, %v704_v36  ;;  %v771_v35 = vld [vmem:[#allocation2 + $0x610] sm:$0xff] }
 0x1ed   : > { %3207 = vmatpush1.bf16.msra.mxu0 %v13702_v40  ;;  %v715_v40 = vld [vmem:[#allocation2 + $0x450] sm:$0xff] }
 0x1ee   : > { %3208 = vmatprep.subr.bf16.mxu0 %v13711_v44  ;;  %v708_v44 = vld [vmem:[#allocation2 + $0x418] sm:$0xff]  ;;  %v13775_v20 = vcombine.high %v715_v40, %v719_v42  ;;  %v13774_v54 = vcombine.low %v715_v40, %v719_v42  ;;  %v775_v36 = vld [vmem:[#allocation2 + $0x630] sm:$0xff]  ;;  %v13822_v40 = vcombine.low %v763_v27, %v767_v28 }
 0x1ef   : > { %3330 = vmatpush1.bf16.msra.mxu1 %v13704_v53  ;;  %v13769_v51 = vcombine.high %v708_v44, %v712_v46  ;;  %v720_v53 = vld [vmem:[#allocation2 + $0x478] sm:$0xff]  ;;  %v13831_v42 = vcombine.high %v771_v35, %v775_v36 }
 0x1f0   : > { %3331 = vmatprep.subr.bf16.mxu1 %v13713_v56  ;;  %v13768_v56 = vcombine.low %v708_v44, %v712_v46  ;;  %v779_v44 = vld [vmem:[#allocation2 + $0x650] sm:$0xff] }
 0x1f1   : > { %3209 = vmatpush1.bf16.msra.mxu0 %v13710_v49  ;;  %v723_v49 = vld [vmem:[#allocation2 + $0x490] sm:$0xff] }
 0x1f2   : > { %3210 = vmatprep.subr.bf16.mxu0 %v13719_v52  ;;  %v716_v52 = vld [vmem:[#allocation2 + $0x458] sm:$0xff]  ;;  %v13783_v55 = vcombine.high %v723_v49, %v727_v50  ;;  %v13782_v62 = vcombine.low %v723_v49, %v727_v50  ;;  %v783_v46 = vld [vmem:[#allocation2 + $0x670] sm:$0xff]  ;;  %v13830_v49 = vcombine.low %v771_v35, %v775_v36 }
 0x1f3   : > { %3332 = vmatpush1.bf16.msra.mxu1 %v13712_v61  ;;  %v728_v61 = vld [vmem:[#allocation2 + $0x4b8] sm:$0xff]  ;;  %v13776_v0 = vcombine.low %v716_v52, %v720_v53  ;;  %v13839_v50 = vcombine.high %v779_v44, %v783_v46 }
 0x1f4   : > { %3333 = vmatprep.subr.bf16.mxu1 %v13721_v63  ;;  %v13784_v45 = vcombine.low %v724_v60, %v728_v61 }
 0x1f5   : > { %3211 = vmatpush1.bf16.msra.mxu0 %v13718_v57  ;;  %v731_v57 = vld [vmem:[#allocation2 + $0x4d0] sm:$0xff] }
 0x1f6   : > { %3212 = vmatprep.subr.bf16.mxu0 %v13727_v59  ;;  %v13777_v59 = vcombine.high %v716_v52, %v720_v53  ;;  %v13791_v63 = vcombine.high %v731_v57, %v735_v58  ;;  %v787_v52 = vld [vmem:[#allocation2 + $0x690] sm:$0xff] }
 0x1f7   : > { %3334 = vmatpush1.bf16.msra.mxu1 %v13720_v3  ;;  %v13785_v3 = vcombine.high %v724_v60, %v728_v61  ;;  %v791_v53 = vld [vmem:[#allocation2 + $0x6b0] sm:$0xff] }
 0x1f8   : > { %3335 = vmatprep.subr.bf16.mxu1 %v13729_v6  ;;  %v13790_v6 = vcombine.low %v731_v57, %v735_v58  ;;  %v13838_v57 = vcombine.low %v779_v44, %v783_v46  ;;  %v13847_v58 = vcombine.high %v787_v52, %v791_v53  ;;  %v795_v60 = vld [vmem:[#allocation2 + $0x6d0] sm:$0xff] }
 0x1f9   : > { %3213 = vmatpush1.bf16.msra.mxu0 %v13726_v1  ;;  %v739_v1 = vld [vmem:[#allocation2 + $0x510] sm:$0xff] }
 0x1fa   : > { %3214 = vmatprep.subr.bf16.mxu0 %v13735_v2  ;;  %v743_v2 = vld [vmem:[#allocation2 + $0x530] sm:$0xff] }
 0x1fb   : > { %3336 = vmatpush1.bf16.msra.mxu1 %v13728_v12  ;;  %v13799_v7 = vcombine.high %v739_v1, %v743_v2  ;;  %v740_v12 = vld [vmem:[#allocation2 + $0x518] sm:$0xff]  ;;  %v13798_v14 = vcombine.low %v739_v1, %v743_v2  ;;  %v799_v61 = vld [vmem:[#allocation2 + $0x6f0] sm:$0xff]  ;;  %v13846_v1 = vcombine.low %v787_v52, %v791_v53 }
 0x1fc   : > { %3337 = vmatprep.subr.bf16.mxu1 %v13737_v16  ;;  %v13855_v2 = vcombine.high %v795_v60, %v799_v61 }
 0x1fd   : > { %3215 = vmatpush1.bf16.msra.mxu0 %v13734_v9  ;;  %v747_v9 = vld [vmem:[#allocation2 + $0x550] sm:$0xff] }
 0x1fe   : > { %3216 = vmatprep.subr.bf16.mxu0 %v13743_v11  ;;  %v13793_v11 = vcombine.high %v732_v4, %v736_v5 }
 0x1ff   : > { %3338 = vmatpush1.bf16.msra.mxu1 %v13736_v22  ;;  %v752_v22 = vld [vmem:[#allocation2 + $0x578] sm:$0xff] }
 0x200   : > { %3339 = vmatprep.subr.bf16.mxu1 %v13745_v26  ;;  %v13800_v26 = vcombine.low %v740_v12, %v744_v13 }
 0x201   : > { %3217 = vmatpush1.bf16.msra.mxu0 %v13742_v19  ;;  %v13801_v19 = vcombine.high %v740_v12, %v744_v13  ;;  %v811_v12 = vld [vmem:[#allocation2 + $0x750] sm:$0xff] }
 0x202   : > { %3218 = vmatprep.subr.bf16.mxu0 %v13751_v41  ;;  %v748_v41 = vld [vmem:[#allocation2 + $0x558] sm:$0xff]  ;;  %v815_v13 = vld [vmem:[#allocation2 + $0x770] sm:$0xff] }
 0x203   : > { %3340 = vmatpush1.bf16.msra.mxu1 %v13744_v8  ;;  %v760_v8 = vld [vmem:[#allocation2 + $0x5b8] sm:$0xff]  ;;  %v13871_v18 = vcombine.high %v811_v12, %v815_v13  ;;  %v13870_v27 = vcombine.low %v811_v12, %v815_v13 }
 0x204   : > { %3341 = vmatprep.subr.bf16.mxu1 %v13753_v33  ;;  %v13808_v33 = vcombine.low %v748_v41, %v752_v22 }
 0x205   : > { %3219 = vmatpush1.bf16.msra.mxu0 %v13750_v29  ;;  %v13809_v29 = vcombine.high %v748_v41, %v752_v22  ;;  %v819_v41 = vld [vmem:[#allocation2 + $0x790] sm:$0xff] }
 0x206   : > { %3220 = vmatprep.subr.bf16.mxu0 %v13759_v30  ;;  %v756_v30 = vld [vmem:[#allocation2 + $0x598] sm:$0xff]  ;;  %v823_v22 = vld [vmem:[#allocation2 + $0x7b0] sm:$0xff] }
 0x207   : > { %3342 = vmatpush1.bf16.msra.mxu1 %v13752_v39  ;;  %v768_v39 = vld [vmem:[#allocation2 + $0x5f8] sm:$0xff]  ;;  %v13879_v28 = vcombine.high %v819_v41, %v823_v22  ;;  %v13878_v35 = vcombine.low %v819_v41, %v823_v22 }
 0x208   : > { %3343 = vmatprep.subr.bf16.mxu1 %v13761_v43  ;;  %v13816_v43 = vcombine.low %v756_v30, %v760_v8 }
 0x209   : > { %3221 = vmatpush1.bf16.msra.mxu0 %v13758_v37  ;;  %v13817_v37 = vcombine.high %v756_v30, %v760_v8  ;;  %v827_v30 = vld [vmem:[#allocation2 + $0x7d0] sm:$0xff] }
 0x20a   : > { %3231 = vmatprep.subr.bf16.mxu0 %v13767_v38  ;;  %v764_v38 = vld [vmem:[#allocation2 + $0x5d8] sm:$0xff]  ;;  %v831_v8 = vld [vmem:[#allocation2 + $0x7f0] sm:$0xff] }
 0x20b   : > { %3344 = vmatpush1.bf16.msra.mxu1 %v13760_v48  ;;  %v776_v48 = vld [vmem:[#allocation2 + $0x638] sm:$0xff]  ;;  %v13887_v36 = vcombine.high %v827_v30, %v831_v8  ;;  %v13886_v44 = vcombine.low %v827_v30, %v831_v8  ;;  %v891_v8 = vld [vmem:[#allocation2 + $0x9d0] sm:$0xff] }
 0x20c   : > { %3223 = vmatmul.mubr.bf16.vlgmr.msra.gmra.mrb[4].mxu0 %v17362_v10  ;;  %3354 = vmatprep.subr.bf16.mxu1 %v13769_v51  ;;  %v13824_v51 = vcombine.low %v764_v38, %v768_v39 }
 0x20d   : > { %3232 = vmatpush1.bf16.msra.mxu0 %v13766_v47  ;;  %3263 = vmatprep.mubr.bf16.mxu0 %v17366_v15  ;;  %v13825_v47 = vcombine.high %v764_v38, %v768_v39  ;;  %v835_v38 = vld [vmem:[#allocation2 + $0x810] sm:$0xff] }
 0x20e   : > { %3233 = vmatprep.subr.bf16.mxu0 %v13775_v20  ;;  %3346 = vmatmul.mubr.bf16.vlgmr.msra.gmra.mrb[4].mxu1 %v17362_v10  ;;  %v751_v10 = vld [vmem:[#allocation2 + $0x570] sm:$0xff]  ;;  %v772_v20 = vld [vmem:[#allocation2 + $0x618] sm:$0xff] }
 0x20f   : > { %3355 = vmatpush1.bf16.msra.mxu1 %v13768_v56  ;;  %3386 = vmatprep.mubr.bf16.mxu1 %v17366_v15  ;;  %v13807_v16 = vcombine.high %v747_v9, %v751_v10  ;;  %v13792_v15 = vcombine.low %v732_v4, %v736_v5  ;;  %v13806_v23 = vcombine.low %v747_v9, %v751_v10  ;;  %v784_v56 = vld [vmem:[#allocation2 + $0x678] sm:$0xff]  ;;  %v803_v4 = vld [vmem:[#allocation2 + $0x710] sm:$0xff] }
 0x210   : > { %3356 = vmatprep.subr.bf16.mxu1 %v13777_v59  ;;  %v13832_v59 = vcombine.low %v772_v20, %v776_v48  ;;  %v807_v5 = vld [vmem:[#allocation2 + $0x730] sm:$0xff]  ;;  %v13854_v9 = vcombine.low %v795_v60, %v799_v61 }
 0x211   : > { %3234 = vmatpush1.bf16.msra.mxu0 %v13774_v54  ;;  %v13833_v54 = vcombine.high %v772_v20, %v776_v48  ;;  %v13863_v10 = vcombine.high %v803_v4, %v807_v5  ;;  %v13862_v17 = vcombine.low %v803_v4, %v807_v5  ;;  %v839_v39 = vld [vmem:[#allocation2 + $0x830] sm:$0xff] }
 0x212   : > { %3235 = vmatprep.subr.bf16.mxu0 %v13783_v55  ;;  %v780_v55 = vld [vmem:[#allocation2 + $0x658] sm:$0xff]  ;;  %v13895_v46 = vcombine.high %v835_v38, %v839_v39  ;;  %v843_v20 = vld [vmem:[#allocation2 + $0x850] sm:$0xff]  ;;  %v13894_v52 = vcombine.low %v835_v38, %v839_v39 }
 0x213   : > { %3357 = vmatpush1.bf16.msra.mxu1 %v13776_v0  ;;  %v792_v0 = vld [vmem:[#allocation2 + $0x6b8] sm:$0xff]  ;;  %v847_v48 = vld [vmem:[#allocation2 + $0x870] sm:$0xff] }
 0x214   : > { %3358 = vmatprep.subr.bf16.mxu1 %v13785_v3  ;;  %v13840_v3 = vcombine.low %v780_v55, %v784_v56  ;;  %v13903_v53 = vcombine.high %v843_v20, %v847_v48  ;;  %v13902_v60 = vcombine.low %v843_v20, %v847_v48  ;;  %v859_v61 = vld [vmem:[#allocation2 + $0x8d0] sm:$0xff] }
 0x215   : > { %3236 = vmatpush1.bf16.msra.mxu0 %v13782_v62  ;;  %v13841_v62 = vcombine.high %v780_v55, %v784_v56  ;;  %v855_v56 = vld [vmem:[#allocation2 + $0x8b0] sm:$0xff] }
 0x216   : > { %3237 = vmatprep.subr.bf16.mxu0 %v13791_v63  ;;  %v788_v63 = vld [vmem:[#allocation2 + $0x698] sm:$0xff]  ;;  %v867_v5 = vld [vmem:[#allocation2 + $0x910] sm:$0xff] }
 0x217   : > { %3359 = vmatpush1.bf16.msra.mxu1 %v13784_v45  ;;  %v800_v45 = vld [vmem:[#allocation2 + $0x6f8] sm:$0xff]  ;;  %v899_v39 = vld [vmem:[#allocation2 + $0xa10] sm:$0xff] }
 0x218   : > { %3360 = vmatprep.subr.bf16.mxu1 %v13793_v11  ;;  %v13848_v11 = vcombine.low %v788_v63, %v792_v0  ;;  %v907_v48 = vld [vmem:[#allocation2 + $0xa50] sm:$0xff] }
 0x219   : > { %3238 = vmatpush1.bf16.msra.mxu0 %v13790_v6  ;;  %v13849_v6 = vcombine.high %v788_v63, %v792_v0 }
 0x21a   : > { %3239 = vmatprep.subr.bf16.mxu0 %v13799_v7  ;;  %v796_v7 = vld [vmem:[#allocation2 + $0x6d8] sm:$0xff] }
 0x21b   : > { %3361 = vmatpush1.bf16.msra.mxu1 %v13792_v15  ;;  %v808_v15 = vld [vmem:[#allocation2 + $0x738] sm:$0xff] }
 0x21c   : > { %3362 = vmatprep.subr.bf16.mxu1 %v13801_v19  ;;  %v13856_v19 = vcombine.low %v796_v7, %v800_v45 }
 0x21d   : > { %3240 = vmatpush1.bf16.msra.mxu0 %v13798_v14  ;;  %v13857_v14 = vcombine.high %v796_v7, %v800_v45 }
 0x21e   : > { %3241 = vmatprep.subr.bf16.mxu0 %v13807_v16  ;;  %v804_v16 = vld [vmem:[#allocation2 + $0x718] sm:$0xff] }
 0x21f   : > { %3363 = vmatpush1.bf16.msra.mxu1 %v13800_v26  ;;  %v816_v26 = vld [vmem:[#allocation2 + $0x778] sm:$0xff] }
 0x220   : > { %3364 = vmatprep.subr.bf16.mxu1 %v13809_v29  ;;  %v13864_v29 = vcombine.low %v804_v16, %v808_v15 }
 0x221   : > { %3242 = vmatpush1.bf16.msra.mxu0 %v13806_v23  ;;  %v13865_v23 = vcombine.high %v804_v16, %v808_v15  ;;  %v875_v16 = vld [vmem:[#allocation2 + $0x950] sm:$0xff] }
 0x222   : > { %3243 = vmatprep.subr.bf16.mxu0 %v13815_v24  ;;  %v812_v24 = vld [vmem:[#allocation2 + $0x758] sm:$0xff]  ;;  %v879_v15 = vld [vmem:[#allocation2 + $0x970] sm:$0xff] }
 0x223   : > { %3365 = vmatpush1.bf16.msra.mxu1 %v13808_v33  ;;  %v824_v33 = vld [vmem:[#allocation2 + $0x7b8] sm:$0xff]  ;;  %v13935_v41 = vcombine.high %v875_v16, %v879_v15 }
 0x224   : > { %3366 = vmatprep.subr.bf16.mxu1 %v13817_v37  ;;  %v13872_v37 = vcombine.low %v812_v24, %v816_v26 }
 0x225   : > { %3244 = vmatpush1.bf16.msra.mxu0 %v13814_v31  ;;  %v13873_v31 = vcombine.high %v812_v24, %v816_v26  ;;  %v876_v26 = vld [vmem:[#allocation2 + $0x958] sm:$0xff] }
 0x226   : > { %3245 = vmatprep.subr.bf16.mxu0 %v13823_v32  ;;  %v820_v32 = vld [vmem:[#allocation2 + $0x798] sm:$0xff] }
 0x227   : > { %3367 = vmatpush1.bf16.msra.mxu1 %v13816_v43  ;;  %v832_v43 = vld [vmem:[#allocation2 + $0x7f8] sm:$0xff] }
 0x228   : > { %3368 = vmatprep.subr.bf16.mxu1 %v13825_v47  ;;  %v13880_v47 = vcombine.low %v820_v32, %v824_v33 }
 0x229   : > { %3246 = vmatpush1.bf16.msra.mxu0 %v13822_v40  ;;  %v13881_v40 = vcombine.high %v820_v32, %v824_v33  ;;  %v884_v33 = vld [vmem:[#allocation2 + $0x998] sm:$0xff] }
 0x22a   : > { %3247 = vmatprep.subr.bf16.mxu0 %v13831_v42  ;;  %v828_v42 = vld [vmem:[#allocation2 + $0x7d8] sm:$0xff] }
 0x22b   : > { %3369 = vmatpush1.bf16.msra.mxu1 %v13824_v51  ;;  %v840_v51 = vld [vmem:[#allocation2 + $0x838] sm:$0xff]  ;;  %v13888_v55 = vcombine.low %v828_v42, %v832_v43 }
 0x22c   : > { %3370 = vmatprep.subr.bf16.mxu1 %v13833_v54  ;;  %v851_v54 = vld [vmem:[#allocation2 + $0x890] sm:$0xff] }
 0x22d   : > { %3248 = vmatpush1.bf16.msra.mxu0 %v13830_v49  ;;  %v13889_v49 = vcombine.high %v828_v42, %v832_v43  ;;  %v13911_v63 = vcombine.high %v851_v54, %v855_v56  ;;  %v13910_v4 = vcombine.low %v851_v54, %v855_v56  ;;  %v892_v43 = vld [vmem:[#allocation2 + $0x9d8] sm:$0xff]  ;;  %v915_v56 = vld [vmem:[#allocation2 + $0xa90] sm:$0xff] }
 0x22e   : > { %3249 = vmatprep.subr.bf16.mxu0 %v13839_v50  ;;  %v836_v50 = vld [vmem:[#allocation2 + $0x818] sm:$0xff] }
 0x22f   : > { %3371 = vmatpush1.bf16.msra.mxu1 %v13832_v59  ;;  %v848_v59 = vld [vmem:[#allocation2 + $0x878] sm:$0xff]  ;;  %v13896_v0 = vcombine.low %v836_v50, %v840_v51 }
 0x230   : > { %3372 = vmatprep.subr.bf16.mxu1 %v13841_v62  ;;  %v863_v62 = vld [vmem:[#allocation2 + $0x8f0] sm:$0xff] }
 0x231   : > { %3250 = vmatpush1.bf16.msra.mxu0 %v13838_v57  ;;  %v13897_v57 = vcombine.high %v836_v50, %v840_v51  ;;  %v13919_v7 = vcombine.high %v859_v61, %v863_v62  ;;  %v13918_v12 = vcombine.low %v859_v61, %v863_v62  ;;  %v900_v51 = vld [vmem:[#allocation2 + $0xa18] sm:$0xff] }
 0x232   : > { %3251 = vmatprep.subr.bf16.mxu0 %v13847_v58  ;;  %v844_v58 = vld [vmem:[#allocation2 + $0x858] sm:$0xff] }
 0x233   : > { %3373 = vmatpush1.bf16.msra.mxu1 %v13840_v3  ;;  %v13905_v3 = vcombine.high %v844_v58, %v848_v59  ;;  %v13904_v45 = vcombine.low %v844_v58, %v848_v59  ;;  %v908_v59 = vld [vmem:[#allocation2 + $0xa58] sm:$0xff] }
 0x234   : > { %3374 = vmatprep.subr.bf16.mxu1 %v13849_v6  ;;  %v871_v6 = vld [vmem:[#allocation2 + $0x930] sm:$0xff] }
 0x235   : > { %3252 = vmatpush1.bf16.msra.mxu0 %v13846_v1  ;;  %v852_v1 = vld [vmem:[#allocation2 + $0x898] sm:$0xff]  ;;  %v13927_v13 = vcombine.high %v867_v5, %v871_v6 }
 0x236   : > { %3253 = vmatprep.subr.bf16.mxu0 %v13855_v2  ;;  %v856_v2 = vld [vmem:[#allocation2 + $0x8b8] sm:$0xff] }
 0x237   : > { %3375 = vmatpush1.bf16.msra.mxu1 %v13848_v11  ;;  %v13913_v11 = vcombine.high %v852_v1, %v856_v2 }
 0x238   : > { %3376 = vmatprep.subr.bf16.mxu1 %v13857_v14  ;;  %v13912_v14 = vcombine.low %v852_v1, %v856_v2  ;;  %v927_v1 = vld [vmem:[#allocation2 + $0xaf0] sm:$0xff] }
 0x239   : > { %3254 = vmatpush1.bf16.msra.mxu0 %v13854_v9  ;;  %v860_v9 = vld [vmem:[#allocation2 + $0x8d8] sm:$0xff] }
 0x23a   : > { %3255 = vmatprep.subr.bf16.mxu0 %v13863_v10  ;;  %v864_v10 = vld [vmem:[#allocation2 + $0x8f8] sm:$0xff] }
 0x23b   : > { %3377 = vmatpush1.bf16.msra.mxu1 %v13856_v19  ;;  %v13926_v19 = vcombine.low %v867_v5, %v871_v6  ;;  %v13920_v22 = vcombine.low %v860_v9, %v864_v10 }
 0x23c   : > { %3378 = vmatprep.subr.bf16.mxu1 %v13865_v23  ;;  %v883_v23 = vld [vmem:[#allocation2 + $0x990] sm:$0xff] }
 0x23d   : > { %3256 = vmatpush1.bf16.msra.mxu0 %v13862_v17  ;;  %v868_v17 = vld [vmem:[#allocation2 + $0x918] sm:$0xff] }
 0x23e   : > { %3257 = vmatprep.subr.bf16.mxu0 %v13871_v18  ;;  %v872_v18 = vld [vmem:[#allocation2 + $0x938] sm:$0xff] }
 0x23f   : > { %3379 = vmatpush1.bf16.msra.mxu1 %v13864_v29  ;;  %v13929_v24 = vcombine.high %v868_v17, %v872_v18  ;;  %v13928_v30 = vcombine.low %v868_v17, %v872_v18  ;;  %v932_v18 = vld [vmem:[#allocation2 + $0xb18] sm:$0xff] }
 0x240   : > { %3380 = vmatprep.subr.bf16.mxu1 %v13873_v31  ;;  %v895_v31 = vld [vmem:[#allocation2 + $0x9f0] sm:$0xff] }
 0x241   : > { %3258 = vmatpush1.bf16.msra.mxu0 %v13870_v27  ;;  %v880_v27 = vld [vmem:[#allocation2 + $0x978] sm:$0xff] }
 0x242   : > { %3259 = vmatprep.subr.bf16.mxu0 %v13879_v28  ;;  %v13934_v28 = vcombine.low %v875_v16, %v879_v15  ;;  %v13937_v32 = vcombine.high %v876_v26, %v880_v27  ;;  %v13936_v38 = vcombine.low %v876_v26, %v880_v27  ;;  %v939_v15 = vld [vmem:[#allocation2 + $0xb50] sm:$0xff]  ;;  %v940_v27 = vld [vmem:[#allocation2 + $0xb58] sm:$0xff] }
 0x243   : > { %3381 = vmatpush1.bf16.msra.mxu1 %v13872_v37  ;;  %v13951_v37 = vcombine.high %v891_v8, %v895_v31 }
 0x244   : > { %3382 = vmatprep.subr.bf16.mxu1 %v13881_v40  ;;  %v903_v40 = vld [vmem:[#allocation2 + $0xa30] sm:$0xff] }
 0x245   : > { %3260 = vmatpush1.bf16.msra.mxu0 %v13878_v35  ;;  %v888_v35 = vld [vmem:[#allocation2 + $0x9b8] sm:$0xff] }
 0x246   : > { %3261 = vmatprep.subr.bf16.mxu0 %v13887_v36  ;;  %v13945_v42 = vcombine.high %v884_v33, %v888_v35  ;;  %v13944_v20 = vcombine.low %v884_v33, %v888_v35  ;;  %v948_v35 = vld [vmem:[#allocation2 + $0xb98] sm:$0xff] }
 0x247   : > { %3383 = vmatpush1.bf16.msra.mxu1 %v13880_v47  ;;  %v13959_v47 = vcombine.high %v899_v39, %v903_v40 }
 0x248   : > { %3384 = vmatprep.subr.bf16.mxu1 %v13889_v49  ;;  %v911_v49 = vld [vmem:[#allocation2 + $0xa70] sm:$0xff] }
 0x249   : > { %3262 = vmatpush1.bf16.msra.mxu0 %v13886_v44  ;;  %v896_v44 = vld [vmem:[#allocation2 + $0x9f8] sm:$0xff]  ;;  %v13967_v54 = vcombine.high %v907_v48, %v911_v49  ;;  %v13966_v61 = vcombine.low %v907_v48, %v911_v49  ;;  %v3484_v49 = vld [vmem:[#allocation4 + $0x80] sm:$0xff] }
 0x24a   : > { %3272 = vmatprep.subr.bf16.mxu0 %v13895_v46  ;;  %v13950_v46 = vcombine.low %v891_v8, %v895_v31  ;;  %v13953_v50 = vcombine.high %v892_v43, %v896_v44  ;;  %v955_v31 = vld [vmem:[#allocation2 + $0xbd0] sm:$0xff] }
 0x24b   : > { %3385 = vmatpush1.bf16.msra.mxu1 %v13888_v55  ;;  %v13952_v55 = vcombine.low %v892_v43, %v896_v44  ;;  %v956_v44 = vld [vmem:[#allocation2 + $0xbd8] sm:$0xff] }
 0x24c   : > { %3264 = vmatmul.mubr.bf16.vlgmr.msra.gmra.mrb[4].mxu0 %v17377_v21  ;;  %3395 = vmatprep.subr.bf16.mxu1 %v13897_v57  ;;  %v919_v57 = vld [vmem:[#allocation2 + $0xab0] sm:$0xff] }
 0x24d   : > { %3273 = vmatpush1.bf16.msra.mxu0 %v13894_v52  ;;  %3304 = vmatprep.mubr.bf16.mxu0 %v17381_v25  ;;  %v904_v52 = vld [vmem:[#allocation2 + $0xa38] sm:$0xff]  ;;  %v13975_v62 = vcombine.high %v915_v56, %v919_v57  ;;  %v13974_v5 = vcombine.low %v915_v56, %v919_v57 }
 0x24e   : > { %3274 = vmatprep.subr.bf16.mxu0 %v13903_v53  ;;  %3387 = vmatmul.mubr.bf16.vlgmr.msra.gmra.mrb[4].mxu1 %v17377_v21  ;;  %v13921_v21 = vcombine.high %v860_v9, %v864_v10  ;;  %v13958_v53 = vcombine.low %v899_v39, %v903_v40  ;;  %v13961_v58 = vcombine.high %v900_v51, %v904_v52  ;;  %v935_v9 = vld [vmem:[#allocation2 + $0xb30] sm:$0xff]  ;;  %v3468_v40 = vld [vmem:[#allocation4] sm:$0xff] }
 0x24f   : > { %3396 = vmatpush1.bf16.msra.mxu1 %v13896_v0  ;;  %3427 = vmatprep.mubr.bf16.mxu1 %v17381_v25  ;;  %v887_v25 = vld [vmem:[#allocation2 + $0x9b0] sm:$0xff] }
 0x250   : > { %3397 = vmatprep.subr.bf16.mxu1 %v13905_v3  ;;  %v13943_v29 = vcombine.high %v883_v23, %v887_v25  ;;  %v13942_v36 = vcombine.low %v883_v23, %v887_v25  ;;  %v923_v0 = vld [vmem:[#allocation2 + $0xad0] sm:$0xff]  ;;  %v916_v3 = vld [vmem:[#allocation2 + $0xa98] sm:$0xff] }
 0x251   : > { %3275 = vmatpush1.bf16.msra.mxu0 %v13902_v60  ;;  %v912_v60 = vld [vmem:[#allocation2 + $0xa78] sm:$0xff]  ;;  %v13983_v6 = vcombine.high %v923_v0, %v927_v1  ;;  %v947_v25 = vld [vmem:[#allocation2 + $0xb90] sm:$0xff] }
 0x252   : > { %3276 = vmatprep.subr.bf16.mxu0 %v13911_v63  ;;  %v13960_v63 = vcombine.low %v900_v51, %v904_v52  ;;  %v13969_v2 = vcombine.high %v908_v59, %v912_v60  ;;  %v3469_v52 = vld [vmem:[#allocation4 + $0x8] sm:$0xff] }
 0x253   : > { %3398 = vmatpush1.bf16.msra.mxu1 %v13904_v45  ;;  %v931_v45 = vld [vmem:[#allocation2 + $0xb10] sm:$0xff] }
 0x254   : > { %3399 = vmatprep.subr.bf16.mxu1 %v13913_v11  ;;  %v924_v11 = vld [vmem:[#allocation2 + $0xad8] sm:$0xff] }
 0x255   : > { %3277 = vmatpush1.bf16.msra.mxu0 %v13910_v4  ;;  %v920_v4 = vld [vmem:[#allocation2 + $0xab8] sm:$0xff] }
 0x256   : > { %3278 = vmatprep.subr.bf16.mxu0 %v13919_v7  ;;  %v13968_v7 = vcombine.low %v908_v59, %v912_v60  ;;  %v13977_v10 = vcombine.high %v916_v3, %v920_v4  ;;  %v13976_v16 = vcombine.low %v916_v3, %v920_v4  ;;  %v3508_v59 = vld [vmem:[#allocation4 + $0x140] sm:$0xff] }
 0x257   : > { %3400 = vmatpush1.bf16.msra.mxu1 %v13912_v14  ;;  %v13991_v14 = vcombine.high %v931_v45, %v935_v9  ;;  %v3524_v3 = vld [vmem:[#allocation4 + $0x1c0] sm:$0xff] }
 0x258   : > { %3401 = vmatprep.subr.bf16.mxu1 %v13921_v21  ;;  %v943_v21 = vld [vmem:[#allocation2 + $0xb70] sm:$0xff] }
 0x259   : > { %3279 = vmatpush1.bf16.msra.mxu0 %v13918_v12  ;;  %v928_v12 = vld [vmem:[#allocation2 + $0xaf8] sm:$0xff] }
 0x25a   : > { %3280 = vmatprep.subr.bf16.mxu0 %v13927_v13  ;;  %v13982_v13 = vcombine.low %v923_v0, %v927_v1  ;;  %v13985_v17 = vcombine.high %v924_v11, %v928_v12  ;;  %v13984_v23 = vcombine.low %v924_v11, %v928_v12  ;;  %v3540_v11 = vld [vmem:[#allocation4 + $0x240] sm:$0xff] }
 0x25b   : > { %3402 = vmatpush1.bf16.msra.mxu1 %v13920_v22  ;;  %v13999_v22 = vcombine.high %v939_v15, %v943_v21 }
 0x25c   : > { %3403 = vmatprep.subr.bf16.mxu1 %v13929_v24  ;;  %v951_v24 = vld [vmem:[#allocation2 + $0xbb0] sm:$0xff] }
 0x25d   : > { %3281 = vmatpush1.bf16.msra.mxu0 %v13926_v19  ;;  %v936_v19 = vld [vmem:[#allocation2 + $0xb38] sm:$0xff] }
 0x25e   : > { %3282 = vmatprep.subr.bf16.mxu0 %v13935_v41  ;;  %v13990_v41 = vcombine.low %v931_v45, %v935_v9  ;;  %v13993_v26 = vcombine.high %v932_v18, %v936_v19  ;;  %v13992_v8 = vcombine.low %v932_v18, %v936_v19  ;;  %v3556_v18 = vld [vmem:[#allocation4 + $0x2c0] sm:$0xff]  ;;  %v3533_v19 = vld [vmem:[#allocation4 + $0x208] sm:$0xff] }
 0x25f   : > { %3404 = vmatpush1.bf16.msra.mxu1 %v13928_v30  ;;  %v14007_v30 = vcombine.high %v947_v25, %v951_v24 }
 0x260   : > { %3405 = vmatprep.subr.bf16.mxu1 %v13937_v32  ;;  %v959_v32 = vld [vmem:[#allocation2 + $0xbf0] sm:$0xff] }
 0x261   : > { %3283 = vmatpush1.bf16.msra.mxu0 %v13934_v28  ;;  %v944_v28 = vld [vmem:[#allocation2 + $0xb78] sm:$0xff] }
 0x262   : > { %3284 = vmatprep.subr.bf16.mxu0 %v13943_v29  ;;  %v13998_v29 = vcombine.low %v939_v15, %v943_v21  ;;  %v14001_v33 = vcombine.high %v940_v27, %v944_v28  ;;  %v14000_v39 = vcombine.low %v940_v27, %v944_v28  ;;  %v3549_v28 = vld [vmem:[#allocation4 + $0x288] sm:$0xff] }
 0x263   : > { %3406 = vmatpush1.bf16.msra.mxu1 %v13936_v38  ;;  %v14015_v38 = vcombine.high %v955_v31, %v959_v32 }
 0x264   : > { %3407 = vmatprep.subr.bf16.mxu1 %v13945_v42  ;;  %v3476_v42 = vld [vmem:[#allocation4 + $0x40] sm:$0xff] }
 0x265   : > { %3285 = vmatpush1.bf16.msra.mxu0 %v13942_v36  ;;  %v952_v36 = vld [vmem:[#allocation2 + $0xbb8] sm:$0xff] }
 0x266   : > { %3286 = vmatprep.subr.bf16.mxu0 %v13951_v37  ;;  %v14006_v37 = vcombine.low %v947_v25, %v951_v24  ;;  %v14009_v43 = vcombine.high %v948_v35, %v952_v36  ;;  %v14008_v48 = vcombine.low %v948_v35, %v952_v36  ;;  %v3564_v24 = vld [vmem:[#allocation4 + $0x300] sm:$0xff] }
 0x267   : > { %3408 = vmatpush1.bf16.msra.mxu1 %v13944_v20  ;;  %v14043_v20 = vcombine.high %v3468_v40, %v3476_v42  ;;  %v3588_v35 = vld [vmem:[#allocation4 + $0x3c0] sm:$0xff] }
 0x268   : > { %3409 = vmatprep.subr.bf16.mxu1 %v13953_v50  ;;  %v3492_v50 = vld [vmem:[#allocation4 + $0xc0] sm:$0xff] }
 0x269   : > { %3287 = vmatpush1.bf16.msra.mxu0 %v13950_v46  ;;  %v960_v46 = vld [vmem:[#allocation2 + $0xbf8] sm:$0xff]  ;;  %v14059_v56 = vcombine.high %v3484_v49, %v3492_v50 }
 0x26a   : > { %3288 = vmatprep.subr.bf16.mxu0 %v13959_v47  ;;  %v14014_v47 = vcombine.low %v955_v31, %v959_v32  ;;  %v14017_v51 = vcombine.high %v956_v44, %v960_v46  ;;  %v14016_v57 = vcombine.low %v956_v44, %v960_v46 }
 0x26b   : > { %3410 = vmatpush1.bf16.msra.mxu1 %v13952_v55  ;;  %v16038_v55 = vld [vmem:[%s17403_s16 + $0x4] ss:$24 sps:$4 sm:$0xff]  }
 0x26c   : > { %3411 = vmatprep.subr.bf16.mxu1 %v13961_v58  ;;  %v3500_v58 = vld [vmem:[#allocation4 + $0x100] sm:$0xff] }
 0x26d   : > { %3289 = vmatpush1.bf16.msra.mxu0 %v13958_v53  ;;  %v3477_v53 = vld [vmem:[#allocation4 + $0x48] sm:$0xff]  ;;  %v14075_v0 = vcombine.high %v3500_v58, %v3508_v59 }
 0x26e   : > { %3290 = vmatprep.subr.bf16.mxu0 %v13967_v54  ;;  %v14042_v54 = vcombine.low %v3468_v40, %v3476_v42  ;;  %v14045_v60 = vcombine.high %v3469_v52, %v3477_v53  ;;  %v14044_v1 = vcombine.low %v3469_v52, %v3477_v53 }
 0x26f   : > { %3412 = vmatpush1.bf16.msra.mxu1 %v13960_v63  ;;  %v14058_v63 = vcombine.low %v3484_v49, %v3492_v50  ;;  %v3581_v49 = vld [vmem:[#allocation4 + $0x388] sm:$0xff] }
 0x270   : > { %3413 = vmatprep.subr.bf16.mxu1 %v13969_v2  ;;  %v3516_v2 = vld [vmem:[#allocation4 + $0x180] sm:$0xff]  ;;  %v3589_v50 = vld [vmem:[#allocation4 + $0x3c8] sm:$0xff] }
 0x271   : > { %3291 = vmatpush1.bf16.msra.mxu0 %v13966_v61  ;;  %v3485_v61 = vld [vmem:[#allocation4 + $0x88] sm:$0xff]  ;;  %v14091_v45 = vcombine.high %v3516_v2, %v3524_v3 }
 0x272   : > { %3292 = vmatprep.subr.bf16.mxu0 %v13975_v62  ;;  %v3493_v62 = vld [vmem:[#allocation4 + $0xc8] sm:$0xff] }
 0x273   : > { %3414 = vmatpush1.bf16.msra.mxu1 %v13968_v7  ;;  %v14061_v4 = vcombine.high %v3485_v61, %v3493_v62  ;;  %v14074_v7 = vcombine.low %v3500_v58, %v3508_v59  ;;  %v14060_v9 = vcombine.low %v3485_v61, %v3493_v62  ;;  %v3605_v58 = vld [vmem:[#allocation4 + $0x448] sm:$0xff]  ;;  %v14156_v61 = vcombine.low %v3581_v49, %v3589_v50  ;;  %v3628_v62 = vld [vmem:[#allocation4 + $0x500] sm:$0xff] }
 0x274   : > { %3415 = vmatprep.subr.bf16.mxu1 %v13977_v10  ;;  %v3532_v10 = vld [vmem:[#allocation4 + $0x200] sm:$0xff] }
 0x275   : > { %3293 = vmatpush1.bf16.msra.mxu0 %v13974_v5  ;;  %v3501_v5 = vld [vmem:[#allocation4 + $0x108] sm:$0xff]  ;;  %v14107_v15 = vcombine.high %v3532_v10, %v3540_v11 }
 0x276   : > { %3294 = vmatprep.subr.bf16.mxu0 %v13983_v6  ;;  %v3509_v6 = vld [vmem:[#allocation4 + $0x148] sm:$0xff] }
 0x277   : > { %3416 = vmatpush1.bf16.msra.mxu1 %v13976_v16  ;;  %v14077_v12 = vcombine.high %v3501_v5, %v3509_v6  ;;  %v14090_v16 = vcombine.low %v3516_v2, %v3524_v3  ;;  %v14076_v21 = vcombine.low %v3501_v5, %v3509_v6  ;;  %v3621_v2 = vld [vmem:[#allocation4 + $0x4c8] sm:$0xff]  ;;  %v3644_v6 = vld [vmem:[#allocation4 + $0x580] sm:$0xff] }
 0x278   : > { %3417 = vmatprep.subr.bf16.mxu1 %v13985_v17  ;;  %v3548_v17 = vld [vmem:[#allocation4 + $0x280] sm:$0xff] }
 0x279   : > { %3295 = vmatpush1.bf16.msra.mxu0 %v13982_v13  ;;  %v3517_v13 = vld [vmem:[#allocation4 + $0x188] sm:$0xff] }
 0x27a   : > { %3296 = vmatprep.subr.bf16.mxu0 %v13991_v14  ;;  %v3525_v14 = vld [vmem:[#allocation4 + $0x1c8] sm:$0xff] }
 0x27b   : > { %3418 = vmatpush1.bf16.msra.mxu1 %v13984_v23  ;;  %v14123_v23 = vcombine.high %v3548_v17, %v3556_v18  ;;  %v14092_v25 = vcombine.low %v3517_v13, %v3525_v14 }
 0x27c   : > { %3419 = vmatprep.subr.bf16.mxu1 %v13993_v26  ;;  %v3572_v26 = vld [vmem:[#allocation4 + $0x340] sm:$0xff] }
 0x27d   : > { %3297 = vmatpush1.bf16.msra.mxu0 %v13990_v41  ;;  %v3541_v41 = vld [vmem:[#allocation4 + $0x248] sm:$0xff]  ;;  %v14138_v42 = vcombine.low %v3564_v24, %v3572_v26 }
 0x27e   : > { %3298 = vmatprep.subr.bf16.mxu0 %v13999_v22  ;;  %v14106_v22 = vcombine.low %v3532_v10, %v3540_v11  ;;  %v14109_v27 = vcombine.high %v3533_v19, %v3541_v41  ;;  %v14108_v31 = vcombine.low %v3533_v19, %v3541_v41  ;;  %v3637_v10 = vld [vmem:[#allocation4 + $0x548] sm:$0xff]  ;;  %v3676_v41 = vld [vmem:[#allocation4 + $0x680] sm:$0xff] }
 0x27f   : > { %3420 = vmatpush1.bf16.msra.mxu1 %v13992_v8  ;;  %v14139_v8 = vcombine.high %v3564_v24, %v3572_v26  ;;  %v3669_v24 = vld [vmem:[#allocation4 + $0x648] sm:$0xff] }
 0x280   : > { %3421 = vmatprep.subr.bf16.mxu1 %v14001_v33  ;;  %v3580_v33 = vld [vmem:[#allocation4 + $0x380] sm:$0xff] }
 0x281   : > { %3299 = vmatpush1.bf16.msra.mxu0 %v13998_v29  ;;  %v3557_v29 = vld [vmem:[#allocation4 + $0x2c8] sm:$0xff]  ;;  %v14155_v44 = vcombine.high %v3580_v33, %v3588_v35 }
 0x282   : > { %3300 = vmatprep.subr.bf16.mxu0 %v14007_v30  ;;  %v14122_v30 = vcombine.low %v3548_v17, %v3556_v18  ;;  %v14125_v36 = vcombine.high %v3549_v28, %v3557_v29  ;;  %v14124_v46 = vcombine.low %v3549_v28, %v3557_v29  ;;  %v3653_v17 = vld [vmem:[#allocation4 + $0x5c8] sm:$0xff]  ;;  %v3692_v29 = vld [vmem:[#allocation4 + $0x700] sm:$0xff] }
 0x283   : > { %3422 = vmatpush1.bf16.msra.mxu1 %v14000_v39  ;;  %v3573_v39 = vld [vmem:[#allocation4 + $0x348] sm:$0xff] }
 0x284   : > { %3423 = vmatprep.subr.bf16.mxu1 %v14009_v43 }
 0x285   : > { %3301 = vmatpush1.bf16.msra.mxu0 %v14006_v37 }
 0x286   : > { %3302 = vmatprep.subr.bf16.mxu0 %v14015_v38  ;;  %v3565_v38 = vld [vmem:[#allocation4 + $0x308] sm:$0xff] }
 0x287   : > { %3424 = vmatpush1.bf16.msra.mxu1 %v14008_v48  ;;  %v14141_v48 = vcombine.high %v3565_v38, %v3573_v39  ;;  %v14140_v53 = vcombine.low %v3565_v38, %v3573_v39  ;;  %v3708_v39 = vld [vmem:[#allocation4 + $0x780] sm:$0xff] }
 0x288   : > { %3425 = vmatprep.subr.bf16.mxu1 %v14017_v51  ;;  %v14154_v51 = vcombine.low %v3580_v33, %v3588_v35  ;;  %v3685_v33 = vld [vmem:[#allocation4 + $0x6c8] sm:$0xff] }
 0x289   : > { %3303 = vmatpush1.bf16.msra.mxu0 %v14014_v47  ;;  %v3596_v47 = vld [vmem:[#allocation4 + $0x400] sm:$0xff] }
 0x28a   : > { %8280 = vmatprep.subr.bf16.mxu0 %v14043_v20  ;;  %v3604_v20 = vld [vmem:[#allocation4 + $0x440] sm:$0xff] }
 0x28b   : > { %3426 = vmatpush1.bf16.msra.mxu1 %v14016_v57  ;;  %v14171_v52 = vcombine.high %v3596_v47, %v3604_v20  ;;  %v3597_v57 = vld [vmem:[#allocation4 + $0x408] sm:$0xff]  ;;  %v14170_v59 = vcombine.low %v3596_v47, %v3604_v20 }
 0x28c   : > { %3305 = vmatmul.mubr.bf16.vlgmr.msra.gmra.mrb[4].mxu0 %v17389_v34  ;;  %8499 = vmatprep.subr.bf16.mxu1 %v14045_v60  ;;  %v14172_v5 = vcombine.low %v3597_v57, %v3605_v58 }
 0x28d   : > { %8281 = vmatpush1.bf16.msra.mxu0 %v14042_v54  ;;  %8312 = vmatprep.mubr.bf16.mxu0 %v16038_v55  ;;  %v3612_v54 = vld [vmem:[#allocation4 + $0x480] sm:$0xff] }
 0x28e   : > { %8282 = vmatprep.subr.bf16.mxu0 %v14059_v56  ;;  %3428 = vmatmul.mubr.bf16.vlgmr.msra.gmra.mrb[4].mxu1 %v17389_v34  ;;  %v14093_v34 = vcombine.high %v3517_v13, %v3525_v14  ;;  %v14157_v56 = vcombine.high %v3581_v49, %v3589_v50  ;;  %v3660_v14 = vld [vmem:[#allocation4 + $0x600] sm:$0xff] }
 0x28f   : > { %8500 = vmatpush1.bf16.msra.mxu1 %v14044_v1  ;;  %8531 = vmatprep.mubr.bf16.mxu1 %v16038_v55  ;;  %v3620_v55 = vld [vmem:[#allocation4 + $0x4c0] sm:$0xff]  ;;  %v3613_v1 = vld [vmem:[#allocation4 + $0x488] sm:$0xff] }
 0x290   : > { %8501 = vmatprep.subr.bf16.mxu1 %v14061_v4  ;;  %v14187_v60 = vcombine.high %v3612_v54, %v3620_v55  ;;  %v14186_v3 = vcombine.low %v3612_v54, %v3620_v55  ;;  %v14188_v13 = vcombine.low %v3613_v1, %v3621_v2  ;;  %v3732_v49 = vld [vmem:[#allocation4 + $0x840] sm:$0xff] }
 0x291   : > { %8283 = vmatpush1.bf16.msra.mxu0 %v14058_v63  ;;  %v3636_v63 = vld [vmem:[#allocation4 + $0x540] sm:$0xff] }
 0x292   : > { %8284 = vmatprep.subr.bf16.mxu0 %v14075_v0  ;;  %v14173_v0 = vcombine.high %v3597_v57, %v3605_v58  ;;  %v14203_v4 = vcombine.high %v3628_v62, %v3636_v63  ;;  %v14202_v11 = vcombine.low %v3628_v62, %v3636_v63  ;;  %v3748_v57 = vld [vmem:[#allocation4 + $0x8c0] sm:$0xff]  ;;  %v16041_v63 = vld [vmem:[%s17403_s16 + $0x34] ss:$24 sps:$4 sm:$0xff]  }
 0x293   : > { %8502 = vmatpush1.bf16.msra.mxu1 %v14060_v9  ;;  %v3629_v9 = vld [vmem:[#allocation4 + $0x508] sm:$0xff] }
 0x294   : > { %8503 = vmatprep.subr.bf16.mxu1 %v14077_v12  ;;  %v14204_v19 = vcombine.low %v3629_v9, %v3637_v10 }
 0x295   : > { %8285 = vmatpush1.bf16.msra.mxu0 %v14074_v7  ;;  %v3652_v7 = vld [vmem:[#allocation4 + $0x5c0] sm:$0xff] }
 0x296   : > { %8286 = vmatprep.subr.bf16.mxu0 %v14091_v45  ;;  %v14189_v45 = vcombine.high %v3613_v1, %v3621_v2  ;;  %v14219_v12 = vcombine.high %v3644_v6, %v3652_v7  ;;  %v14218_v18 = vcombine.low %v3644_v6, %v3652_v7  ;;  %v3756_v2 = vld [vmem:[#allocation4 + $0x900] sm:$0xff]  ;;  %v3749_v6 = vld [vmem:[#allocation4 + $0x8c8] sm:$0xff] }
 0x297   : > { %8504 = vmatpush1.bf16.msra.mxu1 %v14076_v21  ;;  %v3645_v21 = vld [vmem:[#allocation4 + $0x588] sm:$0xff] }
 0x298   : > { %8505 = vmatprep.subr.bf16.mxu1 %v14093_v34  ;;  %v14220_v28 = vcombine.low %v3645_v21, %v3653_v17 }
 0x299   : > { %8287 = vmatpush1.bf16.msra.mxu0 %v14090_v16  ;;  %v3668_v16 = vld [vmem:[#allocation4 + $0x640] sm:$0xff] }
 0x29a   : > { %8288 = vmatprep.subr.bf16.mxu0 %v14107_v15  ;;  %v14205_v15 = vcombine.high %v3629_v9, %v3637_v10  ;;  %v14235_v34 = vcombine.high %v3660_v14, %v3668_v16  ;;  %v14234_v26 = vcombine.low %v3660_v14, %v3668_v16  ;;  %v3772_v10 = vld [vmem:[#allocation4 + $0x980] sm:$0xff]  ;;  %v3765_v14 = vld [vmem:[#allocation4 + $0x948] sm:$0xff] }
 0x29b   : > { %8506 = vmatpush1.bf16.msra.mxu1 %v14092_v25  ;;  %v3661_v25 = vld [vmem:[#allocation4 + $0x608] sm:$0xff] }
 0x29c   : > { %8507 = vmatprep.subr.bf16.mxu1 %v14109_v27  ;;  %v14236_v38 = vcombine.low %v3661_v25, %v3669_v24  ;;  %v16043_v16 = vld [vmem:[%s17403_s16 + $0x30] ss:$24 sps:$4 sm:$0xff]  }
 0x29d   : > { %8289 = vmatpush1.bf16.msra.mxu0 %v14106_v22  ;;  %v3684_v22 = vld [vmem:[#allocation4 + $0x6c0] sm:$0xff] }
 0x29e   : > { %8290 = vmatprep.subr.bf16.mxu0 %v14123_v23  ;;  %v14221_v23 = vcombine.high %v3645_v21, %v3653_v17  ;;  %v14251_v27 = vcombine.high %v3676_v41, %v3684_v22  ;;  %v14250_v35 = vcombine.low %v3676_v41, %v3684_v22  ;;  %v16044_v21 = vld [vmem:[%s17403_s16 + $0x64] ss:$24 sps:$4 sm:$0xff]   ;;  %v3773_v22 = vld [vmem:[#allocation4 + $0x988] sm:$0xff] }
 0x29f   : > { %v17412_v32 = vpop.f32.mrb[0].mxu0  ;;  %8508 = vmatpush1.bf16.msra.mxu1 %v14108_v31  ;;  %v3677_v31 = vld [vmem:[#allocation4 + $0x688] sm:$0xff] }
 0x2a0   : > { %v17414_v37 = vpop.f32.mrb[1].mxu0  ;;  %8509 = vmatprep.subr.bf16.mxu1 %v14125_v36  ;;  %v14252_v20 = vcombine.low %v3677_v31, %v3685_v33 }
 0x2a1   : > { %v3064_v40 = vpop.f32.mrb[2].mxu0  ;;  %8291 = vmatpush1.bf16.msra.mxu0 %v14122_v30  ;;  %v3700_v30 = vld [vmem:[#allocation4 + $0x740] sm:$0xff] }
 0x2a2   : > { %v3065_v43 = vpop.f32.mrb[3].mxu0  ;;  %8292 = vmatprep.subr.bf16.mxu0 %v14139_v8  ;;  %v14237_v8 = vcombine.high %v3661_v25, %v3669_v24  ;;  %v14267_v36 = vcombine.high %v3692_v29, %v3700_v30  ;;  %v3716_v40 = vld [vmem:[#allocation4 + $0x7c0] sm:$0xff] }
 0x2a3   : > { %8510 = vmatpush1.bf16.msra.mxu1 %v14124_v46  ;;  %v3693_v43 = vld [vmem:[#allocation4 + $0x708] sm:$0xff]  ;;  %v14266_v46 = vcombine.low %v3692_v29, %v3700_v30  ;;  %v14283_v47 = vcombine.high %v3708_v39, %v3716_v40 }
 0x2a4   : > { %8511 = vmatprep.subr.bf16.mxu1 %v14141_v48  ;;  %v3724_v48 = vld [vmem:[#allocation4 + $0x800] sm:$0xff]  ;;  %v3789_v30 = vld [vmem:[#allocation4 + $0xa08] sm:$0xff] }
 0x2a5   : > { %8293 = vmatpush1.bf16.msra.mxu0 %v14138_v42  ;;  %v14253_v42 = vcombine.high %v3677_v31, %v3685_v33  ;;  %v14299_v54 = vcombine.high %v3724_v48, %v3732_v49  ;;  %v14298_v62 = vcombine.low %v3724_v48, %v3732_v49  ;;  %v16046_v31 = vld [vmem:[%s17403_s16 + $0x60] ss:$24 sps:$4 sm:$0xff]  }
 0x2a6   : > { %8294 = vmatprep.subr.bf16.mxu0 %v14155_v44  ;;  %v3701_v44 = vld [vmem:[#allocation4 + $0x748] sm:$0xff]  ;;  %v3836_v48 = vld [vmem:[#allocation4 + $0xb80] sm:$0xff] }
 0x2a7   : > { %8512 = vmatpush1.bf16.msra.mxu1 %v14140_v53  ;;  %v14269_v50 = vcombine.high %v3693_v43, %v3701_v44  ;;  %v14282_v53 = vcombine.low %v3708_v39, %v3716_v40  ;;  %v14268_v55 = vcombine.low %v3693_v43, %v3701_v44  ;;  %v3820_v39 = vld [vmem:[#allocation4 + $0xb00] sm:$0xff]  ;;  %v3805_v43 = vld [vmem:[#allocation4 + $0xa88] sm:$0xff] }
 0x2a8   : > { %8513 = vmatprep.subr.bf16.mxu1 %v14157_v56  ;;  %v3740_v56 = vld [vmem:[#allocation4 + $0x880] sm:$0xff]  ;;  %v3813_v44 = vld [vmem:[#allocation4 + $0xac8] sm:$0xff] }
 0x2a9   : > { %8295 = vmatpush1.bf16.msra.mxu0 %v14154_v51  ;;  %v3709_v51 = vld [vmem:[#allocation4 + $0x788] sm:$0xff]  ;;  %v14314_v7 = vcombine.low %v3740_v56, %v3748_v57  ;;  %v3828_v40 = vld [vmem:[#allocation4 + $0xb40] sm:$0xff] }
 0x2aa   : > { %8296 = vmatprep.subr.bf16.mxu0 %v14171_v52  ;;  %v3717_v52 = vld [vmem:[#allocation4 + $0x7c8] sm:$0xff]  ;;  %v3844_v49 = vld [vmem:[#allocation4 + $0xbc0] sm:$0xff] }
 0x2ab   : > { %8514 = vmatpush1.bf16.msra.mxu1 %v14156_v61  ;;  %v14285_v58 = vcombine.high %v3709_v51, %v3717_v52  ;;  %v3733_v61 = vld [vmem:[#allocation4 + $0x848] sm:$0xff]  ;;  %v14284_v1 = vcombine.low %v3709_v51, %v3717_v52 }
 0x2ac   : > { %8515 = vmatprep.subr.bf16.mxu1 %v14173_v0  ;;  %v14315_v0 = vcombine.high %v3740_v56, %v3748_v57  ;;  %v3821_v51 = vld [vmem:[#allocation4 + $0xb08] sm:$0xff]  ;;  %v14411_v56 = vcombine.high %v3836_v48, %v3844_v49  ;;  %v14380_v57 = vcombine.low %v3805_v43, %v3813_v44 }
 0x2ad   : > { %8297 = vmatpush1.bf16.msra.mxu0 %v14170_v59  ;;  %v16040_v59 = vld [vmem:[%s17403_s16] ss:$24 sps:$4 sm:$0xff]   ;;  %v3829_v52 = vld [vmem:[#allocation4 + $0xb48] sm:$0xff] }
 0x2ae   : > { %8298 = vmatprep.subr.bf16.mxu0 %v14187_v60  ;;  %v3725_v60 = vld [vmem:[#allocation4 + $0x808] sm:$0xff] }
 0x2af   : > { %8516 = vmatpush1.bf16.msra.mxu1 %v14172_v5  ;;  %v3741_v5 = vld [vmem:[#allocation4 + $0x888] sm:$0xff]  ;;  %v14300_v9 = vcombine.low %v3725_v60, %v3733_v61 }
 0x2b0   : > { %8517 = vmatprep.subr.bf16.mxu1 %v14189_v45 }
 0x2b1   : > { %8299 = vmatpush1.bf16.msra.mxu0 %v14186_v3  ;;  %v3764_v3 = vld [vmem:[#allocation4 + $0x940] sm:$0xff] }
 0x2b2   : > { %8300 = vmatprep.subr.bf16.mxu0 %v14203_v4  ;;  %v14301_v4 = vcombine.high %v3725_v60, %v3733_v61  ;;  %v14331_v45 = vcombine.high %v3756_v2, %v3764_v3  ;;  %v14397_v60 = vcombine.high %v3821_v51, %v3829_v52  ;;  %v3837_v61 = vld [vmem:[#allocation4 + $0xb88] sm:$0xff] }
 0x2b3   : > { %8518 = vmatpush1.bf16.msra.mxu1 %v14188_v13  ;;  %v3757_v13 = vld [vmem:[#allocation4 + $0x908] sm:$0xff] }
 0x2b4   : > { %8519 = vmatprep.subr.bf16.mxu1 %v14205_v15  ;;  %v14330_v15 = vcombine.low %v3756_v2, %v3764_v3  ;;  %v14333_v41 = vcombine.high %v3757_v13, %v3765_v14  ;;  %v3868_v2 = vld [vmem:[#allocation4 + $0xc80] sm:$0xff] }
 0x2b5   : > { %8301 = vmatpush1.bf16.msra.mxu0 %v14202_v11  ;;  %v3780_v11 = vld [vmem:[#allocation4 + $0x9c0] sm:$0xff] }
 0x2b6   : > { %8302 = vmatprep.subr.bf16.mxu0 %v14219_v12  ;;  %v14317_v12 = vcombine.high %v3741_v5, %v3749_v6  ;;  %v14347_v17 = vcombine.high %v3772_v10, %v3780_v11  ;;  %v14346_v25 = vcombine.low %v3772_v10, %v3780_v11  ;;  %v3876_v3 = vld [vmem:[#allocation4 + $0xcc0] sm:$0xff] }
 0x2b7   : > { %8520 = vmatpush1.bf16.msra.mxu1 %v14204_v19  ;;  %v3796_v19 = vld [vmem:[#allocation4 + $0xa40] sm:$0xff] }
 0x2b8   : > { %8521 = vmatprep.subr.bf16.mxu1 %v14221_v23  ;;  %v3781_v23 = vld [vmem:[#allocation4 + $0x9c8] sm:$0xff]  ;;  %v3884_v10 = vld [vmem:[#allocation4 + $0xd00] sm:$0xff] }
 0x2b9   : > { %8303 = vmatpush1.bf16.msra.mxu0 %v14218_v18  ;;  %v14316_v18 = vcombine.low %v3741_v5, %v3749_v6  ;;  %v14349_v29 = vcombine.high %v3773_v22, %v3781_v23  ;;  %v3853_v5 = vld [vmem:[#allocation4 + $0xc08] sm:$0xff]  ;;  %v3892_v11 = vld [vmem:[#allocation4 + $0xd40] sm:$0xff] }
 0x2ba   : > { %8304 = vmatprep.subr.bf16.mxu0 %v14235_v34  ;;  %v3788_v34 = vld [vmem:[#allocation4 + $0xa00] sm:$0xff]  ;;  %v3861_v6 = vld [vmem:[#allocation4 + $0xc48] sm:$0xff] }
 0x2bb   : > { %8522 = vmatpush1.bf16.msra.mxu1 %v14220_v28  ;;  %v14363_v24 = vcombine.high %v3788_v34, %v3796_v19  ;;  %v3812_v28 = vld [vmem:[#allocation4 + $0xac0] sm:$0xff]  ;;  %v14362_v33 = vcombine.low %v3788_v34, %v3796_v19  ;;  %v3885_v19 = vld [vmem:[#allocation4 + $0xd08] sm:$0xff] }
 0x2bc   : > { %8523 = vmatprep.subr.bf16.mxu1 %v14237_v8  ;;  %v3797_v8 = vld [vmem:[#allocation4 + $0xa48] sm:$0xff] }
 0x2bd   : > { %8305 = vmatpush1.bf16.msra.mxu0 %v14234_v26  ;;  %v14332_v26 = vcombine.low %v3757_v13, %v3765_v14  ;;  %v3869_v13 = vld [vmem:[#allocation4 + $0xc88] sm:$0xff] }
 0x2be   : > { %8306 = vmatprep.subr.bf16.mxu0 %v14251_v27  ;;  %v3804_v27 = vld [vmem:[#allocation4 + $0xa80] sm:$0xff]  ;;  %v3877_v14 = vld [vmem:[#allocation4 + $0xcc8] sm:$0xff] }
 0x2bf   : > { %8524 = vmatpush1.bf16.msra.mxu1 %v14236_v38  ;;  %v14348_v38 = vcombine.low %v3773_v22, %v3781_v23  ;;  %v14445_v34 = vcombine.high %v3869_v13, %v3877_v14  ;;  %v14458_v22 = vcombine.low %v3884_v10, %v3892_v11 }
 0x2c0   : > { %8525 = vmatprep.subr.bf16.mxu1 %v14253_v42  ;;  %v14365_v42 = vcombine.high %v3789_v30, %v3797_v8 }
 0x2c1   : > { %8307 = vmatpush1.bf16.msra.mxu0 %v14250_v35  ;;  %v16047_v35 = vld [vmem:[%s17403_s16 + $0x94] ss:$24 sps:$4 sm:$0xff]  }
 0x2c2   : > { %8308 = vmatprep.subr.bf16.mxu0 %v14267_v36  ;;  %v14379_v36 = vcombine.high %v3804_v27, %v3812_v28 }
 0x2c3   : > { %8526 = vmatpush1.bf16.msra.mxu1 %v14252_v20  ;;  %v14364_v20 = vcombine.low %v3789_v30, %v3797_v8 }
 0x2c4   : > { %8527 = vmatprep.subr.bf16.mxu1 %v14269_v50  ;;  %v14381_v50 = vcombine.high %v3805_v43, %v3813_v44  ;;  %v3948_v44 = vld [vmem:[#allocation4 + $0xf00] sm:$0xff] }
 0x2c5   : > { %8309 = vmatpush1.bf16.msra.mxu0 %v14266_v46  ;;  %v14378_v46 = vcombine.low %v3804_v27, %v3812_v28  ;;  %v3901_v28 = vld [vmem:[#allocation4 + $0xd88] sm:$0xff] }
 0x2c6   : > { %8310 = vmatprep.subr.bf16.mxu0 %v14283_v47  ;;  %v14395_v47 = vcombine.high %v3820_v39, %v3828_v40 }
 0x2c7   : > { %8528 = vmatpush1.bf16.msra.mxu1 %v14268_v55  ;;  %v16050_v55 = vld [vmem:[%s17403_s16 + $0xc] ss:$24 sps:$4 sm:$0xff]  }
 0x2c8   : > { %8529 = vmatprep.subr.bf16.mxu1 %v14285_v58  ;;  %v3852_v58 = vld [vmem:[#allocation4 + $0xc00] sm:$0xff] }
 0x2c9   : > { %8311 = vmatpush1.bf16.msra.mxu0 %v14282_v53  ;;  %v16049_v53 = vld [vmem:[%s17403_s16 + $0x90] ss:$24 sps:$4 sm:$0xff]  }
 0x2ca   : > { %8353 = vmatprep.subr.bf16.mxu0 %v14299_v54  ;;  %v14394_v54 = vcombine.low %v3820_v39, %v3828_v40  ;;  %v3925_v39 = vld [vmem:[#allocation4 + $0xe48] sm:$0xff] }
 0x2cb   : > { %8530 = vmatpush1.bf16.msra.mxu1 %v14284_v1  ;;  %v14396_v1 = vcombine.low %v3821_v51, %v3829_v52  ;;  %v3964_v52 = vld [vmem:[#allocation4 + $0xf80] sm:$0xff] }
 0x2cc   : > { %8313 = vmatmul.mubr.bf16.vlgmr.msra.gmra.mrb[8].mxu0 %v16040_v59  ;;  %8572 = vmatprep.subr.bf16.mxu1 %v14301_v4 }
 0x2cd   : > { %8354 = vmatpush1.bf16.msra.mxu0 %v14298_v62  ;;  %8322 = vmatprep.mubr.bf16.mxu0 %v16041_v63  ;;  %v3845_v62 = vld [vmem:[#allocation4 + $0xbc8] sm:$0xff] }
 0x2ce   : > { %8355 = vmatprep.subr.bf16.mxu0 %v14315_v0  ;;  %8532 = vmatmul.mubr.bf16.vlgmr.msra.gmra.mrb[8].mxu1 %v16040_v59  ;;  %v3860_v59 = vld [vmem:[#allocation4 + $0xc40] sm:$0xff]  ;;  %v14413_v4 = vcombine.high %v3837_v61, %v3845_v62 }
 0x2cf   : > { %8573 = vmatpush1.bf16.msra.mxu1 %v14300_v9  ;;  %8541 = vmatprep.mubr.bf16.mxu1 %v16041_v63  ;;  %v14410_v63 = vcombine.low %v3836_v48, %v3844_v49  ;;  %v14427_v0 = vcombine.high %v3852_v58, %v3860_v59  ;;  %v14412_v9 = vcombine.low %v3837_v61, %v3845_v62  ;;  %v3941_v48 = vld [vmem:[#allocation4 + $0xec8] sm:$0xff]  ;;  %v3988_v61 = vld [vmem:[#allocation4 + $0x1040] sm:$0xff] }
 0x2d0   : > { %8574 = vmatprep.subr.bf16.mxu1 %v14317_v12  ;;  %v14429_v12 = vcombine.high %v3853_v5, %v3861_v6 }
 0x2d1   : > { %8356 = vmatpush1.bf16.msra.mxu0 %v14314_v7  ;;  %v14426_v7 = vcombine.low %v3852_v58, %v3860_v59 }
 0x2d2   : > { %8357 = vmatprep.subr.bf16.mxu0 %v14331_v45  ;;  %v14443_v45 = vcombine.high %v3868_v2, %v3876_v3 }
 0x2d3   : > { %8575 = vmatpush1.bf16.msra.mxu1 %v14316_v18  ;;  %v3908_v18 = vld [vmem:[#allocation4 + $0xdc0] sm:$0xff] }
 0x2d4   : > { %8323 = vmatmul.mubr.bf16.gmra.mrb[12].mxu0 %v16043_v16  ;;  %8576 = vmatprep.subr.bf16.mxu1 %v14333_v41  ;;  %v3893_v41 = vld [vmem:[#allocation4 + $0xd48] sm:$0xff] }
 0x2d5   : > { %8358 = vmatpush1.bf16.msra.mxu0 %v14330_v15  ;;  %8332 = vmatprep.mubr.bf16.mxu0 %v16044_v21  ;;  %v14459_v15 = vcombine.high %v3884_v10, %v3892_v11  ;;  %v14461_v27 = vcombine.high %v3885_v19, %v3893_v41  ;;  %v16053_v11 = vld [vmem:[%s17403_s16 + $0x3c] ss:$24 sps:$4 sm:$0xff]  }
 0x2d6   : > { %8359 = vmatprep.subr.bf16.mxu0 %v14347_v17  ;;  %8542 = vmatmul.mubr.bf16.gmra.mrb[12].mxu1 %v16043_v16  ;;  %v14442_v16 = vcombine.low %v3868_v2, %v3876_v3  ;;  %v3900_v17 = vld [vmem:[#allocation4 + $0xd80] sm:$0xff] }
 0x2d7   : > { %8577 = vmatpush1.bf16.msra.mxu1 %v14332_v26  ;;  %8551 = vmatprep.mubr.bf16.mxu1 %v16044_v21  ;;  %v14428_v21 = vcombine.low %v3853_v5, %v3861_v6  ;;  %v14475_v23 = vcombine.high %v3900_v17, %v3908_v18  ;;  %v3924_v26 = vld [vmem:[#allocation4 + $0xe40] sm:$0xff]  ;;  %v14474_v30 = vcombine.low %v3900_v17, %v3908_v18  ;;  %v4005_v17 = vld [vmem:[#allocation4 + $0x10c8] sm:$0xff] }
 0x2d8   : > { %8578 = vmatprep.subr.bf16.mxu1 %v14349_v29  ;;  %v3909_v29 = vld [vmem:[#allocation4 + $0xdc8] sm:$0xff]  ;;  %v4004_v5 = vld [vmem:[#allocation4 + $0x10c0] sm:$0xff] }
 0x2d9   : > { %8360 = vmatpush1.bf16.msra.mxu0 %v14346_v25  ;;  %v14444_v25 = vcombine.low %v3869_v13, %v3877_v14  ;;  %v14476_v43 = vcombine.low %v3901_v28, %v3909_v29  ;;  %v4012_v14 = vld [vmem:[#allocation4 + $0x1100] sm:$0xff] }
 0x2da   : > { %8361 = vmatprep.subr.bf16.mxu0 %v14363_v24  ;;  %v3916_v24 = vld [vmem:[#allocation4 + $0xe00] sm:$0xff] }
 0x2db   : > { %8579 = vmatpush1.bf16.msra.mxu1 %v14348_v38  ;;  %v14491_v8 = vcombine.high %v3916_v24, %v3924_v26  ;;  %v3917_v38 = vld [vmem:[#allocation4 + $0xe08] sm:$0xff]  ;;  %v14490_v40 = vcombine.low %v3916_v24, %v3924_v26  ;;  %v16055_v26 = vld [vmem:[%s17403_s16 + $0x38] ss:$24 sps:$4 sm:$0xff]  }
 0x2dc   : > { %8333 = vmatmul.mubr.bf16.gmra.mrb[16].mxu0 %v16046_v31  ;;  %8580 = vmatprep.subr.bf16.mxu1 %v14365_v42  ;;  %v14492_v51 = vcombine.low %v3917_v38, %v3925_v39  ;;  %v4021_v24 = vld [vmem:[#allocation4 + $0x1148] sm:$0xff] }
 0x2dd   : > { %8362 = vmatpush1.bf16.msra.mxu0 %v14362_v33  ;;  %8342 = vmatprep.mubr.bf16.mxu0 %v16047_v35  ;;  %v3932_v33 = vld [vmem:[#allocation4 + $0xe80] sm:$0xff] }
 0x2de   : > { %8363 = vmatprep.subr.bf16.mxu0 %v14379_v36  ;;  %8552 = vmatmul.mubr.bf16.gmra.mrb[16].mxu1 %v16046_v31  ;;  %v14460_v31 = vcombine.low %v3885_v19, %v3893_v41  ;;  %v14477_v36 = vcombine.high %v3901_v28, %v3909_v29  ;;  %v4028_v41 = vld [vmem:[#allocation4 + $0x1180] sm:$0xff] }
 0x2df   : > { %8581 = vmatpush1.bf16.msra.mxu1 %v14364_v20  ;;  %8561 = vmatprep.mubr.bf16.mxu1 %v16047_v35  ;;  %v3940_v35 = vld [vmem:[#allocation4 + $0xec0] sm:$0xff]  ;;  %v3933_v20 = vld [vmem:[#allocation4 + $0xe88] sm:$0xff] }
 0x2e0   : > { %8582 = vmatprep.subr.bf16.mxu1 %v14381_v50  ;;  %v14507_v42 = vcombine.high %v3932_v33, %v3940_v35  ;;  %v14506_v49 = vcombine.low %v3932_v33, %v3940_v35  ;;  %v14508_v59 = vcombine.low %v3933_v20, %v3941_v48  ;;  %v16056_v28 = vld [vmem:[%s17403_s16 + $0x6c] ss:$24 sps:$4 sm:$0xff]  }
 0x2e1   : > { %8364 = vmatpush1.bf16.msra.mxu0 %v14378_v46  ;;  %v3956_v46 = vld [vmem:[#allocation4 + $0xf40] sm:$0xff]  ;;  %v4029_v35 = vld [vmem:[#allocation4 + $0x1188] sm:$0xff] }
 0x2e2   : > { %8365 = vmatprep.subr.bf16.mxu0 %v14395_v47  ;;  %v14493_v47 = vcombine.high %v3917_v38, %v3925_v39  ;;  %v14523_v50 = vcombine.high %v3948_v44, %v3956_v46 }
 0x2e3   : > { %8583 = vmatpush1.bf16.msra.mxu1 %v14380_v57  ;;  %v14522_v57 = vcombine.low %v3948_v44, %v3956_v46  ;;  %v4045_v46 = vld [vmem:[#allocation4 + $0x1208] sm:$0xff] }
 0x2e4   : > { %8343 = vmatmul.mubr.bf16.gmra.mrb[20].mxu0 %v16049_v53  ;;  %8584 = vmatprep.subr.bf16.mxu1 %v14397_v60  ;;  %v3980_v60 = vld [vmem:[#allocation4 + $0x1000] sm:$0xff] }
 0x2e5   : > { %8366 = vmatpush1.bf16.msra.mxu0 %v14394_v54  ;;  %8385 = vmatprep.mubr.bf16.mxu0 %v16050_v55  ;;  %v14509_v54 = vcombine.high %v3933_v20, %v3941_v48  ;;  %v14555_v2 = vcombine.high %v3980_v60, %v3988_v61  ;;  %v14554_v10 = vcombine.low %v3980_v60, %v3988_v61  ;;  %v16058_v20 = vld [vmem:[%s17403_s16 + $0x68] ss:$24 sps:$4 sm:$0xff]  }
 0x2e6   : > { %8367 = vmatprep.subr.bf16.mxu0 %v14411_v56  ;;  %8562 = vmatmul.mubr.bf16.gmra.mrb[20].mxu1 %v16049_v53  ;;  %v3972_v53 = vld [vmem:[#allocation4 + $0xfc0] sm:$0xff]  ;;  %v3957_v56 = vld [vmem:[#allocation4 + $0xf48] sm:$0xff] }
 0x2e7   : > { %8585 = vmatpush1.bf16.msra.mxu1 %v14396_v1  ;;  %8604 = vmatprep.mubr.bf16.mxu1 %v16050_v55  ;;  %v3949_v55 = vld [vmem:[#allocation4 + $0xf08] sm:$0xff]  ;;  %v14539_v58 = vcombine.high %v3964_v52, %v3972_v53  ;;  %v14538_v1 = vcombine.low %v3964_v52, %v3972_v53  ;;  %v4076_v52 = vld [vmem:[#allocation4 + $0x1300] sm:$0xff] }
 0x2e8   : > { %8586 = vmatprep.subr.bf16.mxu1 %v14413_v4  ;;  %v14525_v62 = vcombine.high %v3949_v55, %v3957_v56  ;;  %v14524_v3 = vcombine.low %v3949_v55, %v3957_v56  ;;  %v3996_v4 = vld [vmem:[#allocation4 + $0x1080] sm:$0xff]  ;;  %v4061_v55 = vld [vmem:[#allocation4 + $0x1288] sm:$0xff] }
 0x2e9   : > { %8368 = vmatpush1.bf16.msra.mxu0 %v14410_v63  ;;  %v3965_v63 = vld [vmem:[#allocation4 + $0xf88] sm:$0xff]  ;;  %v14570_v18 = vcombine.low %v3996_v4, %v4004_v5  ;;  %v4084_v53 = vld [vmem:[#allocation4 + $0x1340] sm:$0xff] }
 0x2ea   : > { %8369 = vmatprep.subr.bf16.mxu0 %v14427_v0  ;;  %v3973_v0 = vld [vmem:[#allocation4 + $0xfc8] sm:$0xff]  ;;  %v4092_v60 = vld [vmem:[#allocation4 + $0x1380] sm:$0xff] }
 0x2eb   : > { %8587 = vmatpush1.bf16.msra.mxu1 %v14412_v9  ;;  %v14541_v6 = vcombine.high %v3965_v63, %v3973_v0  ;;  %v3989_v9 = vld [vmem:[#allocation4 + $0x1048] sm:$0xff]  ;;  %v14540_v13 = vcombine.low %v3965_v63, %v3973_v0  ;;  %v4100_v61 = vld [vmem:[#allocation4 + $0x13c0] sm:$0xff] }
 0x2ec   : > { %8588 = vmatprep.subr.bf16.mxu1 %v14429_v12  ;;  %v14571_v12 = vcombine.high %v3996_v4, %v4004_v5  ;;  %v4069_v56 = vld [vmem:[#allocation4 + $0x12c8] sm:$0xff]  ;;  %v14667_v4 = vcombine.high %v4092_v60, %v4100_v61 }
 0x2ed   : > { %8370 = vmatpush1.bf16.msra.mxu0 %v14426_v7  ;;  %v16052_v7 = vld [vmem:[%s17403_s16 + $0x8] ss:$24 sps:$4 sm:$0xff]   ;;  %v14636_v5 = vcombine.low %v4061_v55, %v4069_v56 }
 0x2ee   : > { %8371 = vmatprep.subr.bf16.mxu0 %v14443_v45  ;;  %v3981_v45 = vld [vmem:[#allocation4 + $0x1008] sm:$0xff] }
 0x2ef   : > { %8589 = vmatpush1.bf16.msra.mxu1 %v14428_v21  ;;  %v3997_v21 = vld [vmem:[#allocation4 + $0x1088] sm:$0xff]  ;;  %v14556_v19 = vcombine.low %v3981_v45, %v3989_v9 }
 0x2f0   : > { %8590 = vmatprep.subr.bf16.mxu1 %v14445_v34  ;;  %v4077_v63 = vld [vmem:[#allocation4 + $0x1308] sm:$0xff] }
 0x2f1   : > { %8372 = vmatpush1.bf16.msra.mxu0 %v14442_v16  ;;  %v4020_v16 = vld [vmem:[#allocation4 + $0x1140] sm:$0xff]  ;;  %v4085_v0 = vld [vmem:[#allocation4 + $0x1348] sm:$0xff] }
 0x2f2   : > { %8373 = vmatprep.subr.bf16.mxu0 %v14459_v15  ;;  %v14557_v15 = vcombine.high %v3981_v45, %v3989_v9  ;;  %v14587_v34 = vcombine.high %v4012_v14, %v4020_v16  ;;  %v14653_v45 = vcombine.high %v4077_v63, %v4085_v0  ;;  %v4093_v9 = vld [vmem:[#allocation4 + $0x1388] sm:$0xff] }
 0x2f3   : > { %8591 = vmatpush1.bf16.msra.mxu1 %v14444_v25  ;;  %v4013_v25 = vld [vmem:[#allocation4 + $0x1108] sm:$0xff] }
 0x2f4   : > { %8592 = vmatprep.subr.bf16.mxu1 %v14461_v27  ;;  %v14586_v27 = vcombine.low %v4012_v14, %v4020_v16  ;;  %v14589_v33 = vcombine.high %v4013_v25, %v4021_v24  ;;  %v4124_v14 = vld [vmem:[#allocation4 + $0x1480] sm:$0xff] }
 0x2f5   : > { %8374 = vmatpush1.bf16.msra.mxu0 %v14458_v22  ;;  %v4036_v22 = vld [vmem:[#allocation4 + $0x11c0] sm:$0xff] }
 0x2f6   : > { %8375 = vmatprep.subr.bf16.mxu0 %v14475_v23  ;;  %v14573_v23 = vcombine.high %v3997_v21, %v4005_v17  ;;  %v14603_v29 = vcombine.high %v4028_v41, %v4036_v22  ;;  %v14602_v38 = vcombine.low %v4028_v41, %v4036_v22  ;;  %v4132_v16 = vld [vmem:[#allocation4 + $0x14c0] sm:$0xff] }
 0x2f7   : > { %8593 = vmatpush1.bf16.msra.mxu1 %v14460_v31  ;;  %v4052_v31 = vld [vmem:[#allocation4 + $0x1240] sm:$0xff] }
 0x2f8   : > { %8594 = vmatprep.subr.bf16.mxu1 %v14477_v36  ;;  %v4037_v36 = vld [vmem:[#allocation4 + $0x11c8] sm:$0xff]  ;;  %v4140_v41 = vld [vmem:[#allocation4 + $0x1500] sm:$0xff] }
 0x2f9   : > { %8376 = vmatpush1.bf16.msra.mxu0 %v14474_v30  ;;  %v14572_v30 = vcombine.low %v3997_v21, %v4005_v17  ;;  %v14605_v44 = vcombine.high %v4029_v35, %v4037_v36  ;;  %v4109_v21 = vld [vmem:[#allocation4 + $0x1408] sm:$0xff]  ;;  %v4148_v22 = vld [vmem:[#allocation4 + $0x1540] sm:$0xff] }
 0x2fa   : > { %8377 = vmatprep.subr.bf16.mxu0 %v14491_v8  ;;  %v4044_v8 = vld [vmem:[#allocation4 + $0x1200] sm:$0xff]  ;;  %v4117_v17 = vld [vmem:[#allocation4 + $0x1448] sm:$0xff] }
 0x2fb   : > { %8595 = vmatpush1.bf16.msra.mxu1 %v14476_v43  ;;  %v14619_v39 = vcombine.high %v4044_v8, %v4052_v31  ;;  %v4068_v43 = vld [vmem:[#allocation4 + $0x12c0] sm:$0xff]  ;;  %v14618_v48 = vcombine.low %v4044_v8, %v4052_v31  ;;  %v4141_v31 = vld [vmem:[#allocation4 + $0x1508] sm:$0xff] }
 0x2fc   : > { %8596 = vmatprep.subr.bf16.mxu1 %v14493_v47  ;;  %v4053_v47 = vld [vmem:[#allocation4 + $0x1248] sm:$0xff] }
 0x2fd   : > { %8378 = vmatpush1.bf16.msra.mxu0 %v14490_v40  ;;  %v14588_v40 = vcombine.low %v4013_v25, %v4021_v24  ;;  %v4125_v25 = vld [vmem:[#allocation4 + $0x1488] sm:$0xff] }
 0x2fe   : > { %8379 = vmatprep.subr.bf16.mxu0 %v14507_v42  ;;  %v4060_v42 = vld [vmem:[#allocation4 + $0x1280] sm:$0xff]  ;;  %v4133_v24 = vld [vmem:[#allocation4 + $0x14c8] sm:$0xff] }
 0x2ff   : > { %8597 = vmatpush1.bf16.msra.mxu1 %v14492_v51  ;;  %v14604_v51 = vcombine.low %v4029_v35, %v4037_v36  ;;  %v14701_v8 = vcombine.high %v4125_v25, %v4133_v24  ;;  %v14714_v35 = vcombine.low %v4140_v41, %v4148_v22 }
 0x300   : > { %8598 = vmatprep.subr.bf16.mxu1 %v14509_v54  ;;  %v14621_v54 = vcombine.high %v4045_v46, %v4053_v47 }
 0x301   : > { %8380 = vmatpush1.bf16.msra.mxu0 %v14506_v49  ;;  %v16059_v49 = vld [vmem:[%s17403_s16 + $0x9c] ss:$24 sps:$4 sm:$0xff]  }
 0x302   : > { %8381 = vmatprep.subr.bf16.mxu0 %v14523_v50  ;;  %v14635_v50 = vcombine.high %v4060_v42, %v4068_v43 }
 0x303   : > { %8599 = vmatpush1.bf16.msra.mxu1 %v14508_v59  ;;  %v14620_v59 = vcombine.low %v4045_v46, %v4053_v47 }
 0x304   : > { %8600 = vmatprep.subr.bf16.mxu1 %v14525_v62  ;;  %v14637_v62 = vcombine.high %v4061_v55, %v4069_v56  ;;  %v4204_v56 = vld [vmem:[#allocation4 + $0x1700] sm:$0xff] }
 0x305   : > { %8382 = vmatpush1.bf16.msra.mxu0 %v14522_v57  ;;  %v14634_v57 = vcombine.low %v4060_v42, %v4068_v43  ;;  %v4157_v43 = vld [vmem:[#allocation4 + $0x1588] sm:$0xff] }
 0x306   : > { %8383 = vmatprep.subr.bf16.mxu0 %v14539_v58  ;;  %v14651_v58 = vcombine.high %v4076_v52, %v4084_v53 }
 0x307   : > { %8601 = vmatpush1.bf16.msra.mxu1 %v14524_v3  ;;  %v16062_v3 = vld [vmem:[%s17403_s16 + $0x14] ss:$24 sps:$4 sm:$0xff]  }
 0x308   : > { %8602 = vmatprep.subr.bf16.mxu1 %v14541_v6  ;;  %v4108_v6 = vld [vmem:[#allocation4 + $0x1400] sm:$0xff] }
 0x309   : > { %8384 = vmatpush1.bf16.msra.mxu0 %v14538_v1  ;;  %v16061_v1 = vld [vmem:[%s17403_s16 + $0x98] ss:$24 sps:$4 sm:$0xff]  }
 0x30a   : > { %8426 = vmatprep.subr.bf16.mxu0 %v14555_v2  ;;  %v14650_v2 = vcombine.low %v4076_v52, %v4084_v53  ;;  %v4181_v52 = vld [vmem:[#allocation4 + $0x1648] sm:$0xff] }
 0x30b   : > { %8603 = vmatpush1.bf16.msra.mxu1 %v14540_v13  ;;  %v14652_v13 = vcombine.low %v4077_v63, %v4085_v0  ;;  %v4220_v0 = vld [vmem:[#allocation4 + $0x1780] sm:$0xff] }
 0x30c   : > { %8386 = vmatmul.mubr.bf16.vlgmr.msra.gmra.mrb[8].mxu0 %v16052_v7  ;;  %8645 = vmatprep.subr.bf16.mxu1 %v14557_v15 }
 0x30d   : > { %8427 = vmatpush1.bf16.msra.mxu0 %v14554_v10  ;;  %8395 = vmatprep.mubr.bf16.mxu0 %v16053_v11  ;;  %v4101_v10 = vld [vmem:[#allocation4 + $0x13c8] sm:$0xff] }
 0x30e   : > { %8428 = vmatprep.subr.bf16.mxu0 %v14571_v12  ;;  %8605 = vmatmul.mubr.bf16.vlgmr.msra.gmra.mrb[8].mxu1 %v16052_v7  ;;  %v4116_v7 = vld [vmem:[#allocation4 + $0x1440] sm:$0xff]  ;;  %v14669_v15 = vcombine.high %v4093_v9, %v4101_v10 }
 0x30f   : > { %8646 = vmatpush1.bf16.msra.mxu1 %v14556_v19  ;;  %8614 = vmatprep.mubr.bf16.mxu1 %v16053_v11  ;;  %v14666_v11 = vcombine.low %v4092_v60, %v4100_v61  ;;  %v14683_v12 = vcombine.high %v4108_v6, %v4116_v7  ;;  %v14668_v19 = vcombine.low %v4093_v9, %v4101_v10  ;;  %v4197_v60 = vld [vmem:[#allocation4 + $0x16c8] sm:$0xff]  ;;  %v3478_v9 = vld [vmem:[#allocation4 + $0x50] sm:$0xff] }
 0x310   : > { %8647 = vmatprep.subr.bf16.mxu1 %v14573_v23  ;;  %v14685_v23 = vcombine.high %v4109_v21, %v4117_v17 }
 0x311   : > { %8429 = vmatpush1.bf16.msra.mxu0 %v14570_v18  ;;  %v14682_v18 = vcombine.low %v4108_v6, %v4116_v7 }
 0x312   : > { %8430 = vmatprep.subr.bf16.mxu0 %v14587_v34  ;;  %v14699_v34 = vcombine.high %v4124_v14, %v4132_v16 }
 0x313   : > { %8648 = vmatpush1.bf16.msra.mxu1 %v14572_v30  ;;  %v4164_v30 = vld [vmem:[#allocation4 + $0x15c0] sm:$0xff] }
 0x314   : > { %8396 = vmatmul.mubr.bf16.gmra.mrb[12].mxu0 %v16055_v26  ;;  %8649 = vmatprep.subr.bf16.mxu1 %v14589_v33  ;;  %v4149_v33 = vld [vmem:[#allocation4 + $0x1548] sm:$0xff] }
 0x315   : > { %8431 = vmatpush1.bf16.msra.mxu0 %v14586_v27  ;;  %8405 = vmatprep.mubr.bf16.mxu0 %v16056_v28  ;;  %v14715_v27 = vcombine.high %v4140_v41, %v4148_v22  ;;  %v14717_v42 = vcombine.high %v4141_v31, %v4149_v33  ;;  %v3479_v41 = vld [vmem:[#allocation4 + $0x58] sm:$0xff] }
 0x316   : > { %8432 = vmatprep.subr.bf16.mxu0 %v14603_v29  ;;  %8615 = vmatmul.mubr.bf16.gmra.mrb[12].mxu1 %v16055_v26  ;;  %v14698_v26 = vcombine.low %v4124_v14, %v4132_v16  ;;  %v4156_v29 = vld [vmem:[#allocation4 + $0x1580] sm:$0xff] }
 0x317   : > { %8650 = vmatpush1.bf16.msra.mxu1 %v14588_v40  ;;  %8624 = vmatprep.mubr.bf16.mxu1 %v16056_v28  ;;  %v14684_v28 = vcombine.low %v4109_v21, %v4117_v17  ;;  %v14731_v36 = vcombine.high %v4156_v29, %v4164_v30  ;;  %v4180_v40 = vld [vmem:[#allocation4 + $0x1640] sm:$0xff]  ;;  %v14730_v46 = vcombine.low %v4156_v29, %v4164_v30  ;;  %v3486_v21 = vld [vmem:[#allocation4 + $0x90] sm:$0xff] }
 0x318   : > { %8651 = vmatprep.subr.bf16.mxu1 %v14605_v44  ;;  %v4165_v44 = vld [vmem:[#allocation4 + $0x15c8] sm:$0xff]  ;;  %v3494_v17 = vld [vmem:[#allocation4 + $0xd0] sm:$0xff] }
 0x319   : > { %8433 = vmatpush1.bf16.msra.mxu0 %v14602_v38  ;;  %v14700_v38 = vcombine.low %v4125_v25, %v4133_v24  ;;  %v14732_v55 = vcombine.low %v4157_v43, %v4165_v44  ;;  %v14063_v24 = vcombine.high %v3486_v21, %v3494_v17  ;;  %v3510_v29 = vld [vmem:[#allocation4 + $0x150] sm:$0xff] }
 0x31a   : > { %8434 = vmatprep.subr.bf16.mxu0 %v14619_v39  ;;  %v4172_v39 = vld [vmem:[#allocation4 + $0x1600] sm:$0xff] }
 0x31b   : > { %8652 = vmatpush1.bf16.msra.mxu1 %v14604_v51  ;;  %v14747_v47 = vcombine.high %v4172_v39, %v4180_v40  ;;  %v4173_v51 = vld [vmem:[#allocation4 + $0x1608] sm:$0xff]  ;;  %v14746_v53 = vcombine.low %v4172_v39, %v4180_v40  ;;  %v3518_v39 = vld [vmem:[#allocation4 + $0x190] sm:$0xff] }
 0x31c   : > { %8406 = vmatmul.mubr.bf16.gmra.mrb[16].mxu0 %v16058_v20  ;;  %8653 = vmatprep.subr.bf16.mxu1 %v14621_v54  ;;  %v14748_v63 = vcombine.low %v4173_v51, %v4181_v52  ;;  %v3526_v40 = vld [vmem:[#allocation4 + $0x1d0] sm:$0xff] }
 0x31d   : > { %8435 = vmatpush1.bf16.msra.mxu0 %v14618_v48  ;;  %8415 = vmatprep.mubr.bf16.mxu0 %v16059_v49  ;;  %v4188_v48 = vld [vmem:[#allocation4 + $0x1680] sm:$0xff] }
 0x31e   : > { %8436 = vmatprep.subr.bf16.mxu0 %v14635_v50  ;;  %8625 = vmatmul.mubr.bf16.gmra.mrb[16].mxu1 %v16058_v20  ;;  %v14716_v20 = vcombine.low %v4141_v31, %v4149_v33  ;;  %v14733_v50 = vcombine.high %v4157_v43, %v4165_v44  ;;  %v3487_v31 = vld [vmem:[#allocation4 + $0x98] sm:$0xff] }
 0x31f   : > { %8654 = vmatpush1.bf16.msra.mxu1 %v14620_v59  ;;  %8634 = vmatprep.mubr.bf16.mxu1 %v16059_v49  ;;  %v4196_v49 = vld [vmem:[#allocation4 + $0x16c0] sm:$0xff]  ;;  %v4189_v59 = vld [vmem:[#allocation4 + $0x1688] sm:$0xff]  ;;  %v3495_v33 = vld [vmem:[#allocation4 + $0xd8] sm:$0xff] }
 0x320   : > { %8655 = vmatprep.subr.bf16.mxu1 %v14637_v62  ;;  %v14763_v54 = vcombine.high %v4188_v48, %v4196_v49  ;;  %v14762_v61 = vcombine.low %v4188_v48, %v4196_v49  ;;  %v14764_v7 = vcombine.low %v4189_v59, %v4197_v60  ;;  %v16067_v43 = vld [vmem:[%s17403_s16 + $0x40] ss:$24 sps:$4 sm:$0xff]   ;;  %v18424_v48 = vlaneseq }
 0x321   : > { %8437 = vmatpush1.bf16.msra.mxu0 %v14634_v57  ;;  %v4212_v57 = vld [vmem:[#allocation4 + $0x1740] sm:$0xff]  ;;  %v3503_v44 = vld [vmem:[#allocation4 + $0x118] sm:$0xff]  ;;  %v14095_v49 = vcombine.high %v3518_v39, %v3526_v40 }
 0x322   : > { %8438 = vmatprep.subr.bf16.mxu0 %v14651_v58  ;;  %v14749_v58 = vcombine.high %v4173_v51, %v4181_v52  ;;  %v14779_v62 = vcombine.high %v4204_v56, %v4212_v57  ;;  %v3534_v51 = vld [vmem:[#allocation4 + $0x210] sm:$0xff] }
 0x323   : > { %8656 = vmatpush1.bf16.msra.mxu1 %v14636_v5  ;;  %v14778_v5 = vcombine.low %v4204_v56, %v4212_v57  ;;  %v3542_v52 = vld [vmem:[#allocation4 + $0x250] sm:$0xff]  ;;  %v14094_v56 = vcombine.low %v3518_v39, %v3526_v40  ;;  %v17441_v57 = vshrl.u32 %v18424_v48, 7  ;;  %v3583_v40 = vld [vmem:[#allocation4 + $0x398] sm:$0xff]  ;;  %v3736_v48 = vld [vmem:[#allocation4 + $0x860] sm:$0xff] }
 0x324   : > { %8416 = vmatmul.mubr.bf16.gmra.mrb[20].mxu0 %v16061_v1  ;;  %8657 = vmatprep.subr.bf16.mxu1 %v14653_v45  ;;  %v3470_v45 = vld [vmem:[#allocation4 + $0x10] sm:$0xff] }
 0x325   : > { %8439 = vmatpush1.bf16.msra.mxu0 %v14650_v2  ;;  %8458 = vmatprep.mubr.bf16.mxu0 %v16062_v3  ;;  %v14765_v2 = vcombine.high %v4189_v59, %v4197_v60  ;;  %v14047_v14 = vcombine.high %v3470_v45, %v3478_v9  ;;  %v14046_v22 = vcombine.low %v3470_v45, %v3478_v9  ;;  %v3550_v60 = vld [vmem:[#allocation4 + $0x290] sm:$0xff]  ;;  %v961_v45 = vld [vmem:[#allocation10] sm:$0xff] }
 0x326   : > { %8440 = vmatprep.subr.bf16.mxu0 %v14667_v4  ;;  %8635 = vmatmul.mubr.bf16.gmra.mrb[20].mxu1 %v16061_v1  ;;  %v4228_v1 = vld [vmem:[#allocation4 + $0x17c0] sm:$0xff]  ;;  %v4213_v4 = vld [vmem:[#allocation4 + $0x1748] sm:$0xff]  ;;  %v3566_v9 = vld [vmem:[#allocation4 + $0x310] sm:$0xff] }
 0x327   : > { %8658 = vmatpush1.bf16.msra.mxu1 %v14652_v13  ;;  %8677 = vmatprep.mubr.bf16.mxu1 %v16062_v3  ;;  %v4205_v3 = vld [vmem:[#allocation4 + $0x1708] sm:$0xff]  ;;  %v14795_v6 = vcombine.high %v4220_v0, %v4228_v1  ;;  %v14794_v13 = vcombine.low %v4220_v0, %v4228_v1  ;;  %v17445_v0 = vsub.s32 4, %v17441_v57  ;;  %v3535_v1 = vld [vmem:[#allocation4 + $0x218] sm:$0xff] }
 0x328   : > { %8659 = vmatprep.subr.bf16.mxu1 %v14669_v15  ;;  %v14781_v10 = vcombine.high %v4205_v3, %v4213_v4  ;;  %v14780_v16 = vcombine.low %v4205_v3, %v4213_v4  ;;  %v17432_v15 = vpop.f32.mrb[0].mxu1  ;;  %v14110_v3 = vcombine.low %v3534_v51, %v3542_v52  ;;  %v17448_v4 = vsub.s32 5, %v17441_v57 }
 0x329   : > { %8441 = vmatpush1.bf16.msra.mxu0 %v14666_v11  ;;  %v4221_v11 = vld [vmem:[#allocation4 + $0x1788] sm:$0xff]  ;;  %v17436_v25 = vpop.f32.mrb[1].mxu1 }
 0x32a   : > { %8442 = vmatprep.subr.bf16.mxu0 %v14683_v12  ;;  %v4229_v12 = vld [vmem:[#allocation4 + $0x17c8] sm:$0xff]  ;;  %18495 = vst [vmem:[#allocation25_spill] sm:$0xff] %v17436_v25  ;;  %v3611_v25 = vld [vmem:[#allocation4 + $0x478] sm:$0xff] }
 0x32b   : > { %8660 = vmatpush1.bf16.msra.mxu1 %v14668_v19  ;;  %v3471_v19 = vld [vmem:[#allocation4 + $0x18] sm:$0xff] }
 0x32c   : > { %8661 = vmatprep.subr.bf16.mxu1 %v14685_v23  ;;  %v16065_v23 = vld [vmem:[%s17403_s16 + $0x44] ss:$24 sps:$4 sm:$0xff]   ;;  %v14049_v30 = vcombine.high %v3471_v19, %v3479_v41 }
 0x32d   : > { %8443 = vmatpush1.bf16.msra.mxu0 %v14682_v18  ;;  %v14797_v18 = vcombine.high %v4221_v11, %v4229_v12 }
 0x32e   : > { %8444 = vmatprep.subr.bf16.mxu0 %v14699_v34  ;;  %v16064_v34 = vld [vmem:[%s17403_s16 + $0x10] ss:$24 sps:$4 sm:$0xff]  }
 0x32f   : > { %8662 = vmatpush1.bf16.msra.mxu1 %v14684_v28  ;;  %v3502_v28 = vld [vmem:[#allocation4 + $0x110] sm:$0xff] }
 0x330   : > { %8663 = vmatprep.subr.bf16.mxu1 %v14701_v8 }
 0x331   : > { %8445 = vmatpush1.bf16.msra.mxu0 %v14698_v26  ;;  %v14796_v26 = vcombine.low %v4221_v11, %v4229_v12  ;;  %v982_v12 = vrot.slane %v961_v45, %v17445_v0 }
 0x332   : > { %8446 = vmatprep.subr.bf16.mxu0 %v14715_v27  ;;  %v3187_v27 = vpop.f32.mrb[2].mxu1 }
 0x333   : > { %8664 = vmatpush1.bf16.msra.mxu1 %v14700_v38  ;;  %v3188_v8 = vpop.f32.mrb[3].mxu1  ;;  %v14048_v38 = vcombine.low %v3471_v19, %v3479_v41  ;;  %v3582_v19 = vld [vmem:[#allocation4 + $0x390] sm:$0xff]  ;;  %v3567_v27 = vld [vmem:[#allocation4 + $0x318] sm:$0xff] }
 0x334   : > { %8665 = vmatprep.subr.bf16.mxu1 %v14717_v42  ;;  %v14065_v42 = vcombine.high %v3487_v31, %v3495_v33  ;;  %v3590_v41 = vld [vmem:[#allocation4 + $0x3d0] sm:$0xff] }
 0x335   : > { %8447 = vmatpush1.bf16.msra.mxu0 %v14714_v35  ;;  %v14062_v35 = vcombine.low %v3486_v21, %v3494_v17 }
 0x336   : > { %8448 = vmatprep.subr.bf16.mxu0 %v14731_v36  ;;  %v14079_v36 = vcombine.high %v3502_v28, %v3510_v29 }
 0x337   : > { %8666 = vmatpush1.bf16.msra.mxu1 %v14716_v20  ;;  %v16068_v20 = vld [vmem:[%s17403_s16 + $0x74] ss:$24 sps:$4 sm:$0xff]  }
 0x338   : > { %8667 = vmatprep.subr.bf16.mxu1 %v14733_v50  ;;  %v14064_v50 = vcombine.low %v3487_v31, %v3495_v33  ;;  %v14159_v33 = vcombine.high %v3582_v19, %v3590_v41 }
 0x339   : > { %8449 = vmatpush1.bf16.msra.mxu0 %v14730_v46  ;;  %v3511_v46 = vld [vmem:[#allocation4 + $0x158] sm:$0xff] }
 0x33a   : > { %8450 = vmatprep.subr.bf16.mxu0 %v14747_v47  ;;  %v14078_v47 = vcombine.low %v3502_v28, %v3510_v29  ;;  %v14080_v59 = vcombine.low %v3503_v44, %v3511_v46  ;;  %v3575_v28 = vld [vmem:[#allocation4 + $0x358] sm:$0xff] }
 0x33b   : > { %8668 = vmatpush1.bf16.msra.mxu1 %v14732_v55  ;;  %v3527_v55 = vld [vmem:[#allocation4 + $0x1d8] sm:$0xff]  ;;  %v14145_v39 = vcombine.high %v3567_v27, %v3575_v28 }
 0x33c   : > { %8669 = vmatprep.subr.bf16.mxu1 %v14749_v58  ;;  %v14111_v58 = vcombine.high %v3534_v51, %v3542_v52  ;;  %v3599_v51 = vld [vmem:[#allocation4 + $0x418] sm:$0xff] }
 0x33d   : > { %8451 = vmatpush1.bf16.msra.mxu0 %v14746_v53  ;;  %v14081_v53 = vcombine.high %v3503_v44, %v3511_v46  ;;  %v16606_v44 = vld [vmem:[%s17403_s16 + $0x4] ss:$24 sps:$4 sm:$0xff]  }
 0x33e   : > { %8452 = vmatprep.subr.bf16.mxu0 %v14763_v54  ;;  %v3519_v54 = vld [vmem:[#allocation4 + $0x198] sm:$0xff] }
 0x33f   : > { %8670 = vmatpush1.bf16.msra.mxu1 %v14748_v63  ;;  %v16070_v63 = vld [vmem:[%s17403_s16 + $0x70] ss:$24 sps:$4 sm:$0xff]   ;;  %v3607_v52 = vld [vmem:[#allocation4 + $0x458] sm:$0xff] }
 0x340   : > { %8671 = vmatprep.subr.bf16.mxu1 %v14765_v2  ;;  %v3543_v2 = vld [vmem:[#allocation4 + $0x258] sm:$0xff] }
 0x341   : > { %8453 = vmatpush1.bf16.msra.mxu0 %v14762_v61  ;;  %v3558_v61 = vld [vmem:[#allocation4 + $0x2d0] sm:$0xff]  ;;  %v14113_v11 = vcombine.high %v3535_v1, %v3543_v2 }
 0x342   : > { %8454 = vmatprep.subr.bf16.mxu0 %v14779_v62  ;;  %v14097_v62 = vcombine.high %v3519_v54, %v3527_v55  ;;  %v14126_v21 = vcombine.low %v3550_v60, %v3558_v61 }
 0x343   : > { %8672 = vmatpush1.bf16.msra.mxu1 %v14764_v7  ;;  %v14096_v7 = vcombine.low %v3519_v54, %v3527_v55 }
 0x344   : > { %8673 = vmatprep.subr.bf16.mxu1 %v14781_v10  ;;  %v3574_v10 = vld [vmem:[#allocation4 + $0x350] sm:$0xff] }
 0x345   : > { %8455 = vmatpush1.bf16.msra.mxu0 %v14778_v5  ;;  %v16071_v5 = vld [vmem:[%s17403_s16 + $0xa4] ss:$24 sps:$4 sm:$0xff]   ;;  %v14143_v17 = vcombine.high %v3566_v9, %v3574_v10  ;;  %v14142_v8 = vcombine.low %v3566_v9, %v3574_v10 }
 0x346   : > { %8456 = vmatprep.subr.bf16.mxu0 %v14795_v6  ;;  %v14127_v6 = vcombine.high %v3550_v60, %v3558_v61  ;;  %v3615_v60 = vld [vmem:[#allocation4 + $0x498] sm:$0xff] }
 0x347   : > { %8674 = vmatpush1.bf16.msra.mxu1 %v14780_v16  ;;  %v986_v16 = vrot.slane %v961_v45, %v17448_v4  ;;  %v3623_v61 = vld [vmem:[#allocation4 + $0x4d8] sm:$0xff] }
 0x348   : > { %8675 = vmatprep.subr.bf16.mxu1 %v14797_v18  ;;  %v14112_v18 = vcombine.low %v3535_v1, %v3543_v2  ;;  %v14176_v1 = vcombine.low %v3599_v51, %v3607_v52  ;;  %v3646_v2 = vld [vmem:[#allocation4 + $0x590] sm:$0xff]  ;;  %v14192_v10 = vcombine.low %v3615_v60, %v3623_v61 }
 0x349   : > { %8457 = vmatpush1.bf16.msra.mxu0 %v14794_v13  ;;  %v3551_v13 = vld [vmem:[#allocation4 + $0x298] sm:$0xff] }
 0x34a   : > { %8718 = vmatprep.subr.bf16.mxu0 %v14047_v14  ;;  %v3559_v14 = vld [vmem:[#allocation4 + $0x2d8] sm:$0xff] }
 0x34b   : > { %8676 = vmatpush1.bf16.msra.mxu1 %v14796_v26  ;;  %v16073_v26 = vld [vmem:[%s17403_s16 + $0xa0] ss:$24 sps:$4 sm:$0xff]  }
 0x34c   : > { %8459 = vmatmul.mubr.bf16.vlgmr.msra.gmra.mrb[8].mxu0 %v16064_v34  ;;  %8937 = vmatprep.subr.bf16.mxu1 %v14049_v30 }
 0x34d   : > { %8719 = vmatpush1.bf16.msra.mxu0 %v14046_v22  ;;  %8468 = vmatprep.mubr.bf16.mxu0 %v16065_v23  ;;  %v14129_v22 = vcombine.high %v3551_v13, %v3559_v14 }
 0x34e   : > { %8720 = vmatprep.subr.bf16.mxu0 %v14063_v24  ;;  %8678 = vmatmul.mubr.bf16.vlgmr.msra.gmra.mrb[8].mxu1 %v16064_v34 }
 0x34f   : > { %8938 = vmatpush1.bf16.msra.mxu1 %v14048_v38  ;;  %8687 = vmatprep.mubr.bf16.mxu1 %v16065_v23  ;;  %v3606_v38 = vld [vmem:[#allocation4 + $0x450] sm:$0xff] }
 0x350   : > { %8939 = vmatprep.subr.bf16.mxu1 %v14065_v42  ;;  %v3591_v42 = vld [vmem:[#allocation4 + $0x3d8] sm:$0xff] }
 0x351   : > { %8721 = vmatpush1.bf16.msra.mxu0 %v14062_v35  ;;  %v14128_v35 = vcombine.low %v3551_v13, %v3559_v14  ;;  %v14160_v55 = vcombine.low %v3583_v40, %v3591_v42  ;;  %v3647_v14 = vld [vmem:[#allocation4 + $0x598] sm:$0xff] }
 0x352   : > { %8722 = vmatprep.subr.bf16.mxu0 %v14079_v36  ;;  %v3598_v36 = vld [vmem:[#allocation4 + $0x410] sm:$0xff] }
 0x353   : > { %8940 = vmatpush1.bf16.msra.mxu1 %v14064_v50  ;;  %v14175_v46 = vcombine.high %v3598_v36, %v3606_v38  ;;  %v14161_v50 = vcombine.high %v3583_v40, %v3591_v42  ;;  %v3710_v40 = vld [vmem:[#allocation4 + $0x790] sm:$0xff] }
 0x354   : > { %8469 = vmatmul.mubr.bf16.gmra.mrb[12].mxu0 %v16067_v43  ;;  %8941 = vmatprep.subr.bf16.mxu1 %v14081_v53  ;;  %v14174_v53 = vcombine.low %v3598_v36, %v3606_v38  ;;  %v3718_v42 = vld [vmem:[#allocation4 + $0x7d0] sm:$0xff] }
 0x355   : > { %8723 = vmatpush1.bf16.msra.mxu0 %v14078_v47  ;;  %8478 = vmatprep.mubr.bf16.mxu0 %v16068_v20  ;;  %v14144_v47 = vcombine.low %v3567_v27, %v3575_v28 }
 0x356   : > { %8724 = vmatprep.subr.bf16.mxu0 %v14095_v49  ;;  %8688 = vmatmul.mubr.bf16.gmra.mrb[12].mxu1 %v16067_v43  ;;  %v14158_v43 = vcombine.low %v3582_v19, %v3590_v41  ;;  %v3622_v49 = vld [vmem:[#allocation4 + $0x4d0] sm:$0xff] }
 0x357   : > { %8942 = vmatpush1.bf16.msra.mxu1 %v14080_v59  ;;  %8697 = vmatprep.mubr.bf16.mxu1 %v16068_v20  ;;  %v3614_v20 = vld [vmem:[#allocation4 + $0x490] sm:$0xff]  ;;  %v14177_v59 = vcombine.high %v3599_v51, %v3607_v52 }
 0x358   : > { %8943 = vmatprep.subr.bf16.mxu1 %v14097_v62  ;;  %v14191_v54 = vcombine.high %v3614_v20, %v3622_v49  ;;  %v14190_v62 = vcombine.low %v3614_v20, %v3622_v49  ;;  %v3686_v19 = vld [vmem:[#allocation4 + $0x6d0] sm:$0xff]  ;;  %v14287_v20 = vcombine.high %v3710_v40, %v3718_v42 }
 0x359   : > { %8725 = vmatpush1.bf16.msra.mxu0 %v14094_v56  ;;  %v3630_v56 = vld [vmem:[#allocation4 + $0x510] sm:$0xff] }
 0x35a   : > { %8726 = vmatprep.subr.bf16.mxu0 %v14111_v58  ;;  %v3638_v58 = vld [vmem:[#allocation4 + $0x550] sm:$0xff] }
 0x35b   : > { %8944 = vmatpush1.bf16.msra.mxu1 %v14096_v7  ;;  %v3639_v7 = vld [vmem:[#allocation4 + $0x558] sm:$0xff]  ;;  %v14206_v45 = vcombine.low %v3630_v56, %v3638_v58  ;;  %v3734_v51 = vld [vmem:[#allocation4 + $0x850] sm:$0xff] }
 0x35c   : > { %8479 = vmatmul.mubr.bf16.gmra.mrb[16].mxu0 %v16070_v63  ;;  %8945 = vmatprep.subr.bf16.mxu1 %v14113_v11  ;;  %v3662_v11 = vld [vmem:[#allocation4 + $0x610] sm:$0xff] }
 0x35d   : > { %8727 = vmatpush1.bf16.msra.mxu0 %v14110_v3  ;;  %8488 = vmatprep.mubr.bf16.mxu0 %v16071_v5  ;;  %v3654_v3 = vld [vmem:[#allocation4 + $0x5d0] sm:$0xff] }
 0x35e   : > { %8728 = vmatprep.subr.bf16.mxu0 %v14127_v6  ;;  %8698 = vmatmul.mubr.bf16.gmra.mrb[16].mxu1 %v16070_v63  ;;  %v14207_v63 = vcombine.high %v3630_v56, %v3638_v58  ;;  %v3631_v6 = vld [vmem:[#allocation4 + $0x518] sm:$0xff]  ;;  %v14223_v9 = vcombine.high %v3646_v2, %v3654_v3 }
 0x35f   : > { %v3306_v34 = vpop.f32.mrb[4].mxu0  ;;  %8946 = vmatpush1.bf16.msra.mxu1 %v14112_v18  ;;  %8707 = vmatprep.mubr.bf16.mxu1 %v16071_v5  ;;  %v14193_v5 = vcombine.high %v3615_v60, %v3623_v61  ;;  %v14209_v13 = vcombine.high %v3631_v6, %v3639_v7  ;;  %v14208_v18 = vcombine.low %v3631_v6, %v3639_v7  ;;  %v3750_v60 = vld [vmem:[#allocation4 + $0x8d0] sm:$0xff] }
 0x360   : > { %v17453_v23 = vadd.f32 %v3306_v34, %v982_v12  ;;  %v3308_v24 = vpop.f32.mrb[5].mxu0  ;;  %8947 = vmatprep.subr.bf16.mxu1 %v14129_v22  ;;  %v3670_v12 = vld [vmem:[#allocation4 + $0x650] sm:$0xff]  ;;  %v3663_v22 = vld [vmem:[#allocation4 + $0x618] sm:$0xff] }
 0x361   : > { %v17456_v29 = vadd.f32 %v3308_v24, %v986_v16  ;;  %v3310_v30 = vpop.f32.mrb[6].mxu0  ;;  %8729 = vmatpush1.bf16.msra.mxu0 %v14126_v21  ;;  %v3655_v16 = vld [vmem:[#allocation4 + $0x5d8] sm:$0xff]  ;;  %v14222_v21 = vcombine.low %v3646_v2, %v3654_v3  ;;  %v3678_v34 = vld [vmem:[#allocation4 + $0x690] sm:$0xff] }
 0x362   : > { %18496 = vst [vmem:[#allocation26_spill] sm:$0xff] %v17453_v23  ;;  %v3311_v31 = vpop.f32.mrb[7].mxu0  ;;  %8730 = vmatprep.subr.bf16.mxu0 %v14143_v17  ;;  %v14239_v17 = vcombine.high %v3662_v11, %v3670_v12  ;;  %v14225_v41 = vcombine.high %v3647_v14, %v3655_v16  ;;  %v3671_v24 = vld [vmem:[#allocation4 + $0x658] sm:$0xff]  ;;  %v14255_v27 = vcombine.high %v3678_v34, %v3686_v19  ;;  %v3694_v30 = vld [vmem:[#allocation4 + $0x710] sm:$0xff] }
 0x363   : > { %18497 = vst [vmem:[#allocation27_spill] sm:$0xff] %v17456_v29  ;;  %8948 = vmatpush1.bf16.msra.mxu1 %v14128_v35  ;;  %v14224_v28 = vcombine.low %v3647_v14, %v3655_v16  ;;  %v14241_v31 = vcombine.high %v3663_v22, %v3671_v24  ;;  %v3687_v35 = vld [vmem:[#allocation4 + $0x6d8] sm:$0xff]  ;;  %v14254_v36 = vcombine.low %v3678_v34, %v3686_v19  ;;  %v3766_v6 = vld [vmem:[#allocation4 + $0x950] sm:$0xff] }
 0x364   : > { %8489 = vmatmul.mubr.bf16.gmra.mrb[20].mxu0 %v16073_v26  ;;  %8949 = vmatprep.subr.bf16.mxu1 %v14145_v39  ;;  %v14240_v39 = vcombine.low %v3663_v22, %v3671_v24  ;;  %v3774_v16 = vld [vmem:[#allocation4 + $0x990] sm:$0xff]  ;;  %v3767_v34 = vld [vmem:[#allocation4 + $0x958] sm:$0xff] }
 0x365   : > { %8731 = vmatpush1.bf16.msra.mxu0 %v14142_v8  ;;  %8750 = vmatprep.mubr.bf16.mxu0 %v16606_v44  ;;  %v3702_v8 = vld [vmem:[#allocation4 + $0x750] sm:$0xff] }
 0x366   : > { %8732 = vmatprep.subr.bf16.mxu0 %v14159_v33  ;;  %8708 = vmatmul.mubr.bf16.gmra.mrb[20].mxu1 %v16073_v26  ;;  %v14238_v26 = vcombine.low %v3662_v11, %v3670_v12  ;;  %v3679_v33 = vld [vmem:[#allocation4 + $0x698] sm:$0xff]  ;;  %v14271_v38 = vcombine.high %v3694_v30, %v3702_v8  ;;  %v16608_v12 = vld [vmem:[%s17403_s16 + $0x34] ss:$24 sps:$4 sm:$0xff]  }
 0x367   : > { %8950 = vmatpush1.bf16.msra.mxu1 %v14144_v47  ;;  %8969 = vmatprep.mubr.bf16.mxu1 %v16606_v44  ;;  %v3695_v44 = vld [vmem:[#allocation4 + $0x718] sm:$0xff]  ;;  %v14270_v47 = vcombine.low %v3694_v30, %v3702_v8  ;;  %v14256_v49 = vcombine.low %v3679_v33, %v3687_v35  ;;  %v3790_v24 = vld [vmem:[#allocation4 + $0xa10] sm:$0xff] }
 0x368   : > { %8951 = vmatprep.subr.bf16.mxu1 %v14161_v50  ;;  %v3726_v50 = vld [vmem:[#allocation4 + $0x810] sm:$0xff]  ;;  %v3783_v30 = vld [vmem:[#allocation4 + $0x9d8] sm:$0xff] }
 0x369   : > { %8733 = vmatpush1.bf16.msra.mxu0 %v14158_v43  ;;  %v14257_v43 = vcombine.high %v3679_v33, %v3687_v35  ;;  %v14303_v56 = vcombine.high %v3726_v50, %v3734_v51  ;;  %v16609_v8 = vld [vmem:[%s17403_s16 + $0x30] ss:$24 sps:$4 sm:$0xff]   ;;  %v16610_v33 = vld [vmem:[%s17403_s16 + $0x64] ss:$24 sps:$4 sm:$0xff]  }
 0x36a   : > { %8734 = vmatprep.subr.bf16.mxu0 %v14175_v46  ;;  %v3703_v46 = vld [vmem:[#allocation4 + $0x758] sm:$0xff] }
 0x36b   : > { %8952 = vmatpush1.bf16.msra.mxu1 %v14160_v55  ;;  %v14273_v52 = vcombine.high %v3695_v44, %v3703_v46  ;;  %v14286_v55 = vcombine.low %v3710_v40, %v3718_v42  ;;  %v14272_v58 = vcombine.low %v3695_v44, %v3703_v46  ;;  %v3791_v42 = vld [vmem:[#allocation4 + $0xa18] sm:$0xff] }
 0x36c   : > { %8953 = vmatprep.subr.bf16.mxu1 %v14177_v59  ;;  %v3742_v59 = vld [vmem:[#allocation4 + $0x890] sm:$0xff] }
 0x36d   : > { %8735 = vmatpush1.bf16.msra.mxu0 %v14174_v53  ;;  %v3711_v53 = vld [vmem:[#allocation4 + $0x798] sm:$0xff]  ;;  %v14319_v2 = vcombine.high %v3742_v59, %v3750_v60  ;;  %v14318_v11 = vcombine.low %v3742_v59, %v3750_v60  ;;  %v3838_v59 = vld [vmem:[#allocation4 + $0xb90] sm:$0xff] }
 0x36e   : > { %8736 = vmatprep.subr.bf16.mxu0 %v14191_v54  ;;  %v3719_v54 = vld [vmem:[#allocation4 + $0x7d8] sm:$0xff]  ;;  %v3846_v60 = vld [vmem:[#allocation4 + $0xbd0] sm:$0xff] }
 0x36f   : > { %8954 = vmatpush1.bf16.msra.mxu1 %v14176_v1  ;;  %v14289_v61 = vcombine.high %v3711_v53, %v3719_v54  ;;  %v14302_v1 = vcombine.low %v3726_v50, %v3734_v51  ;;  %v14288_v3 = vcombine.low %v3711_v53, %v3719_v54  ;;  %v3807_v51 = vld [vmem:[#allocation4 + $0xa98] sm:$0xff] }
 0x370   : > { %8955 = vmatprep.subr.bf16.mxu1 %v14193_v5  ;;  %v3758_v5 = vld [vmem:[#allocation4 + $0x910] sm:$0xff]  ;;  %v16611_v53 = vld [vmem:[%s17403_s16 + $0x60] ss:$24 sps:$4 sm:$0xff]  }
 0x371   : > { %8737 = vmatpush1.bf16.msra.mxu0 %v14190_v62  ;;  %v3727_v62 = vld [vmem:[#allocation4 + $0x818] sm:$0xff]  ;;  %v14334_v19 = vcombine.low %v3758_v5, %v3766_v6 }
 0x372   : > { %8738 = vmatprep.subr.bf16.mxu0 %v14207_v63  ;;  %v3735_v63 = vld [vmem:[#allocation4 + $0x858] sm:$0xff] }
 0x373   : > { %8956 = vmatpush1.bf16.msra.mxu1 %v14192_v10  ;;  %v14305_v7 = vcombine.high %v3727_v62, %v3735_v63  ;;  %v3751_v10 = vld [vmem:[#allocation4 + $0x8d8] sm:$0xff]  ;;  %v14304_v14 = vcombine.low %v3727_v62, %v3735_v63 }
 0x374   : > { %8957 = vmatprep.subr.bf16.mxu1 %v14209_v13  ;;  %v14335_v13 = vcombine.high %v3758_v5, %v3766_v6  ;;  %v3823_v62 = vld [vmem:[#allocation4 + $0xb18] sm:$0xff]  ;;  %v3854_v5 = vld [vmem:[#allocation4 + $0xc10] sm:$0xff] }
 0x375   : > { %8739 = vmatpush1.bf16.msra.mxu0 %v14206_v45  ;;  %v16607_v45 = vld [vmem:[%s17403_s16] ss:$24 sps:$4 sm:$0xff]   ;;  %v3862_v6 = vld [vmem:[#allocation4 + $0xc50] sm:$0xff] }
 0x376   : > { %8740 = vmatprep.subr.bf16.mxu0 %v14223_v9  ;;  %v3743_v9 = vld [vmem:[#allocation4 + $0x898] sm:$0xff] }
 0x377   : > { %8958 = vmatpush1.bf16.msra.mxu1 %v14208_v18  ;;  %v3759_v18 = vld [vmem:[#allocation4 + $0x918] sm:$0xff]  ;;  %v14320_v22 = vcombine.low %v3743_v9, %v3751_v10 }
 0x378   : > { %8959 = vmatprep.subr.bf16.mxu1 %v14225_v41  ;;  %v3831_v63 = vld [vmem:[#allocation4 + $0xb58] sm:$0xff] }
 0x379   : > { %8741 = vmatpush1.bf16.msra.mxu0 %v14222_v21  ;;  %v3782_v21 = vld [vmem:[#allocation4 + $0x9d0] sm:$0xff] }
 0x37a   : > { %8742 = vmatprep.subr.bf16.mxu0 %v14239_v17  ;;  %v14321_v17 = vcombine.high %v3743_v9, %v3751_v10  ;;  %v14351_v41 = vcombine.high %v3774_v16, %v3782_v21  ;;  %v3847_v9 = vld [vmem:[#allocation4 + $0xbd8] sm:$0xff]  ;;  %v16613_v10 = vld [vmem:[%s17403_s16 + $0x90] ss:$24 sps:$4 sm:$0xff]  }
 0x37b   : > { %8960 = vmatpush1.bf16.msra.mxu1 %v14224_v28  ;;  %v3775_v28 = vld [vmem:[#allocation4 + $0x998] sm:$0xff] }
 0x37c   : > { %8961 = vmatprep.subr.bf16.mxu1 %v14241_v31  ;;  %v14350_v31 = vcombine.low %v3774_v16, %v3782_v21  ;;  %v14353_v40 = vcombine.high %v3775_v28, %v3783_v30  ;;  %v3870_v16 = vld [vmem:[#allocation4 + $0xc90] sm:$0xff] }
 0x37d   : > { %8743 = vmatpush1.bf16.msra.mxu0 %v14238_v26  ;;  %v3798_v26 = vld [vmem:[#allocation4 + $0xa50] sm:$0xff] }
 0x37e   : > { %8744 = vmatprep.subr.bf16.mxu0 %v14255_v27  ;;  %v14337_v27 = vcombine.high %v3759_v18, %v3767_v34  ;;  %v14367_v35 = vcombine.high %v3790_v24, %v3798_v26  ;;  %v14366_v44 = vcombine.low %v3790_v24, %v3798_v26  ;;  %v3878_v21 = vld [vmem:[#allocation4 + $0xcd0] sm:$0xff] }
 0x37f   : > { %8962 = vmatpush1.bf16.msra.mxu1 %v14240_v39  ;;  %v3814_v39 = vld [vmem:[#allocation4 + $0xad0] sm:$0xff] }
 0x380   : > { %8963 = vmatprep.subr.bf16.mxu1 %v14257_v43  ;;  %v3799_v43 = vld [vmem:[#allocation4 + $0xa58] sm:$0xff]  ;;  %v3886_v24 = vld [vmem:[#allocation4 + $0xd10] sm:$0xff] }
 0x381   : > { %8745 = vmatpush1.bf16.msra.mxu0 %v14254_v36  ;;  %v14336_v36 = vcombine.low %v3759_v18, %v3767_v34  ;;  %v14369_v50 = vcombine.high %v3791_v42, %v3799_v43  ;;  %v3855_v18 = vld [vmem:[#allocation4 + $0xc18] sm:$0xff]  ;;  %v3894_v26 = vld [vmem:[#allocation4 + $0xd50] sm:$0xff] }
 0x382   : > { %8746 = vmatprep.subr.bf16.mxu0 %v14271_v38  ;;  %v3806_v38 = vld [vmem:[#allocation4 + $0xa90] sm:$0xff]  ;;  %v3863_v34 = vld [vmem:[#allocation4 + $0xc58] sm:$0xff] }
 0x383   : > { %8964 = vmatpush1.bf16.msra.mxu1 %v14256_v49  ;;  %v14383_v46 = vcombine.high %v3806_v38, %v3814_v39  ;;  %v3830_v49 = vld [vmem:[#allocation4 + $0xb50] sm:$0xff]  ;;  %v14382_v54 = vcombine.low %v3806_v38, %v3814_v39  ;;  %v3887_v39 = vld [vmem:[#allocation4 + $0xd18] sm:$0xff] }
 0x384   : > { %8965 = vmatprep.subr.bf16.mxu1 %v14273_v52  ;;  %v3815_v52 = vld [vmem:[#allocation4 + $0xad8] sm:$0xff] }
 0x385   : > { %8747 = vmatpush1.bf16.msra.mxu0 %v14270_v47  ;;  %v14352_v47 = vcombine.low %v3775_v28, %v3783_v30  ;;  %v3871_v28 = vld [vmem:[#allocation4 + $0xc98] sm:$0xff] }
 0x386   : > { %8748 = vmatprep.subr.bf16.mxu0 %v14287_v20  ;;  %v3822_v20 = vld [vmem:[#allocation4 + $0xb10] sm:$0xff]  ;;  %v3879_v30 = vld [vmem:[#allocation4 + $0xcd8] sm:$0xff] }
 0x387   : > { %8966 = vmatpush1.bf16.msra.mxu1 %v14272_v58  ;;  %v14368_v58 = vcombine.low %v3791_v42, %v3799_v43  ;;  %v14449_v38 = vcombine.high %v3871_v28, %v3879_v30  ;;  %v14462_v42 = vcombine.low %v3886_v24, %v3894_v26 }
 0x388   : > { %8967 = vmatprep.subr.bf16.mxu1 %v14289_v61  ;;  %v14385_v61 = vcombine.high %v3807_v51, %v3815_v52 }
 0x389   : > { %8749 = vmatpush1.bf16.msra.mxu0 %v14286_v55  ;;  %v16612_v55 = vld [vmem:[%s17403_s16 + $0x94] ss:$24 sps:$4 sm:$0xff]  }
 0x38a   : > { %8791 = vmatprep.subr.bf16.mxu0 %v14303_v56  ;;  %v14399_v56 = vcombine.high %v3822_v20, %v3830_v49 }
 0x38b   : > { %8968 = vmatpush1.bf16.msra.mxu1 %v14288_v3  ;;  %v14384_v3 = vcombine.low %v3807_v51, %v3815_v52 }
 0x38c   : > { %8751 = vmatmul.mubr.bf16.vlgmr.msra.gmra.mrb[24].mxu0 %v16607_v45  ;;  %9010 = vmatprep.subr.bf16.mxu1 %v14305_v7  ;;  %v14401_v7 = vcombine.high %v3823_v62, %v3831_v63 }
 0x38d   : > { %8792 = vmatpush1.bf16.msra.mxu0 %v14302_v1  ;;  %8760 = vmatprep.mubr.bf16.mxu0 %v16608_v12  ;;  %v14398_v1 = vcombine.low %v3822_v20, %v3830_v49  ;;  %v3903_v49 = vld [vmem:[#allocation4 + $0xd98] sm:$0xff] }
 0x38e   : > { %8793 = vmatprep.subr.bf16.mxu0 %v14319_v2  ;;  %8970 = vmatmul.mubr.bf16.vlgmr.msra.gmra.mrb[24].mxu1 %v16607_v45  ;;  %v14415_v2 = vcombine.high %v3838_v59, %v3846_v60  ;;  %v3839_v45 = vld [vmem:[#allocation4 + $0xb98] sm:$0xff] }
 0x38f   : > { %9011 = vmatpush1.bf16.msra.mxu1 %v14304_v14  ;;  %8979 = vmatprep.mubr.bf16.mxu1 %v16608_v12  ;;  %v16614_v12 = vld [vmem:[%s17403_s16 + $0xc] ss:$24 sps:$4 sm:$0xff]   ;;  %v14400_v14 = vcombine.low %v3823_v62, %v3831_v63  ;;  %v3950_v63 = vld [vmem:[#allocation4 + $0xf10] sm:$0xff] }
 0x390   : > { %9012 = vmatprep.subr.bf16.mxu1 %v14321_v17  ;;  %v14417_v17 = vcombine.high %v3839_v45, %v3847_v9 }
 0x391   : > { %8794 = vmatpush1.bf16.msra.mxu0 %v14318_v11  ;;  %v14414_v11 = vcombine.low %v3838_v59, %v3846_v60  ;;  %v3927_v59 = vld [vmem:[#allocation4 + $0xe58] sm:$0xff] }
 0x392   : > { %8795 = vmatprep.subr.bf16.mxu0 %v14335_v13  ;;  %v14431_v13 = vcombine.high %v3854_v5, %v3862_v6 }
 0x393   : > { %9013 = vmatpush1.bf16.msra.mxu1 %v14320_v22  ;;  %v14416_v22 = vcombine.low %v3839_v45, %v3847_v9  ;;  %v3966_v9 = vld [vmem:[#allocation4 + $0xf90] sm:$0xff] }
 0x394   : > { %8761 = vmatmul.mubr.bf16.gmra.mrb[28].mxu0 %v16609_v8  ;;  %9014 = vmatprep.subr.bf16.mxu1 %v14337_v27  ;;  %v14433_v27 = vcombine.high %v3855_v18, %v3863_v34 }
 0x395   : > { %8796 = vmatpush1.bf16.msra.mxu0 %v14334_v19  ;;  %8770 = vmatprep.mubr.bf16.mxu0 %v16610_v33  ;;  %v14430_v19 = vcombine.low %v3854_v5, %v3862_v6  ;;  %v3943_v5 = vld [vmem:[#allocation4 + $0xed8] sm:$0xff] }
 0x396   : > { %8797 = vmatprep.subr.bf16.mxu0 %v14351_v41  ;;  %8980 = vmatmul.mubr.bf16.gmra.mrb[28].mxu1 %v16609_v8  ;;  %v14447_v41 = vcombine.high %v3870_v16, %v3878_v21  ;;  %v14446_v8 = vcombine.low %v3870_v16, %v3878_v21 }
 0x397   : > { %9015 = vmatpush1.bf16.msra.mxu1 %v14336_v36  ;;  %8989 = vmatprep.mubr.bf16.mxu1 %v16610_v33  ;;  %v14432_v33 = vcombine.low %v3855_v18, %v3863_v34  ;;  %v3910_v36 = vld [vmem:[#allocation4 + $0xdd0] sm:$0xff] }
 0x398   : > { %9016 = vmatprep.subr.bf16.mxu1 %v14353_v40  ;;  %v3895_v40 = vld [vmem:[#allocation4 + $0xd58] sm:$0xff]  ;;  %v3990_v18 = vld [vmem:[#allocation4 + $0x1050] sm:$0xff] }
 0x399   : > { %8798 = vmatpush1.bf16.msra.mxu0 %v14350_v31  ;;  %v14463_v31 = vcombine.high %v3886_v24, %v3894_v26  ;;  %v14465_v20 = vcombine.high %v3887_v39, %v3895_v40 }
 0x39a   : > { %8799 = vmatprep.subr.bf16.mxu0 %v14367_v35  ;;  %v3902_v35 = vld [vmem:[#allocation4 + $0xd90] sm:$0xff] }
 0x39b   : > { %9017 = vmatpush1.bf16.msra.mxu1 %v14352_v47  ;;  %v14479_v43 = vcombine.high %v3902_v35, %v3910_v36  ;;  %v3926_v47 = vld [vmem:[#allocation4 + $0xe50] sm:$0xff]  ;;  %v14478_v51 = vcombine.low %v3902_v35, %v3910_v36 }
 0x39c   : > { %8771 = vmatmul.mubr.bf16.gmra.mrb[32].mxu0 %v16611_v53  ;;  %9018 = vmatprep.subr.bf16.mxu1 %v14369_v50  ;;  %v3911_v50 = vld [vmem:[#allocation4 + $0xdd8] sm:$0xff] }
 0x39d   : > { %8800 = vmatpush1.bf16.msra.mxu0 %v14366_v44  ;;  %8780 = vmatprep.mubr.bf16.mxu0 %v16612_v55  ;;  %v14448_v44 = vcombine.low %v3871_v28, %v3879_v30  ;;  %v14480_v62 = vcombine.low %v3903_v49, %v3911_v50  ;;  %v4006_v28 = vld [vmem:[#allocation4 + $0x10d0] sm:$0xff] }
 0x39e   : > { %8801 = vmatprep.subr.bf16.mxu0 %v14383_v46  ;;  %8990 = vmatmul.mubr.bf16.gmra.mrb[32].mxu1 %v16611_v53  ;;  %v3918_v46 = vld [vmem:[#allocation4 + $0xe10] sm:$0xff]  ;;  %v14464_v53 = vcombine.low %v3887_v39, %v3895_v40 }
 0x39f   : > { %9019 = vmatpush1.bf16.msra.mxu1 %v14368_v58  ;;  %8999 = vmatprep.mubr.bf16.mxu1 %v16612_v55  ;;  %v14495_v52 = vcombine.high %v3918_v46, %v3926_v47  ;;  %v3942_v55 = vld [vmem:[#allocation4 + $0xed0] sm:$0xff]  ;;  %v3919_v58 = vld [vmem:[#allocation4 + $0xe18] sm:$0xff]  ;;  %v14494_v60 = vcombine.low %v3918_v46, %v3926_v47 }
 0x3a0   : > { %9020 = vmatprep.subr.bf16.mxu1 %v14385_v61  ;;  %v14496_v45 = vcombine.low %v3919_v58, %v3927_v59  ;;  %v4022_v39 = vld [vmem:[#allocation4 + $0x1150] sm:$0xff] }
 0x3a1   : > { %8802 = vmatpush1.bf16.msra.mxu0 %v14382_v54  ;;  %v3934_v54 = vld [vmem:[#allocation4 + $0xe90] sm:$0xff] }
 0x3a2   : > { %8803 = vmatprep.subr.bf16.mxu0 %v14399_v56  ;;  %v14481_v56 = vcombine.high %v3903_v49, %v3911_v50  ;;  %v14511_v61 = vcombine.high %v3934_v54, %v3942_v55  ;;  %v14510_v6 = vcombine.low %v3934_v54, %v3942_v55  ;;  %v16616_v47 = vld [vmem:[%s17403_s16 + $0x3c] ss:$24 sps:$4 sm:$0xff]  }
 0x3a3   : > { %9021 = vmatpush1.bf16.msra.mxu1 %v14384_v3  ;;  %v3935_v3 = vld [vmem:[#allocation4 + $0xe98] sm:$0xff]  ;;  %v4030_v50 = vld [vmem:[#allocation4 + $0x1190] sm:$0xff] }
 0x3a4   : > { %8781 = vmatmul.mubr.bf16.gmra.mrb[36].mxu0 %v16613_v10  ;;  %9022 = vmatprep.subr.bf16.mxu1 %v14401_v7  ;;  %v14512_v21 = vcombine.low %v3935_v3, %v3943_v5  ;;  %v4023_v54 = vld [vmem:[#allocation4 + $0x1158] sm:$0xff] }
 0x3a5   : > { %8804 = vmatpush1.bf16.msra.mxu0 %v14398_v1  ;;  %8823 = vmatprep.mubr.bf16.mxu0 %v16614_v12  ;;  %v3958_v1 = vld [vmem:[#allocation4 + $0xf50] sm:$0xff] }
 0x3a6   : > { %8805 = vmatprep.subr.bf16.mxu0 %v14415_v2  ;;  %9000 = vmatmul.mubr.bf16.gmra.mrb[36].mxu1 %v16613_v10  ;;  %v14497_v2 = vcombine.high %v3919_v58, %v3927_v59  ;;  %v14527_v7 = vcombine.high %v3950_v63, %v3958_v1  ;;  %v3974_v10 = vld [vmem:[#allocation4 + $0xfd0] sm:$0xff] }
 0x3a7   : > { %9023 = vmatpush1.bf16.msra.mxu1 %v14400_v14  ;;  %9042 = vmatprep.mubr.bf16.mxu1 %v16614_v12  ;;  %v3951_v12 = vld [vmem:[#allocation4 + $0xf18] sm:$0xff]  ;;  %v14526_v14 = vcombine.low %v3950_v63, %v3958_v1  ;;  %v14543_v16 = vcombine.high %v3966_v9, %v3974_v10  ;;  %v4046_v59 = vld [vmem:[#allocation4 + $0x1210] sm:$0xff] }
 0x3a8   : > { %9024 = vmatprep.subr.bf16.mxu1 %v14417_v17  ;;  %v3982_v17 = vld [vmem:[#allocation4 + $0x1010] sm:$0xff]  ;;  %v4039_v63 = vld [vmem:[#allocation4 + $0x11d8] sm:$0xff] }
 0x3a9   : > { %8806 = vmatpush1.bf16.msra.mxu0 %v14414_v11  ;;  %v14513_v11 = vcombine.high %v3935_v3, %v3943_v5  ;;  %v14559_v24 = vcombine.high %v3982_v17, %v3990_v18  ;;  %v16617_v1 = vld [vmem:[%s17403_s16 + $0x38] ss:$24 sps:$4 sm:$0xff]   ;;  %v16618_v3 = vld [vmem:[%s17403_s16 + $0x6c] ss:$24 sps:$4 sm:$0xff]  }
 0x3aa   : > { %8807 = vmatprep.subr.bf16.mxu0 %v14431_v13  ;;  %v3959_v13 = vld [vmem:[#allocation4 + $0xf58] sm:$0xff] }
 0x3ab   : > { %9025 = vmatpush1.bf16.msra.mxu1 %v14416_v22  ;;  %v14529_v34 = vcombine.high %v3951_v12, %v3959_v13  ;;  %v14542_v22 = vcombine.low %v3966_v9, %v3974_v10  ;;  %v14528_v26 = vcombine.low %v3951_v12, %v3959_v13  ;;  %v4047_v10 = vld [vmem:[#allocation4 + $0x1218] sm:$0xff] }
 0x3ac   : > { %9026 = vmatprep.subr.bf16.mxu1 %v14433_v27  ;;  %v3998_v27 = vld [vmem:[#allocation4 + $0x1090] sm:$0xff] }
 0x3ad   : > { %8808 = vmatpush1.bf16.msra.mxu0 %v14430_v19  ;;  %v3967_v19 = vld [vmem:[#allocation4 + $0xf98] sm:$0xff]  ;;  %v14575_v35 = vcombine.high %v3998_v27, %v4006_v28  ;;  %v14574_v46 = vcombine.low %v3998_v27, %v4006_v28  ;;  %v4094_v27 = vld [vmem:[#allocation4 + $0x1390] sm:$0xff] }
 0x3ae   : > { %8809 = vmatprep.subr.bf16.mxu0 %v14447_v41  ;;  %v3975_v41 = vld [vmem:[#allocation4 + $0xfd8] sm:$0xff]  ;;  %v4102_v28 = vld [vmem:[#allocation4 + $0x13d0] sm:$0xff] }
 0x3af   : > { %9027 = vmatpush1.bf16.msra.mxu1 %v14432_v33  ;;  %v14545_v30 = vcombine.high %v3967_v19, %v3975_v41  ;;  %v14558_v33 = vcombine.low %v3982_v17, %v3990_v18  ;;  %v14544_v36 = vcombine.low %v3967_v19, %v3975_v41  ;;  %v4063_v18 = vld [vmem:[#allocation4 + $0x1298] sm:$0xff]  ;;  %v16619_v19 = vld [vmem:[%s17403_s16 + $0x68] ss:$24 sps:$4 sm:$0xff]  }
 0x3b0   : > { %9028 = vmatprep.subr.bf16.mxu1 %v14449_v38  ;;  %v4014_v38 = vld [vmem:[#allocation4 + $0x1110] sm:$0xff] }
 0x3b1   : > { %8810 = vmatpush1.bf16.msra.mxu0 %v14446_v8  ;;  %v3983_v8 = vld [vmem:[#allocation4 + $0x1018] sm:$0xff]  ;;  %v14590_v55 = vcombine.low %v4014_v38, %v4022_v39 }
 0x3b2   : > { %8811 = vmatprep.subr.bf16.mxu0 %v14463_v31  ;;  %v3991_v31 = vld [vmem:[#allocation4 + $0x1058] sm:$0xff] }
 0x3b3   : > { %9029 = vmatpush1.bf16.msra.mxu1 %v14448_v44  ;;  %v14561_v40 = vcombine.high %v3983_v8, %v3991_v31  ;;  %v4007_v44 = vld [vmem:[#allocation4 + $0x10d8] sm:$0xff]  ;;  %v14560_v49 = vcombine.low %v3983_v8, %v3991_v31 }
 0x3b4   : > { %9030 = vmatprep.subr.bf16.mxu1 %v14465_v20  ;;  %v14591_v20 = vcombine.high %v4014_v38, %v4022_v39  ;;  %v4079_v8 = vld [vmem:[#allocation4 + $0x1318] sm:$0xff]  ;;  %v4110_v38 = vld [vmem:[#allocation4 + $0x1410] sm:$0xff] }
 0x3b5   : > { %8812 = vmatpush1.bf16.msra.mxu0 %v14462_v42  ;;  %v16615_v42 = vld [vmem:[%s17403_s16 + $0x8] ss:$24 sps:$4 sm:$0xff]   ;;  %v4087_v31 = vld [vmem:[#allocation4 + $0x1358] sm:$0xff]  ;;  %v4118_v39 = vld [vmem:[#allocation4 + $0x1450] sm:$0xff] }
 0x3b6   : > { %8813 = vmatprep.subr.bf16.mxu0 %v14479_v43  ;;  %v3999_v43 = vld [vmem:[#allocation4 + $0x1098] sm:$0xff] }
 0x3b7   : > { %9031 = vmatpush1.bf16.msra.mxu1 %v14464_v53  ;;  %v4015_v53 = vld [vmem:[#allocation4 + $0x1118] sm:$0xff]  ;;  %v14576_v58 = vcombine.low %v3999_v43, %v4007_v44 }
 0x3b8   : > { %9032 = vmatprep.subr.bf16.mxu1 %v14481_v56 }
 0x3b9   : > { %8814 = vmatpush1.bf16.msra.mxu0 %v14478_v51  ;;  %v4038_v51 = vld [vmem:[#allocation4 + $0x11d0] sm:$0xff] }
 0x3ba   : > { %8815 = vmatprep.subr.bf16.mxu0 %v14495_v52  ;;  %v14577_v52 = vcombine.high %v3999_v43, %v4007_v44  ;;  %v14607_v56 = vcombine.high %v4030_v50, %v4038_v51  ;;  %v4103_v43 = vld [vmem:[#allocation4 + $0x13d8] sm:$0xff] }
 0x3bb   : > { %9033 = vmatpush1.bf16.msra.mxu1 %v14480_v62  ;;  %v4031_v62 = vld [vmem:[#allocation4 + $0x1198] sm:$0xff] }
 0x3bc   : > { %9034 = vmatprep.subr.bf16.mxu1 %v14497_v2  ;;  %v14606_v2 = vcombine.low %v4030_v50, %v4038_v51  ;;  %v14609_v9 = vcombine.high %v4031_v62, %v4039_v63  ;;  %v16621_v44 = vld [vmem:[%s17403_s16 + $0x98] ss:$24 sps:$4 sm:$0xff]  }
 0x3bd   : > { %8816 = vmatpush1.bf16.msra.mxu0 %v14494_v60  ;;  %v4054_v60 = vld [vmem:[#allocation4 + $0x1250] sm:$0xff] }
 0x3be   : > { %8817 = vmatprep.subr.bf16.mxu0 %v14511_v61  ;;  %v14593_v61 = vcombine.high %v4015_v53, %v4023_v54  ;;  %v14623_v5 = vcombine.high %v4046_v59, %v4054_v60  ;;  %v14622_v12 = vcombine.low %v4046_v59, %v4054_v60  ;;  %v4126_v50 = vld [vmem:[#allocation4 + $0x1490] sm:$0xff] }
 0x3bf   : > { %9035 = vmatpush1.bf16.msra.mxu1 %v14496_v45  ;;  %v4070_v45 = vld [vmem:[#allocation4 + $0x12d0] sm:$0xff] }
 0x3c0   : > { %9036 = vmatprep.subr.bf16.mxu1 %v14513_v11  ;;  %v4055_v11 = vld [vmem:[#allocation4 + $0x1258] sm:$0xff]  ;;  %v4134_v51 = vld [vmem:[#allocation4 + $0x14d0] sm:$0xff] }
 0x3c1   : > { %8818 = vmatpush1.bf16.msra.mxu0 %v14510_v6  ;;  %v14592_v6 = vcombine.low %v4015_v53, %v4023_v54  ;;  %v14625_v17 = vcombine.high %v4047_v10, %v4055_v11  ;;  %v4111_v53 = vld [vmem:[#allocation4 + $0x1418] sm:$0xff]  ;;  %v4142_v59 = vld [vmem:[#allocation4 + $0x1510] sm:$0xff] }
 0x3c2   : > { %8819 = vmatprep.subr.bf16.mxu0 %v14527_v7  ;;  %v4062_v7 = vld [vmem:[#allocation4 + $0x1290] sm:$0xff]  ;;  %v4119_v54 = vld [vmem:[#allocation4 + $0x1458] sm:$0xff] }
 0x3c3   : > { %9037 = vmatpush1.bf16.msra.mxu1 %v14512_v21  ;;  %v14639_v13 = vcombine.high %v4062_v7, %v4070_v45  ;;  %v4086_v21 = vld [vmem:[#allocation4 + $0x1350] sm:$0xff]  ;;  %v14638_v41 = vcombine.low %v4062_v7, %v4070_v45  ;;  %v4143_v45 = vld [vmem:[#allocation4 + $0x1518] sm:$0xff] }
 0x3c4   : > { %9038 = vmatprep.subr.bf16.mxu1 %v14529_v34  ;;  %v4071_v34 = vld [vmem:[#allocation4 + $0x12d8] sm:$0xff]  ;;  %v4150_v60 = vld [vmem:[#allocation4 + $0x1550] sm:$0xff] }
 0x3c5   : > { %8820 = vmatpush1.bf16.msra.mxu0 %v14526_v14  ;;  %v14608_v14 = vcombine.low %v4031_v62, %v4039_v63  ;;  %v4127_v62 = vld [vmem:[#allocation4 + $0x1498] sm:$0xff] }
 0x3c6   : > { %8821 = vmatprep.subr.bf16.mxu0 %v14543_v16  ;;  %v4078_v16 = vld [vmem:[#allocation4 + $0x1310] sm:$0xff]  ;;  %v4135_v63 = vld [vmem:[#allocation4 + $0x14d8] sm:$0xff] }
 0x3c7   : > { %9039 = vmatpush1.bf16.msra.mxu1 %v14528_v26  ;;  %v14624_v26 = vcombine.low %v4047_v10, %v4055_v11  ;;  %v14705_v7 = vcombine.high %v4127_v62, %v4135_v63  ;;  %v14718_v10 = vcombine.low %v4142_v59, %v4150_v60 }
 0x3c8   : > { %9040 = vmatprep.subr.bf16.mxu1 %v14545_v30  ;;  %v14641_v30 = vcombine.high %v4063_v18, %v4071_v34 }
 0x3c9   : > { %8822 = vmatpush1.bf16.msra.mxu0 %v14542_v22  ;;  %v16620_v22 = vld [vmem:[%s17403_s16 + $0x9c] ss:$24 sps:$4 sm:$0xff]  }
 0x3ca   : > { %8864 = vmatprep.subr.bf16.mxu0 %v14559_v24  ;;  %v14655_v24 = vcombine.high %v4078_v16, %v4086_v21 }
 0x3cb   : > { %9041 = vmatpush1.bf16.msra.mxu1 %v14544_v36  ;;  %v14640_v36 = vcombine.low %v4063_v18, %v4071_v34 }
 0x3cc   : > { %8824 = vmatmul.mubr.bf16.vlgmr.msra.gmra.mrb[24].mxu0 %v16615_v42  ;;  %9083 = vmatprep.subr.bf16.mxu1 %v14561_v40  ;;  %v14657_v40 = vcombine.high %v4079_v8, %v4087_v31 }
 0x3cd   : > { %8865 = vmatpush1.bf16.msra.mxu0 %v14558_v33  ;;  %8833 = vmatprep.mubr.bf16.mxu0 %v16616_v47  ;;  %v14654_v33 = vcombine.low %v4078_v16, %v4086_v21  ;;  %v4159_v21 = vld [vmem:[#allocation4 + $0x1598] sm:$0xff] }
 0x3ce   : > { %8866 = vmatprep.subr.bf16.mxu0 %v14575_v35  ;;  %9043 = vmatmul.mubr.bf16.vlgmr.msra.gmra.mrb[24].mxu1 %v16615_v42  ;;  %v14671_v35 = vcombine.high %v4094_v27, %v4102_v28  ;;  %v4095_v42 = vld [vmem:[#allocation4 + $0x1398] sm:$0xff] }
 0x3cf   : > { %9084 = vmatpush1.bf16.msra.mxu1 %v14560_v49  ;;  %9052 = vmatprep.mubr.bf16.mxu1 %v16616_v47  ;;  %v16622_v47 = vld [vmem:[%s17403_s16 + $0x14] ss:$24 sps:$4 sm:$0xff]   ;;  %v14656_v49 = vcombine.low %v4079_v8, %v4087_v31 }
 0x3d0   : > { %9085 = vmatprep.subr.bf16.mxu1 %v14577_v52  ;;  %v14673_v52 = vcombine.high %v4095_v42, %v4103_v43  ;;  %v4206_v31 = vld [vmem:[#allocation4 + $0x1710] sm:$0xff] }
 0x3d1   : > { %8867 = vmatpush1.bf16.msra.mxu0 %v14574_v46  ;;  %v14670_v46 = vcombine.low %v4094_v27, %v4102_v28  ;;  %v4183_v27 = vld [vmem:[#allocation4 + $0x1658] sm:$0xff] }
 0x3d2   : > { %8868 = vmatprep.subr.bf16.mxu0 %v14591_v20  ;;  %v14687_v20 = vcombine.high %v4110_v38, %v4118_v39 }
 0x3d3   : > { %9086 = vmatpush1.bf16.msra.mxu1 %v14576_v58  ;;  %v14672_v58 = vcombine.low %v4095_v42, %v4103_v43  ;;  %v4222_v43 = vld [vmem:[#allocation4 + $0x1790] sm:$0xff] }
 0x3d4   : > { %8834 = vmatmul.mubr.bf16.gmra.mrb[28].mxu0 %v16617_v1  ;;  %9087 = vmatprep.subr.bf16.mxu1 %v14593_v61  ;;  %v14689_v61 = vcombine.high %v4111_v53, %v4119_v54 }
 0x3d5   : > { %8869 = vmatpush1.bf16.msra.mxu0 %v14590_v55  ;;  %8843 = vmatprep.mubr.bf16.mxu0 %v16618_v3  ;;  %v14686_v55 = vcombine.low %v4110_v38, %v4118_v39  ;;  %v4199_v38 = vld [vmem:[#allocation4 + $0x16d8] sm:$0xff] }
 0x3d6   : > { %8870 = vmatprep.subr.bf16.mxu0 %v14607_v56  ;;  %9053 = vmatmul.mubr.bf16.gmra.mrb[28].mxu1 %v16617_v1  ;;  %v14703_v56 = vcombine.high %v4126_v50, %v4134_v51  ;;  %v14702_v1 = vcombine.low %v4126_v50, %v4134_v51 }
 0x3d7   : > { %9088 = vmatpush1.bf16.msra.mxu1 %v14592_v6  ;;  %9062 = vmatprep.mubr.bf16.mxu1 %v16618_v3  ;;  %v14688_v3 = vcombine.low %v4111_v53, %v4119_v54  ;;  %v4166_v6 = vld [vmem:[#allocation4 + $0x15d0] sm:$0xff]  ;;  %v3480_v53 = vld [vmem:[#allocation4 + $0x60] sm:$0xff] }
 0x3d8   : > { %9089 = vmatprep.subr.bf16.mxu1 %v14609_v9  ;;  %v4151_v9 = vld [vmem:[#allocation4 + $0x1558] sm:$0xff] }
 0x3d9   : > { %8871 = vmatpush1.bf16.msra.mxu0 %v14606_v2  ;;  %v14719_v2 = vcombine.high %v4142_v59, %v4150_v60  ;;  %v14721_v16 = vcombine.high %v4143_v45, %v4151_v9 }
 0x3da   : > { %8872 = vmatprep.subr.bf16.mxu0 %v14623_v5  ;;  %v4158_v5 = vld [vmem:[#allocation4 + $0x1590] sm:$0xff] }
 0x3db   : > { %9090 = vmatpush1.bf16.msra.mxu1 %v14608_v14  ;;  %v14735_v11 = vcombine.high %v4158_v5, %v4166_v6  ;;  %v4182_v14 = vld [vmem:[#allocation4 + $0x1650] sm:$0xff]  ;;  %v14734_v18 = vcombine.low %v4158_v5, %v4166_v6  ;;  %v3481_v5 = vld [vmem:[#allocation4 + $0x68] sm:$0xff]  ;;  %v16623_v6 = vld [vmem:[#allocation10] sm:$0xff] }
 0x3dc   : > { %8844 = vmatmul.mubr.bf16.gmra.mrb[32].mxu0 %v16619_v19  ;;  %9091 = vmatprep.subr.bf16.mxu1 %v14625_v17  ;;  %v4167_v17 = vld [vmem:[#allocation4 + $0x15d8] sm:$0xff] }
 0x3dd   : > { %8873 = vmatpush1.bf16.msra.mxu0 %v14622_v12  ;;  %8853 = vmatprep.mubr.bf16.mxu0 %v16620_v22  ;;  %v14704_v12 = vcombine.low %v4127_v62, %v4135_v63  ;;  %v14736_v8 = vcombine.low %v4159_v21, %v4167_v17  ;;  %v3429_v62 = vpop.f32.mrb[4].mxu1  ;;  %v3488_v63 = vld [vmem:[#allocation4 + $0xa0] sm:$0xff] }
 0x3de   : > { %8874 = vmatprep.subr.bf16.mxu0 %v14639_v13  ;;  %9063 = vmatmul.mubr.bf16.gmra.mrb[32].mxu1 %v16619_v19  ;;  %v4174_v13 = vld [vmem:[#allocation4 + $0x1610] sm:$0xff]  ;;  %v14720_v19 = vcombine.low %v4143_v45, %v4151_v9  ;;  %v17480_v9 = vsub.s32 7, %v17441_v57 }
 0x3df   : > { %9092 = vmatpush1.bf16.msra.mxu1 %v14624_v26  ;;  %9072 = vmatprep.mubr.bf16.mxu1 %v16620_v22  ;;  %v14751_v34 = vcombine.high %v4174_v13, %v4182_v14  ;;  %v4198_v22 = vld [vmem:[#allocation4 + $0x16d0] sm:$0xff]  ;;  %v4175_v26 = vld [vmem:[#allocation4 + $0x1618] sm:$0xff]  ;;  %v14750_v28 = vcombine.low %v4174_v13, %v4182_v14 }
 0x3e0   : > { %9093 = vmatprep.subr.bf16.mxu1 %v14641_v30  ;;  %v14752_v42 = vcombine.low %v4175_v26, %v4183_v27 }
 0x3e1   : > { %8875 = vmatpush1.bf16.msra.mxu0 %v14638_v41  ;;  %v4190_v41 = vld [vmem:[#allocation4 + $0x1690] sm:$0xff] }
 0x3e2   : > { %8876 = vmatprep.subr.bf16.mxu0 %v14655_v24  ;;  %v14737_v24 = vcombine.high %v4159_v21, %v4167_v17  ;;  %v14767_v30 = vcombine.high %v4190_v41, %v4198_v22  ;;  %v14766_v39 = vcombine.low %v4190_v41, %v4198_v22  ;;  %v3512_v21 = vld [vmem:[#allocation4 + $0x160] sm:$0xff]  ;;  %v3489_v41 = vld [vmem:[#allocation4 + $0xa8] sm:$0xff] }
 0x3e3   : > { %9094 = vmatpush1.bf16.msra.mxu1 %v14640_v36  ;;  %v4191_v36 = vld [vmem:[#allocation4 + $0x1698] sm:$0xff]  ;;  %v3497_v22 = vld [vmem:[#allocation4 + $0xe8] sm:$0xff] }
 0x3e4   : > { %8854 = vmatmul.mubr.bf16.gmra.mrb[36].mxu0 %v16621_v44  ;;  %9095 = vmatprep.subr.bf16.mxu1 %v14657_v40  ;;  %v14768_v51 = vcombine.low %v4191_v36, %v4199_v38 }
 0x3e5   : > { %8877 = vmatpush1.bf16.msra.mxu0 %v14654_v33  ;;  %8896 = vmatprep.mubr.bf16.mxu0 %v16622_v47  ;;  %v4214_v33 = vld [vmem:[#allocation4 + $0x1750] sm:$0xff] }
 0x3e6   : > { %8878 = vmatprep.subr.bf16.mxu0 %v14671_v35  ;;  %9073 = vmatmul.mubr.bf16.gmra.mrb[36].mxu1 %v16621_v44  ;;  %v14753_v35 = vcombine.high %v4175_v26, %v4183_v27  ;;  %v14783_v40 = vcombine.high %v4206_v31, %v4214_v33  ;;  %v4230_v44 = vld [vmem:[#allocation4 + $0x17d0] sm:$0xff]  ;;  %v16625_v26 = vld [vmem:[%s17403_s16 + $0x44] ss:$24 sps:$4 sm:$0xff]  }
 0x3e7   : > { %9096 = vmatpush1.bf16.msra.mxu1 %v14656_v49  ;;  %9115 = vmatprep.mubr.bf16.mxu1 %v16622_v47  ;;  %v4207_v47 = vld [vmem:[#allocation4 + $0x1718] sm:$0xff]  ;;  %v14782_v49 = vcombine.low %v4206_v31, %v4214_v33  ;;  %v14799_v50 = vcombine.high %v4222_v43, %v4230_v44  ;;  %v3528_v31 = vld [vmem:[#allocation4 + $0x1e0] sm:$0xff]  ;;  %v14069_v33 = vcombine.high %v3489_v41, %v3497_v22 }
 0x3e8   : > { %9097 = vmatprep.subr.bf16.mxu1 %v14673_v52  ;;  %v3472_v52 = vld [vmem:[#allocation4 + $0x20] sm:$0xff] }
 0x3e9   : > { %8879 = vmatpush1.bf16.msra.mxu0 %v14670_v46  ;;  %v14769_v46 = vcombine.high %v4191_v36, %v4199_v38  ;;  %v14051_v59 = vcombine.high %v3472_v52, %v3480_v53  ;;  %v14050_v45 = vcombine.low %v3472_v52, %v3480_v53  ;;  %v3513_v36 = vld [vmem:[#allocation4 + $0x168] sm:$0xff]  ;;  %v3552_v53 = vld [vmem:[#allocation4 + $0x2a0] sm:$0xff] }
 0x3ea   : > { %8880 = vmatprep.subr.bf16.mxu0 %v14687_v20  ;;  %v4215_v20 = vld [vmem:[#allocation4 + $0x1758] sm:$0xff] }
 0x3eb   : > { %9098 = vmatpush1.bf16.msra.mxu1 %v14672_v58  ;;  %v14785_v54 = vcombine.high %v4207_v47, %v4215_v20  ;;  %v14798_v58 = vcombine.low %v4222_v43, %v4230_v44  ;;  %v14784_v60 = vcombine.low %v4207_v47, %v4215_v20  ;;  %v3544_v43 = vld [vmem:[#allocation4 + $0x260] sm:$0xff]  ;;  %v3521_v47 = vld [vmem:[#allocation4 + $0x1a8] sm:$0xff] }
 0x3ec   : > { %9099 = vmatprep.subr.bf16.mxu1 %v14689_v61  ;;  %v17476_v61 = vsub.s32 6, %v17441_v57  ;;  %v3529_v20 = vld [vmem:[#allocation4 + $0x1e8] sm:$0xff] }
 0x3ed   : > { %8881 = vmatpush1.bf16.msra.mxu0 %v14686_v55  ;;  %v4223_v55 = vld [vmem:[#allocation4 + $0x1798] sm:$0xff] }
 0x3ee   : > { %8882 = vmatprep.subr.bf16.mxu0 %v14703_v56  ;;  %v4231_v56 = vld [vmem:[#allocation4 + $0x17d8] sm:$0xff] }
 0x3ef   : > { %9100 = vmatpush1.bf16.msra.mxu1 %v14688_v3  ;;  %v3473_v3 = vld [vmem:[#allocation4 + $0x28] sm:$0xff] }
 0x3f0   : > { %9101 = vmatprep.subr.bf16.mxu1 %v14705_v7  ;;  %v990_v7 = vrot.slane %v16623_v6, %v17476_v61  ;;  %v14053_v17 = vcombine.high %v3473_v3, %v3481_v5 }
 0x3f1   : > { %8883 = vmatpush1.bf16.msra.mxu0 %v14702_v1  ;;  %v3496_v1 = vld [vmem:[#allocation4 + $0xe0] sm:$0xff] }
 0x3f2   : > { %8884 = vmatprep.subr.bf16.mxu0 %v14719_v2  ;;  %v14801_v2 = vcombine.high %v4223_v55, %v4231_v56  ;;  %v17482_v13 = vadd.f32 %v3429_v62, %v990_v7  ;;  %v14100_v62 = vcombine.low %v3521_v47, %v3529_v20  ;;  %v3553_v7 = vld [vmem:[#allocation4 + $0x2a8] sm:$0xff] }
 0x3f3   : > { %9102 = vmatpush1.bf16.msra.mxu1 %v14704_v12  ;;  %v14800_v12 = vcombine.low %v4223_v55, %v4231_v56  ;;  %v14101_v55 = vcombine.high %v3521_v47, %v3529_v20  ;;  %v3537_v56 = vld [vmem:[#allocation4 + $0x228] sm:$0xff] }
 0x3f4   : > { %9103 = vmatprep.subr.bf16.mxu1 %v14721_v16  ;;  %18498 = vst [vmem:[#allocation28_spill] sm:$0xff] %v17482_v13  ;;  %v3504_v16 = vld [vmem:[#allocation4 + $0x120] sm:$0xff]  ;;  %v3585_v47 = vld [vmem:[#allocation4 + $0x3a8] sm:$0xff]  ;;  %v3571_v13 = vld [vmem:[#allocation4 + $0x338] sm:$0xff] }
 0x3f5   : > { %8885 = vmatpush1.bf16.msra.mxu0 %v14718_v10  ;;  %v3431_v10 = vpop.f32.mrb[5].mxu1  ;;  %v14082_v38 = vcombine.low %v3504_v16, %v3512_v21  ;;  %v3593_v20 = vld [vmem:[#allocation4 + $0x3e8] sm:$0xff] }
 0x3f6   : > { %8886 = vmatprep.subr.bf16.mxu0 %v14735_v11  ;;  %v14067_v11 = vcombine.high %v3488_v63, %v3496_v1  ;;  %v3433_v14 = vpop.f32.mrb[6].mxu1 }
 0x3f7   : > { %9104 = vmatpush1.bf16.msra.mxu1 %v14720_v19  ;;  %v16624_v19 = vld [vmem:[%s17403_s16 + $0x10] ss:$24 sps:$4 sm:$0xff]  }
 0x3f8   : > { %9105 = vmatprep.subr.bf16.mxu1 %v14737_v24  ;;  %v14066_v24 = vcombine.low %v3488_v63, %v3496_v1  ;;  %v4236_v63 = vld [vmem:[#allocation12] sm:$0xff]  ;;  %v3568_v1 = vld [vmem:[#allocation4 + $0x320] sm:$0xff] }
 0x3f9   : > { %8887 = vmatpush1.bf16.msra.mxu0 %v14734_v18  ;;  %v994_v18 = vrot.slane %v16623_v6, %v17480_v9  ;;  %v16628_v6 = vld [vmem:[%s17403_s16 + $0x70] ss:$24 sps:$4 sm:$0xff]  }
 0x3fa   : > { %8888 = vmatprep.subr.bf16.mxu0 %v14751_v34  ;;  %v3434_v34 = vpop.f32.mrb[7].mxu1 }
 0x3fb   : > { %9106 = vmatpush1.bf16.msra.mxu1 %v14736_v8  ;;  %v17487_v27 = vadd.f32 %v3431_v10, %v994_v18  ;;  %v3520_v8 = vld [vmem:[#allocation4 + $0x1a0] sm:$0xff]  ;;  %v17496_v10 = vsub.s32 1, %v17441_v57 }
 0x3fc   : > { %9107 = vmatprep.subr.bf16.mxu1 %v14753_v35  ;;  %v3505_v35 = vld [vmem:[#allocation4 + $0x128] sm:$0xff] }
 0x3fd   : > { %8889 = vmatpush1.bf16.msra.mxu0 %v14750_v28  ;;  %18499 = vst [vmem:[#allocation29_spill] sm:$0xff] %v17487_v27  ;;  %v14083_v28 = vcombine.high %v3504_v16, %v3512_v21  ;;  %v14085_v44 = vcombine.high %v3505_v35, %v3513_v36  ;;  %v14084_v52 = vcombine.low %v3505_v35, %v3513_v36  ;;  %18501 = vst [vmem:[#allocation31_spill] sm:$0xff] %v17496_v10  ;;  %v3584_v21 = vld [vmem:[#allocation4 + $0x3a0] sm:$0xff]  ;;  %v16652_v27 = vld [vmem:[%s17403_s16 + $0x74] ss:$24 sps:$4 sm:$0xff]  }
 0x3fe   : > { %8890 = vmatprep.subr.bf16.mxu0 %v14767_v30  ;;  %v14052_v30 = vcombine.low %v3473_v3, %v3481_v5  ;;  %v17492_v5 = vsub.s32 0, %v17441_v57  ;;  %v17503_v34 = vrot.slane %v4236_v63, %v17496_v10 }
 0x3ff   : > { %9108 = vmatpush1.bf16.msra.mxu1 %v14752_v42  ;;  %v3536_v42 = vld [vmem:[#allocation4 + $0x220] sm:$0xff] }
 0x400   : > { %9109 = vmatprep.subr.bf16.mxu1 %v14769_v46  ;;  %v16626_v46 = vld [vmem:[%s17403_s16 + $0x40] ss:$24 sps:$4 sm:$0xff]   ;;  %18500 = vst [vmem:[#allocation30_spill] sm:$0xff] %v17492_v5  ;;  %v17500_v14 = vrot.slane %v4236_v63, %v17492_v5 }
 0x401   : > { %8891 = vmatpush1.bf16.msra.mxu0 %v14766_v39  ;;  %v14099_v39 = vcombine.high %v3520_v8, %v3528_v31 }
 0x402   : > { %8892 = vmatprep.subr.bf16.mxu0 %v14783_v40  ;;  %v14068_v40 = vcombine.low %v3489_v41, %v3497_v22 }
 0x403   : > { %9110 = vmatpush1.bf16.msra.mxu1 %v14768_v51  ;;  %v14115_v51 = vcombine.high %v3536_v42, %v3544_v43 }
 0x404   : > { %9111 = vmatprep.subr.bf16.mxu1 %v14785_v54  ;;  %v3560_v54 = vld [vmem:[#allocation4 + $0x2e0] sm:$0xff] }
 0x405   : > { %8893 = vmatpush1.bf16.msra.mxu0 %v14782_v49  ;;  %v14098_v49 = vcombine.low %v3520_v8, %v3528_v31 }
 0x406   : > { %8894 = vmatprep.subr.bf16.mxu0 %v14799_v50  ;;  %v16627_v50 = vld [vmem:[%s17403_s16 + $0x74] ss:$24 sps:$4 sm:$0xff]  }
 0x407   : > { %9112 = vmatpush1.bf16.msra.mxu1 %v14784_v60  ;;  %v14131_v60 = vcombine.high %v3552_v53, %v3560_v54 }
 0x408   : > { %9113 = vmatprep.subr.bf16.mxu1 %v14801_v2  ;;  %v3576_v2 = vld [vmem:[#allocation4 + $0x360] sm:$0xff] }
 0x409   : > { %8895 = vmatpush1.bf16.msra.mxu0 %v14798_v58  ;;  %v3545_v58 = vld [vmem:[#allocation4 + $0x268] sm:$0xff]  ;;  %v14147_v16 = vcombine.high %v3568_v1, %v3576_v2 }
 0x40a   : > { %9156 = vmatprep.subr.bf16.mxu0 %v14051_v59  ;;  %v14114_v59 = vcombine.low %v3536_v42, %v3544_v43  ;;  %v14117_v3 = vcombine.high %v3537_v56, %v3545_v58  ;;  %v14116_v18 = vcombine.low %v3537_v56, %v3545_v58  ;;  %v3608_v42 = vld [vmem:[#allocation4 + $0x460] sm:$0xff]  ;;  %v14165_v58 = vcombine.high %v3585_v47, %v3593_v20 }
 0x40b   : > { %9114 = vmatpush1.bf16.msra.mxu1 %v14800_v12  ;;  %v16629_v12 = vld [vmem:[%s17403_s16 + $0xa4] ss:$24 sps:$4 sm:$0xff]  }
 0x40c   : > { %8897 = vmatmul.mubr.bf16.vlgmr.msra.gmra.mrb[24].mxu0 %v16624_v19  ;;  %9375 = vmatprep.subr.bf16.mxu1 %v14053_v17  ;;  %v3592_v17 = vld [vmem:[#allocation4 + $0x3e0] sm:$0xff] }
 0x40d   : > { %9157 = vmatpush1.bf16.msra.mxu0 %v14050_v45  ;;  %8906 = vmatprep.mubr.bf16.mxu0 %v16625_v26  ;;  %v3561_v45 = vld [vmem:[#allocation4 + $0x2e8] sm:$0xff]  ;;  %v14163_v8 = vcombine.high %v3584_v21, %v3592_v17 }
 0x40e   : > { %9158 = vmatprep.subr.bf16.mxu0 %v14067_v11  ;;  %9116 = vmatmul.mubr.bf16.vlgmr.msra.gmra.mrb[24].mxu1 %v16624_v19  ;;  %v14130_v11 = vcombine.low %v3552_v53, %v3560_v54  ;;  %v14133_v41 = vcombine.high %v3553_v7, %v3561_v45  ;;  %v14132_v36 = vcombine.low %v3553_v7, %v3561_v45  ;;  %v3616_v53 = vld [vmem:[#allocation4 + $0x4a0] sm:$0xff] }
 0x40f   : > { %9376 = vmatpush1.bf16.msra.mxu1 %v14052_v30  ;;  %9125 = vmatprep.mubr.bf16.mxu1 %v16625_v26  ;;  %v3577_v26 = vld [vmem:[#allocation4 + $0x368] sm:$0xff]  ;;  %v14146_v30 = vcombine.low %v3568_v1, %v3576_v2  ;;  %v3624_v54 = vld [vmem:[#allocation4 + $0x4e0] sm:$0xff]  ;;  %v14164_v45 = vcombine.low %v3585_v47, %v3593_v20 }
 0x410   : > { %9377 = vmatprep.subr.bf16.mxu1 %v14069_v33  ;;  %v14195_v2 = vcombine.high %v3616_v53, %v3624_v54 }
 0x411   : > { %9159 = vmatpush1.bf16.msra.mxu0 %v14066_v24  ;;  %v3569_v24 = vld [vmem:[#allocation4 + $0x328] sm:$0xff] }
 0x412   : > { %9160 = vmatprep.subr.bf16.mxu0 %v14083_v28  ;;  %v14149_v43 = vcombine.high %v3569_v24, %v3577_v26 }
 0x413   : > { %9378 = vmatpush1.bf16.msra.mxu1 %v14068_v40  ;;  %v3600_v40 = vld [vmem:[#allocation4 + $0x420] sm:$0xff] }
 0x414   : > { %8907 = vmatmul.mubr.bf16.gmra.mrb[28].mxu0 %v16626_v46  ;;  %9379 = vmatprep.subr.bf16.mxu1 %v14085_v44  ;;  %v14178_v1 = vcombine.low %v3600_v40, %v3608_v42 }
 0x415   : > { %9161 = vmatpush1.bf16.msra.mxu0 %v14082_v38  ;;  %8916 = vmatprep.mubr.bf16.mxu0 %v16627_v50 }
 0x416   : > { %9162 = vmatprep.subr.bf16.mxu0 %v14099_v39  ;;  %9126 = vmatmul.mubr.bf16.gmra.mrb[28].mxu1 %v16626_v46  ;;  %v16630_v46 = vld [vmem:[%s17403_s16 + $0xa0] ss:$24 sps:$4 sm:$0xff]  }
 0x417   : > { %9380 = vmatpush1.bf16.msra.mxu1 %v14084_v52  ;;  %9135 = vmatprep.mubr.bf16.mxu1 %v16627_v50  ;;  %v14162_v50 = vcombine.low %v3584_v21, %v3592_v17  ;;  %v14179_v52 = vcombine.high %v3600_v40, %v3608_v42  ;;  %v3640_v21 = vld [vmem:[#allocation4 + $0x560] sm:$0xff]  ;;  %v3633_v42 = vld [vmem:[#allocation4 + $0x528] sm:$0xff] }
 0x418   : > { %9381 = vmatprep.subr.bf16.mxu1 %v14101_v55  ;;  %v14148_v55 = vcombine.low %v3569_v24, %v3577_v26  ;;  %v14194_v24 = vcombine.low %v3616_v53, %v3624_v54 }
 0x419   : > { %9163 = vmatpush1.bf16.msra.mxu0 %v14098_v49  ;;  %v16651_v49 = vld [vmem:[%s17403_s16 + $0x40] ss:$24 sps:$4 sm:$0xff]  }
 0x41a   : > { %9164 = vmatprep.subr.bf16.mxu0 %v14115_v51  ;;  %v16631_v51 = vld [vmem:[%s17403_s16 + $0x4] ss:$24 sps:$4 sm:$0xff]  }
 0x41b   : > { %9382 = vmatpush1.bf16.msra.mxu1 %v14100_v62  ;;  %v3609_v62 = vld [vmem:[#allocation4 + $0x468] sm:$0xff] }
 0x41c   : > { %8917 = vmatmul.mubr.bf16.gmra.mrb[32].mxu0 %v16628_v6  ;;  %9383 = vmatprep.subr.bf16.mxu1 %v14117_v3 }
 0x41d   : > { %9165 = vmatpush1.bf16.msra.mxu0 %v14114_v59  ;;  %8926 = vmatprep.mubr.bf16.mxu0 %v16629_v12 }
 0x41e   : > { %9166 = vmatprep.subr.bf16.mxu0 %v14131_v60  ;;  %9136 = vmatmul.mubr.bf16.gmra.mrb[32].mxu1 %v16628_v6  ;;  %v3601_v60 = vld [vmem:[#allocation4 + $0x428] sm:$0xff] }
 0x41f   : > { %v8460_v19 = vpop.f32.mrb[8].mxu0  ;;  %9384 = vmatpush1.bf16.msra.mxu1 %v14116_v18  ;;  %9145 = vmatprep.mubr.bf16.mxu1 %v16629_v12  ;;  %v14181_v17 = vcombine.high %v3601_v60, %v3609_v62  ;;  %v3507_v18 = vld [vmem:[#allocation4 + $0x138] sm:$0xff] }
 0x420   : > { %v8462_v22 = vpop.f32.mrb[9].mxu0  ;;  %v17506_v31 = vadd.f32 %v8460_v19, %v17500_v14  ;;  %9385 = vmatprep.subr.bf16.mxu1 %v14133_v41  ;;  %v3617_v19 = vld [vmem:[#allocation4 + $0x4a8] sm:$0xff] }
 0x421   : > { %v8464_v28 = vpop.f32.mrb[10].mxu0  ;;  %9167 = vmatpush1.bf16.msra.mxu0 %v14130_v11  ;;  %v17512_v38 = vadd.f32 %v8462_v22, %v17503_v34  ;;  %v3625_v41 = vld [vmem:[#allocation4 + $0x4e8] sm:$0xff] }
 0x422   : > { %v17509_v33 = vadd.f32 %v8464_v28, %v17500_v14  ;;  %v8466_v35 = vpop.f32.mrb[11].mxu0  ;;  %9168 = vmatprep.subr.bf16.mxu0 %v14147_v16  ;;  %v3632_v16 = vld [vmem:[#allocation4 + $0x520] sm:$0xff]  ;;  %v14196_v53 = vcombine.low %v3617_v19, %v3625_v41 }
 0x423   : > { %v17515_v39 = vadd.f32 %v8466_v35, %v17503_v34  ;;  %9386 = vmatpush1.bf16.msra.mxu1 %v14132_v36  ;;  %v14211_v26 = vcombine.high %v3632_v16, %v3640_v21  ;;  %v3648_v28 = vld [vmem:[#allocation4 + $0x5a0] sm:$0xff]  ;;  %v14197_v36 = vcombine.high %v3617_v19, %v3625_v41  ;;  %v14210_v47 = vcombine.low %v3632_v16, %v3640_v21 }
 0x424   : > { %8927 = vmatmul.mubr.bf16.gmra.mrb[36].mxu0 %v16630_v46  ;;  %9387 = vmatprep.subr.bf16.mxu1 %v14149_v43  ;;  %v3641_v43 = vld [vmem:[#allocation4 + $0x568] sm:$0xff]  ;;  %v3688_v16 = vld [vmem:[#allocation4 + $0x6e0] sm:$0xff] }
 0x425   : > { %9169 = vmatpush1.bf16.msra.mxu0 %v14146_v30  ;;  %9188 = vmatprep.mubr.bf16.mxu0 %v16631_v51  ;;  %v3656_v30 = vld [vmem:[#allocation4 + $0x5e0] sm:$0xff]  ;;  %v14212_v21 = vcombine.low %v3633_v42, %v3641_v43 }
 0x426   : > { %9170 = vmatprep.subr.bf16.mxu0 %v14163_v8  ;;  %9146 = vmatmul.mubr.bf16.gmra.mrb[36].mxu1 %v16630_v46  ;;  %v14180_v8 = vcombine.low %v3601_v60, %v3609_v62  ;;  %v14227_v20 = vcombine.high %v3648_v28, %v3656_v30  ;;  %v3649_v62 = vld [vmem:[#allocation4 + $0x5a8] sm:$0xff]  ;;  %v3530_v60 = vld [vmem:[#allocation4 + $0x1f0] sm:$0xff] }
 0x427   : > { %v8470_v56 = vpop.f32.mrb[12].mxu0  ;;  %9388 = vmatpush1.bf16.msra.mxu1 %v14148_v55  ;;  %9407 = vmatprep.mubr.bf16.mxu1 %v16631_v51 }
 0x428   : > { %v8472_v59 = vpop.f32.mrb[13].mxu0  ;;  %v17524_v3 = vadd.f32 %v8470_v56, %v17500_v14  ;;  %9389 = vmatprep.subr.bf16.mxu1 %v14165_v58  ;;  %v3664_v56 = vld [vmem:[#allocation4 + $0x620] sm:$0xff] }
 0x429   : > { %v8474_v63 = vpop.f32.mrb[14].mxu0  ;;  %9171 = vmatpush1.bf16.msra.mxu0 %v14162_v50  ;;  %v17530_v11 = vadd.f32 %v8472_v59, %v17503_v34  ;;  %v3672_v58 = vld [vmem:[#allocation4 + $0x660] sm:$0xff]  ;;  %v14213_v59 = vcombine.high %v3633_v42, %v3641_v43 }
 0x42a   : > { %v17527_v6 = vadd.f32 %v8474_v63, %v17500_v14  ;;  %v8476_v7 = vpop.f32.mrb[15].mxu0  ;;  %9172 = vmatprep.subr.bf16.mxu0 %v14179_v52  ;;  %v3657_v63 = vld [vmem:[#allocation4 + $0x5e8] sm:$0xff] }
 0x42b   : > { %v17533_v12 = vadd.f32 %v8476_v7, %v17503_v34  ;;  %9390 = vmatpush1.bf16.msra.mxu1 %v14164_v45  ;;  %v14243_v7 = vcombine.high %v3664_v56, %v3672_v58  ;;  %v3680_v45 = vld [vmem:[#allocation4 + $0x6a0] sm:$0xff]  ;;  %v14229_v19 = vcombine.high %v3649_v62, %v3657_v63  ;;  %v14228_v42 = vcombine.low %v3649_v62, %v3657_v63 }
 0x42c   : > { %9391 = vmatprep.subr.bf16.mxu1 %v14181_v17 }
 0x42d   : > { %9173 = vmatpush1.bf16.msra.mxu0 %v14178_v1 }
 0x42e   : > { %9174 = vmatprep.subr.bf16.mxu0 %v14195_v2  ;;  %v14226_v2 = vcombine.low %v3648_v28, %v3656_v30 }
 0x42f   : > { %v8480_v35 = vpop.f32.mrb[16].mxu0  ;;  %9392 = vmatpush1.bf16.msra.mxu1 %v14180_v8 }
 0x430   : > { %v8482_v40 = vpop.f32.mrb[17].mxu0  ;;  %v17540_v50 = vadd.f32 %v8480_v35, %v17500_v14  ;;  %9393 = vmatprep.subr.bf16.mxu1 %v14197_v36  ;;  %v14242_v35 = vcombine.low %v3664_v56, %v3672_v58  ;;  %v14259_v36 = vcombine.high %v3680_v45, %v3688_v16  ;;  %v3681_v56 = vld [vmem:[#allocation4 + $0x6a8] sm:$0xff]  ;;  %v3483_v58 = vld [vmem:[#allocation4 + $0x78] sm:$0xff] }
 0x431   : > { %v8484_v46 = vpop.f32.mrb[18].mxu0  ;;  %9175 = vmatpush1.bf16.msra.mxu0 %v14194_v24  ;;  %v17546_v54 = vadd.f32 %v8482_v40, %v17503_v34  ;;  %v3665_v24 = vld [vmem:[#allocation4 + $0x628] sm:$0xff] }
 0x432   : > { %v17543_v51 = vadd.f32 %v8484_v46, %v17500_v14  ;;  %v8486_v52 = vpop.f32.mrb[19].mxu0  ;;  %9176 = vmatprep.subr.bf16.mxu0 %v14211_v26  ;;  %v3673_v26 = vld [vmem:[#allocation4 + $0x668] sm:$0xff] }
 0x433   : > { %v17549_v55 = vadd.f32 %v8486_v52, %v17503_v34  ;;  %9394 = vmatpush1.bf16.msra.mxu1 %v14196_v53  ;;  %v14245_v52 = vcombine.high %v3665_v24, %v3673_v26  ;;  %v14244_v63 = vcombine.low %v3665_v24, %v3673_v26  ;;  %v3522_v53 = vld [vmem:[#allocation4 + $0x1b0] sm:$0xff] }
 0x434   : > { %9395 = vmatprep.subr.bf16.mxu1 %v14213_v59  ;;  %v14258_v59 = vcombine.low %v3680_v45, %v3688_v16  ;;  %v3713_v16 = vld [vmem:[#allocation4 + $0x7a8] sm:$0xff]  ;;  %v14102_v44 = vcombine.low %v3522_v53, %v3530_v60 }
 0x435   : > { %9177 = vmatpush1.bf16.msra.mxu0 %v14210_v47  ;;  %v3696_v47 = vld [vmem:[#allocation4 + $0x720] sm:$0xff] }
 0x436   : > { %9178 = vmatprep.subr.bf16.mxu0 %v14227_v20  ;;  %v3704_v20 = vld [vmem:[#allocation4 + $0x760] sm:$0xff] }
 0x437   : > { %v8490_v17 = vpop.f32.mrb[20].mxu0  ;;  %9396 = vmatpush1.bf16.msra.mxu1 %v14212_v21  ;;  %v14275_v62 = vcombine.high %v3696_v47, %v3704_v20  ;;  %v3697_v21 = vld [vmem:[#allocation4 + $0x728] sm:$0xff] }
 0x438   : > { %v8492_v41 = vpop.f32.mrb[21].mxu0  ;;  %v17556_v40 = vadd.f32 %v8490_v17, %v17500_v14  ;;  %9397 = vmatprep.subr.bf16.mxu1 %v14229_v19  ;;  %v3705_v17 = vld [vmem:[#allocation4 + $0x768] sm:$0xff]  ;;  %v14274_v19 = vcombine.low %v3696_v47, %v3704_v20 }
 0x439   : > { %v8494_v8 = vpop.f32.mrb[22].mxu0  ;;  %9179 = vmatpush1.bf16.msra.mxu0 %v14226_v2  ;;  %v17562_v43 = vadd.f32 %v8492_v41, %v17503_v34  ;;  %v3720_v2 = vld [vmem:[#allocation4 + $0x7e0] sm:$0xff]  ;;  %v14277_v45 = vcombine.high %v3697_v21, %v3705_v17  ;;  %v3729_v20 = vld [vmem:[#allocation4 + $0x828] sm:$0xff] }
 0x43a   : > { %v17559_v28 = vadd.f32 %v8494_v8, %v17500_v14  ;;  %v8496_v30 = vpop.f32.mrb[23].mxu0  ;;  %9180 = vmatprep.subr.bf16.mxu0 %v14243_v7  ;;  %v3689_v14 = vld [vmem:[#allocation4 + $0x6e8] sm:$0xff] }
 0x43b   : > { %v17565_v46 = vadd.f32 %v8496_v30, %v17503_v34  ;;  %9398 = vmatpush1.bf16.msra.mxu1 %v14228_v42  ;;  %v3712_v34 = vld [vmem:[#allocation4 + $0x7a0] sm:$0xff]  ;;  %v14261_v7 = vcombine.high %v3681_v56, %v3689_v14  ;;  %v14260_v8 = vcombine.low %v3681_v56, %v3689_v14 }
 0x43c   : > { %9399 = vmatprep.subr.bf16.mxu1 %v14245_v52  ;;  %v14291_v41 = vcombine.high %v3712_v34, %v3720_v2  ;;  %v3728_v30 = vld [vmem:[#allocation4 + $0x820] sm:$0xff]  ;;  %v14290_v24 = vcombine.low %v3712_v34, %v3720_v2 }
 0x43d   : > { %9181 = vmatpush1.bf16.msra.mxu0 %v14242_v35  ;;  %v3721_v35 = vld [vmem:[#allocation4 + $0x7e8] sm:$0xff]  ;;  %v14307_v26 = vcombine.high %v3728_v30, %v3736_v48  ;;  %v3744_v42 = vld [vmem:[#allocation4 + $0x8a0] sm:$0xff]  ;;  %v14306_v56 = vcombine.low %v3728_v30, %v3736_v48 }
 0x43e   : > { %9182 = vmatprep.subr.bf16.mxu0 %v14259_v36  ;;  %v14276_v36 = vcombine.low %v3697_v21, %v3705_v17  ;;  %v3752_v52 = vld [vmem:[#allocation4 + $0x8e0] sm:$0xff]  ;;  %v14293_v47 = vcombine.high %v3713_v16, %v3721_v35  ;;  %v3745_v21 = vld [vmem:[#allocation4 + $0x8a8] sm:$0xff] }
 0x43f   : > { %9400 = vmatpush1.bf16.msra.mxu1 %v14244_v63  ;;  %v14323_v14 = vcombine.high %v3744_v42, %v3752_v52  ;;  %v3760_v63 = vld [vmem:[#allocation4 + $0x920] sm:$0xff]  ;;  %v3753_v17 = vld [vmem:[#allocation4 + $0x8e8] sm:$0xff] }
 0x440   : > { %9401 = vmatprep.subr.bf16.mxu1 %v14261_v7  ;;  %v3768_v34 = vld [vmem:[#allocation4 + $0x960] sm:$0xff] }
 0x441   : > { %9183 = vmatpush1.bf16.msra.mxu0 %v14258_v59  ;;  %v3737_v59 = vld [vmem:[#allocation4 + $0x868] sm:$0xff]  ;;  %v16632_v7 = vld [vmem:[%s17403_s16] ss:$24 sps:$4 sm:$0xff]  }
 0x442   : > { %9184 = vmatprep.subr.bf16.mxu0 %v14275_v62  ;;  %v14292_v62 = vcombine.low %v3713_v16, %v3721_v35  ;;  %v14309_v2 = vcombine.high %v3729_v20, %v3737_v59  ;;  %v14308_v48 = vcombine.low %v3729_v20, %v3737_v59  ;;  %v3776_v30 = vld [vmem:[#allocation4 + $0x9a0] sm:$0xff]  ;;  %v14325_v16 = vcombine.high %v3745_v21, %v3753_v17  ;;  %v3761_v35 = vld [vmem:[#allocation4 + $0x928] sm:$0xff] }
 0x443   : > { %9402 = vmatpush1.bf16.msra.mxu1 %v14260_v8  ;;  %v14339_v8 = vcombine.high %v3760_v63, %v3768_v34  ;;  %v3777_v20 = vld [vmem:[#allocation4 + $0x9a8] sm:$0xff] }
 0x444   : > { %9403 = vmatprep.subr.bf16.mxu1 %v14277_v45  ;;  %v3784_v45 = vld [vmem:[#allocation4 + $0x9e0] sm:$0xff]  ;;  %v3785_v59 = vld [vmem:[#allocation4 + $0x9e8] sm:$0xff] }
 0x445   : > { %9185 = vmatpush1.bf16.msra.mxu0 %v14274_v19  ;;  %v14322_v19 = vcombine.low %v3744_v42, %v3752_v52  ;;  %v14324_v42 = vcombine.low %v3745_v21, %v3753_v17  ;;  %v3792_v52 = vld [vmem:[#allocation4 + $0xa20] sm:$0xff]  ;;  %v14357_v21 = vcombine.high %v3777_v20, %v3785_v59  ;;  %v3793_v17 = vld [vmem:[#allocation4 + $0xa28] sm:$0xff] }
 0x446   : > { %9186 = vmatprep.subr.bf16.mxu0 %v14291_v41  ;;  %v16633_v41 = vld [vmem:[%s17403_s16 + $0x34] ss:$24 sps:$4 sm:$0xff]  }
 0x447   : > { %9404 = vmatpush1.bf16.msra.mxu1 %v14276_v36  ;;  %v14355_v36 = vcombine.high %v3776_v30, %v3784_v45 }
 0x448   : > { %9405 = vmatprep.subr.bf16.mxu1 %v14293_v47  ;;  %v3800_v47 = vld [vmem:[#allocation4 + $0xa60] sm:$0xff] }
 0x449   : > { %9187 = vmatpush1.bf16.msra.mxu0 %v14290_v24  ;;  %v3769_v24 = vld [vmem:[#allocation4 + $0x968] sm:$0xff] }
 0x44a   : > { %9229 = vmatprep.subr.bf16.mxu0 %v14307_v26  ;;  %v14338_v26 = vcombine.low %v3760_v63, %v3768_v34  ;;  %v14371_v63 = vcombine.high %v3792_v52, %v3800_v47  ;;  %v14340_v34 = vcombine.low %v3761_v35, %v3769_v24 }
 0x44b   : > { %9406 = vmatpush1.bf16.msra.mxu1 %v14292_v62  ;;  %v14354_v62 = vcombine.low %v3776_v30, %v3784_v45  ;;  %v14356_v30 = vcombine.low %v3777_v20, %v3785_v59  ;;  %v3824_v45 = vld [vmem:[#allocation4 + $0xb20] sm:$0xff]  ;;  %v3825_v59 = vld [vmem:[#allocation4 + $0xb28] sm:$0xff] }
 0x44c   : > { %9189 = vmatmul.mubr.bf16.vlgmr.msra.gmra.mrb[40].mxu0 %v16632_v7  ;;  %9448 = vmatprep.subr.bf16.mxu1 %v14309_v2  ;;  %v16635_v2 = vld [vmem:[%s17403_s16 + $0x64] ss:$24 sps:$4 sm:$0xff]  }
 0x44d   : > { %9230 = vmatpush1.bf16.msra.mxu0 %v14306_v56  ;;  %9198 = vmatprep.mubr.bf16.mxu0 %v16633_v41  ;;  %v14341_v56 = vcombine.high %v3761_v35, %v3769_v24  ;;  %v3809_v35 = vld [vmem:[#allocation4 + $0xaa8] sm:$0xff] }
 0x44e   : > { %9231 = vmatprep.subr.bf16.mxu0 %v14323_v14  ;;  %9408 = vmatmul.mubr.bf16.vlgmr.msra.gmra.mrb[40].mxu1 %v16632_v7  ;;  %v16634_v14 = vld [vmem:[%s17403_s16 + $0x30] ss:$24 sps:$4 sm:$0xff]   ;;  %v3808_v7 = vld [vmem:[#allocation4 + $0xaa0] sm:$0xff] }
 0x44f   : > { %9449 = vmatpush1.bf16.msra.mxu1 %v14308_v48  ;;  %9417 = vmatprep.mubr.bf16.mxu1 %v16633_v41  ;;  %v14370_v41 = vcombine.low %v3792_v52, %v3800_v47  ;;  %v3817_v24 = vld [vmem:[#allocation4 + $0xae8] sm:$0xff] }
 0x450   : > { %9450 = vmatprep.subr.bf16.mxu1 %v14325_v16  ;;  %v3832_v16 = vld [vmem:[#allocation4 + $0xb60] sm:$0xff]  ;;  %v14389_v20 = vcombine.high %v3809_v35, %v3817_v24 }
 0x451   : > { %9232 = vmatpush1.bf16.msra.mxu0 %v14322_v19  ;;  %v3816_v19 = vld [vmem:[#allocation4 + $0xae0] sm:$0xff]  ;;  %v14403_v52 = vcombine.high %v3824_v45, %v3832_v16 }
 0x452   : > { %9233 = vmatprep.subr.bf16.mxu0 %v14339_v8  ;;  %v3801_v8 = vld [vmem:[#allocation4 + $0xa68] sm:$0xff]  ;;  %v14387_v48 = vcombine.high %v3808_v7, %v3816_v19 }
 0x453   : > { %9451 = vmatpush1.bf16.msra.mxu1 %v14324_v42  ;;  %v14386_v42 = vcombine.low %v3808_v7, %v3816_v19  ;;  %v14372_v47 = vcombine.low %v3793_v17, %v3801_v8  ;;  %v14388_v7 = vcombine.low %v3809_v35, %v3817_v24  ;;  %v3856_v19 = vld [vmem:[#allocation4 + $0xc20] sm:$0xff]  ;;  %v3857_v24 = vld [vmem:[#allocation4 + $0xc28] sm:$0xff] }
 0x454   : > { %9199 = vmatmul.mubr.bf16.gmra.mrb[44].mxu0 %v16634_v14  ;;  %9452 = vmatprep.subr.bf16.mxu1 %v14341_v56  ;;  %v16637_v56 = vld [vmem:[%s17403_s16 + $0x94] ss:$24 sps:$4 sm:$0xff]  }
 0x455   : > { %9234 = vmatpush1.bf16.msra.mxu0 %v14338_v26  ;;  %9208 = vmatprep.mubr.bf16.mxu0 %v16635_v2  ;;  %v14373_v26 = vcombine.high %v3793_v17, %v3801_v8  ;;  %v3841_v17 = vld [vmem:[#allocation4 + $0xba8] sm:$0xff] }
 0x456   : > { %9235 = vmatprep.subr.bf16.mxu0 %v14355_v36  ;;  %9418 = vmatmul.mubr.bf16.gmra.mrb[44].mxu1 %v16634_v14  ;;  %v16636_v36 = vld [vmem:[%s17403_s16 + $0x60] ss:$24 sps:$4 sm:$0xff]   ;;  %v3849_v8 = vld [vmem:[#allocation4 + $0xbe8] sm:$0xff] }
 0x457   : > { %9453 = vmatpush1.bf16.msra.mxu1 %v14340_v34  ;;  %9427 = vmatprep.mubr.bf16.mxu1 %v16635_v2  ;;  %v3840_v14 = vld [vmem:[#allocation4 + $0xba0] sm:$0xff]  ;;  %v14402_v2 = vcombine.low %v3824_v45, %v3832_v16  ;;  %v14421_v35 = vcombine.high %v3841_v17, %v3849_v8 }
 0x458   : > { %9454 = vmatprep.subr.bf16.mxu1 %v14357_v21  ;;  %v3864_v21 = vld [vmem:[#allocation4 + $0xc60] sm:$0xff] }
 0x459   : > { %9236 = vmatpush1.bf16.msra.mxu0 %v14354_v62  ;;  %v3848_v62 = vld [vmem:[#allocation4 + $0xbe0] sm:$0xff]  ;;  %v14435_v45 = vcombine.high %v3856_v19, %v3864_v21 }
 0x45a   : > { %9237 = vmatprep.subr.bf16.mxu0 %v14371_v63  ;;  %v3833_v63 = vld [vmem:[#allocation4 + $0xb68] sm:$0xff]  ;;  %v14419_v34 = vcombine.high %v3840_v14, %v3848_v62 }
 0x45b   : > { %9455 = vmatpush1.bf16.msra.mxu1 %v14356_v30  ;;  %v14418_v30 = vcombine.low %v3840_v14, %v3848_v62  ;;  %v14404_v16 = vcombine.low %v3825_v59, %v3833_v63  ;;  %v3888_v14 = vld [vmem:[#allocation4 + $0xd20] sm:$0xff] }
 0x45c   : > { %9209 = vmatmul.mubr.bf16.gmra.mrb[48].mxu0 %v16636_v36  ;;  %9456 = vmatprep.subr.bf16.mxu1 %v14373_v26  ;;  %v16639_v26 = vld [vmem:[%s17403_s16 + $0xc] ss:$24 sps:$4 sm:$0xff]  }
 0x45d   : > { %9238 = vmatpush1.bf16.msra.mxu0 %v14370_v41  ;;  %9218 = vmatprep.mubr.bf16.mxu0 %v16637_v56  ;;  %v14405_v41 = vcombine.high %v3825_v59, %v3833_v63  ;;  %v3896_v62 = vld [vmem:[#allocation4 + $0xd60] sm:$0xff]  ;;  %v3881_v59 = vld [vmem:[#allocation4 + $0xce8] sm:$0xff] }
 0x45e   : > { %9239 = vmatprep.subr.bf16.mxu0 %v14387_v48  ;;  %9428 = vmatmul.mubr.bf16.gmra.mrb[48].mxu1 %v16636_v36  ;;  %v16638_v48 = vld [vmem:[%s17403_s16 + $0x90] ss:$24 sps:$4 sm:$0xff]   ;;  %v3872_v36 = vld [vmem:[#allocation4 + $0xca0] sm:$0xff] }
 0x45f   : > { %9457 = vmatpush1.bf16.msra.mxu1 %v14372_v47  ;;  %9437 = vmatprep.mubr.bf16.mxu1 %v16637_v56  ;;  %v14434_v56 = vcombine.low %v3856_v19, %v3864_v21  ;;  %v3912_v19 = vld [vmem:[#allocation4 + $0xde0] sm:$0xff] }
 0x460   : > { %9458 = vmatprep.subr.bf16.mxu1 %v14389_v20  ;;  %v14420_v20 = vcombine.low %v3841_v17, %v3849_v8  ;;  %v14466_v17 = vcombine.low %v3888_v14, %v3896_v62 }
 0x461   : > { %9240 = vmatpush1.bf16.msra.mxu0 %v14386_v42  ;;  %v3880_v42 = vld [vmem:[#allocation4 + $0xce0] sm:$0xff] }
 0x462   : > { %9241 = vmatprep.subr.bf16.mxu0 %v14403_v52  ;;  %v3865_v52 = vld [vmem:[#allocation4 + $0xc68] sm:$0xff]  ;;  %v14451_v47 = vcombine.high %v3872_v36, %v3880_v42  ;;  %v14450_v63 = vcombine.low %v3872_v36, %v3880_v42 }
 0x463   : > { %9459 = vmatpush1.bf16.msra.mxu1 %v14388_v7  ;;  %v14467_v7 = vcombine.high %v3888_v14, %v3896_v62  ;;  %v3905_v42 = vld [vmem:[#allocation4 + $0xda8] sm:$0xff] }
 0x464   : > { %9219 = vmatmul.mubr.bf16.gmra.mrb[52].mxu0 %v16638_v48  ;;  %9460 = vmatprep.subr.bf16.mxu1 %v14405_v41  ;;  %v14436_v41 = vcombine.low %v3857_v24, %v3865_v52  ;;  %v3921_v62 = vld [vmem:[#allocation4 + $0xe28] sm:$0xff] }
 0x465   : > { %9242 = vmatpush1.bf16.msra.mxu0 %v14402_v2  ;;  %9261 = vmatprep.mubr.bf16.mxu0 %v16639_v26  ;;  %v14437_v2 = vcombine.high %v3857_v24, %v3865_v52 }
 0x466   : > { %9243 = vmatprep.subr.bf16.mxu0 %v14419_v34  ;;  %9438 = vmatmul.mubr.bf16.gmra.mrb[52].mxu1 %v16638_v48  ;;  %v3873_v34 = vld [vmem:[#allocation4 + $0xca8] sm:$0xff] }
 0x467   : > { %9461 = vmatpush1.bf16.msra.mxu1 %v14404_v16  ;;  %9480 = vmatprep.mubr.bf16.mxu1 %v16639_v26  ;;  %v14453_v21 = vcombine.high %v3873_v34, %v3881_v59  ;;  %v3889_v48 = vld [vmem:[#allocation4 + $0xd28] sm:$0xff]  ;;  %v14452_v26 = vcombine.low %v3873_v34, %v3881_v59  ;;  %v3920_v16 = vld [vmem:[#allocation4 + $0xe20] sm:$0xff] }
 0x468   : > { %9462 = vmatprep.subr.bf16.mxu1 %v14421_v35  ;;  %v3928_v35 = vld [vmem:[#allocation4 + $0xe60] sm:$0xff] }
 0x469   : > { %9244 = vmatpush1.bf16.msra.mxu0 %v14418_v30  ;;  %v3904_v30 = vld [vmem:[#allocation4 + $0xda0] sm:$0xff]  ;;  %v14499_v52 = vcombine.high %v3920_v16, %v3928_v35  ;;  %v14498_v34 = vcombine.low %v3920_v16, %v3928_v35  ;;  %v3953_v35 = vld [vmem:[#allocation4 + $0xf28] sm:$0xff] }
 0x46a   : > { %9245 = vmatprep.subr.bf16.mxu0 %v14435_v45  ;;  %v3897_v45 = vld [vmem:[#allocation4 + $0xd68] sm:$0xff]  ;;  %v14483_v8 = vcombine.high %v3904_v30, %v3912_v19  ;;  %v14482_v24 = vcombine.low %v3904_v30, %v3912_v19 }
 0x46b   : > { %9463 = vmatpush1.bf16.msra.mxu1 %v14420_v20  ;;  %v14469_v36 = vcombine.high %v3889_v48, %v3897_v45  ;;  %v3936_v20 = vld [vmem:[#allocation4 + $0xea0] sm:$0xff]  ;;  %v3937_v19 = vld [vmem:[#allocation4 + $0xea8] sm:$0xff] }
 0x46c   : > { %9464 = vmatprep.subr.bf16.mxu1 %v14437_v2  ;;  %v3944_v2 = vld [vmem:[#allocation4 + $0xee0] sm:$0xff] }
 0x46d   : > { %9246 = vmatpush1.bf16.msra.mxu0 %v14434_v56  ;;  %v3913_v56 = vld [vmem:[#allocation4 + $0xde8] sm:$0xff]  ;;  %v14515_v59 = vcombine.high %v3936_v20, %v3944_v2 }
 0x46e   : > { %9247 = vmatprep.subr.bf16.mxu0 %v14451_v47  ;;  %v14468_v47 = vcombine.low %v3889_v48, %v3897_v45  ;;  %v14485_v14 = vcombine.high %v3905_v42, %v3913_v56  ;;  %v14514_v48 = vcombine.low %v3936_v20, %v3944_v2  ;;  %v3969_v2 = vld [vmem:[#allocation4 + $0xfa8] sm:$0xff] }
 0x46f   : > { %9465 = vmatpush1.bf16.msra.mxu1 %v14436_v41  ;;  %v3952_v41 = vld [vmem:[#allocation4 + $0xf20] sm:$0xff] }
 0x470   : > { %9466 = vmatprep.subr.bf16.mxu1 %v14453_v21  ;;  %v3960_v21 = vld [vmem:[#allocation4 + $0xf60] sm:$0xff] }
 0x471   : > { %9248 = vmatpush1.bf16.msra.mxu0 %v14450_v63  ;;  %v3929_v63 = vld [vmem:[#allocation4 + $0xe68] sm:$0xff]  ;;  %v14531_v45 = vcombine.high %v3952_v41, %v3960_v21 }
 0x472   : > { %9249 = vmatprep.subr.bf16.mxu0 %v14467_v7  ;;  %v14484_v7 = vcombine.low %v3905_v42, %v3913_v56  ;;  %v14501_v30 = vcombine.high %v3921_v62, %v3929_v63  ;;  %v14530_v42 = vcombine.low %v3952_v41, %v3960_v21  ;;  %v3985_v21 = vld [vmem:[#allocation4 + $0x1028] sm:$0xff] }
 0x473   : > { %9467 = vmatpush1.bf16.msra.mxu1 %v14452_v26  ;;  %v3968_v26 = vld [vmem:[#allocation4 + $0xfa0] sm:$0xff] }
 0x474   : > { %9468 = vmatprep.subr.bf16.mxu1 %v14469_v36  ;;  %v3976_v36 = vld [vmem:[#allocation4 + $0xfe0] sm:$0xff] }
 0x475   : > { %9250 = vmatpush1.bf16.msra.mxu0 %v14466_v17  ;;  %v3945_v17 = vld [vmem:[#allocation4 + $0xee8] sm:$0xff]  ;;  %v14547_v56 = vcombine.high %v3968_v26, %v3976_v36 }
 0x476   : > { %9251 = vmatprep.subr.bf16.mxu0 %v14483_v8  ;;  %v14500_v8 = vcombine.low %v3921_v62, %v3929_v63  ;;  %v14517_v16 = vcombine.high %v3937_v19, %v3945_v17  ;;  %v14546_v62 = vcombine.low %v3968_v26, %v3976_v36  ;;  %v4024_v26 = vld [vmem:[#allocation4 + $0x1160] sm:$0xff] }
 0x477   : > { %9469 = vmatpush1.bf16.msra.mxu1 %v14468_v47  ;;  %v3984_v47 = vld [vmem:[#allocation4 + $0x1020] sm:$0xff] }
 0x478   : > { %9470 = vmatprep.subr.bf16.mxu1 %v14485_v14  ;;  %v3992_v14 = vld [vmem:[#allocation4 + $0x1060] sm:$0xff] }
 0x479   : > { %9252 = vmatpush1.bf16.msra.mxu0 %v14482_v24  ;;  %v3961_v24 = vld [vmem:[#allocation4 + $0xf68] sm:$0xff]  ;;  %v14563_v63 = vcombine.high %v3984_v47, %v3992_v14 }
 0x47a   : > { %9253 = vmatprep.subr.bf16.mxu0 %v14499_v52  ;;  %v14516_v52 = vcombine.low %v3937_v19, %v3945_v17  ;;  %v14533_v20 = vcombine.high %v3953_v35, %v3961_v24  ;;  %v14562_v19 = vcombine.low %v3984_v47, %v3992_v14  ;;  %v4032_v14 = vld [vmem:[#allocation4 + $0x11a0] sm:$0xff] }
 0x47b   : > { %9471 = vmatpush1.bf16.msra.mxu1 %v14484_v7  ;;  %v4000_v7 = vld [vmem:[#allocation4 + $0x10a0] sm:$0xff] }
 0x47c   : > { %9472 = vmatprep.subr.bf16.mxu1 %v14501_v30  ;;  %v4008_v30 = vld [vmem:[#allocation4 + $0x10e0] sm:$0xff] }
 0x47d   : > { %9254 = vmatpush1.bf16.msra.mxu0 %v14498_v34  ;;  %v3977_v34 = vld [vmem:[#allocation4 + $0xfe8] sm:$0xff]  ;;  %v14579_v17 = vcombine.high %v4000_v7, %v4008_v30 }
 0x47e   : > { %9255 = vmatprep.subr.bf16.mxu0 %v14515_v59  ;;  %v14532_v59 = vcombine.low %v3953_v35, %v3961_v24  ;;  %v14549_v41 = vcombine.high %v3969_v2, %v3977_v34  ;;  %v4001_v35 = vld [vmem:[#allocation4 + $0x10a8] sm:$0xff] }
 0x47f   : > { %9473 = vmatpush1.bf16.msra.mxu1 %v14500_v8  ;;  %v4016_v8 = vld [vmem:[#allocation4 + $0x1120] sm:$0xff]  ;;  %v4009_v24 = vld [vmem:[#allocation4 + $0x10e8] sm:$0xff] }
 0x480   : > { %9474 = vmatprep.subr.bf16.mxu1 %v14517_v16  ;;  %v16640_v16 = vld [vmem:[%s17403_s16 + $0x8] ss:$24 sps:$4 sm:$0xff]  }
 0x481   : > { %9256 = vmatpush1.bf16.msra.mxu0 %v14514_v48  ;;  %v3993_v48 = vld [vmem:[#allocation4 + $0x1068] sm:$0xff] }
 0x482   : > { %9257 = vmatprep.subr.bf16.mxu0 %v14531_v45  ;;  %v14548_v45 = vcombine.low %v3969_v2, %v3977_v34  ;;  %v14565_v36 = vcombine.high %v3985_v21, %v3993_v48  ;;  %v14564_v47 = vcombine.low %v3985_v21, %v3993_v48  ;;  %v14581_v2 = vcombine.high %v4001_v35, %v4009_v24  ;;  %v4017_v34 = vld [vmem:[#allocation4 + $0x1128] sm:$0xff] }
 0x483   : > { %9475 = vmatpush1.bf16.msra.mxu1 %v14516_v52  ;;  %v14595_v52 = vcombine.high %v4016_v8, %v4024_v26  ;;  %v4033_v21 = vld [vmem:[#allocation4 + $0x11a8] sm:$0xff] }
 0x484   : > { %9476 = vmatprep.subr.bf16.mxu1 %v14533_v20  ;;  %v4040_v20 = vld [vmem:[#allocation4 + $0x11e0] sm:$0xff]  ;;  %v4041_v48 = vld [vmem:[#allocation4 + $0x11e8] sm:$0xff] }
 0x485   : > { %9258 = vmatpush1.bf16.msra.mxu0 %v14530_v42  ;;  %v14578_v42 = vcombine.low %v4000_v7, %v4008_v30  ;;  %v14580_v7 = vcombine.low %v4001_v35, %v4009_v24  ;;  %v4048_v30 = vld [vmem:[#allocation4 + $0x1220] sm:$0xff]  ;;  %v14613_v35 = vcombine.high %v4033_v21, %v4041_v48  ;;  %v4049_v24 = vld [vmem:[#allocation4 + $0x1228] sm:$0xff] }
 0x486   : > { %9259 = vmatprep.subr.bf16.mxu0 %v14547_v56  ;;  %v16641_v56 = vld [vmem:[%s17403_s16 + $0x3c] ss:$24 sps:$4 sm:$0xff]  }
 0x487   : > { %9477 = vmatpush1.bf16.msra.mxu1 %v14532_v59  ;;  %v14611_v59 = vcombine.high %v4032_v14, %v4040_v20 }
 0x488   : > { %9478 = vmatprep.subr.bf16.mxu1 %v14549_v41  ;;  %v4056_v41 = vld [vmem:[#allocation4 + $0x1260] sm:$0xff] }
 0x489   : > { %9260 = vmatpush1.bf16.msra.mxu0 %v14546_v62  ;;  %v4025_v62 = vld [vmem:[#allocation4 + $0x1168] sm:$0xff] }
 0x48a   : > { %9302 = vmatprep.subr.bf16.mxu0 %v14563_v63  ;;  %v14594_v63 = vcombine.low %v4016_v8, %v4024_v26  ;;  %v14627_v8 = vcombine.high %v4048_v30, %v4056_v41  ;;  %v14596_v26 = vcombine.low %v4017_v34, %v4025_v62 }
 0x48b   : > { %9479 = vmatpush1.bf16.msra.mxu1 %v14548_v45  ;;  %v14610_v45 = vcombine.low %v4032_v14, %v4040_v20  ;;  %v14612_v14 = vcombine.low %v4033_v21, %v4041_v48  ;;  %v4080_v20 = vld [vmem:[#allocation4 + $0x1320] sm:$0xff]  ;;  %v4081_v48 = vld [vmem:[#allocation4 + $0x1328] sm:$0xff] }
 0x48c   : > { %9262 = vmatmul.mubr.bf16.vlgmr.msra.gmra.mrb[40].mxu0 %v16640_v16  ;;  %9521 = vmatprep.subr.bf16.mxu1 %v14565_v36  ;;  %v16643_v36 = vld [vmem:[%s17403_s16 + $0x6c] ss:$24 sps:$4 sm:$0xff]  }
 0x48d   : > { %9303 = vmatpush1.bf16.msra.mxu0 %v14562_v19  ;;  %9271 = vmatprep.mubr.bf16.mxu0 %v16641_v56  ;;  %v14597_v19 = vcombine.high %v4017_v34, %v4025_v62  ;;  %v4065_v34 = vld [vmem:[#allocation4 + $0x12a8] sm:$0xff] }
 0x48e   : > { %9304 = vmatprep.subr.bf16.mxu0 %v14579_v17  ;;  %9481 = vmatmul.mubr.bf16.vlgmr.msra.gmra.mrb[40].mxu1 %v16640_v16  ;;  %v16642_v17 = vld [vmem:[%s17403_s16 + $0x38] ss:$24 sps:$4 sm:$0xff]   ;;  %v4064_v16 = vld [vmem:[#allocation4 + $0x12a0] sm:$0xff]  ;;  %v4073_v62 = vld [vmem:[#allocation4 + $0x12e8] sm:$0xff] }
 0x48f   : > { %9522 = vmatpush1.bf16.msra.mxu1 %v14564_v47  ;;  %9490 = vmatprep.mubr.bf16.mxu1 %v16641_v56  ;;  %v14626_v56 = vcombine.low %v4048_v30, %v4056_v41  ;;  %v14645_v21 = vcombine.high %v4065_v34, %v4073_v62 }
 0x490   : > { %9523 = vmatprep.subr.bf16.mxu1 %v14581_v2  ;;  %v4088_v2 = vld [vmem:[#allocation4 + $0x1360] sm:$0xff] }
 0x491   : > { %9305 = vmatpush1.bf16.msra.mxu0 %v14578_v42  ;;  %v4072_v42 = vld [vmem:[#allocation4 + $0x12e0] sm:$0xff]  ;;  %v14659_v30 = vcombine.high %v4080_v20, %v4088_v2 }
 0x492   : > { %9306 = vmatprep.subr.bf16.mxu0 %v14595_v52  ;;  %v4057_v52 = vld [vmem:[#allocation4 + $0x1268] sm:$0xff]  ;;  %v14643_v47 = vcombine.high %v4064_v16, %v4072_v42 }
 0x493   : > { %9524 = vmatpush1.bf16.msra.mxu1 %v14580_v7  ;;  %v14642_v7 = vcombine.low %v4064_v16, %v4072_v42  ;;  %v14628_v41 = vcombine.low %v4049_v24, %v4057_v52  ;;  %v14644_v16 = vcombine.low %v4065_v34, %v4073_v62  ;;  %v4112_v42 = vld [vmem:[#allocation4 + $0x1420] sm:$0xff]  ;;  %v4113_v62 = vld [vmem:[#allocation4 + $0x1428] sm:$0xff] }
 0x494   : > { %9272 = vmatmul.mubr.bf16.gmra.mrb[44].mxu0 %v16642_v17  ;;  %9525 = vmatprep.subr.bf16.mxu1 %v14597_v19  ;;  %v16645_v19 = vld [vmem:[%s17403_s16 + $0x9c] ss:$24 sps:$4 sm:$0xff]  }
 0x495   : > { %9307 = vmatpush1.bf16.msra.mxu0 %v14594_v63  ;;  %9281 = vmatprep.mubr.bf16.mxu0 %v16643_v36  ;;  %v14629_v63 = vcombine.high %v4049_v24, %v4057_v52  ;;  %v4097_v24 = vld [vmem:[#allocation4 + $0x13a8] sm:$0xff] }
 0x496   : > { %9308 = vmatprep.subr.bf16.mxu0 %v14611_v59  ;;  %9491 = vmatmul.mubr.bf16.gmra.mrb[44].mxu1 %v16642_v17  ;;  %v16644_v59 = vld [vmem:[%s17403_s16 + $0x68] ss:$24 sps:$4 sm:$0xff]  }
 0x497   : > { %9526 = vmatpush1.bf16.msra.mxu1 %v14596_v26  ;;  %9500 = vmatprep.mubr.bf16.mxu1 %v16643_v36  ;;  %v4096_v17 = vld [vmem:[#allocation4 + $0x13a0] sm:$0xff]  ;;  %v14658_v36 = vcombine.low %v4080_v20, %v4088_v2  ;;  %v4105_v52 = vld [vmem:[#allocation4 + $0x13e8] sm:$0xff] }
 0x498   : > { %9527 = vmatprep.subr.bf16.mxu1 %v14613_v35  ;;  %v4120_v35 = vld [vmem:[#allocation4 + $0x1460] sm:$0xff]  ;;  %v14677_v34 = vcombine.high %v4097_v24, %v4105_v52 }
 0x499   : > { %9309 = vmatpush1.bf16.msra.mxu0 %v14610_v45  ;;  %v4104_v45 = vld [vmem:[#allocation4 + $0x13e0] sm:$0xff]  ;;  %v14691_v20 = vcombine.high %v4112_v42, %v4120_v35 }
 0x49a   : > { %9310 = vmatprep.subr.bf16.mxu0 %v14627_v8  ;;  %v4089_v8 = vld [vmem:[#allocation4 + $0x1368] sm:$0xff]  ;;  %v14675_v26 = vcombine.high %v4096_v17, %v4104_v45 }
 0x49b   : > { %9528 = vmatpush1.bf16.msra.mxu1 %v14612_v14  ;;  %v14674_v14 = vcombine.low %v4096_v17, %v4104_v45  ;;  %v14660_v2 = vcombine.low %v4081_v48, %v4089_v8  ;;  %v4144_v17 = vld [vmem:[#allocation4 + $0x1520] sm:$0xff] }
 0x49c   : > { %9282 = vmatmul.mubr.bf16.gmra.mrb[48].mxu0 %v16644_v59  ;;  %9529 = vmatprep.subr.bf16.mxu1 %v14629_v63  ;;  %v16647_v63 = vld [vmem:[%s17403_s16 + $0x14] ss:$24 sps:$4 sm:$0xff]   ;;  %v4152_v45 = vld [vmem:[#allocation4 + $0x1560] sm:$0xff] }
 0x49d   : > { %9311 = vmatpush1.bf16.msra.mxu0 %v14626_v56  ;;  %9291 = vmatprep.mubr.bf16.mxu0 %v16645_v19  ;;  %v14661_v56 = vcombine.high %v4081_v48, %v4089_v8  ;;  %v4137_v48 = vld [vmem:[#allocation4 + $0x14e8] sm:$0xff] }
 0x49e   : > { %9312 = vmatprep.subr.bf16.mxu0 %v14643_v47  ;;  %9501 = vmatmul.mubr.bf16.gmra.mrb[48].mxu1 %v16644_v59  ;;  %v16646_v47 = vld [vmem:[%s17403_s16 + $0x98] ss:$24 sps:$4 sm:$0xff]   ;;  %v4128_v59 = vld [vmem:[#allocation4 + $0x14a0] sm:$0xff] }
 0x49f   : > { %9530 = vmatpush1.bf16.msra.mxu1 %v14628_v41  ;;  %9510 = vmatprep.mubr.bf16.mxu1 %v16645_v19  ;;  %v14690_v19 = vcombine.low %v4112_v42, %v4120_v35  ;;  %v4168_v42 = vld [vmem:[#allocation4 + $0x15e0] sm:$0xff] }
 0x4a0   : > { %9531 = vmatprep.subr.bf16.mxu1 %v14645_v21  ;;  %v14676_v21 = vcombine.low %v4097_v24, %v4105_v52  ;;  %v14722_v24 = vcombine.low %v4144_v17, %v4152_v45 }
 0x4a1   : > { %9313 = vmatpush1.bf16.msra.mxu0 %v14642_v7  ;;  %v4136_v7 = vld [vmem:[#allocation4 + $0x14e0] sm:$0xff] }
 0x4a2   : > { %9314 = vmatprep.subr.bf16.mxu0 %v14659_v30  ;;  %v4121_v30 = vld [vmem:[#allocation4 + $0x1468] sm:$0xff]  ;;  %v14707_v41 = vcombine.high %v4128_v59, %v4136_v7  ;;  %v14706_v8 = vcombine.low %v4128_v59, %v4136_v7 }
 0x4a3   : > { %9532 = vmatpush1.bf16.msra.mxu1 %v14644_v16  ;;  %v14723_v16 = vcombine.high %v4144_v17, %v4152_v45  ;;  %v4161_v7 = vld [vmem:[#allocation4 + $0x15a8] sm:$0xff] }
 0x4a4   : > { %9292 = vmatmul.mubr.bf16.gmra.mrb[52].mxu0 %v16646_v47  ;;  %9533 = vmatprep.subr.bf16.mxu1 %v14661_v56  ;;  %v14692_v56 = vcombine.low %v4113_v62, %v4121_v30  ;;  %v4177_v45 = vld [vmem:[#allocation4 + $0x1628] sm:$0xff] }
 0x4a5   : > { %9315 = vmatpush1.bf16.msra.mxu0 %v14658_v36  ;;  %9334 = vmatprep.mubr.bf16.mxu0 %v16647_v63  ;;  %v14693_v36 = vcombine.high %v4113_v62, %v4121_v30 }
 0x4a6   : > { %9316 = vmatprep.subr.bf16.mxu0 %v14675_v26  ;;  %9511 = vmatmul.mubr.bf16.gmra.mrb[52].mxu1 %v16646_v47  ;;  %v4129_v26 = vld [vmem:[#allocation4 + $0x14a8] sm:$0xff] }
 0x4a7   : > { %9534 = vmatpush1.bf16.msra.mxu1 %v14660_v2  ;;  %9553 = vmatprep.mubr.bf16.mxu1 %v16647_v63  ;;  %v14709_v35 = vcombine.high %v4129_v26, %v4137_v48  ;;  %v4145_v47 = vld [vmem:[#allocation4 + $0x1528] sm:$0xff]  ;;  %v14708_v63 = vcombine.low %v4129_v26, %v4137_v48  ;;  %v4176_v2 = vld [vmem:[#allocation4 + $0x1620] sm:$0xff] }
 0x4a8   : > { %9535 = vmatprep.subr.bf16.mxu1 %v14677_v34  ;;  %v4184_v34 = vld [vmem:[#allocation4 + $0x1660] sm:$0xff] }
 0x4a9   : > { %9317 = vmatpush1.bf16.msra.mxu0 %v14674_v14  ;;  %v4160_v14 = vld [vmem:[#allocation4 + $0x15a0] sm:$0xff]  ;;  %v14755_v30 = vcombine.high %v4176_v2, %v4184_v34  ;;  %v14754_v26 = vcombine.low %v4176_v2, %v4184_v34  ;;  %v4209_v34 = vld [vmem:[#allocation4 + $0x1728] sm:$0xff] }
 0x4aa   : > { %9318 = vmatprep.subr.bf16.mxu0 %v14691_v20  ;;  %v4153_v20 = vld [vmem:[#allocation4 + $0x1568] sm:$0xff]  ;;  %v14739_v52 = vcombine.high %v4160_v14, %v4168_v42  ;;  %v14738_v62 = vcombine.low %v4160_v14, %v4168_v42 }
 0x4ab   : > { %9536 = vmatpush1.bf16.msra.mxu1 %v14676_v21  ;;  %v14725_v59 = vcombine.high %v4145_v47, %v4153_v20  ;;  %v4192_v21 = vld [vmem:[#allocation4 + $0x16a0] sm:$0xff]  ;;  %v4193_v42 = vld [vmem:[#allocation4 + $0x16a8] sm:$0xff] }
 0x4ac   : > { %9537 = vmatprep.subr.bf16.mxu1 %v14693_v36  ;;  %v4200_v36 = vld [vmem:[#allocation4 + $0x16e0] sm:$0xff] }
 0x4ad   : > { %9319 = vmatpush1.bf16.msra.mxu0 %v14690_v19  ;;  %v4169_v19 = vld [vmem:[#allocation4 + $0x15e8] sm:$0xff]  ;;  %v14771_v48 = vcombine.high %v4192_v21, %v4200_v36 }
 0x4ae   : > { %9320 = vmatprep.subr.bf16.mxu0 %v14707_v41  ;;  %v14724_v41 = vcombine.low %v4145_v47, %v4153_v20  ;;  %v14741_v17 = vcombine.high %v4161_v7, %v4169_v19  ;;  %v14770_v47 = vcombine.low %v4192_v21, %v4200_v36  ;;  %v3474_v21 = vld [vmem:[#allocation4 + $0x30] sm:$0xff] }
 0x4af   : > { %9538 = vmatpush1.bf16.msra.mxu1 %v14692_v56  ;;  %v4208_v56 = vld [vmem:[#allocation4 + $0x1720] sm:$0xff]  ;;  %v3482_v36 = vld [vmem:[#allocation4 + $0x70] sm:$0xff] }
 0x4b0   : > { %9539 = vmatprep.subr.bf16.mxu1 %v14709_v35  ;;  %v4216_v35 = vld [vmem:[#allocation4 + $0x1760] sm:$0xff]  ;;  %v14054_v1 = vcombine.low %v3474_v21, %v3482_v36 }
 0x4b1   : > { %9321 = vmatpush1.bf16.msra.mxu0 %v14706_v8  ;;  %v4185_v8 = vld [vmem:[#allocation4 + $0x1668] sm:$0xff]  ;;  %v14787_v20 = vcombine.high %v4208_v56, %v4216_v35 }
 0x4b2   : > { %9322 = vmatprep.subr.bf16.mxu0 %v14723_v16  ;;  %v14740_v16 = vcombine.low %v4161_v7, %v4169_v19  ;;  %v14757_v14 = vcombine.high %v4177_v45, %v4185_v8  ;;  %v14786_v7 = vcombine.low %v4208_v56, %v4216_v35 }
 0x4b3   : > { %9540 = vmatpush1.bf16.msra.mxu1 %v14708_v63  ;;  %v4224_v63 = vld [vmem:[#allocation4 + $0x17a0] sm:$0xff] }
 0x4b4   : > { %9541 = vmatprep.subr.bf16.mxu1 %v14725_v59  ;;  %v4232_v59 = vld [vmem:[#allocation4 + $0x17e0] sm:$0xff] }
 0x4b5   : > { %9323 = vmatpush1.bf16.msra.mxu0 %v14722_v24  ;;  %v4201_v24 = vld [vmem:[#allocation4 + $0x16e8] sm:$0xff]  ;;  %v14803_v19 = vcombine.high %v4224_v63, %v4232_v59  ;;  %v14802_v56 = vcombine.low %v4224_v63, %v4232_v59 }
 0x4b6   : > { %9324 = vmatprep.subr.bf16.mxu0 %v14739_v52  ;;  %v14756_v52 = vcombine.low %v4177_v45, %v4185_v8  ;;  %v14773_v2 = vcombine.high %v4193_v42, %v4201_v24  ;;  %v17591_v45 = vsub.s32 3, %v17441_v57  ;;  %v4225_v8 = vld [vmem:[#allocation4 + $0x17a8] sm:$0xff] }
 0x4b7   : > { %9542 = vmatpush1.bf16.msra.mxu1 %v14724_v41  ;;  %v17588_v41 = vsub.s32 2, %v17441_v57 }
 0x4b8   : > { %9543 = vmatprep.subr.bf16.mxu1 %v14741_v17 }
 0x4b9   : > { %9325 = vmatpush1.bf16.msra.mxu0 %v14738_v62  ;;  %v4217_v62 = vld [vmem:[#allocation4 + $0x1768] sm:$0xff]  ;;  %18502 = vst [vmem:[#allocation32_spill] sm:$0xff] %v17588_v41 }
 0x4ba   : > { %9326 = vmatprep.subr.bf16.mxu0 %v14755_v30  ;;  %v14772_v30 = vcombine.low %v4193_v42, %v4201_v24  ;;  %v14789_v17 = vcombine.high %v4209_v34, %v4217_v62  ;;  %v14788_v42 = vcombine.low %v4209_v34, %v4217_v62  ;;  %v8679_v24 = vpop.f32.mrb[8].mxu1 }
 0x4bb   : > { %9544 = vmatpush1.bf16.msra.mxu1 %v14740_v16  ;;  %v8681_v59 = vpop.f32.mrb[9].mxu1 }
 0x4bc   : > { %9545 = vmatprep.subr.bf16.mxu1 %v14757_v14  ;;  %v14055_v14 = vcombine.high %v3474_v21, %v3482_v36  ;;  %v8683_v62 = vpop.f32.mrb[10].mxu1  ;;  %v16649_v36 = vld [vmem:[%s17403_s16 + $0x10] ss:$24 sps:$4 sm:$0xff]  }
 0x4bd   : > { %9327 = vmatpush1.bf16.msra.mxu0 %v14754_v26  ;;  %v4233_v26 = vld [vmem:[#allocation4 + $0x17e8] sm:$0xff]  ;;  %v8685_v21 = vpop.f32.mrb[11].mxu1 }
 0x4be   : > { %9328 = vmatprep.subr.bf16.mxu0 %v14771_v48  ;;  %v17593_v48 = vld [vmem:[#allocation12] sm:$0xff] }
 0x4bf   : > { %9546 = vmatpush1.bf16.msra.mxu1 %v14756_v52  ;;  %v17597_v16 = vrot.slane %v17593_v48, %v17588_v41  ;;  %v17601_v35 = vrot.slane %v17593_v48, %v17591_v45  ;;  %v14805_v52 = vcombine.high %v4225_v8, %v4233_v26 }
 0x4c0   : > { %9547 = vmatprep.subr.bf16.mxu1 %v14773_v2  ;;  %v3475_v2 = vld [vmem:[#allocation4 + $0x38] sm:$0xff] }
 0x4c1   : > { %9329 = vmatpush1.bf16.msra.mxu0 %v14770_v47  ;;  %v3490_v47 = vld [vmem:[#allocation4 + $0xb0] sm:$0xff]  ;;  %v17604_v63 = vadd.f32 %v8679_v24, %v17597_v16  ;;  %v17607_v34 = vadd.f32 %v8681_v59, %v17601_v35  ;;  %v14057_v22 = vcombine.high %v3475_v2, %v3483_v58  ;;  %v3491_v24 = vld [vmem:[#allocation4 + $0xb8] sm:$0xff] }
 0x4c2   : > { %9330 = vmatprep.subr.bf16.mxu0 %v14787_v20  ;;  %v3498_v20 = vld [vmem:[#allocation4 + $0xf0] sm:$0xff]  ;;  %v3531_v59 = vld [vmem:[#allocation4 + $0x1f8] sm:$0xff] }
 0x4c3   : > { %9548 = vmatpush1.bf16.msra.mxu1 %v14772_v30  ;;  %18503 = vst [vmem:[#allocation33_spill] sm:$0xff] %v17607_v34  ;;  %v3506_v30 = vld [vmem:[#allocation4 + $0x130] sm:$0xff] }
 0x4c4   : > { %9549 = vmatprep.subr.bf16.mxu1 %v14789_v17  ;;  %v3514_v17 = vld [vmem:[#allocation4 + $0x170] sm:$0xff] }
 0x4c5   : > { %9331 = vmatpush1.bf16.msra.mxu0 %v14786_v7  ;;  %v14071_v7 = vcombine.high %v3490_v47, %v3498_v20 }
 0x4c6   : > { %9332 = vmatprep.subr.bf16.mxu0 %v14803_v19  ;;  %v14804_v19 = vcombine.low %v4225_v8, %v4233_v26  ;;  %v14070_v8 = vcombine.low %v3490_v47, %v3498_v20  ;;  %v16650_v26 = vld [vmem:[%s17403_s16 + $0x44] ss:$24 sps:$4 sm:$0xff]   ;;  %v14086_v47 = vcombine.low %v3506_v30, %v3514_v17  ;;  %v14103_v20 = vcombine.high %v3522_v53, %v3530_v60  ;;  %v3570_v53 = vld [vmem:[#allocation4 + $0x330] sm:$0xff] }
 0x4c7   : > { %9550 = vmatpush1.bf16.msra.mxu1 %v14788_v42  ;;  %v17614_v42 = vadd.f32 %v8685_v21, %v17601_v35 }
 0x4c8   : > { %9551 = vmatprep.subr.bf16.mxu1 %v14805_v52  ;;  %v14087_v52 = vcombine.high %v3506_v30, %v3514_v17 }
 0x4c9   : > { %9333 = vmatpush1.bf16.msra.mxu0 %v14802_v56  ;;  %v17610_v56 = vadd.f32 %v8683_v62, %v17597_v16  ;;  %18504 = vst [vmem:[#allocation34_spill] sm:$0xff] %v17614_v42  ;;  %v14056_v62 = vcombine.low %v3475_v2, %v3483_v58  ;;  %v3546_v58 = vld [vmem:[#allocation4 + $0x270] sm:$0xff]  ;;  %v3707_v42 = vld [vmem:[#allocation4 + $0x778] sm:$0xff] }
 0x4ca   : > { %9594 = vmatprep.subr.bf16.mxu0 %v14055_v14  ;;  %v3499_v14 = vld [vmem:[#allocation4 + $0xf8] sm:$0xff] }
 0x4cb   : > { %9552 = vmatpush1.bf16.msra.mxu1 %v14804_v19  ;;  %v14073_v21 = vcombine.high %v3491_v24, %v3499_v14  ;;  %v3538_v19 = vld [vmem:[#allocation4 + $0x230] sm:$0xff] }
 0x4cc   : > { %9335 = vmatmul.mubr.bf16.vlgmr.msra.gmra.mrb[40].mxu0 %v16649_v36  ;;  %9813 = vmatprep.subr.bf16.mxu1 %v14057_v22  ;;  %v3523_v22 = vld [vmem:[#allocation4 + $0x1b8] sm:$0xff]  ;;  %v14119_v30 = vcombine.high %v3538_v19, %v3546_v58 }
 0x4cd   : > { %9595 = vmatpush1.bf16.msra.mxu0 %v14054_v1  ;;  %9344 = vmatprep.mubr.bf16.mxu0 %v16650_v26  ;;  %v3515_v1 = vld [vmem:[#allocation4 + $0x178] sm:$0xff]  ;;  %v14104_v60 = vcombine.low %v3523_v22, %v3531_v59 }
 0x4ce   : > { %9596 = vmatprep.subr.bf16.mxu0 %v14071_v7  ;;  %9554 = vmatmul.mubr.bf16.vlgmr.msra.gmra.mrb[40].mxu1 %v16649_v36  ;;  %v14072_v7 = vcombine.low %v3491_v24, %v3499_v14  ;;  %v14089_v2 = vcombine.high %v3507_v18, %v3515_v1  ;;  %v14088_v17 = vcombine.low %v3507_v18, %v3515_v1  ;;  %v3554_v36 = vld [vmem:[#allocation4 + $0x2b0] sm:$0xff]  ;;  %v3539_v14 = vld [vmem:[#allocation4 + $0x238] sm:$0xff] }
 0x4cf   : > { %9814 = vmatpush1.bf16.msra.mxu1 %v14056_v62  ;;  %9563 = vmatprep.mubr.bf16.mxu1 %v16650_v26  ;;  %v14105_v24 = vcombine.high %v3523_v22, %v3531_v59  ;;  %v14118_v26 = vcombine.low %v3538_v19, %v3546_v58  ;;  %v17625_v18 = vrot.slane %v17593_v48, %v17445_v0  ;;  %v16653_v1 = vld [vmem:[%s17403_s16 + $0x70] ss:$24 sps:$4 sm:$0xff]   ;;  %v16654_v59 = vld [vmem:[%s17403_s16 + $0xa4] ss:$24 sps:$4 sm:$0xff]  }
 0x4d0   : > { %9815 = vmatprep.subr.bf16.mxu1 %v14073_v21  ;;  %v3578_v21 = vld [vmem:[#allocation4 + $0x370] sm:$0xff] }
 0x4d1   : > { %9597 = vmatpush1.bf16.msra.mxu0 %v14070_v8  ;;  %v3562_v8 = vld [vmem:[#allocation4 + $0x2f0] sm:$0xff]  ;;  %v14151_v19 = vcombine.high %v3570_v53, %v3578_v21 }
 0x4d2   : > { %9598 = vmatprep.subr.bf16.mxu0 %v14087_v52  ;;  %v3547_v52 = vld [vmem:[#allocation4 + $0x278] sm:$0xff]  ;;  %v14135_v62 = vcombine.high %v3554_v36, %v3562_v8  ;;  %v3594_v22 = vld [vmem:[#allocation4 + $0x3f0] sm:$0xff] }
 0x4d3   : > { %9816 = vmatpush1.bf16.msra.mxu1 %v14072_v7  ;;  %v14134_v7 = vcombine.low %v3554_v36, %v3562_v8  ;;  %v14150_v8 = vcombine.low %v3570_v53, %v3578_v21  ;;  %v16655_v21 = vld [vmem:[%s17403_s16 + $0xa0] ss:$24 sps:$4 sm:$0xff]  }
 0x4d4   : > { %9345 = vmatmul.mubr.bf16.gmra.mrb[44].mxu0 %v16651_v49  ;;  %9817 = vmatprep.subr.bf16.mxu1 %v14089_v2  ;;  %v3586_v2 = vld [vmem:[#allocation4 + $0x3b0] sm:$0xff] }
 0x4d5   : > { %9599 = vmatpush1.bf16.msra.mxu0 %v14086_v47  ;;  %9354 = vmatprep.mubr.bf16.mxu0 %v16652_v27  ;;  %v14121_v47 = vcombine.high %v3539_v14, %v3547_v52 }
 0x4d6   : > { %9600 = vmatprep.subr.bf16.mxu0 %v14103_v20  ;;  %9564 = vmatmul.mubr.bf16.gmra.mrb[44].mxu1 %v16651_v49  ;;  %v3555_v20 = vld [vmem:[#allocation4 + $0x2b8] sm:$0xff]  ;;  %v17630_v49 = vrot.slane %v17593_v48, %v17448_v4 }
 0x4d7   : > { %9818 = vmatpush1.bf16.msra.mxu1 %v14088_v17  ;;  %9573 = vmatprep.mubr.bf16.mxu1 %v16652_v27  ;;  %v14120_v27 = vcombine.low %v3539_v14, %v3547_v52  ;;  %v3579_v48 = vld [vmem:[#allocation4 + $0x378] sm:$0xff] }
 0x4d8   : > { %9819 = vmatprep.subr.bf16.mxu1 %v14105_v24  ;;  %v14153_v29 = vcombine.high %v3571_v13, %v3579_v48 }
 0x4d9   : > { %9601 = vmatpush1.bf16.msra.mxu0 %v14102_v44  ;;  %v3563_v44 = vld [vmem:[#allocation4 + $0x2f8] sm:$0xff] }
 0x4da   : > { %9602 = vmatprep.subr.bf16.mxu0 %v14119_v30  ;;  %v14137_v30 = vcombine.high %v3555_v20, %v3563_v44 }
 0x4db   : > { %9820 = vmatpush1.bf16.msra.mxu1 %v14104_v60  ;;  %v14136_v60 = vcombine.low %v3555_v20, %v3563_v44  ;;  %v14166_v20 = vcombine.low %v3586_v2, %v3594_v22  ;;  %v16656_v44 = vld [vmem:[%s17403_s16 + $0x4] ss:$24 sps:$4 sm:$0xff]  }
 0x4dc   : > { %9355 = vmatmul.mubr.bf16.gmra.mrb[48].mxu0 %v16653_v1  ;;  %9821 = vmatprep.subr.bf16.mxu1 %v14121_v47 }
 0x4dd   : > { %9603 = vmatpush1.bf16.msra.mxu0 %v14118_v26  ;;  %9364 = vmatprep.mubr.bf16.mxu0 %v16654_v59 }
 0x4de   : > { %9604 = vmatprep.subr.bf16.mxu0 %v14135_v62  ;;  %9574 = vmatmul.mubr.bf16.gmra.mrb[48].mxu1 %v16653_v1  ;;  %v14167_v62 = vcombine.high %v3586_v2, %v3594_v22  ;;  %v3587_v1 = vld [vmem:[#allocation4 + $0x3b8] sm:$0xff] }
 0x4df   : > { %v8898_v58 = vpop.f32.mrb[24].mxu0  ;;  %9822 = vmatpush1.bf16.msra.mxu1 %v14120_v27  ;;  %9583 = vmatprep.mubr.bf16.mxu1 %v16654_v59  ;;  %v3618_v59 = vld [vmem:[#allocation4 + $0x4b0] sm:$0xff] }
 0x4e0   : > { %v17634_v17 = vadd.f32 %v8898_v58, %v17625_v18  ;;  %v8900_v24 = vpop.f32.mrb[25].mxu0  ;;  %v3602_v58 = vld [vmem:[#allocation4 + $0x430] sm:$0xff]  ;;  %9823 = vmatprep.subr.bf16.mxu1 %v14137_v30  ;;  %v14152_v30 = vcombine.low %v3571_v13, %v3579_v48 }
 0x4e1   : > { %v17637_v26 = vadd.f32 %v8900_v24, %v17630_v49  ;;  %v8902_v36 = vpop.f32.mrb[26].mxu0  ;;  %9605 = vmatpush1.bf16.msra.mxu0 %v14134_v7  ;;  %v3610_v24 = vld [vmem:[#allocation4 + $0x470] sm:$0xff]  ;;  %v3595_v7 = vld [vmem:[#allocation4 + $0x3f8] sm:$0xff] }
 0x4e2   : > { %18505 = vst [vmem:[#allocation35_spill] sm:$0xff] %v17634_v17  ;;  %v17640_v14 = vadd.f32 %v8902_v36, %v17625_v18  ;;  %v8904_v52 = vpop.f32.mrb[27].mxu0  ;;  %9606 = vmatprep.subr.bf16.mxu0 %v14151_v19  ;;  %v14183_v27 = vcombine.high %v3602_v58, %v3610_v24  ;;  %v14169_v53 = vcombine.high %v3587_v1, %v3595_v7  ;;  %v3642_v19 = vld [vmem:[#allocation4 + $0x570] sm:$0xff] }
 0x4e3   : > { %18506 = vst [vmem:[#allocation36_spill] sm:$0xff] %v17637_v26  ;;  %v17643_v47 = vadd.f32 %v8904_v52, %v17630_v49  ;;  %9824 = vmatpush1.bf16.msra.mxu1 %v14136_v60  ;;  %v3626_v52 = vld [vmem:[#allocation4 + $0x4f0] sm:$0xff]  ;;  %v14182_v22 = vcombine.low %v3602_v58, %v3610_v24  ;;  %v3619_v24 = vld [vmem:[#allocation4 + $0x4b8] sm:$0xff] }
 0x4e4   : > { %18507 = vst [vmem:[#allocation37_spill] sm:$0xff] %v17640_v14  ;;  %9365 = vmatmul.mubr.bf16.gmra.mrb[52].mxu0 %v16655_v21  ;;  %9825 = vmatprep.subr.bf16.mxu1 %v14153_v29  ;;  %v3603_v14 = vld [vmem:[#allocation4 + $0x438] sm:$0xff]  ;;  %v14199_v29 = vcombine.high %v3618_v59, %v3626_v52 }
 0x4e5   : > { %18508 = vst [vmem:[#allocation38_spill] sm:$0xff] %v17643_v47  ;;  %9607 = vmatpush1.bf16.msra.mxu0 %v14150_v8  ;;  %9626 = vmatprep.mubr.bf16.mxu0 %v16656_v44  ;;  %v3635_v47 = vld [vmem:[#allocation4 + $0x538] sm:$0xff] }
 0x4e6   : > { %9608 = vmatprep.subr.bf16.mxu0 %v14167_v62  ;;  %9584 = vmatmul.mubr.bf16.gmra.mrb[52].mxu1 %v16655_v21  ;;  %v14168_v62 = vcombine.low %v3587_v1, %v3595_v7  ;;  %v3627_v21 = vld [vmem:[#allocation4 + $0x4f8] sm:$0xff]  ;;  %v3650_v7 = vld [vmem:[#allocation4 + $0x5b0] sm:$0xff] }
 0x4e7   : > { %v8908_v36 = vpop.f32.mrb[28].mxu0  ;;  %9826 = vmatpush1.bf16.msra.mxu1 %v14152_v30  ;;  %9845 = vmatprep.mubr.bf16.mxu1 %v16656_v44  ;;  %v3658_v30 = vld [vmem:[#allocation4 + $0x5f0] sm:$0xff]  ;;  %v14201_v44 = vcombine.high %v3619_v24, %v3627_v21 }
 0x4e8   : > { %v17652_v23 = vadd.f32 %v8908_v36, %v17625_v18  ;;  %v8910_v17 = vpop.f32.mrb[29].mxu0  ;;  %v3634_v36 = vld [vmem:[#allocation4 + $0x530] sm:$0xff]  ;;  %9827 = vmatprep.subr.bf16.mxu1 %v14169_v53 }
 0x4e9   : > { %v17655_v8 = vadd.f32 %v8910_v17, %v17630_v49  ;;  %v8912_v2 = vpop.f32.mrb[30].mxu0  ;;  %9609 = vmatpush1.bf16.msra.mxu0 %v14166_v20  ;;  %v14185_v17 = vcombine.high %v3603_v14, %v3611_v25  ;;  %v14215_v1 = vcombine.high %v3634_v36, %v3642_v19 }
 0x4ea   : > { %18509 = vst [vmem:[#allocation39_spill] sm:$0xff] %v17652_v23  ;;  %v17658_v13 = vadd.f32 %v8912_v2, %v17625_v18  ;;  %v8914_v48 = vpop.f32.mrb[31].mxu0  ;;  %9610 = vmatprep.subr.bf16.mxu0 %v14183_v27  ;;  %v14198_v27 = vcombine.low %v3618_v59, %v3626_v52  ;;  %v14184_v2 = vcombine.low %v3603_v14, %v3611_v25  ;;  %v3643_v23 = vld [vmem:[#allocation4 + $0x578] sm:$0xff] }
 0x4eb   : > { %18510 = vst [vmem:[#allocation40_spill] sm:$0xff] %v17655_v8  ;;  %v17661_v60 = vadd.f32 %v8914_v48, %v17630_v49  ;;  %9828 = vmatpush1.bf16.msra.mxu1 %v14168_v62  ;;  %v8689_v48 = vpop.f32.mrb[12].mxu1  ;;  %v14214_v52 = vcombine.low %v3634_v36, %v3642_v19  ;;  %v3666_v19 = vld [vmem:[#allocation4 + $0x630] sm:$0xff]  ;;  %v14216_v34 = vcombine.low %v3635_v47, %v3643_v23 }
 0x4ec   : > { %18511 = vst [vmem:[#allocation41_spill] sm:$0xff] %v17658_v13  ;;  %9829 = vmatprep.subr.bf16.mxu1 %v14185_v17  ;;  %v8691_v25 = vpop.f32.mrb[13].mxu1  ;;  %v14200_v17 = vcombine.low %v3619_v24, %v3627_v21  ;;  %v3674_v36 = vld [vmem:[#allocation4 + $0x670] sm:$0xff]  ;;  %v3659_v24 = vld [vmem:[#allocation4 + $0x5f8] sm:$0xff] }
 0x4ed   : > { %18512 = vst [vmem:[#allocation42_spill] sm:$0xff] %v17661_v60  ;;  %9611 = vmatpush1.bf16.msra.mxu0 %v14182_v22  ;;  %v14231_v22 = vcombine.high %v3650_v7, %v3658_v30  ;;  %v3682_v60 = vld [vmem:[#allocation4 + $0x6b0] sm:$0xff] }
 0x4ee   : > { %9612 = vmatprep.subr.bf16.mxu0 %v14199_v29  ;;  %v17674_v29 = vadd.f32 %v8689_v48, %v17597_v16  ;;  %v3690_v13 = vld [vmem:[#allocation4 + $0x6f0] sm:$0xff] }
 0x4ef   : > { %v8918_v53 = vpop.f32.mrb[32].mxu0  ;;  %9830 = vmatpush1.bf16.msra.mxu1 %v14184_v2  ;;  %v3651_v2 = vld [vmem:[#allocation4 + $0x5b8] sm:$0xff] }
 0x4f0   : > { %v17668_v26 = vadd.f32 %v8918_v53, %v17625_v18  ;;  %v8920_v58 = vpop.f32.mrb[33].mxu0  ;;  %v17680_v53 = vadd.f32 %v8691_v25, %v17601_v35  ;;  %9831 = vmatprep.subr.bf16.mxu1 %v14201_v44 }
 0x4f1   : > { %v17671_v20 = vadd.f32 %v8920_v58, %v17630_v49  ;;  %v8922_v59 = vpop.f32.mrb[34].mxu0  ;;  %9613 = vmatpush1.bf16.msra.mxu0 %v14198_v27  ;;  %v8693_v58 = vpop.f32.mrb[14].mxu1  ;;  %v14217_v27 = vcombine.high %v3635_v47, %v3643_v23  ;;  %v14263_v23 = vcombine.high %v3682_v60, %v3690_v13 }
 0x4f2   : > { %18513 = vst [vmem:[#allocation43_spill] sm:$0xff] %v17668_v26  ;;  %v17677_v14 = vadd.f32 %v8922_v59, %v17625_v18  ;;  %v8924_v62 = vpop.f32.mrb[35].mxu0  ;;  %9614 = vmatprep.subr.bf16.mxu0 %v14215_v1  ;;  %18516 = vst [vmem:[#allocation46_spill] sm:$0xff] %v17680_v53  ;;  %v17686_v48 = vadd.f32 %v8693_v58, %v17597_v16  ;;  %v8695_v59 = vpop.f32.mrb[15].mxu1  ;;  %v14247_v58 = vcombine.high %v3666_v19, %v3674_v36 }
 0x4f3   : > { %18514 = vst [vmem:[#allocation44_spill] sm:$0xff] %v17671_v20  ;;  %v17683_v8 = vadd.f32 %v8924_v62, %v17630_v49  ;;  %v17691_v21 = vadd.f32 %v8695_v59, %v17601_v35  ;;  %v14230_v62 = vcombine.low %v3650_v7, %v3658_v30  ;;  %9832 = vmatpush1.bf16.msra.mxu1 %v14200_v17  ;;  %v8699_v26 = vpop.f32.mrb[16].mxu1  ;;  %v3667_v30 = vld [vmem:[#allocation4 + $0x638] sm:$0xff] }
 0x4f4   : > { %18515 = vst [vmem:[#allocation45_spill] sm:$0xff] %v17677_v14  ;;  %9833 = vmatprep.subr.bf16.mxu1 %v14217_v27  ;;  %v14233_v14 = vcombine.high %v3651_v2, %v3659_v24  ;;  %v14246_v17 = vcombine.low %v3666_v19, %v3674_v36  ;;  %v17706_v47 = vadd.f32 %v8699_v26, %v17597_v16  ;;  %v8701_v1 = vpop.f32.mrb[17].mxu1  ;;  %v3698_v19 = vld [vmem:[#allocation4 + $0x730] sm:$0xff] }
 0x4f5   : > { %18517 = vst [vmem:[#allocation47_spill] sm:$0xff] %v17683_v8  ;;  %18518 = vst [vmem:[#allocation48_spill] sm:$0xff] %v17691_v21  ;;  %9615 = vmatpush1.bf16.msra.mxu0 %v14214_v52  ;;  %v3675_v52 = vld [vmem:[#allocation4 + $0x678] sm:$0xff]  ;;  %v17712_v8 = vadd.f32 %v8701_v1, %v17601_v35  ;;  %v3706_v36 = vld [vmem:[#allocation4 + $0x770] sm:$0xff] }
 0x4f6   : > { %9616 = vmatprep.subr.bf16.mxu0 %v14231_v22  ;;  %v14249_v26 = vcombine.high %v3667_v30, %v3675_v52  ;;  %v3699_v21 = vld [vmem:[#allocation4 + $0x738] sm:$0xff] }
 0x4f7   : > { %v8928_v59 = vpop.f32.mrb[36].mxu0  ;;  %9834 = vmatpush1.bf16.msra.mxu1 %v14216_v34  ;;  %v3683_v34 = vld [vmem:[#allocation4 + $0x6b8] sm:$0xff] }
 0x4f8   : > { %v17700_v25 = vadd.f32 %v8928_v59, %v17625_v18  ;;  %v8930_v7 = vpop.f32.mrb[37].mxu0  ;;  %v14232_v59 = vcombine.low %v3651_v2, %v3659_v24  ;;  %9835 = vmatprep.subr.bf16.mxu1 %v14233_v14  ;;  %v3691_v2 = vld [vmem:[#allocation4 + $0x6f8] sm:$0xff]  ;;  %v14279_v24 = vcombine.high %v3698_v19, %v3706_v36 }
 0x4f9   : > { %v17703_v22 = vadd.f32 %v8930_v7, %v17630_v49  ;;  %v8932_v44 = vpop.f32.mrb[38].mxu0  ;;  %9617 = vmatpush1.bf16.msra.mxu0 %v14230_v62  ;;  %v8703_v7 = vpop.f32.mrb[18].mxu1 }
 0x4fa   : > { %18519 = vst [vmem:[#allocation49_spill] sm:$0xff] %v17700_v25  ;;  %v17709_v27 = vadd.f32 %v8932_v44, %v17625_v18  ;;  %v8934_v20 = vpop.f32.mrb[39].mxu0  ;;  %9618 = vmatprep.subr.bf16.mxu0 %v14247_v58  ;;  %v17718_v62 = vadd.f32 %v8703_v7, %v17597_v16  ;;  %v8705_v18 = vpop.f32.mrb[19].mxu1  ;;  %v14248_v58 = vcombine.low %v3667_v30, %v3675_v52  ;;  %v3714_v25 = vld [vmem:[#allocation4 + $0x7b0] sm:$0xff] }
 0x4fb   : > { %18520 = vst [vmem:[#allocation50_spill] sm:$0xff] %v17703_v22  ;;  %v17715_v53 = vadd.f32 %v8934_v20, %v17630_v49  ;;  %v17723_v1 = vadd.f32 %v8705_v18, %v17601_v35  ;;  %v14262_v20 = vcombine.low %v3682_v60, %v3690_v13  ;;  %9836 = vmatpush1.bf16.msra.mxu1 %v14232_v59  ;;  %v8709_v44 = vpop.f32.mrb[20].mxu1  ;;  %v3730_v49 = vld [vmem:[#allocation4 + $0x830] sm:$0xff]  ;;  %v3731_v22 = vld [vmem:[#allocation4 + $0x838] sm:$0xff] }
 0x4fc   : > { %18521 = vst [vmem:[#allocation51_spill] sm:$0xff] %v17709_v27  ;;  %v3722_v27 = vld [vmem:[#allocation4 + $0x7f0] sm:$0xff]  ;;  %9837 = vmatprep.subr.bf16.mxu1 %v14249_v26  ;;  %v14265_v18 = vcombine.high %v3683_v34, %v3691_v2  ;;  %v17732_v13 = vadd.f32 %v8709_v44, %v17597_v16  ;;  %v8711_v60 = vpop.f32.mrb[21].mxu1  ;;  %v14264_v30 = vcombine.low %v3683_v34, %v3691_v2  ;;  %v3723_v44 = vld [vmem:[#allocation4 + $0x7f8] sm:$0xff] }
 0x4fd   : > { %18522 = vst [vmem:[#allocation52_spill] sm:$0xff] %v17715_v53  ;;  %9619 = vmatpush1.bf16.msra.mxu0 %v14246_v17  ;;  %v14278_v17 = vcombine.low %v3698_v19, %v3706_v36  ;;  %v17735_v52 = vadd.f32 %v8711_v60, %v17601_v35  ;;  %v8713_v59 = vpop.f32.mrb[22].mxu1  ;;  %v3738_v7 = vld [vmem:[#allocation4 + $0x870] sm:$0xff]  ;;  %v14281_v26 = vcombine.high %v3699_v21, %v3707_v42  ;;  %v3715_v36 = vld [vmem:[#allocation4 + $0x7b8] sm:$0xff] }
 0x4fe   : > { %9620 = vmatprep.subr.bf16.mxu0 %v14263_v23  ;;  %v14295_v23 = vcombine.high %v3714_v25, %v3722_v27  ;;  %v17738_v14 = vadd.f32 %v8713_v59, %v17597_v16  ;;  %v8715_v19 = vpop.f32.mrb[23].mxu1  ;;  %v14311_v2 = vcombine.high %v3730_v49, %v3738_v7  ;;  %v3746_v16 = vld [vmem:[#allocation4 + $0x8b0] sm:$0xff]  ;;  %v14297_v59 = vcombine.high %v3715_v36, %v3723_v44 }
 0x4ff   : > { %9838 = vmatpush1.bf16.msra.mxu1 %v14248_v58  ;;  %18523 = vst [vmem:[#allocation53_spill] sm:$0xff] %v17735_v52  ;;  %v14280_v58 = vcombine.low %v3699_v21, %v3707_v42  ;;  %v3754_v60 = vld [vmem:[#allocation4 + $0x8f0] sm:$0xff]  ;;  %v16657_v21 = vld [vmem:[%s17403_s16] ss:$24 sps:$4 sm:$0xff]   ;;  %v16660_v52 = vld [vmem:[%s17403_s16 + $0x64] ss:$24 sps:$4 sm:$0xff]  }
 0x500   : > { %9839 = vmatprep.subr.bf16.mxu1 %v14265_v18  ;;  %v3755_v18 = vld [vmem:[#allocation4 + $0x8f8] sm:$0xff]  ;;  %v16658_v34 = vld [vmem:[%s17403_s16 + $0x34] ss:$24 sps:$4 sm:$0xff]  }
 0x501   : > { %9621 = vmatpush1.bf16.msra.mxu0 %v14262_v20  ;;  %v17741_v20 = vadd.f32 %v8715_v19, %v17601_v35  ;;  %v3739_v35 = vld [vmem:[#allocation4 + $0x878] sm:$0xff] }
 0x502   : > { %9622 = vmatprep.subr.bf16.mxu0 %v14279_v24  ;;  %v14294_v24 = vcombine.low %v3714_v25, %v3722_v27  ;;  %v14310_v25 = vcombine.low %v3730_v49, %v3738_v7  ;;  %v14327_v27 = vcombine.high %v3746_v16, %v3754_v60  ;;  %v14313_v42 = vcombine.high %v3731_v22, %v3739_v35  ;;  %v3747_v19 = vld [vmem:[#allocation4 + $0x8b8] sm:$0xff]  ;;  %v3778_v7 = vld [vmem:[#allocation4 + $0x9b0] sm:$0xff] }
 0x503   : > { %9840 = vmatpush1.bf16.msra.mxu1 %v14264_v30  ;;  %v3770_v30 = vld [vmem:[#allocation4 + $0x970] sm:$0xff]  ;;  %v14312_v49 = vcombine.low %v3731_v22, %v3739_v35  ;;  %v3779_v22 = vld [vmem:[#allocation4 + $0x9b8] sm:$0xff] }
 0x504   : > { %9841 = vmatprep.subr.bf16.mxu1 %v14281_v26  ;;  %v14326_v26 = vcombine.low %v3746_v16, %v3754_v60  ;;  %v14328_v16 = vcombine.low %v3747_v19, %v3755_v18  ;;  %v3794_v60 = vld [vmem:[#allocation4 + $0xa30] sm:$0xff]  ;;  %v3787_v35 = vld [vmem:[#allocation4 + $0x9f8] sm:$0xff] }
 0x505   : > { %9623 = vmatpush1.bf16.msra.mxu0 %v14278_v17  ;;  %v14296_v17 = vcombine.low %v3715_v36, %v3723_v44  ;;  %v14329_v36 = vcombine.high %v3747_v19, %v3755_v18  ;;  %v3763_v44 = vld [vmem:[#allocation4 + $0x938] sm:$0xff]  ;;  %v14361_v18 = vcombine.high %v3779_v22, %v3787_v35 }
 0x506   : > { %9624 = vmatprep.subr.bf16.mxu0 %v14295_v23  ;;  %v3762_v23 = vld [vmem:[#allocation4 + $0x930] sm:$0xff]  ;;  %v3795_v19 = vld [vmem:[#allocation4 + $0xa38] sm:$0xff] }
 0x507   : > { %9842 = vmatpush1.bf16.msra.mxu1 %v14280_v58  ;;  %v3771_v58 = vld [vmem:[#allocation4 + $0x978] sm:$0xff] }
 0x508   : > { %9843 = vmatprep.subr.bf16.mxu1 %v14297_v59  ;;  %v14342_v59 = vcombine.low %v3762_v23, %v3770_v30 }
 0x509   : > { %9625 = vmatpush1.bf16.msra.mxu0 %v14294_v24  ;;  %v14343_v24 = vcombine.high %v3762_v23, %v3770_v30  ;;  %v14344_v30 = vcombine.low %v3763_v44, %v3771_v58 }
 0x50a   : > { %9667 = vmatprep.subr.bf16.mxu0 %v14311_v2  ;;  %v3786_v2 = vld [vmem:[#allocation4 + $0x9f0] sm:$0xff] }
 0x50b   : > { %9844 = vmatpush1.bf16.msra.mxu1 %v14296_v17  ;;  %v14345_v17 = vcombine.high %v3763_v44, %v3771_v58  ;;  %v14358_v53 = vcombine.low %v3778_v7, %v3786_v2  ;;  %v3811_v44 = vld [vmem:[#allocation4 + $0xab8] sm:$0xff] }
 0x50c   : > { %9627 = vmatmul.mubr.bf16.vlgmr.msra.gmra.mrb[56].mxu0 %v16657_v21  ;;  %9886 = vmatprep.subr.bf16.mxu1 %v14313_v42  ;;  %v16659_v42 = vld [vmem:[%s17403_s16 + $0x30] ss:$24 sps:$4 sm:$0xff]   ;;  %v3819_v58 = vld [vmem:[#allocation4 + $0xaf8] sm:$0xff] }
 0x50d   : > { %9668 = vmatpush1.bf16.msra.mxu0 %v14310_v25  ;;  %9636 = vmatprep.mubr.bf16.mxu0 %v16658_v34  ;;  %v14359_v25 = vcombine.high %v3778_v7, %v3786_v2  ;;  %v14360_v7 = vcombine.low %v3779_v22, %v3787_v35  ;;  %v3826_v2 = vld [vmem:[#allocation4 + $0xb30] sm:$0xff]  ;;  %v14393_v22 = vcombine.high %v3811_v44, %v3819_v58  ;;  %v3827_v35 = vld [vmem:[#allocation4 + $0xb38] sm:$0xff] }
 0x50e   : > { %9669 = vmatprep.subr.bf16.mxu0 %v14327_v27  ;;  %9846 = vmatmul.mubr.bf16.vlgmr.msra.gmra.mrb[56].mxu1 %v16657_v21  ;;  %v3802_v27 = vld [vmem:[#allocation4 + $0xa70] sm:$0xff] }
 0x50f   : > { %9887 = vmatpush1.bf16.msra.mxu1 %v14312_v49  ;;  %9855 = vmatprep.mubr.bf16.mxu1 %v16658_v34  ;;  %v14375_v23 = vcombine.high %v3794_v60, %v3802_v27  ;;  %v3810_v21 = vld [vmem:[#allocation4 + $0xab0] sm:$0xff]  ;;  %v14374_v34 = vcombine.low %v3794_v60, %v3802_v27 }
 0x510   : > { %9888 = vmatprep.subr.bf16.mxu1 %v14329_v36  ;;  %v3834_v36 = vld [vmem:[#allocation4 + $0xb70] sm:$0xff] }
 0x511   : > { %9670 = vmatpush1.bf16.msra.mxu0 %v14326_v26  ;;  %v3818_v26 = vld [vmem:[#allocation4 + $0xaf0] sm:$0xff] }
 0x512   : > { %9671 = vmatprep.subr.bf16.mxu0 %v14343_v24  ;;  %v3803_v24 = vld [vmem:[#allocation4 + $0xa78] sm:$0xff]  ;;  %v14391_v49 = vcombine.high %v3810_v21, %v3818_v26  ;;  %v3842_v27 = vld [vmem:[#allocation4 + $0xbb0] sm:$0xff] }
 0x513   : > { %9889 = vmatpush1.bf16.msra.mxu1 %v14328_v16  ;;  %v14390_v16 = vcombine.low %v3810_v21, %v3818_v26  ;;  %v14376_v60 = vcombine.low %v3795_v19, %v3803_v24  ;;  %v14392_v21 = vcombine.low %v3811_v44, %v3819_v58  ;;  %v3858_v26 = vld [vmem:[#allocation4 + $0xc30] sm:$0xff]  ;;  %v3859_v58 = vld [vmem:[#allocation4 + $0xc38] sm:$0xff] }
 0x514   : > { %9637 = vmatmul.mubr.bf16.gmra.mrb[60].mxu0 %v16659_v42  ;;  %9890 = vmatprep.subr.bf16.mxu1 %v14345_v17  ;;  %v16662_v17 = vld [vmem:[%s17403_s16 + $0x94] ss:$24 sps:$4 sm:$0xff]  }
 0x515   : > { %9672 = vmatpush1.bf16.msra.mxu0 %v14342_v59  ;;  %9646 = vmatprep.mubr.bf16.mxu0 %v16660_v52  ;;  %v14377_v59 = vcombine.high %v3795_v19, %v3803_v24  ;;  %v3843_v19 = vld [vmem:[#allocation4 + $0xbb8] sm:$0xff] }
 0x516   : > { %9673 = vmatprep.subr.bf16.mxu0 %v14359_v25  ;;  %9856 = vmatmul.mubr.bf16.gmra.mrb[60].mxu1 %v16659_v42  ;;  %v16661_v25 = vld [vmem:[%s17403_s16 + $0x60] ss:$24 sps:$4 sm:$0xff]   ;;  %v3850_v42 = vld [vmem:[#allocation4 + $0xbf0] sm:$0xff] }
 0x517   : > { %9891 = vmatpush1.bf16.msra.mxu1 %v14344_v30  ;;  %9865 = vmatprep.mubr.bf16.mxu1 %v16660_v52  ;;  %v14406_v52 = vcombine.low %v3826_v2, %v3834_v36  ;;  %v14423_v30 = vcombine.high %v3842_v27, %v3850_v42  ;;  %v3851_v24 = vld [vmem:[#allocation4 + $0xbf8] sm:$0xff] }
 0x518   : > { %9892 = vmatprep.subr.bf16.mxu1 %v14361_v18  ;;  %v3866_v18 = vld [vmem:[#allocation4 + $0xc70] sm:$0xff]  ;;  %v14425_v44 = vcombine.high %v3843_v19, %v3851_v24 }
 0x519   : > { %9674 = vmatpush1.bf16.msra.mxu0 %v14358_v53  ;;  %v14407_v53 = vcombine.high %v3826_v2, %v3834_v36  ;;  %v14439_v2 = vcombine.high %v3858_v26, %v3866_v18 }
 0x51a   : > { %9675 = vmatprep.subr.bf16.mxu0 %v14375_v23  ;;  %v3835_v23 = vld [vmem:[#allocation4 + $0xb78] sm:$0xff] }
 0x51b   : > { %9893 = vmatpush1.bf16.msra.mxu1 %v14360_v7  ;;  %v14422_v7 = vcombine.low %v3842_v27, %v3850_v42  ;;  %v14408_v36 = vcombine.low %v3827_v35, %v3835_v23  ;;  %v3890_v27 = vld [vmem:[#allocation4 + $0xd30] sm:$0xff] }
 0x51c   : > { %9647 = vmatmul.mubr.bf16.gmra.mrb[64].mxu0 %v16661_v25  ;;  %9894 = vmatprep.subr.bf16.mxu1 %v14377_v59  ;;  %v16664_v59 = vld [vmem:[%s17403_s16 + $0xc] ss:$24 sps:$4 sm:$0xff]   ;;  %v3898_v42 = vld [vmem:[#allocation4 + $0xd70] sm:$0xff] }
 0x51d   : > { %9676 = vmatpush1.bf16.msra.mxu0 %v14374_v34  ;;  %9656 = vmatprep.mubr.bf16.mxu0 %v16662_v17  ;;  %v14409_v34 = vcombine.high %v3827_v35, %v3835_v23  ;;  %v3883_v35 = vld [vmem:[#allocation4 + $0xcf8] sm:$0xff] }
 0x51e   : > { %9677 = vmatprep.subr.bf16.mxu0 %v14391_v49  ;;  %9866 = vmatmul.mubr.bf16.gmra.mrb[64].mxu1 %v16661_v25  ;;  %v16663_v49 = vld [vmem:[%s17403_s16 + $0x90] ss:$24 sps:$4 sm:$0xff]  }
 0x51f   : > { %9895 = vmatpush1.bf16.msra.mxu1 %v14376_v60  ;;  %9875 = vmatprep.mubr.bf16.mxu1 %v16662_v17  ;;  %v3874_v25 = vld [vmem:[#allocation4 + $0xcb0] sm:$0xff]  ;;  %v14438_v17 = vcombine.low %v3858_v26, %v3866_v18 }
 0x520   : > { %9896 = vmatprep.subr.bf16.mxu1 %v14393_v22  ;;  %v14424_v22 = vcombine.low %v3843_v19, %v3851_v24  ;;  %v3914_v26 = vld [vmem:[#allocation4 + $0xdf0] sm:$0xff]  ;;  %v14470_v19 = vcombine.low %v3890_v27, %v3898_v42 }
 0x521   : > { %9678 = vmatpush1.bf16.msra.mxu0 %v14390_v16  ;;  %v3882_v16 = vld [vmem:[#allocation4 + $0xcf0] sm:$0xff] }
 0x522   : > { %9679 = vmatprep.subr.bf16.mxu0 %v14407_v53  ;;  %v3867_v53 = vld [vmem:[#allocation4 + $0xc78] sm:$0xff]  ;;  %v14455_v60 = vcombine.high %v3874_v25, %v3882_v16  ;;  %v14454_v23 = vcombine.low %v3874_v25, %v3882_v16 }
 0x523   : > { %9897 = vmatpush1.bf16.msra.mxu1 %v14392_v21  ;;  %v14471_v21 = vcombine.high %v3890_v27, %v3898_v42  ;;  %v3907_v16 = vld [vmem:[#allocation4 + $0xdb8] sm:$0xff] }
 0x524   : > { %9657 = vmatmul.mubr.bf16.gmra.mrb[68].mxu0 %v16663_v49  ;;  %9898 = vmatprep.subr.bf16.mxu1 %v14409_v34  ;;  %v14440_v34 = vcombine.low %v3859_v58, %v3867_v53  ;;  %v3923_v42 = vld [vmem:[#allocation4 + $0xe38] sm:$0xff] }
 0x525   : > { %9680 = vmatpush1.bf16.msra.mxu0 %v14406_v52  ;;  %9699 = vmatprep.mubr.bf16.mxu0 %v16664_v59  ;;  %v14441_v52 = vcombine.high %v3859_v58, %v3867_v53 }
 0x526   : > { %9681 = vmatprep.subr.bf16.mxu0 %v14423_v30  ;;  %9876 = vmatmul.mubr.bf16.gmra.mrb[68].mxu1 %v16663_v49  ;;  %v3875_v30 = vld [vmem:[#allocation4 + $0xcb8] sm:$0xff] }
 0x527   : > { %9899 = vmatpush1.bf16.msra.mxu1 %v14408_v36  ;;  %9918 = vmatprep.mubr.bf16.mxu1 %v16664_v59  ;;  %v14457_v18 = vcombine.high %v3875_v30, %v3883_v35  ;;  %v3891_v49 = vld [vmem:[#allocation4 + $0xd38] sm:$0xff]  ;;  %v14456_v59 = vcombine.low %v3875_v30, %v3883_v35  ;;  %v3922_v36 = vld [vmem:[#allocation4 + $0xe30] sm:$0xff] }
 0x528   : > { %9900 = vmatprep.subr.bf16.mxu1 %v14425_v44  ;;  %v3930_v44 = vld [vmem:[#allocation4 + $0xe70] sm:$0xff] }
 0x529   : > { %9682 = vmatpush1.bf16.msra.mxu0 %v14422_v7  ;;  %v3906_v7 = vld [vmem:[#allocation4 + $0xdb0] sm:$0xff]  ;;  %v14503_v53 = vcombine.high %v3922_v36, %v3930_v44  ;;  %v14502_v30 = vcombine.low %v3922_v36, %v3930_v44  ;;  %v3955_v44 = vld [vmem:[#allocation4 + $0xf38] sm:$0xff] }
 0x52a   : > { %9683 = vmatprep.subr.bf16.mxu0 %v14439_v2  ;;  %v3899_v2 = vld [vmem:[#allocation4 + $0xd78] sm:$0xff]  ;;  %v14487_v24 = vcombine.high %v3906_v7, %v3914_v26  ;;  %v14486_v58 = vcombine.low %v3906_v7, %v3914_v26 }
 0x52b   : > { %9901 = vmatpush1.bf16.msra.mxu1 %v14424_v22  ;;  %v14473_v25 = vcombine.high %v3891_v49, %v3899_v2  ;;  %v3938_v22 = vld [vmem:[#allocation4 + $0xeb0] sm:$0xff]  ;;  %v3939_v26 = vld [vmem:[#allocation4 + $0xeb8] sm:$0xff] }
 0x52c   : > { %9902 = vmatprep.subr.bf16.mxu1 %v14441_v52  ;;  %v3946_v52 = vld [vmem:[#allocation4 + $0xef0] sm:$0xff] }
 0x52d   : > { %9684 = vmatpush1.bf16.msra.mxu0 %v14438_v17  ;;  %v3915_v17 = vld [vmem:[#allocation4 + $0xdf8] sm:$0xff]  ;;  %v14519_v35 = vcombine.high %v3938_v22, %v3946_v52 }
 0x52e   : > { %9685 = vmatprep.subr.bf16.mxu0 %v14455_v60  ;;  %v14472_v60 = vcombine.low %v3891_v49, %v3899_v2  ;;  %v14489_v27 = vcombine.high %v3907_v16, %v3915_v17  ;;  %v14518_v49 = vcombine.low %v3938_v22, %v3946_v52  ;;  %v3971_v52 = vld [vmem:[#allocation4 + $0xfb8] sm:$0xff] }
 0x52f   : > { %9903 = vmatpush1.bf16.msra.mxu1 %v14440_v34  ;;  %v3954_v34 = vld [vmem:[#allocation4 + $0xf30] sm:$0xff] }
 0x530   : > { %9904 = vmatprep.subr.bf16.mxu1 %v14457_v18  ;;  %v3962_v18 = vld [vmem:[#allocation4 + $0xf70] sm:$0xff] }
 0x531   : > { %9686 = vmatpush1.bf16.msra.mxu0 %v14454_v23  ;;  %v3931_v23 = vld [vmem:[#allocation4 + $0xe78] sm:$0xff]  ;;  %v14535_v2 = vcombine.high %v3954_v34, %v3962_v18 }
 0x532   : > { %9687 = vmatprep.subr.bf16.mxu0 %v14471_v21  ;;  %v14488_v21 = vcombine.low %v3907_v16, %v3915_v17  ;;  %v14505_v7 = vcombine.high %v3923_v42, %v3931_v23  ;;  %v14534_v16 = vcombine.low %v3954_v34, %v3962_v18  ;;  %v3987_v18 = vld [vmem:[#allocation4 + $0x1038] sm:$0xff] }
 0x533   : > { %9905 = vmatpush1.bf16.msra.mxu1 %v14456_v59  ;;  %v3970_v59 = vld [vmem:[#allocation4 + $0xfb0] sm:$0xff] }
 0x534   : > { %9906 = vmatprep.subr.bf16.mxu1 %v14473_v25  ;;  %v3978_v25 = vld [vmem:[#allocation4 + $0xff0] sm:$0xff] }
 0x535   : > { %9688 = vmatpush1.bf16.msra.mxu0 %v14470_v19  ;;  %v3947_v19 = vld [vmem:[#allocation4 + $0xef8] sm:$0xff]  ;;  %v14551_v17 = vcombine.high %v3970_v59, %v3978_v25 }
 0x536   : > { %9689 = vmatprep.subr.bf16.mxu0 %v14487_v24  ;;  %v14504_v24 = vcombine.low %v3923_v42, %v3931_v23  ;;  %v14521_v36 = vcombine.high %v3939_v26, %v3947_v19  ;;  %v14550_v42 = vcombine.low %v3970_v59, %v3978_v25  ;;  %v4026_v59 = vld [vmem:[#allocation4 + $0x1170] sm:$0xff] }
 0x537   : > { %9907 = vmatpush1.bf16.msra.mxu1 %v14472_v60  ;;  %v3986_v60 = vld [vmem:[#allocation4 + $0x1030] sm:$0xff] }
 0x538   : > { %9908 = vmatprep.subr.bf16.mxu1 %v14489_v27  ;;  %v3994_v27 = vld [vmem:[#allocation4 + $0x1070] sm:$0xff] }
 0x539   : > { %9690 = vmatpush1.bf16.msra.mxu0 %v14486_v58  ;;  %v3963_v58 = vld [vmem:[#allocation4 + $0xf78] sm:$0xff]  ;;  %v14567_v23 = vcombine.high %v3986_v60, %v3994_v27 }
 0x53a   : > { %9691 = vmatprep.subr.bf16.mxu0 %v14503_v53  ;;  %v14520_v53 = vcombine.low %v3939_v26, %v3947_v19  ;;  %v14537_v22 = vcombine.high %v3955_v44, %v3963_v58  ;;  %v14566_v26 = vcombine.low %v3986_v60, %v3994_v27  ;;  %v4034_v27 = vld [vmem:[#allocation4 + $0x11b0] sm:$0xff] }
 0x53b   : > { %9909 = vmatpush1.bf16.msra.mxu1 %v14488_v21  ;;  %v4002_v21 = vld [vmem:[#allocation4 + $0x10b0] sm:$0xff] }
 0x53c   : > { %9910 = vmatprep.subr.bf16.mxu1 %v14505_v7  ;;  %v4010_v7 = vld [vmem:[#allocation4 + $0x10f0] sm:$0xff] }
 0x53d   : > { %9692 = vmatpush1.bf16.msra.mxu0 %v14502_v30  ;;  %v3979_v30 = vld [vmem:[#allocation4 + $0xff8] sm:$0xff]  ;;  %v14583_v19 = vcombine.high %v4002_v21, %v4010_v7 }
 0x53e   : > { %9693 = vmatprep.subr.bf16.mxu0 %v14519_v35  ;;  %v14536_v35 = vcombine.low %v3955_v44, %v3963_v58  ;;  %v14553_v34 = vcombine.high %v3971_v52, %v3979_v30  ;;  %v4003_v44 = vld [vmem:[#allocation4 + $0x10b8] sm:$0xff] }
 0x53f   : > { %9911 = vmatpush1.bf16.msra.mxu1 %v14504_v24  ;;  %v4018_v24 = vld [vmem:[#allocation4 + $0x1130] sm:$0xff]  ;;  %v4011_v58 = vld [vmem:[#allocation4 + $0x10f8] sm:$0xff] }
 0x540   : > { %9912 = vmatprep.subr.bf16.mxu1 %v14521_v36  ;;  %v16665_v36 = vld [vmem:[%s17403_s16 + $0x8] ss:$24 sps:$4 sm:$0xff]  }
 0x541   : > { %9694 = vmatpush1.bf16.msra.mxu0 %v14518_v49  ;;  %v3995_v49 = vld [vmem:[#allocation4 + $0x1078] sm:$0xff] }
 0x542   : > { %9695 = vmatprep.subr.bf16.mxu0 %v14535_v2  ;;  %v14552_v2 = vcombine.low %v3971_v52, %v3979_v30  ;;  %v14569_v25 = vcombine.high %v3987_v18, %v3995_v49  ;;  %v14568_v60 = vcombine.low %v3987_v18, %v3995_v49  ;;  %v14585_v52 = vcombine.high %v4003_v44, %v4011_v58  ;;  %v4019_v30 = vld [vmem:[#allocation4 + $0x1138] sm:$0xff] }
 0x543   : > { %9913 = vmatpush1.bf16.msra.mxu1 %v14520_v53  ;;  %v14599_v53 = vcombine.high %v4018_v24, %v4026_v59  ;;  %v4035_v18 = vld [vmem:[#allocation4 + $0x11b8] sm:$0xff] }
 0x544   : > { %9914 = vmatprep.subr.bf16.mxu1 %v14537_v22  ;;  %v4042_v22 = vld [vmem:[#allocation4 + $0x11f0] sm:$0xff]  ;;  %v4043_v49 = vld [vmem:[#allocation4 + $0x11f8] sm:$0xff] }
 0x545   : > { %9696 = vmatpush1.bf16.msra.mxu0 %v14534_v16  ;;  %v14582_v16 = vcombine.low %v4002_v21, %v4010_v7  ;;  %v14584_v21 = vcombine.low %v4003_v44, %v4011_v58  ;;  %v4050_v7 = vld [vmem:[#allocation4 + $0x1230] sm:$0xff]  ;;  %v14617_v44 = vcombine.high %v4035_v18, %v4043_v49  ;;  %v4051_v58 = vld [vmem:[#allocation4 + $0x1238] sm:$0xff] }
 0x546   : > { %9697 = vmatprep.subr.bf16.mxu0 %v14551_v17  ;;  %v16666_v17 = vld [vmem:[%s17403_s16 + $0x3c] ss:$24 sps:$4 sm:$0xff]  }
 0x547   : > { %9915 = vmatpush1.bf16.msra.mxu1 %v14536_v35  ;;  %v14615_v35 = vcombine.high %v4034_v27, %v4042_v22 }
 0x548   : > { %9916 = vmatprep.subr.bf16.mxu1 %v14553_v34  ;;  %v4058_v34 = vld [vmem:[#allocation4 + $0x1270] sm:$0xff] }
 0x549   : > { %9698 = vmatpush1.bf16.msra.mxu0 %v14550_v42  ;;  %v4027_v42 = vld [vmem:[#allocation4 + $0x1178] sm:$0xff] }
 0x54a   : > { %9740 = vmatprep.subr.bf16.mxu0 %v14567_v23  ;;  %v14598_v23 = vcombine.low %v4018_v24, %v4026_v59  ;;  %v14631_v24 = vcombine.high %v4050_v7, %v4058_v34  ;;  %v14600_v59 = vcombine.low %v4019_v30, %v4027_v42 }
 0x54b   : > { %9917 = vmatpush1.bf16.msra.mxu1 %v14552_v2  ;;  %v14614_v2 = vcombine.low %v4034_v27, %v4042_v22  ;;  %v14616_v27 = vcombine.low %v4035_v18, %v4043_v49  ;;  %v4082_v22 = vld [vmem:[#allocation4 + $0x1330] sm:$0xff]  ;;  %v4083_v49 = vld [vmem:[#allocation4 + $0x1338] sm:$0xff] }
 0x54c   : > { %9700 = vmatmul.mubr.bf16.vlgmr.msra.gmra.mrb[56].mxu0 %v16665_v36  ;;  %9959 = vmatprep.subr.bf16.mxu1 %v14569_v25  ;;  %v16668_v25 = vld [vmem:[%s17403_s16 + $0x6c] ss:$24 sps:$4 sm:$0xff]  }
 0x54d   : > { %9741 = vmatpush1.bf16.msra.mxu0 %v14566_v26  ;;  %9709 = vmatprep.mubr.bf16.mxu0 %v16666_v17  ;;  %v14601_v26 = vcombine.high %v4019_v30, %v4027_v42  ;;  %v4067_v30 = vld [vmem:[#allocation4 + $0x12b8] sm:$0xff] }
 0x54e   : > { %9742 = vmatprep.subr.bf16.mxu0 %v14583_v19  ;;  %9919 = vmatmul.mubr.bf16.vlgmr.msra.gmra.mrb[56].mxu1 %v16665_v36  ;;  %v16667_v19 = vld [vmem:[%s17403_s16 + $0x38] ss:$24 sps:$4 sm:$0xff]  }
 0x54f   : > { %9960 = vmatpush1.bf16.msra.mxu1 %v14568_v60  ;;  %9928 = vmatprep.mubr.bf16.mxu1 %v16666_v17  ;;  %v4066_v36 = vld [vmem:[#allocation4 + $0x12b0] sm:$0xff]  ;;  %v14630_v17 = vcombine.low %v4050_v7, %v4058_v34  ;;  %v4075_v42 = vld [vmem:[#allocation4 + $0x12f8] sm:$0xff] }
 0x550   : > { %9961 = vmatprep.subr.bf16.mxu1 %v14585_v52  ;;  %v4090_v52 = vld [vmem:[#allocation4 + $0x1370] sm:$0xff]  ;;  %v14649_v18 = vcombine.high %v4067_v30, %v4075_v42 }
 0x551   : > { %9743 = vmatpush1.bf16.msra.mxu0 %v14582_v16  ;;  %v4074_v16 = vld [vmem:[#allocation4 + $0x12f0] sm:$0xff]  ;;  %v14663_v7 = vcombine.high %v4082_v22, %v4090_v52 }
 0x552   : > { %9744 = vmatprep.subr.bf16.mxu0 %v14599_v53  ;;  %v4059_v53 = vld [vmem:[#allocation4 + $0x1278] sm:$0xff]  ;;  %v14647_v60 = vcombine.high %v4066_v36, %v4074_v16 }
 0x553   : > { %9962 = vmatpush1.bf16.msra.mxu1 %v14584_v21  ;;  %v14646_v21 = vcombine.low %v4066_v36, %v4074_v16  ;;  %v14632_v34 = vcombine.low %v4051_v58, %v4059_v53  ;;  %v14648_v36 = vcombine.low %v4067_v30, %v4075_v42  ;;  %v4114_v16 = vld [vmem:[#allocation4 + $0x1430] sm:$0xff]  ;;  %v4115_v42 = vld [vmem:[#allocation4 + $0x1438] sm:$0xff] }
 0x554   : > { %9710 = vmatmul.mubr.bf16.gmra.mrb[60].mxu0 %v16667_v19  ;;  %9963 = vmatprep.subr.bf16.mxu1 %v14601_v26  ;;  %v16670_v26 = vld [vmem:[%s17403_s16 + $0x9c] ss:$24 sps:$4 sm:$0xff]  }
 0x555   : > { %9745 = vmatpush1.bf16.msra.mxu0 %v14598_v23  ;;  %9719 = vmatprep.mubr.bf16.mxu0 %v16668_v25  ;;  %v14633_v23 = vcombine.high %v4051_v58, %v4059_v53  ;;  %v4099_v58 = vld [vmem:[#allocation4 + $0x13b8] sm:$0xff] }
 0x556   : > { %9746 = vmatprep.subr.bf16.mxu0 %v14615_v35  ;;  %9929 = vmatmul.mubr.bf16.gmra.mrb[60].mxu1 %v16667_v19  ;;  %v16669_v35 = vld [vmem:[%s17403_s16 + $0x68] ss:$24 sps:$4 sm:$0xff]   ;;  %v4098_v19 = vld [vmem:[#allocation4 + $0x13b0] sm:$0xff]  ;;  %v4107_v53 = vld [vmem:[#allocation4 + $0x13f8] sm:$0xff] }
 0x557   : > { %9964 = vmatpush1.bf16.msra.mxu1 %v14600_v59  ;;  %9938 = vmatprep.mubr.bf16.mxu1 %v16668_v25  ;;  %v14662_v25 = vcombine.low %v4082_v22, %v4090_v52  ;;  %v14681_v30 = vcombine.high %v4099_v58, %v4107_v53 }
 0x558   : > { %9965 = vmatprep.subr.bf16.mxu1 %v14617_v44  ;;  %v4122_v44 = vld [vmem:[#allocation4 + $0x1470] sm:$0xff] }
 0x559   : > { %9747 = vmatpush1.bf16.msra.mxu0 %v14614_v2  ;;  %v4106_v2 = vld [vmem:[#allocation4 + $0x13f0] sm:$0xff]  ;;  %v14695_v22 = vcombine.high %v4114_v16, %v4122_v44 }
 0x55a   : > { %9748 = vmatprep.subr.bf16.mxu0 %v14631_v24  ;;  %v4091_v24 = vld [vmem:[#allocation4 + $0x1378] sm:$0xff]  ;;  %v14679_v59 = vcombine.high %v4098_v19, %v4106_v2 }
 0x55b   : > { %9966 = vmatpush1.bf16.msra.mxu1 %v14616_v27  ;;  %v14678_v27 = vcombine.low %v4098_v19, %v4106_v2  ;;  %v14664_v52 = vcombine.low %v4083_v49, %v4091_v24  ;;  %v4146_v19 = vld [vmem:[#allocation4 + $0x1530] sm:$0xff] }
 0x55c   : > { %9720 = vmatmul.mubr.bf16.gmra.mrb[64].mxu0 %v16669_v35  ;;  %9967 = vmatprep.subr.bf16.mxu1 %v14633_v23  ;;  %v16672_v23 = vld [vmem:[%s17403_s16 + $0x14] ss:$24 sps:$4 sm:$0xff]  }
 0x55d   : > { %9749 = vmatpush1.bf16.msra.mxu0 %v14630_v17  ;;  %9729 = vmatprep.mubr.bf16.mxu0 %v16670_v26  ;;  %v14665_v17 = vcombine.high %v4083_v49, %v4091_v24  ;;  %v4154_v2 = vld [vmem:[#allocation4 + $0x1570] sm:$0xff]  ;;  %v4139_v49 = vld [vmem:[#allocation4 + $0x14f8] sm:$0xff] }
 0x55e   : > { %9750 = vmatprep.subr.bf16.mxu0 %v14647_v60  ;;  %9939 = vmatmul.mubr.bf16.gmra.mrb[64].mxu1 %v16669_v35  ;;  %v16671_v60 = vld [vmem:[%s17403_s16 + $0x98] ss:$24 sps:$4 sm:$0xff]  }
 0x55f   : > { %9968 = vmatpush1.bf16.msra.mxu1 %v14632_v34  ;;  %9948 = vmatprep.mubr.bf16.mxu1 %v16670_v26  ;;  %v4130_v35 = vld [vmem:[#allocation4 + $0x14b0] sm:$0xff]  ;;  %v14694_v26 = vcombine.low %v4114_v16, %v4122_v44 }
 0x560   : > { %9969 = vmatprep.subr.bf16.mxu1 %v14649_v18  ;;  %v14680_v18 = vcombine.low %v4099_v58, %v4107_v53  ;;  %v4170_v16 = vld [vmem:[#allocation4 + $0x15f0] sm:$0xff]  ;;  %v14726_v58 = vcombine.low %v4146_v19, %v4154_v2 }
 0x561   : > { %9751 = vmatpush1.bf16.msra.mxu0 %v14646_v21  ;;  %v4138_v21 = vld [vmem:[#allocation4 + $0x14f0] sm:$0xff] }
 0x562   : > { %9752 = vmatprep.subr.bf16.mxu0 %v14663_v7  ;;  %v4123_v7 = vld [vmem:[#allocation4 + $0x1478] sm:$0xff]  ;;  %v14711_v34 = vcombine.high %v4130_v35, %v4138_v21  ;;  %v14710_v24 = vcombine.low %v4130_v35, %v4138_v21 }
 0x563   : > { %9970 = vmatpush1.bf16.msra.mxu1 %v14648_v36  ;;  %v14727_v36 = vcombine.high %v4146_v19, %v4154_v2  ;;  %v4163_v21 = vld [vmem:[#allocation4 + $0x15b8] sm:$0xff] }
 0x564   : > { %9730 = vmatmul.mubr.bf16.gmra.mrb[68].mxu0 %v16671_v60  ;;  %9971 = vmatprep.subr.bf16.mxu1 %v14665_v17  ;;  %v14696_v17 = vcombine.low %v4115_v42, %v4123_v7  ;;  %v4179_v2 = vld [vmem:[#allocation4 + $0x1638] sm:$0xff] }
 0x565   : > { %9753 = vmatpush1.bf16.msra.mxu0 %v14662_v25  ;;  %9772 = vmatprep.mubr.bf16.mxu0 %v16672_v23  ;;  %v14697_v25 = vcombine.high %v4115_v42, %v4123_v7 }
 0x566   : > { %9754 = vmatprep.subr.bf16.mxu0 %v14679_v59  ;;  %9949 = vmatmul.mubr.bf16.gmra.mrb[68].mxu1 %v16671_v60  ;;  %v4131_v59 = vld [vmem:[#allocation4 + $0x14b8] sm:$0xff] }
 0x567   : > { %9972 = vmatpush1.bf16.msra.mxu1 %v14664_v52  ;;  %9991 = vmatprep.mubr.bf16.mxu1 %v16672_v23  ;;  %v14713_v44 = vcombine.high %v4131_v59, %v4139_v49  ;;  %v4147_v60 = vld [vmem:[#allocation4 + $0x1538] sm:$0xff]  ;;  %v14712_v23 = vcombine.low %v4131_v59, %v4139_v49  ;;  %v4178_v52 = vld [vmem:[#allocation4 + $0x1630] sm:$0xff] }
 0x568   : > { %9973 = vmatprep.subr.bf16.mxu1 %v14681_v30  ;;  %v4186_v30 = vld [vmem:[#allocation4 + $0x1670] sm:$0xff] }
 0x569   : > { %9755 = vmatpush1.bf16.msra.mxu0 %v14678_v27  ;;  %v4162_v27 = vld [vmem:[#allocation4 + $0x15b0] sm:$0xff]  ;;  %v14759_v7 = vcombine.high %v4178_v52, %v4186_v30  ;;  %v14758_v59 = vcombine.low %v4178_v52, %v4186_v30  ;;  %v4211_v30 = vld [vmem:[#allocation4 + $0x1738] sm:$0xff] }
 0x56a   : > { %9756 = vmatprep.subr.bf16.mxu0 %v14695_v22  ;;  %v4155_v22 = vld [vmem:[#allocation4 + $0x1578] sm:$0xff]  ;;  %v14743_v53 = vcombine.high %v4162_v27, %v4170_v16  ;;  %v14742_v42 = vcombine.low %v4162_v27, %v4170_v16 }
 0x56b   : > { %9974 = vmatpush1.bf16.msra.mxu1 %v14680_v18  ;;  %v14729_v35 = vcombine.high %v4147_v60, %v4155_v22  ;;  %v4194_v18 = vld [vmem:[#allocation4 + $0x16b0] sm:$0xff]  ;;  %v4195_v16 = vld [vmem:[#allocation4 + $0x16b8] sm:$0xff] }
 0x56c   : > { %9975 = vmatprep.subr.bf16.mxu1 %v14697_v25  ;;  %v4202_v25 = vld [vmem:[#allocation4 + $0x16f0] sm:$0xff] }
 0x56d   : > { %9757 = vmatpush1.bf16.msra.mxu0 %v14694_v26  ;;  %v4171_v26 = vld [vmem:[#allocation4 + $0x15f8] sm:$0xff]  ;;  %v14775_v49 = vcombine.high %v4194_v18, %v4202_v25 }
 0x56e   : > { %9758 = vmatprep.subr.bf16.mxu0 %v14711_v34  ;;  %v14728_v34 = vcombine.low %v4147_v60, %v4155_v22  ;;  %v14745_v19 = vcombine.high %v4163_v21, %v4171_v26  ;;  %v14774_v60 = vcombine.low %v4194_v18, %v4202_v25  ;;  %v4227_v18 = vld [vmem:[#allocation4 + $0x17b8] sm:$0xff] }
 0x56f   : > { %9976 = vmatpush1.bf16.msra.mxu1 %v14696_v17  ;;  %v4210_v17 = vld [vmem:[#allocation4 + $0x1730] sm:$0xff]  ;;  %v4235_v25 = vld [vmem:[#allocation4 + $0x17f8] sm:$0xff] }
 0x570   : > { %9977 = vmatprep.subr.bf16.mxu1 %v14713_v44  ;;  %v4218_v44 = vld [vmem:[#allocation4 + $0x1770] sm:$0xff] }
 0x571   : > { %9759 = vmatpush1.bf16.msra.mxu0 %v14710_v24  ;;  %v4187_v24 = vld [vmem:[#allocation4 + $0x1678] sm:$0xff]  ;;  %v14791_v22 = vcombine.high %v4210_v17, %v4218_v44 }
 0x572   : > { %9760 = vmatprep.subr.bf16.mxu0 %v14727_v36  ;;  %v14744_v36 = vcombine.low %v4163_v21, %v4171_v26  ;;  %v14761_v27 = vcombine.high %v4179_v2, %v4187_v24  ;;  %v14790_v21 = vcombine.low %v4210_v17, %v4218_v44  ;;  %v16674_v17 = vld [vmem:[%s17403_s16 + $0x44] ss:$24 sps:$4 sm:$0xff]   ;;  %v18524_v44 = vpack.c.bf16 %v17509_v33, %v17506_v31 }
 0x573   : > { %9978 = vmatpush1.bf16.msra.mxu1 %v14712_v23  ;;  %v4226_v23 = vld [vmem:[#allocation4 + $0x17b0] sm:$0xff]  ;;  %v16678_v31 = vld [vmem:[%s17403_s16 + $0xa4] ss:$24 sps:$4 sm:$0xff]  }
 0x574   : > { %9979 = vmatprep.subr.bf16.mxu1 %v14729_v35  ;;  %v4234_v35 = vld [vmem:[#allocation4 + $0x17f0] sm:$0xff] }
 0x575   : > { %9761 = vmatpush1.bf16.msra.mxu0 %v14726_v58  ;;  %v4203_v58 = vld [vmem:[#allocation4 + $0x16f8] sm:$0xff]  ;;  %v14807_v26 = vcombine.high %v4226_v23, %v4234_v35 }
 0x576   : > { %9762 = vmatprep.subr.bf16.mxu0 %v14743_v53  ;;  %v14760_v53 = vcombine.low %v4179_v2, %v4187_v24  ;;  %v14777_v52 = vcombine.high %v4195_v16, %v4203_v58  ;;  %v14809_v24 = vcombine.high %v4227_v18, %v4235_v25 }
 0x577   : > { %9980 = vmatpush1.bf16.msra.mxu1 %v14728_v34 }
 0x578   : > { %9981 = vmatprep.subr.bf16.mxu1 %v14745_v19  ;;  %v14806_v19 = vcombine.low %v4226_v23, %v4234_v35 }
 0x579   : > { %9763 = vmatpush1.bf16.msra.mxu0 %v14742_v42  ;;  %v4219_v42 = vld [vmem:[#allocation4 + $0x1778] sm:$0xff] }
 0x57a   : > { %9764 = vmatprep.subr.bf16.mxu0 %v14759_v7  ;;  %v14776_v7 = vcombine.low %v4195_v16, %v4203_v58  ;;  %v14793_v34 = vcombine.high %v4211_v30, %v4219_v42  ;;  %v14792_v2 = vcombine.low %v4211_v30, %v4219_v42  ;;  %v16676_v16 = vld [vmem:[%s17403_s16 + $0x74] ss:$24 sps:$4 sm:$0xff]   ;;  %v18525_v58 = vpack.c.bf16 %v17527_v6, %v17524_v3 }
 0x57b   : > { %9982 = vmatpush1.bf16.msra.mxu1 %v14744_v36  ;;  %v16673_v36 = vld [vmem:[%s17403_s16 + $0x10] ss:$24 sps:$4 sm:$0xff]   ;;  %v18526_v42 = vpack.c.bf16 %v17543_v51, %v17540_v50  ;;  %v17802_v50 = vld [vmem:[#allocation10] sm:$0xff] }
 0x57c   : > { %9983 = vmatprep.subr.bf16.mxu1 %v14761_v27  ;;  %v16675_v27 = vld [vmem:[%s17403_s16 + $0x40] ss:$24 sps:$4 sm:$0xff]   ;;  %v966_v51 = vrot.slane %v17802_v50, %v17492_v5 }
 0x57d   : > { %9765 = vmatpush1.bf16.msra.mxu0 %v14758_v59  ;;  %v18446_v59 = vmov 0.0  }
 0x57e   : > { %9766 = vmatprep.subr.bf16.mxu0 %v14775_v49  ;;  %v14808_v49 = vcombine.low %v4227_v18, %v4235_v25 }
 0x57f   : > { %9984 = vmatpush1.bf16.msra.mxu1 %v14760_v53 }
 0x580   : > { %9985 = vmatprep.subr.bf16.mxu1 %v14777_v52 }
 0x581   : > { %9767 = vmatpush1.bf16.msra.mxu0 %v14774_v60  ;;  %v17776_v60 = vld [vmem:[#allocation12 + $0x8] sm:$0xff] }
 0x582   : > { %9768 = vmatprep.subr.bf16.mxu0 %v14791_v22  ;;  %v16677_v22 = vld [vmem:[%s17403_s16 + $0x70] ss:$24 sps:$4 sm:$0xff]   ;;  %v4275_v33 = vrot.slane %v17776_v60, %v17492_v5  ;;  %v17785_v53 = vrot.slane %v17776_v60, %v17496_v10 }
 0x583   : > { %9986 = vmatpush1.bf16.msra.mxu1 %v14776_v7 }
 0x584   : > { %9987 = vmatprep.subr.bf16.mxu1 %v14793_v34  ;;  %v16679_v34 = vld [vmem:[%s17403_s16 + $0xa0] ss:$24 sps:$4 sm:$0xff]  }
 0x585   : > { %9769 = vmatpush1.bf16.msra.mxu0 %v14790_v21 }
 0x586   : > { %9770 = vmatprep.subr.bf16.mxu0 %v14807_v26 }
 0x587   : > { %9988 = vmatpush1.bf16.msra.mxu1 %v14792_v2 }
 0x588   : > { %9989 = vmatprep.subr.bf16.mxu1 %v14809_v24 }
 0x589   : > { %9771 = vmatpush1.bf16.msra.mxu0 %v14806_v19 }
 0x58a   : > { %15259 = vmatprep.subr.bf16.mxu0 %v18446_v59 }
 0x58b   : > { %9990 = vmatpush1.bf16.msra.mxu1 %v14808_v49 }
 0x58c   : > { %9773 = vmatmul.mubr.bf16.vlgmr.msra.gmra.mrb[56].mxu0 %v16673_v36  ;;  %15271 = vmatprep.subr.bf16.mxu1 %v18446_v59 }
 0x58d   : > { %9782 = vmatprep.mubr.bf16.mxu0 %v16674_v17 }
 0x58e   : > { %9992 = vmatmul.mubr.bf16.vlgmr.msra.gmra.mrb[56].mxu1 %v16673_v36 }
 0x58f   : > { %10001 = vmatprep.mubr.bf16.mxu1 %v16674_v17  ;;  %v18527_v17 = vpack.c.bf16 %v17559_v28, %v17556_v40 }
 0x592   : > { %15260 = vmatpush3.bf16.xpose.msra.mxu0 %v18524_v44  ;;  %v15451_v44 = vadd.f32 %v17412_v32, %v966_v51 }
 0x593   : > { %15261 = vmatprep.subr.bf16.mxu0 %v18446_v59 }
 0x594   : > { %9783 = vmatmul.mubr.bf16.gmra.mrb[60].mxu0 %v16675_v27  ;;  %v3436_v40 = vpack.c.bf16 %v15451_v44, %v15451_v44 }
 0x595   : > { %9792 = vmatprep.mubr.bf16.mxu0 %v16676_v16 }
 0x596   : > { %10002 = vmatmul.mubr.bf16.gmra.mrb[60].mxu1 %v16675_v27 }
 0x597   : > { %10011 = vmatprep.mubr.bf16.mxu1 %v16676_v16 }
 0x59a   : > { %15262 = vmatpush3.bf16.xpose.msra.mxu0 %v18525_v58 }
 0x59b   : > { %15263 = vmatprep.subr.bf16.mxu0 %v18446_v59 }
 0x59c   : > { %9793 = vmatmul.mubr.bf16.gmra.mrb[64].mxu0 %v16677_v22 }
 0x59d   : > { %9802 = vmatprep.mubr.bf16.mxu0 %v16678_v31 }
 0x59e   : > { %10012 = vmatmul.mubr.bf16.gmra.mrb[64].mxu1 %v16677_v22 }
 0x59f   : > { %v9336_v23 = vpop.f32.mrb[40].mxu0  ;;  %10021 = vmatprep.mubr.bf16.mxu1 %v16678_v31 }
 0x5a0   : > { %v9338_v3 = vpop.f32.mrb[41].mxu0  ;;  %v15523_v35 = vadd.f32 %v9336_v23, %v4275_v33 }
 0x5a1   : > { %v9340_v6 = vpop.f32.mrb[42].mxu0  ;;  %v17791_v21 = vadd.f32 %v9338_v3, %v17785_v53 }
 0x5a2   : > { %v15525_v52 = vadd.f32 %v9340_v6, %v4275_v33  ;;  %v9342_v30 = vpop.f32.mrb[43].mxu0  ;;  %15264 = vmatpush3.bf16.xpose.msra.mxu0 %v18526_v42 }
 0x5a3   : > { %v17794_v26 = vadd.f32 %v9342_v30, %v17785_v53  ;;  %15265 = vmatprep.subr.bf16.mxu0 %v18446_v59 }
 0x5a4   : > { %v10040_v7 = vpack.c.bf16 %v15525_v52, %v15523_v35  ;;  %9803 = vmatmul.mubr.bf16.gmra.mrb[68].mxu0 %v16679_v34  ;;  %v18528_v35 = vpack.c.bf16 %v17515_v39, %v17512_v38 }
 0x5a5   : > { %15267 = vmatprep.mubr.msk.bf16.mxu0 %vm17014_vm0, %v18446_v59 }
 0x5a6   : > { %15272 = vmatpush3.bf16.msra.mxu1 %v10040_v7 }
 0x5a7   : > { %v9346_v25 = vpop.f32.mrb[44].mxu0  ;;  %15273 = vmatprep.subr.bf16.mxu1 %v18446_v59  ;;  %10022 = vmatmul.mubr.bf16.gmra.mrb[68].mxu1 %v16679_v34 }
 0x5a8   : > { %v9348_v19 = vpop.f32.mrb[45].mxu0  ;;  %v15527_v24 = vadd.f32 %v9346_v25, %v4275_v33  ;;  %15279 = vmatprep.mubr.msk.bf16.mxu1 %vm17014_vm0, %v18446_v59 }
 0x5a9   : > { %v9350_v2 = vpop.f32.mrb[46].mxu0  ;;  %v17814_v27 = vadd.f32 %v9348_v19, %v17785_v53 }
 0x5aa   : > { %v15529_v49 = vadd.f32 %v9350_v2, %v4275_v33  ;;  %v9352_v36 = vpop.f32.mrb[47].mxu0  ;;  %15266 = vmatpush3.bf16.xpose.msra.mxu0 %v18527_v17  ;;  %v18529_v2 = vpack.c.bf16 %v17533_v12, %v17530_v11  ;;  %v970_v11 = vrot.slane %v17802_v50, %v17496_v10  ;;  %v18531_v12 = vpack.c.bf16 %v17565_v46, %v17562_v43 }
 0x5ab   : > { %v17817_v16 = vadd.f32 %v9352_v36, %v17785_v53  ;;  %15283 = vmatprep.subr.bf16.mxu0 %v18446_v59  ;;  %v18535_v43 = vpack.c.bf16 %v17738_v14, %v17732_v13  ;;  %v18552_v17 = vlaneseq }
 0x5ac   : > { %v10056_v58 = vpack.c.bf16 %v15529_v49, %v15527_v24 }
 0x5ae   : > { %15274 = vmatpush3.bf16.msra.mxu1 %v10056_v58  ;;  %v18532_v58 = vpack.c.bf16 %v17610_v56, %v17604_v63  ;;  %v16681_v56 = vld [vmem:[#allocation12] sm:$0xff] }
 0x5af   : > { %v9356_v28 = vpop.f32.mrb[48].mxu0  ;;  %15275 = vmatprep.subr.bf16.mxu1 %v18446_v59 }
 0x5b0   : > { %v9358_v31 = vpop.f32.mrb[49].mxu0  ;;  %v15531_v32 = vadd.f32 %v9356_v28, %v4275_v33 }
 0x5b1   : > { %v9360_v23 = vpop.f32.mrb[50].mxu0  ;;  %15268 = vmatmul.mubr.bf16.vlgmr.msra.gmra.mrb[72].mxu0 %v3436_v40  ;;  %v17829_v52 = vadd.f32 %v9358_v31, %v17785_v53 }
 0x5b2   : > { %v15533_v3 = vadd.f32 %v9360_v23, %v4275_v33  ;;  %v9362_v6 = vpop.f32.mrb[51].mxu0  ;;  %15284 = vmatpush3.bf16.xpose.msra.mxu0 %v18528_v35  ;;  %15291 = vmatprep.mubr.msk.bf16.mxu0 %vm17014_vm0, %v18446_v59 }
 0x5b3   : > { %v17832_v30 = vadd.f32 %v9362_v6, %v17785_v53  ;;  %15285 = vmatprep.subr.bf16.mxu0 %v18446_v59 }
 0x5b4   : > { %v10072_v42 = vpack.c.bf16 %v15533_v3, %v15531_v32 }
 0x5b6   : > { %15276 = vmatpush3.bf16.msra.mxu1 %v10072_v42 }
 0x5b7   : > { %v9366_v34 = vpop.f32.mrb[52].mxu0  ;;  %15277 = vmatprep.subr.bf16.mxu1 %v18446_v59 }
 0x5b8   : > { %v9368_v38 = vpop.f32.mrb[53].mxu0  ;;  %v15535_v51 = vadd.f32 %v9366_v34, %v4275_v33 }
 0x5b9   : > { %v9370_v39 = vpop.f32.mrb[54].mxu0  ;;  %v17842_v24 = vadd.f32 %v9368_v38, %v17785_v53 }
 0x5ba   : > { %v15537_v25 = vadd.f32 %v9370_v39, %v4275_v33  ;;  %v9372_v19 = vpop.f32.mrb[55].mxu0  ;;  %15286 = vmatpush3.bf16.xpose.msra.mxu0 %v18529_v2  ;;  %v18530_v33 = vpack.c.bf16 %v17549_v55, %v17546_v54  ;;  %v18533_v54 = vpack.c.bf16 %v17686_v48, %v17674_v29  ;;  %v974_v55 = vrot.slane %v17802_v50, %v17588_v41 }
 0x5bb   : > { %v17845_v49 = vadd.f32 %v9372_v19, %v17785_v53  ;;  %15287 = vmatprep.subr.bf16.mxu0 %v18446_v59  ;;  %v15452_v53 = vadd.f32 %v17414_v37, %v970_v11  ;;  %v18534_v37 = vpack.c.bf16 %v17718_v62, %v17706_v47  ;;  %v4267_v29 = vrot.slane %v16681_v56, %v17476_v61  ;;  %v9117_v47 = vpop.f32.mrb[24].mxu1 }
 0x5bc   : > { %v10088_v36 = vpack.c.bf16 %v15537_v25, %v15535_v51  ;;  %v15453_v46 = vadd.f32 %v17432_v15, %v974_v55  ;;  %v4271_v48 = vrot.slane %v16681_v56, %v17480_v9  ;;  %v9119_v40 = vpop.f32.mrb[25].mxu1 }
 0x5bd   : > { %v3437_v44 = vpack.c.bf16 %v15452_v53, %v15452_v53  ;;  %v17887_v62 = vadd.f32 %v9117_v47, %v4267_v29  ;;  %v9121_v13 = vpop.f32.mrb[26].mxu1 }
 0x5be   : > { %15278 = vmatpush3.bf16.msra.mxu1 %v10088_v36  ;;  %v3438_v63 = vpack.c.bf16 %v15453_v46, %v15453_v46  ;;  %v17889_v14 = vadd.f32 %v9119_v40, %v4271_v48  ;;  %v17891_v15 = vadd.f32 %v9121_v13, %v4267_v29  ;;  %v9123_v28 = vpop.f32.mrb[27].mxu1 }
 0x5bf   : > { %15295 = vmatprep.subr.bf16.mxu1 %v18446_v59  ;;  %18536 = vst [vmem:[#allocation54_spill] sm:$0xff] %v17887_v62  ;;  %v17893_v31 = vadd.f32 %v9123_v28, %v4271_v48  ;;  %v9127_v3 = vpop.f32.mrb[28].mxu1 }
 0x5c0   : > { %18537 = vst [vmem:[#allocation55_spill] sm:$0xff] %v17889_v14  ;;  %18538 = vst [vmem:[#allocation56_spill] sm:$0xff] %v17891_v15  ;;  %v17899_v6 = vadd.f32 %v9127_v3, %v4267_v29  ;;  %v9129_v35 = vpop.f32.mrb[29].mxu1 }
 0x5c1   : > { %18539 = vst [vmem:[#allocation57_spill] sm:$0xff] %v17893_v31  ;;  %v17901_v42 = vadd.f32 %v9129_v35, %v4271_v48  ;;  %v9131_v34 = vpop.f32.mrb[30].mxu1  ;;  %v4291_v35 = vrot.slane %v17776_v60, %v17445_v0  ;;  %v10100_v0 = vmul.u32 8, %v17441_v57 }
 0x5c2   : > { %15288 = vmatpush3.bf16.xpose.msra.mxu0 %v18530_v33  ;;  %18540 = vst [vmem:[#allocation58_spill] sm:$0xff] %v17899_v6  ;;  %v17903_v38 = vadd.f32 %v9131_v34, %v4267_v29  ;;  %v9133_v39 = vpop.f32.mrb[31].mxu1  ;;  %v4295_v34 = vrot.slane %v17776_v60, %v17448_v4 }
 0x5c3   : > { %15289 = vmatprep.subr.bf16.mxu0 %v18446_v59  ;;  %18541 = vst [vmem:[#allocation59_spill] sm:$0xff] %v17901_v42  ;;  %v17905_v51 = vadd.f32 %v9133_v39, %v4271_v48  ;;  %v9137_v2 = vpop.f32.mrb[32].mxu1  ;;  %v10102_v7 = vadd.s32 8, %v10100_v0 }
 0x5c4   : > { %18542 = vst [vmem:[#allocation60_spill] sm:$0xff] %v17903_v38  ;;  %v17911_v36 = vadd.f32 %v9137_v2, %v4267_v29  ;;  %v9139_v33 = vpop.f32.mrb[33].mxu1 }
 0x5c5   : > { %18543 = vst [vmem:[#allocation61_spill] sm:$0xff] %v17905_v51  ;;  %v17913_v11 = vadd.f32 %v9139_v33, %v4271_v48 }
 0x5c6   : > { %18544 = vst [vmem:[#allocation62_spill] sm:$0xff] %v17911_v36 }
 0x5c7   : > { %18545 = vst [vmem:[#allocation63_spill] sm:$0xff] %v17913_v11 }
 0x5ca   : > { %15290 = vmatpush3.bf16.xpose.msra.mxu0 %v18531_v12  ;;  %v9141_v12 = vpop.f32.mrb[34].mxu1 }
 0x5cb   : > { %15307 = vmatprep.subr.bf16.mxu0 %v18446_v59  ;;  %v17915_v53 = vadd.f32 %v9141_v12, %v4267_v29 }
 0x5cd   : > { %18546 = vst [vmem:[#allocation64_spill] sm:$0xff] %v17915_v53 }
 0x5d1   : > { %15292 = vmatmul.mubr.bf16.vlgmr.msra.gmra.mrb[76].mxu0 %v3437_v44  ;;  %v9143_v44 = vpop.f32.mrb[35].mxu1 }
 0x5d2   : > { %15308 = vmatpush3.bf16.xpose.msra.mxu0 %v18532_v58  ;;  %15315 = vmatprep.mubr.msk.bf16.mxu0 %vm17014_vm0, %v18446_v59  ;;  %v17917_v58 = vadd.f32 %v9143_v44, %v4271_v48 }
 0x5d3   : > { %15309 = vmatprep.subr.bf16.mxu0 %v18446_v59 }
 0x5d4   : > { %18547 = vst [vmem:[#allocation65_spill] sm:$0xff] %v17917_v58 }
 0x5da   : > { %15310 = vmatpush3.bf16.xpose.msra.mxu0 %v18533_v54  ;;  %v9147_v54 = vpop.f32.mrb[36].mxu1 }
 0x5db   : > { %15311 = vmatprep.subr.bf16.mxu0 %v18446_v59  ;;  %v17921_v55 = vadd.f32 %v9147_v54, %v4267_v29 }
 0x5dd   : > { %18548 = vst [vmem:[#allocation66_spill] sm:$0xff] %v17921_v55 }
 0x5e2   : > { %15312 = vmatpush3.bf16.xpose.msra.mxu0 %v18534_v37 }
 0x5e3   : > { %15313 = vmatprep.subr.bf16.mxu0 %v18446_v59 }
 0x5ea   : > { %15314 = vmatpush3.bf16.xpose.msra.mxu0 %v18535_v43  ;;  %v9149_v43 = vpop.f32.mrb[37].mxu1 }
 0x5eb   : > { %15319 = vmatprep.subr.bf16.mxu0 %v18446_v59  ;;  %v9151_v56 = vpop.f32.mrb[38].mxu1 }
 0x5ec   : > { %v17927_v47 = vadd.f32 %v9151_v56, %v4267_v29  ;;  %v9153_v40 = vpop.f32.mrb[39].mxu1 }
 0x5ed   : > { %v17929_v13 = vadd.f32 %v9153_v40, %v4271_v48 }
 0x5ee   : > { %18550 = vst [vmem:[#allocation68_spill] sm:$0xff] %v17927_v47 }
 0x5ef   : > { %18551 = vst [vmem:[#allocation69_spill] sm:$0xff] %v17929_v13  ;;  %v18553_v13 = vmov 0.0  }
 0x5f1   : > { %15316 = vmatmul.mubr.bf16.vlgmr.msra.gmra.mrb[80].mxu0 %v3438_v63  ;;  %v17925_v63 = vadd.f32 %v9149_v43, %v4271_v48 }
 0x5f2   : > { %15327 = vmatprep.mubr.msk.bf16.mxu0 %vm17014_vm0, %v18446_v59 }
 0x5f3   : > { %18549 = vst [vmem:[#allocation67_spill] sm:$0xff] %v17925_v63 }
 0x65f   : > { %v9774_v39 = vpop.f32.mrb[56].mxu0 }
 0x660   : > { %v9776_v2 = vpop.f32.mrb[57].mxu0  ;;  %v17939_v29 = vadd.f32 %v9774_v39, %v4291_v35 }
 0x661   : > { %v9778_v33 = vpop.f32.mrb[58].mxu0  ;;  %v17943_v44 = vadd.f32 %v9776_v2, %v4295_v34 }
 0x662   : > { %v17941_v12 = vadd.f32 %v9778_v33, %v4291_v35  ;;  %v9780_v48 = vpop.f32.mrb[59].mxu0 }
 0x663   : > { %v17945_v54 = vadd.f32 %v9780_v48, %v4295_v34 }
 0x667   : > { %v9784_v56 = vpop.f32.mrb[60].mxu0 }
 0x668   : > { %v9786_v4 = vpop.f32.mrb[61].mxu0  ;;  %v17951_v3 = vadd.f32 %v9784_v56, %v4291_v35 }
 0x669   : > { %v9788_v40 = vpop.f32.mrb[62].mxu0  ;;  %v17955_v46 = vadd.f32 %v9786_v4, %v4295_v34 }
 0x66a   : > { %v17953_v39 = vadd.f32 %v9788_v40, %v4291_v35  ;;  %v9790_v33 = vpop.f32.mrb[63].mxu0 }
 0x66b   : > { %v17957_v2 = vadd.f32 %v9790_v33, %v4295_v34 }
 0x66f   : > { %v9794_v32 = vpop.f32.mrb[64].mxu0 }
 0x670   : > { %v9796_v28 = vpop.f32.mrb[65].mxu0  ;;  %v17963_v25 = vadd.f32 %v9794_v32, %v4291_v35  ;;  %v10099_v32 = vand.u32 127, %v18552_v17  ;;  %v17015_v17 = vmov -1e+30  }
 0x671   : > { %v9798_v37 = vpop.f32.mrb[66].mxu0  ;;  %v17967_v23 = vadd.f32 %v9796_v28, %v4295_v34 }
 0x672   : > { %v17965_v56 = vadd.f32 %v9798_v37, %v4291_v35  ;;  %v9800_v40 = vpop.f32.mrb[67].mxu0  ;;  %vm10101_vm1 = vcmp.ge.s32.totalorder %v10099_v32, %v10100_v0  ;;  %vm10103_vm2 = vcmp.lt.s32.totalorder %v10099_v32, %v10102_v7 }
 0x673   : > { %v17969_v4 = vadd.f32 %v9800_v40, %v4295_v34  ;;  %vm10104_vm3 = vmand %vm10101_vm1, %vm10103_vm2 }
 0x674   : > { %v17989_v33 = vsel %vm10104_vm3, 0.0, %v17015_v17 }
 0x677   : > { %v9804_v48 = vpop.f32.mrb[68].mxu0 }
 0x678   : > { %v9806_v43 = vpop.f32.mrb[69].mxu0  ;;  %v17977_v22 = vadd.f32 %v9804_v48, %v4291_v35 }
 0x679   : > { %v9808_v37 = vpop.f32.mrb[70].mxu0  ;;  %v17981_v18 = vadd.f32 %v9806_v43, %v4295_v34 }
 0x67a   : > { %v17979_v28 = vadd.f32 %v9808_v37, %v4291_v35  ;;  %v9810_v40 = vpop.f32.mrb[71].mxu0 }
 0x67b   : > { %v17983_v59 = vadd.f32 %v9810_v40, %v4295_v34 }
 0x684   : > { %v10140_v48 = vpop.f32.mrb[72].mxu0 }
 0x685   : > { %v17992_v35 = vadd.f32 %v10140_v48, %v17989_v33  ;;  %v15269_v43 = vpop.f32.mrb[73].mxu0 }
 0x686   : > { %v10143_v34 = vpop.f32.mrb[74].mxu0 }
 0x687   : > { %v15270_v37 = vpop.f32.mrb[75].mxu0  ;;  %v10147_v40 = vsel %vm10146_vm4, %v17992_v35, -inf }
 0x688   : > { %10148 = vmax.xlane.f32.xlu1 %v10147_v40 }
 0x6a4   : > { %v10236_v7 = vpop.f32.mrb[76].mxu0 }
 0x6a5   : > { %v17997_v0 = vadd.f32 %v10236_v7, %v17989_v33  ;;  %v15293_v32 = vpop.f32.mrb[77].mxu0  ;;  %v4283_v7 = vrot.slane %v17776_v60, %v17588_v41 }
 0x6a6   : > { %v10239_v19 = vpop.f32.mrb[78].mxu0  ;;  %v9555_v32 = vpop.f32.mrb[40].mxu1 }
 0x6a7   : > { %v15294_v17 = vpop.f32.mrb[79].mxu0  ;;  %v10242_v57 = vsel %vm10146_vm4, %v17997_v0, -inf  ;;  %v4287_v19 = vrot.slane %v17776_v60, %v17591_v45 }
 0x6a8   : > { %10243 = vmax.xlane.f32.xlu1 %v10242_v57  ;;  %v15539_v17 = vadd.f32 %v9555_v32, %v4283_v7  ;;  %v9557_v57 = vpop.f32.mrb[41].mxu1 }
 0x6a9   : > { %v18010_v5 = vadd.f32 %v9557_v57, %v4287_v19 }
 0x6c4   : > { %v10331_v48 = vpop.f32.mrb[80].mxu0 }
 0x6c5   : > { %v18002_v43 = vadd.f32 %v10331_v48, %v17989_v33  ;;  %v15317_v34 = vpop.f32.mrb[81].mxu0  ;;  %v9559_v48 = vpop.f32.mrb[42].mxu1 }
 0x6c6   : > { %v10334_v37 = vpop.f32.mrb[82].mxu0  ;;  %v15541_v63 = vadd.f32 %v9559_v48, %v4283_v7  ;;  %v9561_v34 = vpop.f32.mrb[43].mxu1 }
 0x6c7   : > { %v15318_v10 = vpop.f32.mrb[83].mxu0  ;;  %v10337_v40 = vsel %vm10146_vm4, %v18002_v43, -inf  ;;  %v18012_v37 = vadd.f32 %v9561_v34, %v4287_v19  ;;  %v9565_v41 = vpop.f32.mrb[44].mxu1 }
 0x6c8   : > { %10338 = vmax.xlane.f32.xlu0 %v10337_v40  ;;  %v10042_v10 = vpack.c.bf16 %v15541_v63, %v15539_v17  ;;  %v15543_v11 = vadd.f32 %v9565_v41, %v4283_v7  ;;  %v9567_v58 = vpop.f32.mrb[45].mxu1 }
 0x6c9   : > { %v18017_v42 = vadd.f32 %v9567_v58, %v4287_v19  ;;  %v9569_v32 = vpop.f32.mrb[46].mxu1 }
 0x6ca   : > { %15320 = vmatpush3.bf16.msra.mxu0 %v10042_v10  ;;  %v15545_v57 = vadd.f32 %v9569_v32, %v4283_v7  ;;  %v9571_v51 = vpop.f32.mrb[47].mxu1 }
 0x6cb   : > { %15321 = vmatprep.subr.bf16.mxu0 %v18553_v13  ;;  %v18019_v14 = vadd.f32 %v9571_v51, %v4287_v19  ;;  %v9575_v48 = vpop.f32.mrb[48].mxu1 }
 0x6cc   : > { %v10058_v34 = vpack.c.bf16 %v15545_v57, %v15543_v11  ;;  %v15547_v31 = vadd.f32 %v9575_v48, %v4283_v7  ;;  %v9577_v63 = vpop.f32.mrb[49].mxu1 }
 0x6cd   : > { %v18023_v10 = vadd.f32 %v9577_v63, %v4287_v19  ;;  %v9579_v40 = vpop.f32.mrb[50].mxu1 }
 0x6ce   : > { %15322 = vmatpush3.bf16.msra.mxu0 %v10058_v34  ;;  %v15549_v41 = vadd.f32 %v9579_v40, %v4283_v7  ;;  %v9581_v55 = vpop.f32.mrb[51].mxu1 }
 0x6cf   : > { %v18025_v58 = vadd.f32 %v9581_v55, %v4287_v19  ;;  %15323 = vmatprep.subr.bf16.mxu0 %v18553_v13  ;;  %v9585_v32 = vpop.f32.mrb[52].mxu1 }
 0x6d0   : > { %v10074_v51 = vpack.c.bf16 %v15549_v41, %v15547_v31  ;;  %v15551_v47 = vadd.f32 %v9585_v32, %v4283_v7  ;;  %v9587_v36 = vpop.f32.mrb[53].mxu1 }
 0x6d1   : > { %v18030_v57 = vadd.f32 %v9587_v36, %v4287_v19  ;;  %v9589_v48 = vpop.f32.mrb[54].mxu1 }
 0x6d2   : > { %15324 = vmatpush3.bf16.msra.mxu0 %v10074_v51  ;;  %v15553_v63 = vadd.f32 %v9589_v48, %v4283_v7  ;;  %v9591_v17 = vpop.f32.mrb[55].mxu1 }
 0x6d3   : > { %v18032_v34 = vadd.f32 %v9591_v17, %v4287_v19  ;;  %15325 = vmatprep.subr.bf16.mxu0 %v18553_v13 }
 0x6d4   : > { %v10090_v55 = vpack.c.bf16 %v15553_v63, %v15551_v47  ;;  %v4303_v63 = vrot.slane %v17776_v60, %v17480_v9 }
 0x6d6   : > { %15326 = vmatpush3.bf16.msra.mxu0 %v10090_v55 }
 0x6d7   : > { %15331 = vmatprep.subr.bf16.mxu0 %v18553_v13 }
 0x715   : > { %v10149_v31 = vpop.xlane.xlu1 %10148 }
 0x716   : > { %v10150_v41 = vsub.f32 %v17992_v35, %v10149_v31  ;;  %v4299_v35 = vrot.slane %v17776_v60, %v17476_v61  ;;  %v9993_v31 = vpop.f32.mrb[56].mxu1 }
 0x718   : > { %v10151_v36 = vmul.f32 1.442695, %v10150_v41  ;;  %v18051_v41 = vadd.f32 %v9993_v31, %v4299_v35 }
 0x71a   : > { %16570 = vpow2.f32 %v10151_v36 }
 0x724   : > { %v16571_v32 = vpop.eup %16570 }
 0x725   : > { %v10153_v7 = vsel %vm10146_vm4, %v16571_v32, 0.0 }
 0x726   : > { %10154 = vadd.xlane.f32.xlu1 %v10153_v7 }
 0x735   : > { %v18049_v55 = vpop.xlane.xlu1 %10243 }
 0x755   : > { %v10339_v19 = vpop.xlane.xlu0 %10338 }
 0x756   : > { %v10340_v17 = vsub.f32 %v18002_v43, %v10339_v19  ;;  %v9995_v43 = vpop.f32.mrb[57].mxu1 }
 0x757   : > { %v18053_v36 = vadd.f32 %v9995_v43, %v4303_v63  ;;  %v9997_v7 = vpop.f32.mrb[58].mxu1 }
 0x758   : > { %v10341_v51 = vmul.f32 1.442695, %v10340_v17  ;;  %v18055_v17 = vadd.f32 %v9997_v7, %v4299_v35 }
 0x759   : > { %18554 = vst [vmem:[#allocation70_spill] sm:$0xff] %v18053_v36 }
 0x75a   : > { %16572 = vpow2.f32 %v10341_v51  ;;  %v9999_v51 = vpop.f32.mrb[59].mxu1 }
 0x75b   : > { %v10003_v61 = vpop.f32.mrb[60].mxu1 }
 0x75c   : > { %v18061_v60 = vadd.f32 %v10003_v61, %v4299_v35  ;;  %v10005_v40 = vpop.f32.mrb[61].mxu1 }
 0x75d   : > { %v18065_v43 = vadd.f32 %v10005_v40, %v4303_v63  ;;  %v10007_v11 = vpop.f32.mrb[62].mxu1 }
 0x75e   : > { %18556 = vst [vmem:[#allocation72_spill] sm:$0xff] %v18061_v60  ;;  %v18067_v53 = vadd.f32 %v10007_v11, %v4299_v35  ;;  %v10009_v7 = vpop.f32.mrb[63].mxu1 }
 0x75f   : > { %18557 = vst [vmem:[#allocation73_spill] sm:$0xff] %v18065_v43  ;;  %v18069_v6 = vadd.f32 %v10009_v7, %v4303_v63 }
 0x760   : > { %18558 = vst [vmem:[#allocation74_spill] sm:$0xff] %v18067_v53 }
 0x761   : > { %18559 = vst [vmem:[#allocation75_spill] sm:$0xff] %v18069_v6 }
 0x764   : > { %v18041_v47 = vpop.eup %16572 }
 0x765   : > { %v10343_v48 = vsel %vm10146_vm4, %v18041_v47, 0.0 }
 0x766   : > { %10344 = vadd.xlane.f32.xlu0 %v10343_v48  ;;  %v18057_v48 = vadd.f32 %v9999_v51, %v4303_v63 }
 0x768   : > { %18555 = vst [vmem:[#allocation71_spill] sm:$0xff] %v18057_v48 }
 0x7b3   : > { %v10155_v19 = vpop.xlane.xlu1 %10154 }
 0x7b4   : > { %16574 = vrcp.f32 %v10155_v19  ;;  %v10013_v19 = vpop.f32.mrb[64].mxu1 }
 0x7b5   : > { %v18073_v38 = vadd.f32 %v10013_v19, %v4299_v35  ;;  %v10015_v61 = vpop.f32.mrb[65].mxu1 }
 0x7b6   : > { %v18077_v62 = vadd.f32 %v10015_v61, %v4303_v63  ;;  %v10017_v40 = vpop.f32.mrb[66].mxu1 }
 0x7b7   : > { %v18079_v31 = vadd.f32 %v10017_v40, %v4299_v35  ;;  %v10019_v11 = vpop.f32.mrb[67].mxu1 }
 0x7b8   : > { %v18081_v36 = vadd.f32 %v10019_v11, %v4303_v63  ;;  %v10023_v7 = vpop.f32.mrb[68].mxu1 }
 0x7b9   : > { %v18085_v15 = vadd.f32 %v10023_v7, %v4299_v35  ;;  %v10025_v19 = vpop.f32.mrb[69].mxu1 }
 0x7ba   : > { %v10079_v60 = vpack.c.bf16 %v18081_v36, %v18077_v62  ;;  %v18089_v9 = vadd.f32 %v10025_v19, %v4303_v63  ;;  %v10027_v61 = vpop.f32.mrb[70].mxu1  ;;  %v18560_v19 = vpack.c.bf16 %v17794_v26, %v17791_v21  ;;  %v18563_v21 = vpack.c.bf16 %v17845_v49, %v17842_v24  ;;  %v18568_v24 = vld [vmem:[#allocation46_spill] sm:$0xff] }
 0x7bb   : > { %v18091_v40 = vadd.f32 %v10027_v61, %v4299_v35  ;;  %v10029_v6 = vpop.f32.mrb[71].mxu1  ;;  %v18564_v35 = vld [vmem:[#allocation34_spill] sm:$0xff] }
 0x7bc   : > { %v18093_v11 = vadd.f32 %v10029_v6, %v4303_v63  ;;  %v18561_v6 = vpack.c.bf16 %v17817_v16, %v17814_v27  ;;  %v18565_v63 = vld [vmem:[#allocation33_spill] sm:$0xff] }
 0x7bd   : > { %v10094_v48 = vpack.c.bf16 %v18091_v40, %v18085_v15 }
 0x7be   : > { %v16575_v51 = vpop.eup %16574  ;;  %v10095_v7 = vpack.c.bf16 %v18093_v11, %v18089_v9 }
 0x7bf   : > { %v10157_v43 = vmul.f32 %v16575_v51, %v16571_v32  ;;  %v18562_v32 = vpack.c.bf16 %v17832_v30, %v17829_v52  ;;  %v18566_v52 = vpack.c.bf16 %v18564_v35, %v18565_v63  ;;  %v18567_v30 = vld [vmem:[#allocation48_spill] sm:$0xff]  ;;  %v18571_v51 = vld [vmem:[#allocation53_spill] sm:$0xff] }
 0x7c0   : > { %v18569_v49 = vpack.c.bf16 %v18567_v30, %v18568_v24  ;;  %v18572_v61 = vpack.c.bf16 %v17741_v20, %v18571_v51  ;;  %v18577_v20 = vpack.c.bf16 %v17979_v28, %v17977_v22 }
 0x7c1   : > { %v10158_v53 = vpack.c.bf16 %v10157_v43, %v10157_v43  ;;  %v978_v43 = vrot.slane %v17802_v50, %v17591_v45 }
 0x7c3   : > { %15280 = vmatmul.mubr.msk.bf16.vlgmr.msra.gmra.mrb[72].mxu1 %vm10146_vm4, %v10158_v53 }
 0x7c4   : > { %15296 = vmatpush3.bf16.msra.mxu1 %v18560_v19  ;;  %15303 = vmatprep.mubr.msk.bf16.mxu1 %vm17014_vm0, %v18553_v13  ;;  %v18573_v19 = vld [vmem:[#allocation25_spill] sm:$0xff] }
 0x7c5   : > { %15297 = vmatprep.subr.bf16.mxu1 %v18553_v13 }
 0x7c8   : > { %15298 = vmatpush3.bf16.msra.mxu1 %v18561_v6  ;;  %v15454_v6 = vadd.f32 %v18573_v19, %v978_v43 }
 0x7c9   : > { %15299 = vmatprep.subr.bf16.mxu1 %v18553_v13 }
 0x7cc   : > { %15300 = vmatpush3.bf16.msra.mxu1 %v18562_v32  ;;  %v3439_v32 = vpack.c.bf16 %v15454_v6, %v15454_v6 }
 0x7cd   : > { %15301 = vmatprep.subr.bf16.mxu1 %v18553_v13 }
 0x7d0   : > { %15302 = vmatpush3.bf16.msra.mxu1 %v18563_v21  ;;  %v18574_v21 = vpack.c.bf16 %v17941_v12, %v17939_v29 }
 0x7d1   : > { %15343 = vmatprep.subr.bf16.mxu1 %v18553_v13 }
 0x7f3   : > { %v10345_v26 = vpop.xlane.xlu0 %10344 }
 0x7f4   : > { %16576 = vrcp.f32 %v10345_v26 }
 0x7fe   : > { %v16577_v53 = vpop.eup %16576 }
 0x7ff   : > { %v10347_v27 = vmul.f32 %v16577_v53, %v18041_v47  ;;  %v18570_v47 = vpack.c.bf16 %v17723_v1, %v17712_v8  ;;  %v18575_v8 = vpack.c.bf16 %v17953_v39, %v17951_v3  ;;  %v18576_v1 = vpack.c.bf16 %v17965_v56, %v17963_v25 }
 0x800   : > { %v10245_v25 = vsub.f32 %v17997_v0, %v18049_v55 }
 0x801   : > { %v10348_v16 = vpack.c.bf16 %v10347_v27, %v10347_v27 }
 0x802   : > { %v10246_v56 = vmul.f32 1.442695, %v10245_v25 }
 0x803   : > { %15328 = vmatmul.mubr.msk.bf16.vlgmr.msra.gmra.mrb[84].mxu0 %vm10146_vm4, %v10348_v16 }
 0x804   : > { %15332 = vmatpush3.bf16.xpose.msra.mxu0 %v18566_v52  ;;  %15339 = vmatprep.mubr.msk.bf16.mxu0 %vm17014_vm0, %v18553_v13  ;;  %16578 = vpow2.f32 %v10246_v56  ;;  %v18594_v56 = vld [vmem:[#allocation26_spill] sm:$0xff] }
 0x805   : > { %15333 = vmatprep.subr.bf16.mxu0 %v18553_v13 }
 0x80c   : > { %15334 = vmatpush3.bf16.xpose.msra.mxu0 %v18569_v49 }
 0x80d   : > { %15335 = vmatprep.subr.bf16.mxu0 %v18553_v13 }
 0x80e   : > { %v16579_v30 = vpop.eup %16578 }
 0x80f   : > { %v10248_v24 = vsel %vm10146_vm4, %v16579_v30, 0.0 }
 0x814   : > { %15336 = vmatpush3.bf16.xpose.msra.mxu0 %v18570_v47 }
 0x815   : > { %15337 = vmatprep.subr.bf16.mxu0 %v18553_v13 }
 0x81c   : > { %15338 = vmatpush3.bf16.xpose.msra.mxu0 %v18572_v61 }
 0x81d   : > { %15367 = vmatprep.subr.bf16.mxu0 %v18553_v13 }
 0x823   : > { %15340 = vmatmul.mubr.bf16.vlgmr.msra.gmra.mrb[88].mxu0 %v3439_v32  ;;  %v18578_v32 = vpack.c.bf16 %v18012_v37, %v18010_v5  ;;  %v18581_v5 = vpack.c.bf16 %v18032_v34, %v18030_v57  ;;  %v18588_v34 = vld [vmem:[#allocation45_spill] sm:$0xff] }
 0x824   : > { %15368 = vmatpush3.bf16.msra.mxu0 %v18574_v21  ;;  %15375 = vmatprep.mubr.msk.bf16.mxu0 %vm17014_vm0, %v18553_v13  ;;  %v18579_v21 = vpack.c.bf16 %v18019_v14, %v18017_v42  ;;  %v18582_v42 = vld [vmem:[#allocation37_spill] sm:$0xff] }
 0x825   : > { %15369 = vmatprep.subr.bf16.mxu0 %v18553_v13 }
 0x828   : > { %15370 = vmatpush3.bf16.msra.mxu0 %v18575_v8  ;;  %v18580_v8 = vpack.c.bf16 %v18025_v58, %v18023_v10  ;;  %v18585_v10 = vld [vmem:[#allocation41_spill] sm:$0xff]  ;;  %v18586_v58 = vld [vmem:[#allocation39_spill] sm:$0xff] }
 0x829   : > { %15371 = vmatprep.subr.bf16.mxu0 %v18553_v13  ;;  %v18587_v57 = vpack.c.bf16 %v18585_v10, %v18586_v58  ;;  %v18608_v58 = vld [vmem:[#allocation52_spill] sm:$0xff] }
 0x82c   : > { %15372 = vmatpush3.bf16.msra.mxu0 %v18576_v1 }
 0x82d   : > { %15373 = vmatprep.subr.bf16.mxu0 %v18553_v13 }
 0x830   : > { %15374 = vmatpush3.bf16.msra.mxu0 %v18577_v20 }
 0x831   : > { %15379 = vmatprep.subr.bf16.mxu0 %v18553_v13 }
 0x896   : > { %v18159_v50 = vpop.f32.mrb[72].mxu1 }
 0x897   : > { %v15281_v29 = vpop.f32.mrb[73].mxu1 }
 0x898   : > { %v10199_v12 = vpop.f32.mrb[74].mxu1  ;;  %v18583_v29 = vld [vmem:[#allocation35_spill] sm:$0xff] }
 0x899   : > { %v15282_v3 = vpop.f32.mrb[75].mxu1  ;;  %v18584_v12 = vpack.c.bf16 %v18582_v42, %v18583_v29  ;;  %v18605_v29 = vld [vmem:[#allocation47_spill] sm:$0xff] }
 0x89a   : > { %v18589_v3 = vld [vmem:[#allocation43_spill] sm:$0xff] }
 0x8d6   : > { %v18161_v39 = vpop.f32.mrb[84].mxu0 }
 0x8d7   : > { %v15329_v26 = vpop.f32.mrb[85].mxu0 }
 0x8d8   : > { %v10389_v53 = vpop.f32.mrb[86].mxu0  ;;  %v18590_v26 = vpack.c.bf16 %v18588_v34, %v18589_v3  ;;  %v18611_v3 = vld [vmem:[#allocation27_spill] sm:$0xff] }
 0x8d9   : > { %v15330_v27 = vpop.f32.mrb[87].mxu0  ;;  %v18591_v53 = vld [vmem:[#allocation51_spill] sm:$0xff] }
 0x8da   : > { %v18592_v27 = vld [vmem:[#allocation49_spill] sm:$0xff] }
 0x8db   : > { %v18593_v25 = vpack.c.bf16 %v18591_v53, %v18592_v27  ;;  %v18612_v53 = vpack.c.bf16 %v18055_v17, %v18051_v41  ;;  %v18613_v27 = vld [vmem:[#allocation74_spill] sm:$0xff] }
 0x8f6   : > { %v10426_v16 = vpop.f32.mrb[88].mxu0 }
 0x8f7   : > { %v10427_v22 = vadd.f32 %v10426_v16, %v17989_v33  ;;  %v15341_v28 = vpop.f32.mrb[89].mxu0  ;;  %v3440_v16 = vpack.c.bf16 %v18594_v56, %v18594_v56 }
 0x8f8   : > { %v10429_v35 = vpop.f32.mrb[90].mxu0  ;;  %v18596_v28 = vpack.c.bf16 %v17957_v2, %v17955_v46 }
 0x8f9   : > { %v15342_v63 = vpop.f32.mrb[91].mxu0  ;;  %v10432_v52 = vsel %vm10146_vm4, %v10427_v22, -inf  ;;  %v18597_v35 = vpack.c.bf16 %v17969_v4, %v17967_v23 }
 0x8fa   : > { %10433 = vmax.xlane.f32.xlu0 %v10432_v52 }
 0x8fe   : > { %10249 = vadd.xlane.f32.xlu0 %v10248_v24 }
 0x987   : > { %v10434_v49 = vpop.xlane.xlu0 %10433 }
 0x988   : > { %v10435_v47 = vsub.f32 %v10427_v22, %v10434_v49  ;;  %v18595_v22 = vpack.c.bf16 %v17945_v54, %v17943_v44  ;;  %v18598_v44 = vpack.c.bf16 %v17983_v59, %v17981_v18 }
 0x98a   : > { %v10436_v43 = vmul.f32 1.442695, %v10435_v47 }
 0x98b   : > { %v10250_v51 = vpop.xlane.xlu0 %10249 }
 0x98c   : > { %16580 = vpow2.f32 %v10436_v43 }
 0x98d   : > { %16582 = vrcp.f32 %v10250_v51 }
 0x996   : > { %v16581_v0 = vpop.eup %16580 }
 0x997   : > { %v16583_v55 = vpop.eup %16582  ;;  %v10438_v61 = vsel %vm10146_vm4, %v16581_v0, 0.0 }
 0x998   : > { %v10252_v19 = vmul.f32 %v16583_v55, %v16579_v30  ;;  %10439 = vadd.xlane.f32.xlu1 %v10438_v61 }
 0x99a   : > { %v10253_v6 = vpack.c.bf16 %v10252_v19, %v10252_v19 }
 0x99c   : > { %15304 = vmatmul.mubr.msk.bf16.vlgmr.msra.gmra.mrb[76].mxu1 %vm10146_vm4, %v10253_v6 }
 0x99d   : > { %15344 = vmatpush3.bf16.msra.mxu1 %v18578_v32  ;;  %15351 = vmatprep.mubr.msk.bf16.mxu1 %vm17014_vm0, %v18553_v13 }
 0x99e   : > { %15345 = vmatprep.subr.bf16.mxu1 %v18553_v13 }
 0x9a1   : > { %15346 = vmatpush3.bf16.msra.mxu1 %v18579_v21 }
 0x9a2   : > { %15347 = vmatprep.subr.bf16.mxu1 %v18553_v13 }
 0x9a5   : > { %15348 = vmatpush3.bf16.msra.mxu1 %v18580_v8 }
 0x9a6   : > { %15349 = vmatprep.subr.bf16.mxu1 %v18553_v13 }
 0x9a9   : > { %15350 = vmatpush3.bf16.msra.mxu1 %v18581_v5  ;;  %v18599_v5 = vld [vmem:[#allocation38_spill] sm:$0xff] }
 0x9aa   : > { %15355 = vmatprep.subr.bf16.mxu1 %v18553_v13 }
 0xa25   : > { %v10440_v37 = vpop.xlane.xlu1 %10439 }
 0xa26   : > { %16584 = vrcp.f32 %v10440_v37  ;;  %v18600_v37 = vld [vmem:[#allocation36_spill] sm:$0xff] }
 0xa30   : > { %v16585_v1 = vpop.eup %16584 }
 0xa31   : > { %v10442_v20 = vmul.f32 %v16585_v1, %v16581_v0  ;;  %v18601_v1 = vpack.c.bf16 %v18599_v5, %v18600_v37  ;;  %v18630_v37 = vld [vmem:[#allocation71_spill] sm:$0xff] }
 0xa33   : > { %v10443_v14 = vpack.c.bf16 %v10442_v20, %v10442_v20  ;;  %v18602_v20 = vld [vmem:[#allocation42_spill] sm:$0xff] }
 0xa35   : > { %15352 = vmatmul.mubr.msk.bf16.vlgmr.msra.gmra.mrb[80].mxu1 %vm10146_vm4, %v10443_v14  ;;  %v18603_v14 = vld [vmem:[#allocation40_spill] sm:$0xff] }
 0xa36   : > { %15356 = vmatpush3.bf16.xpose.msra.mxu1 %v18584_v12  ;;  %15363 = vmatprep.mubr.msk.bf16.mxu1 %vm17014_vm0, %v18553_v13  ;;  %v18604_v42 = vpack.c.bf16 %v18602_v20, %v18603_v14  ;;  %v18606_v12 = vld [vmem:[#allocation44_spill] sm:$0xff]  ;;  %v18633_v14 = vld [vmem:[#allocation75_spill] sm:$0xff] }
 0xa37   : > { %15357 = vmatprep.subr.bf16.mxu1 %v18553_v13  ;;  %v18607_v10 = vpack.c.bf16 %v18605_v29, %v18606_v12 }
 0xa3e   : > { %15358 = vmatpush3.bf16.xpose.msra.mxu1 %v18587_v57  ;;  %v18609_v57 = vld [vmem:[#allocation50_spill] sm:$0xff] }
 0xa3f   : > { %15359 = vmatprep.subr.bf16.mxu1 %v18553_v13  ;;  %v18610_v34 = vpack.c.bf16 %v18608_v58, %v18609_v57 }
 0xa46   : > { %15360 = vmatpush3.bf16.xpose.msra.mxu1 %v18590_v26  ;;  %v3441_v26 = vpack.c.bf16 %v18611_v3, %v18611_v3 }
 0xa47   : > { %15361 = vmatprep.subr.bf16.mxu1 %v18553_v13 }
 0xa4e   : > { %15362 = vmatpush3.bf16.xpose.msra.mxu1 %v18593_v25  ;;  %v18614_v25 = vld [vmem:[#allocation72_spill] sm:$0xff] }
 0xa4f   : > { %15391 = vmatprep.subr.bf16.mxu1 %v18553_v13  ;;  %v18615_v56 = vpack.c.bf16 %v18613_v27, %v18614_v25 }
 0xa55   : > { %15364 = vmatmul.mubr.bf16.vlgmr.msra.gmra.mrb[84].mxu1 %v3440_v16  ;;  %v18616_v16 = vpack.c.bf16 %v18079_v31, %v18073_v38 }
 0xa56   : > { %15392 = vmatpush3.bf16.msra.mxu1 %v18595_v22  ;;  %15399 = vmatprep.mubr.msk.bf16.mxu1 %vm17014_vm0, %v18553_v13 }
 0xa57   : > { %15393 = vmatprep.subr.bf16.mxu1 %v18553_v13 }
 0xa5a   : > { %15394 = vmatpush3.bf16.msra.mxu1 %v18596_v28 }
 0xa5b   : > { %15395 = vmatprep.subr.bf16.mxu1 %v18553_v13 }
 0xa5e   : > { %15396 = vmatpush3.bf16.msra.mxu1 %v18597_v35 }
 0xa5f   : > { %15397 = vmatprep.subr.bf16.mxu1 %v18553_v13 }
 0xa62   : > { %15398 = vmatpush3.bf16.msra.mxu1 %v18598_v44 }
 0xa63   : > { %15403 = vmatprep.subr.bf16.mxu1 %v18553_v13 }
 0xa6f   : > { %v18227_v54 = vpop.f32.mrb[76].mxu1 }
 0xa70   : > { %v15305_v63 = vpop.f32.mrb[77].mxu1 }
 0xa71   : > { %v10294_v52 = vpop.f32.mrb[78].mxu1 }
 0xa72   : > { %v15306_v46 = vpop.f32.mrb[79].mxu1 }
 0xb08   : > { %v18229_v2 = vpop.f32.mrb[80].mxu1 }
 0xb09   : > { %v15353_v30 = vpop.f32.mrb[81].mxu1 }
 0xb0a   : > { %v10484_v24 = vpop.f32.mrb[82].mxu1 }
 0xb0b   : > { %v15354_v49 = vpop.f32.mrb[83].mxu1 }
 0xb28   : > { %v10521_v23 = vpop.f32.mrb[84].mxu1 }
 0xb29   : > { %v10522_v4 = vadd.f32 %v10521_v23, %v17989_v33  ;;  %v15365_v47 = vpop.f32.mrb[85].mxu1 }
 0xb2a   : > { %v10524_v43 = vpop.f32.mrb[86].mxu1  ;;  %v18617_v47 = vld [vmem:[#allocation56_spill] sm:$0xff] }
 0xb2b   : > { %v15366_v51 = vpop.f32.mrb[87].mxu1  ;;  %v10527_v59 = vsel %vm10146_vm4, %v10522_v4, -inf  ;;  %v18618_v43 = vld [vmem:[#allocation54_spill] sm:$0xff] }
 0xb2c   : > { %10528 = vmax.xlane.f32.xlu0 %v10527_v59  ;;  %v18619_v51 = vpack.c.bf16 %v18617_v47, %v18618_v43  ;;  %v18620_v59 = vld [vmem:[#allocation60_spill] sm:$0xff]  ;;  %v18343_v47 = vpack.c.bf16 %v18227_v54, %v18227_v54 }
 0xb2d   : > { %v16082_v43 = vld [vmem:[#allocation6 + $0x4c] ss:$16 sps:$4 sm:$0xff]  }
 0xb2e   : > { %v16091_v54 = vld [vmem:[#allocation6 + $0xac] ss:$16 sps:$4 sm:$0xff]  }
 0xbb9   : > { %v10529_v18 = vpop.xlane.xlu0 %10528 }
 0xbba   : > { %v10530_v0 = vsub.f32 %v10522_v4, %v10529_v18  ;;  %v18621_v18 = vld [vmem:[#allocation58_spill] sm:$0xff] }
 0xbbc   : > { %v10531_v55 = vmul.f32 1.442695, %v10530_v0  ;;  %v18622_v0 = vpack.c.bf16 %v18620_v59, %v18621_v18  ;;  %v16085_v59 = vld [vmem:[#allocation6 + $0x6c] ss:$16 sps:$4 sm:$0xff]   ;;  %v16083_v18 = vld [vmem:[#allocation6 + $0x68] ss:$16 sps:$4 sm:$0xff]  }
 0xbbe   : > { %16586 = vpow2.f32 %v10531_v55  ;;  %v18623_v55 = vld [vmem:[#allocation64_spill] sm:$0xff] }
 0xbc8   : > { %v16587_v61 = vpop.eup %16586 }
 0xbc9   : > { %v10533_v19 = vsel %vm10146_vm4, %v16587_v61, 0.0 }
 0xbca   : > { %10534 = vadd.xlane.f32.xlu1 %v10533_v19 }
 0xc57   : > { %v10535_v6 = vpop.xlane.xlu1 %10534 }
 0xc58   : > { %16588 = vrcp.f32 %v10535_v6  ;;  %v18626_v6 = vld [vmem:[#allocation68_spill] sm:$0xff] }
 0xc62   : > { %v16589_v32 = vpop.eup %16588 }
 0xc63   : > { %v10537_v21 = vmul.f32 %v16589_v32, %v16587_v61  ;;  %v18624_v61 = vld [vmem:[#allocation62_spill] sm:$0xff] }
 0xc64   : > { %v18625_v19 = vpack.c.bf16 %v18623_v55, %v18624_v61  ;;  %v18627_v32 = vld [vmem:[#allocation66_spill] sm:$0xff] }
 0xc65   : > { %v10538_v8 = vpack.c.bf16 %v10537_v21, %v10537_v21  ;;  %v18628_v21 = vpack.c.bf16 %v18626_v6, %v18627_v32  ;;  %v16086_v55 = vld [vmem:[#allocation6 + $0x88] ss:$16 sps:$4 sm:$0xff]   ;;  %v16097_v32 = vld [vmem:[#allocation6 + $0xec] ss:$16 sps:$4 sm:$0xff]  }
 0xc66   : > { %v16089_v61 = vld [vmem:[#allocation6 + $0xa8] ss:$16 sps:$4 sm:$0xff]  }
 0xc67   : > { %15376 = vmatmul.mubr.msk.bf16.vlgmr.msra.gmra.mrb[92].mxu0 %vm10146_vm4, %v10538_v8  ;;  %v18629_v8 = vld [vmem:[#allocation28_spill] sm:$0xff] }
 0xc68   : > { %15380 = vmatpush3.bf16.xpose.msra.mxu0 %v18601_v1  ;;  %15387 = vmatprep.mubr.msk.bf16.mxu0 %vm17014_vm0, %v18553_v13  ;;  %v3442_v5 = vpack.c.bf16 %v18629_v8, %v18629_v8  ;;  %v18631_v1 = vld [vmem:[#allocation70_spill] sm:$0xff] }
 0xc69   : > { %15381 = vmatprep.subr.bf16.mxu0 %v18553_v13  ;;  %v18632_v20 = vpack.c.bf16 %v18630_v37, %v18631_v1  ;;  %v16092_v6 = vld [vmem:[#allocation6 + $0xc8] ss:$16 sps:$4 sm:$0xff]   ;;  %v16100_v8 = vld [vmem:[#allocation6 + $0x10c] ss:$16 sps:$4 sm:$0xff]  }
 0xc6a   : > { %v16103_v37 = vld [vmem:[#allocation6 + $0x12c] ss:$16 sps:$4 sm:$0xff]   ;;  %v16101_v1 = vld [vmem:[#allocation6 + $0x128] ss:$16 sps:$4 sm:$0xff]  }
 0xc70   : > { %15382 = vmatpush3.bf16.xpose.msra.mxu0 %v18604_v42  ;;  %v18634_v42 = vld [vmem:[#allocation73_spill] sm:$0xff] }
 0xc71   : > { %15383 = vmatprep.subr.bf16.mxu0 %v18553_v13  ;;  %v18635_v29 = vpack.c.bf16 %v18633_v14, %v18634_v42  ;;  %v16104_v14 = vld [vmem:[#allocation6 + $0x148] ss:$16 sps:$4 sm:$0xff]   ;;  %v16109_v42 = vld [vmem:[#allocation6 + $0x16c] ss:$16 sps:$4 sm:$0xff]  }
 0xc78   : > { %15384 = vmatpush3.bf16.xpose.msra.mxu0 %v18607_v10 }
 0xc79   : > { %15385 = vmatprep.subr.bf16.mxu0 %v18553_v13 }
 0xc80   : > { %15386 = vmatpush3.bf16.xpose.msra.mxu0 %v18610_v34 }
 0xc81   : > { %15415 = vmatprep.subr.bf16.mxu0 %v18553_v13 }
 0xc87   : > { %15388 = vmatmul.mubr.bf16.vlgmr.msra.gmra.mrb[96].mxu0 %v3441_v26 }
 0xc88   : > { %15416 = vmatpush3.bf16.msra.mxu0 %v18612_v53  ;;  %15423 = vmatprep.mubr.msk.bf16.mxu0 %vm17014_vm0, %v18553_v13 }
 0xc89   : > { %15417 = vmatprep.subr.bf16.mxu0 %v18553_v13 }
 0xc8c   : > { %15418 = vmatpush3.bf16.msra.mxu0 %v18615_v56 }
 0xc8d   : > { %15419 = vmatprep.subr.bf16.mxu0 %v18553_v13 }
 0xc90   : > { %15420 = vmatpush3.bf16.msra.mxu0 %v18616_v16 }
 0xc91   : > { %15421 = vmatprep.subr.bf16.mxu0 %v18553_v13 }
 0xc94   : > { %15422 = vmatpush3.bf16.msra.mxu0 %v10094_v48 }
 0xc95   : > { %15427 = vmatprep.subr.bf16.mxu0 %v18553_v13 }
 0xd3a   : > { %v18273_v41 = vpop.f32.mrb[92].mxu0 }
 0xd3b   : > { %v15377_v17 = vpop.f32.mrb[93].mxu0 }
 0xd3c   : > { %v10579_v22 = vpop.f32.mrb[94].mxu0 }
 0xd3d   : > { %v15378_v28 = vpop.f32.mrb[95].mxu0  ;;  %v18636_v22 = vld [vmem:[#allocation57_spill] sm:$0xff] }
 0xd3e   : > { %v18637_v28 = vld [vmem:[#allocation55_spill] sm:$0xff] }
 0xd5a   : > { %v10616_v35 = vpop.f32.mrb[96].mxu0 }
 0xd5b   : > { %v10617_v44 = vadd.f32 %v10616_v35, %v17989_v33  ;;  %v15389_v63 = vpop.f32.mrb[97].mxu0  ;;  %v18638_v35 = vpack.c.bf16 %v18636_v22, %v18637_v28  ;;  %v16134_v22 = vld [vmem:[#allocation6 + $0x288] ss:$16 sps:$4 sm:$0xff]  }
 0xd5c   : > { %v10619_v52 = vpop.f32.mrb[98].mxu0  ;;  %v18640_v63 = vld [vmem:[#allocation59_spill] sm:$0xff]  ;;  %v16137_v28 = vld [vmem:[#allocation6 + $0x2a8] ss:$16 sps:$4 sm:$0xff]  }
 0xd5d   : > { %v15390_v38 = vpop.f32.mrb[99].mxu0  ;;  %v10622_v31 = vsel %vm10146_vm4, %v10617_v44, -inf }
 0xd5e   : > { %10623 = vmax.xlane.f32.xlu0 %v10622_v31  ;;  %v18642_v38 = vld [vmem:[#allocation65_spill] sm:$0xff]  ;;  %v18643_v31 = vld [vmem:[#allocation63_spill] sm:$0xff] }
 0xdeb   : > { %v10624_v46 = vpop.xlane.xlu0 %10623 }
 0xdec   : > { %v10625_v30 = vsub.f32 %v10617_v44, %v10624_v46  ;;  %v18639_v44 = vld [vmem:[#allocation61_spill] sm:$0xff]  ;;  %v18644_v46 = vpack.c.bf16 %v18642_v38, %v18643_v31  ;;  %v16148_v38 = vld [vmem:[#allocation6 + $0x30c] ss:$16 sps:$4 sm:$0xff]   ;;  %v16146_v31 = vld [vmem:[#allocation6 + $0x308] ss:$16 sps:$4 sm:$0xff]  }
 0xded   : > { %v18641_v52 = vpack.c.bf16 %v18639_v44, %v18640_v63  ;;  %v16140_v44 = vld [vmem:[#allocation6 + $0x2c8] ss:$16 sps:$4 sm:$0xff]   ;;  %v16145_v63 = vld [vmem:[#allocation6 + $0x2ec] ss:$16 sps:$4 sm:$0xff]  }
 0xdee   : > { %v10626_v15 = vmul.f32 1.442695, %v10625_v30  ;;  %v16076_v30 = vld [vmem:[#allocation6 + $0xc] ss:$16 sps:$4 sm:$0xff]  }
 0xdf0   : > { %16590 = vpow2.f32 %v10626_v15  ;;  %v18645_v15 = vld [vmem:[#allocation69_spill] sm:$0xff] }
 0xdfa   : > { %v16591_v48 = vpop.eup %16590 }
 0xdfb   : > { %v10628_v40 = vsel %vm10146_vm4, %v16591_v48, 0.0 }
 0xdfc   : > { %10629 = vadd.xlane.f32.xlu1 %v10628_v40 }
 0xe89   : > { %v10630_v24 = vpop.xlane.xlu1 %10629 }
 0xe8a   : > { %16592 = vrcp.f32 %v10630_v24  ;;  %v16074_v24 = vld [vmem:[#allocation6 + $0x8] ss:$16 sps:$4 sm:$0xff]  }
 0xe94   : > { %v16593_v49 = vpop.eup %16592 }
 0xe95   : > { %v10632_v23 = vmul.f32 %v16593_v49, %v16591_v48  ;;  %v18646_v48 = vld [vmem:[#allocation67_spill] sm:$0xff]  ;;  %v18648_v49 = vld [vmem:[#allocation29_spill] sm:$0xff] }
 0xe96   : > { %v18647_v40 = vpack.c.bf16 %v18645_v15, %v18646_v48  ;;  %v16154_v15 = vld [vmem:[#allocation6 + $0x34c] ss:$16 sps:$4 sm:$0xff]   ;;  %v16152_v48 = vld [vmem:[#allocation6 + $0x348] ss:$16 sps:$4 sm:$0xff]  }
 0xe97   : > { %v10633_v4 = vpack.c.bf16 %v10632_v23, %v10632_v23  ;;  %v3443_v23 = vpack.c.bf16 %v18648_v49, %v18648_v49  ;;  %v16160_v49 = vld [vmem:[#allocation6 + $0x38c] ss:$16 sps:$4 sm:$0xff]  }
 0xe99   : > { %15400 = vmatmul.mubr.msk.bf16.vlgmr.msra.gmra.mrb[88].mxu1 %vm10146_vm4, %v10633_v4  ;;  %v16079_v4 = vld [vmem:[#allocation6 + $0x2c] ss:$16 sps:$4 sm:$0xff]  }
 0xe9a   : > { %15404 = vmatpush3.bf16.xpose.msra.mxu1 %v18619_v51  ;;  %15411 = vmatprep.mubr.msk.bf16.mxu1 %vm17014_vm0, %v18553_v13  ;;  %v16080_v51 = vld [vmem:[#allocation6 + $0x48] ss:$16 sps:$4 sm:$0xff]  }
 0xe9b   : > { %15405 = vmatprep.subr.bf16.mxu1 %v18553_v13 }
 0xea2   : > { %15406 = vmatpush3.bf16.xpose.msra.mxu1 %v18622_v0  ;;  %v16088_v0 = vld [vmem:[#allocation6 + $0x8c] ss:$16 sps:$4 sm:$0xff]  }
 0xea3   : > { %15407 = vmatprep.subr.bf16.mxu1 %v18553_v13 }
 0xeaa   : > { %15408 = vmatpush3.bf16.xpose.msra.mxu1 %v18625_v19  ;;  %v16094_v19 = vld [vmem:[#allocation6 + $0xcc] ss:$16 sps:$4 sm:$0xff]  }
 0xeab   : > { %15409 = vmatprep.subr.bf16.mxu1 %v18553_v13 }
 0xeb2   : > { %15410 = vmatpush3.bf16.xpose.msra.mxu1 %v18628_v21  ;;  %v16095_v21 = vld [vmem:[#allocation6 + $0xe8] ss:$16 sps:$4 sm:$0xff]  }
 0xeb3   : > { %15439 = vmatprep.subr.bf16.mxu1 %v18553_v13 }
 0xeb9   : > { %15412 = vmatmul.mubr.bf16.vlgmr.msra.gmra.mrb[92].mxu1 %v3442_v5  ;;  %v16098_v5 = vld [vmem:[#allocation6 + $0x108] ss:$16 sps:$4 sm:$0xff]  }
 0xeba   : > { %15440 = vmatpush3.bf16.msra.mxu1 %v18632_v20  ;;  %15447 = vmatprep.mubr.msk.bf16.mxu1 %vm17014_vm0, %v18553_v13  ;;  %v16106_v20 = vld [vmem:[#allocation6 + $0x14c] ss:$16 sps:$4 sm:$0xff]  }
 0xebb   : > { %15441 = vmatprep.subr.bf16.mxu1 %v18553_v13 }
 0xebe   : > { %15442 = vmatpush3.bf16.msra.mxu1 %v18635_v29  ;;  %v16107_v29 = vld [vmem:[#allocation6 + $0x168] ss:$16 sps:$4 sm:$0xff]  }
 0xebf   : > { %15443 = vmatprep.subr.bf16.mxu1 %v18553_v13 }
 0xec2   : > { %15444 = vmatpush3.bf16.msra.mxu1 %v10079_v60 }
 0xec3   : > { %15445 = vmatprep.subr.bf16.mxu1 %v18553_v13 }
 0xec6   : > { %15446 = vmatpush3.bf16.msra.mxu1 %v10095_v7 }
 0xf6c   : > { %v18316_v12 = vpop.f32.mrb[88].mxu1 }
 0xf6d   : > { %v15401_v10 = vpop.f32.mrb[89].mxu1 }
 0xf6e   : > { %v10674_v58 = vpop.f32.mrb[90].mxu1  ;;  %v16112_v10 = vld [vmem:[#allocation6 + $0x18c] ss:$16 sps:$4 sm:$0xff]  }
 0xf6f   : > { %v15402_v57 = vpop.f32.mrb[91].mxu1  ;;  %v16110_v58 = vld [vmem:[#allocation6 + $0x188] ss:$16 sps:$4 sm:$0xff]  }
 0xf70   : > { %v16115_v57 = vld [vmem:[#allocation6 + $0x1ac] ss:$16 sps:$4 sm:$0xff]  }
 0xf8c   : > { %v10711_v34 = vpop.f32.mrb[92].mxu1 }
 0xf8d   : > { %v10712_v3 = vadd.f32 %v10711_v34, %v17989_v33  ;;  %v15413_v26 = vpop.f32.mrb[93].mxu1  ;;  %v16113_v34 = vld [vmem:[#allocation6 + $0x1a8] ss:$16 sps:$4 sm:$0xff]  }
 0xf8e   : > { %v10714_v53 = vpop.f32.mrb[94].mxu1  ;;  %v16116_v26 = vld [vmem:[#allocation6 + $0x1c8] ss:$16 sps:$4 sm:$0xff]  }
 0xf8f   : > { %v15414_v27 = vpop.f32.mrb[95].mxu1  ;;  %v10717_v62 = vsel %vm10146_vm4, %v10712_v3, -inf  ;;  %v16121_v53 = vld [vmem:[#allocation6 + $0x1ec] ss:$16 sps:$4 sm:$0xff]  }
 0xf90   : > { %10718 = vmax.xlane.f32.xlu0 %v10717_v62  ;;  %v16119_v27 = vld [vmem:[#allocation6 + $0x1e8] ss:$16 sps:$4 sm:$0xff]   ;;  %v16124_v62 = vld [vmem:[#allocation6 + $0x20c] ss:$16 sps:$4 sm:$0xff]  }
0x101d   : > { %v10719_v36 = vpop.xlane.xlu0 %10718 }
0x101e   : > { %v10720_v60 = vsub.f32 %v10712_v3, %v10719_v36  ;;  %v16118_v3 = vld [vmem:[#allocation6 + $0x1cc] ss:$16 sps:$4 sm:$0xff]   ;;  %v16122_v36 = vld [vmem:[#allocation6 + $0x208] ss:$16 sps:$4 sm:$0xff]  }
0x1020   : > { %v10721_v25 = vmul.f32 1.442695, %v10720_v60  ;;  %v18348_v60 = vpack.c.bf16 %v18159_v50, %v18159_v50  ;;  %v16131_v50 = vld [vmem:[#allocation6 + $0x268] ss:$16 sps:$4 sm:$0xff]  }
0x1022   : > { %16594 = vpow2.f32 %v10721_v25  ;;  %v16127_v25 = vld [vmem:[#allocation6 + $0x22c] ss:$16 sps:$4 sm:$0xff]  }
0x102c   : > { %v16595_v9 = vpop.eup %16594 }
0x102d   : > { %v10723_v11 = vsel %vm10146_vm4, %v16595_v9, 0.0 }
0x102e   : > { %10724 = vadd.xlane.f32.xlu1 %v10723_v11  ;;  %v16125_v11 = vld [vmem:[#allocation6 + $0x228] ss:$16 sps:$4 sm:$0xff]  }
0x10bb   : > { %v10725_v7 = vpop.xlane.xlu1 %10724 }
0x10bc   : > { %16596 = vrcp.f32 %v10725_v7  ;;  %v16130_v7 = vld [vmem:[#allocation6 + $0x24c] ss:$16 sps:$4 sm:$0xff]  }
0x10c6   : > { %v16597_v56 = vpop.eup %16596 }
0x10c7   : > { %v10727_v16 = vmul.f32 %v16597_v56, %v16595_v9  ;;  %v18352_v9 = vpack.c.bf16 %v18229_v2, %v18229_v2  ;;  %v16128_v56 = vld [vmem:[#allocation6 + $0x248] ss:$16 sps:$4 sm:$0xff]   ;;  %v16139_v2 = vld [vmem:[#allocation6 + $0x2ac] ss:$16 sps:$4 sm:$0xff]  }
0x10c9   : > { %v10728_v17 = vpack.c.bf16 %v10727_v16, %v10727_v16  ;;  %v16133_v16 = vld [vmem:[#allocation6 + $0x26c] ss:$16 sps:$4 sm:$0xff]  }
0x10cb   : > { %15424 = vmatmul.mubr.msk.bf16.vlgmr.msra.gmra.mrb[100].mxu0 %vm10146_vm4, %v10728_v17  ;;  %v16136_v17 = vld [vmem:[#allocation6 + $0x28c] ss:$16 sps:$4 sm:$0xff]  }
0x10cc   : > { %15428 = vmatpush3.bf16.xpose.msra.mxu0 %v18638_v35  ;;  %15435 = vmatprep.mubr.msk.bf16.mxu0 %vm17014_vm0, %v18553_v13  ;;  %v16142_v35 = vld [vmem:[#allocation6 + $0x2cc] ss:$16 sps:$4 sm:$0xff]  }
0x10cd   : > { %15429 = vmatprep.subr.bf16.mxu0 %v18553_v13 }
0x10d4   : > { %15430 = vmatpush3.bf16.xpose.msra.mxu0 %v18641_v52  ;;  %v16143_v52 = vld [vmem:[#allocation6 + $0x2e8] ss:$16 sps:$4 sm:$0xff]  }
0x10d5   : > { %15431 = vmatprep.subr.bf16.mxu0 %v18553_v13 }
0x10dc   : > { %15432 = vmatpush3.bf16.xpose.msra.mxu0 %v18644_v46  ;;  %v16151_v46 = vld [vmem:[#allocation6 + $0x32c] ss:$16 sps:$4 sm:$0xff]  }
0x10dd   : > { %15433 = vmatprep.subr.bf16.mxu0 %v18553_v13  ;;  %v16077_v13 = vld [vmem:[#allocation6 + $0x28] ss:$16 sps:$4 sm:$0xff]  }
0x10e4   : > { %15434 = vmatpush3.bf16.xpose.msra.mxu0 %v18647_v40  ;;  %v16157_v40 = vld [vmem:[#allocation6 + $0x36c] ss:$16 sps:$4 sm:$0xff]  }
0x10e5   : > { %12597 = vmatprep.subr.bf16.mxu0 %v16076_v30  ;;  %v16149_v30 = vld [vmem:[#allocation6 + $0x328] ss:$16 sps:$4 sm:$0xff]  }
0x10eb   : > { %15436 = vmatmul.mubr.bf16.vlgmr.msra.gmra.mrb[104].mxu0 %v3443_v23  ;;  %v16158_v23 = vld [vmem:[#allocation6 + $0x388] ss:$16 sps:$4 sm:$0xff]  }
0x10ec   : > { %12598 = vmatpush1.bf16.msra.mxu0 %v16074_v24  ;;  %12629 = vmatprep.mubr.bf16.mxu0 %v18343_v47  ;;  %v16155_v24 = vld [vmem:[#allocation6 + $0x368] ss:$16 sps:$4 sm:$0xff]  }
0x10ed   : > { %12599 = vmatprep.subr.bf16.mxu0 %v16079_v4  ;;  %v16163_v4 = vld [vmem:[#allocation6 + $0x3ac] ss:$16 sps:$4 sm:$0xff]  }
0x10f0   : > { %12600 = vmatpush1.bf16.msra.mxu0 %v16077_v13  ;;  %v16161_v13 = vld [vmem:[#allocation6 + $0x3a8] ss:$16 sps:$4 sm:$0xff]  }
0x10f1   : > { %12601 = vmatprep.subr.bf16.mxu0 %v16082_v43  ;;  %v16166_v43 = vld [vmem:[#allocation6 + $0x3cc] ss:$16 sps:$4 sm:$0xff]  }
0x10f4   : > { %12602 = vmatpush1.bf16.msra.mxu0 %v16080_v51  ;;  %v16164_v51 = vld [vmem:[#allocation6 + $0x3c8] ss:$16 sps:$4 sm:$0xff]  }
0x10f5   : > { %12603 = vmatprep.subr.bf16.mxu0 %v16085_v59  ;;  %v16169_v59 = vld [vmem:[#allocation6 + $0x3ec] ss:$16 sps:$4 sm:$0xff]  }
0x10f8   : > { %12604 = vmatpush1.bf16.msra.mxu0 %v16083_v18  ;;  %v16167_v18 = vld [vmem:[#allocation6 + $0x3e8] ss:$16 sps:$4 sm:$0xff]  }
0x10f9   : > { %12605 = vmatprep.subr.bf16.mxu0 %v16088_v0  ;;  %v16172_v0 = vld [vmem:[#allocation6 + $0x40c] ss:$16 sps:$4 sm:$0xff]  }
0x10fc   : > { %12606 = vmatpush1.bf16.msra.mxu0 %v16086_v55  ;;  %v16170_v55 = vld [vmem:[#allocation6 + $0x408] ss:$16 sps:$4 sm:$0xff]  }
0x10fd   : > { %12607 = vmatprep.subr.bf16.mxu0 %v16091_v54  ;;  %v18358_v54 = vpack.c.bf16 %v18161_v39, %v18161_v39  ;;  %v16179_v39 = vld [vmem:[#allocation6 + $0x468] ss:$16 sps:$4 sm:$0xff]  }
0x1100   : > { %12608 = vmatpush1.bf16.msra.mxu0 %v16089_v61  ;;  %v16175_v61 = vld [vmem:[#allocation6 + $0x42c] ss:$16 sps:$4 sm:$0xff]  }
0x1101   : > { %12609 = vmatprep.subr.bf16.mxu0 %v16094_v19  ;;  %v18362_v19 = vpack.c.bf16 %v18316_v12, %v18316_v12  ;;  %v16187_v12 = vld [vmem:[#allocation6 + $0x4ac] ss:$16 sps:$4 sm:$0xff]  }
0x1104   : > { %12610 = vmatpush1.bf16.msra.mxu0 %v16092_v6  ;;  %v16173_v6 = vld [vmem:[#allocation6 + $0x428] ss:$16 sps:$4 sm:$0xff]  }
0x1105   : > { %12611 = vmatprep.subr.bf16.mxu0 %v16097_v32  ;;  %v16178_v32 = vld [vmem:[#allocation6 + $0x44c] ss:$16 sps:$4 sm:$0xff]  }
0x1108   : > { %12612 = vmatpush1.bf16.msra.mxu0 %v16095_v21  ;;  %v16176_v21 = vld [vmem:[#allocation6 + $0x448] ss:$16 sps:$4 sm:$0xff]  }
0x1109   : > { %12613 = vmatprep.subr.bf16.mxu0 %v16100_v8  ;;  %v16181_v8 = vld [vmem:[#allocation6 + $0x46c] ss:$16 sps:$4 sm:$0xff]  }
0x110c   : > { %12614 = vmatpush1.bf16.msra.mxu0 %v16098_v5  ;;  %v16184_v5 = vld [vmem:[#allocation6 + $0x48c] ss:$16 sps:$4 sm:$0xff]  }
0x110d   : > { %12615 = vmatprep.subr.bf16.mxu0 %v16103_v37  ;;  %v16182_v37 = vld [vmem:[#allocation6 + $0x488] ss:$16 sps:$4 sm:$0xff]  }
0x1110   : > { %12616 = vmatpush1.bf16.msra.mxu0 %v16101_v1  ;;  %v16185_v1 = vld [vmem:[#allocation6 + $0x4a8] ss:$16 sps:$4 sm:$0xff]  }
0x1111   : > { %12617 = vmatprep.subr.bf16.mxu0 %v16106_v20  ;;  %v16190_v20 = vld [vmem:[#allocation6 + $0x4cc] ss:$16 sps:$4 sm:$0xff]  }
0x1114   : > { %12618 = vmatpush1.bf16.msra.mxu0 %v16104_v14  ;;  %v16188_v14 = vld [vmem:[#allocation6 + $0x4c8] ss:$16 sps:$4 sm:$0xff]  }
0x1115   : > { %12619 = vmatprep.subr.bf16.mxu0 %v16109_v42  ;;  %v16193_v42 = vld [vmem:[#allocation6 + $0x4ec] ss:$16 sps:$4 sm:$0xff]  }
0x1118   : > { %12620 = vmatpush1.bf16.msra.mxu0 %v16107_v29  ;;  %v16191_v29 = vld [vmem:[#allocation6 + $0x4e8] ss:$16 sps:$4 sm:$0xff]  }
0x1119   : > { %12621 = vmatprep.subr.bf16.mxu0 %v16112_v10  ;;  %v16196_v10 = vld [vmem:[#allocation6 + $0x50c] ss:$16 sps:$4 sm:$0xff]  }
0x111c   : > { %12622 = vmatpush1.bf16.msra.mxu0 %v16110_v58  ;;  %v16194_v58 = vld [vmem:[#allocation6 + $0x508] ss:$16 sps:$4 sm:$0xff]  }
0x111d   : > { %12623 = vmatprep.subr.bf16.mxu0 %v16115_v57  ;;  %v16199_v57 = vld [vmem:[#allocation6 + $0x52c] ss:$16 sps:$4 sm:$0xff]  }
0x1120   : > { %12624 = vmatpush1.bf16.msra.mxu0 %v16113_v34  ;;  %v16197_v34 = vld [vmem:[#allocation6 + $0x528] ss:$16 sps:$4 sm:$0xff]  }
0x1121   : > { %12625 = vmatprep.subr.bf16.mxu0 %v16118_v3  ;;  %v16202_v3 = vld [vmem:[#allocation6 + $0x54c] ss:$16 sps:$4 sm:$0xff]  }
0x1124   : > { %12626 = vmatpush1.bf16.msra.mxu0 %v16116_v26  ;;  %v16200_v26 = vld [vmem:[#allocation6 + $0x548] ss:$16 sps:$4 sm:$0xff]  }
0x1125   : > { %12627 = vmatprep.subr.bf16.mxu0 %v16121_v53  ;;  %v16205_v53 = vld [vmem:[#allocation6 + $0x56c] ss:$16 sps:$4 sm:$0xff]  }
0x1128   : > { %12628 = vmatpush1.bf16.msra.mxu0 %v16119_v27  ;;  %v16203_v27 = vld [vmem:[#allocation6 + $0x568] ss:$16 sps:$4 sm:$0xff]  }
0x1129   : > { %12638 = vmatprep.subr.bf16.mxu0 %v16124_v62  ;;  %v16208_v62 = vld [vmem:[#allocation6 + $0x58c] ss:$16 sps:$4 sm:$0xff]  }
0x112b   : > { %12630 = vmatmul.mubr.bf16.vlgmr.msra.gmra.mrb[108].mxu0 %v18348_v60 }
0x112c   : > { %12639 = vmatpush1.bf16.msra.mxu0 %v16122_v36  ;;  %12670 = vmatprep.mubr.bf16.mxu0 %v18352_v9  ;;  %v16206_v36 = vld [vmem:[#allocation6 + $0x588] ss:$16 sps:$4 sm:$0xff]  }
0x112d   : > { %12640 = vmatprep.subr.bf16.mxu0 %v16127_v25  ;;  %v16211_v25 = vld [vmem:[#allocation6 + $0x5ac] ss:$16 sps:$4 sm:$0xff]  }
0x1130   : > { %12641 = vmatpush1.bf16.msra.mxu0 %v16125_v11  ;;  %v16209_v11 = vld [vmem:[#allocation6 + $0x5a8] ss:$16 sps:$4 sm:$0xff]  }
0x1131   : > { %12642 = vmatprep.subr.bf16.mxu0 %v16130_v7  ;;  %v16214_v7 = vld [vmem:[#allocation6 + $0x5cc] ss:$16 sps:$4 sm:$0xff]  }
0x1134   : > { %12643 = vmatpush1.bf16.msra.mxu0 %v16128_v56 }
0x1135   : > { %12644 = vmatprep.subr.bf16.mxu0 %v16133_v16 }
0x1138   : > { %12645 = vmatpush1.bf16.msra.mxu0 %v16131_v50 }
0x1139   : > { %12646 = vmatprep.subr.bf16.mxu0 %v16136_v17  ;;  %v16212_v17 = vld [vmem:[#allocation6 + $0x5c8] ss:$16 sps:$4 sm:$0xff]  }
0x113c   : > { %12647 = vmatpush1.bf16.msra.mxu0 %v16134_v22 }
0x113d   : > { %12648 = vmatprep.subr.bf16.mxu0 %v16139_v2  ;;  %v16217_v2 = vld [vmem:[#allocation6 + $0x5ec] ss:$16 sps:$4 sm:$0xff]  }
0x1140   : > { %12649 = vmatpush1.bf16.msra.mxu0 %v16137_v28  ;;  %v16215_v28 = vld [vmem:[#allocation6 + $0x5e8] ss:$16 sps:$4 sm:$0xff]  }
0x1141   : > { %12650 = vmatprep.subr.bf16.mxu0 %v16142_v35  ;;  %v18370_v35 = vpack.c.bf16 %v18273_v41, %v18273_v41  ;;  %v16220_v41 = vld [vmem:[#allocation6 + $0x4] ss:$16 sps:$4 sm:$0xff]  }
0x1142   : > { %12433 = vmatprep.subr.bf16.mxu1 %v16220_v41  ;;  %v16266_v41 = vld [vmem:[#allocation6 + $0x200] ss:$16 sps:$4 sm:$0xff]  }
0x1144   : > { %12651 = vmatpush1.bf16.msra.mxu0 %v16140_v44 }
0x1145   : > { %12652 = vmatprep.subr.bf16.mxu0 %v16145_v63 }
0x1148   : > { %12653 = vmatpush1.bf16.msra.mxu0 %v16143_v52 }
0x1149   : > { %12654 = vmatprep.subr.bf16.mxu0 %v16148_v38 }
0x114c   : > { %12655 = vmatpush1.bf16.msra.mxu0 %v16146_v31 }
0x114d   : > { %12656 = vmatprep.subr.bf16.mxu0 %v16151_v46 }
0x1150   : > { %12657 = vmatpush1.bf16.msra.mxu0 %v16149_v30 }
0x1151   : > { %12658 = vmatprep.subr.bf16.mxu0 %v16154_v15 }
0x1154   : > { %12659 = vmatpush1.bf16.msra.mxu0 %v16152_v48 }
0x1155   : > { %12660 = vmatprep.subr.bf16.mxu0 %v16157_v40 }
0x1158   : > { %12661 = vmatpush1.bf16.msra.mxu0 %v16155_v24 }
0x1159   : > { %12662 = vmatprep.subr.bf16.mxu0 %v16160_v49 }
0x115c   : > { %12663 = vmatpush1.bf16.msra.mxu0 %v16158_v23 }
0x115d   : > { %12664 = vmatprep.subr.bf16.mxu0 %v16163_v4  ;;  %v16218_v4 = vld [vmem:[#allocation6] ss:$16 sps:$4 sm:$0xff]  }
0x1160   : > { %12665 = vmatpush1.bf16.msra.mxu0 %v16161_v13 }
0x1161   : > { %12666 = vmatprep.subr.bf16.mxu0 %v16166_v43  ;;  %v16223_v43 = vld [vmem:[#allocation6 + $0x24] ss:$16 sps:$4 sm:$0xff]  }
0x1164   : > { %12667 = vmatpush1.bf16.msra.mxu0 %v16164_v51  ;;  %v16221_v51 = vld [vmem:[#allocation6 + $0x20] ss:$16 sps:$4 sm:$0xff]  }
0x1165   : > { %12668 = vmatprep.subr.bf16.mxu0 %v16169_v59  ;;  %v16226_v59 = vld [vmem:[#allocation6 + $0x44] ss:$16 sps:$4 sm:$0xff]  }
0x1168   : > { %12669 = vmatpush1.bf16.msra.mxu0 %v16167_v18  ;;  %v16224_v18 = vld [vmem:[#allocation6 + $0x40] ss:$16 sps:$4 sm:$0xff]  }
0x1169   : > { %12679 = vmatprep.subr.bf16.mxu0 %v16172_v0  ;;  %v16229_v0 = vld [vmem:[#allocation6 + $0x64] ss:$16 sps:$4 sm:$0xff]  }
0x116b   : > { %12671 = vmatmul.mubr.bf16.vlgmr.msra.gmra.mrb[108].mxu0 %v18358_v54 }
0x116c   : > { %12680 = vmatpush1.bf16.msra.mxu0 %v16170_v55  ;;  %12711 = vmatprep.mubr.bf16.mxu0 %v18362_v19  ;;  %v16227_v55 = vld [vmem:[#allocation6 + $0x60] ss:$16 sps:$4 sm:$0xff]  }
0x116d   : > { %12681 = vmatprep.subr.bf16.mxu0 %v16175_v61  ;;  %v16232_v61 = vld [vmem:[#allocation6 + $0x84] ss:$16 sps:$4 sm:$0xff]  }
0x1170   : > { %12682 = vmatpush1.bf16.msra.mxu0 %v16173_v6  ;;  %v16230_v6 = vld [vmem:[#allocation6 + $0x80] ss:$16 sps:$4 sm:$0xff]  }
0x1171   : > { %12683 = vmatprep.subr.bf16.mxu0 %v16178_v32  ;;  %v16235_v32 = vld [vmem:[#allocation6 + $0xa4] ss:$16 sps:$4 sm:$0xff]  }
0x1174   : > { %12684 = vmatpush1.bf16.msra.mxu0 %v16176_v21  ;;  %v16233_v21 = vld [vmem:[#allocation6 + $0xa0] ss:$16 sps:$4 sm:$0xff]  }
0x1175   : > { %12685 = vmatprep.subr.bf16.mxu0 %v16181_v8  ;;  %v16238_v8 = vld [vmem:[#allocation6 + $0xc4] ss:$16 sps:$4 sm:$0xff]  }
0x1178   : > { %12686 = vmatpush1.bf16.msra.mxu0 %v16179_v39  ;;  %v16241_v39 = vld [vmem:[#allocation6 + $0xe4] ss:$16 sps:$4 sm:$0xff]  }
0x1179   : > { %12687 = vmatprep.subr.bf16.mxu0 %v16184_v5  ;;  %v16335_v5 = vld [vmem:[#allocation6 + $0x608] ss:$16 sps:$4 sm:$0xff]  }
0x117c   : > { %12688 = vmatpush1.bf16.msra.mxu0 %v16182_v37  ;;  %v16337_v37 = vld [vmem:[#allocation6 + $0x60c] ss:$16 sps:$4 sm:$0xff]  }
0x117d   : > { %12689 = vmatprep.subr.bf16.mxu0 %v16187_v12  ;;  %v16239_v12 = vld [vmem:[#allocation6 + $0xe0] ss:$16 sps:$4 sm:$0xff]  }
0x1180   : > { %12690 = vmatpush1.bf16.msra.mxu0 %v16185_v1  ;;  %v16244_v1 = vld [vmem:[#allocation6 + $0x104] ss:$16 sps:$4 sm:$0xff]  }
0x1181   : > { %12691 = vmatprep.subr.bf16.mxu0 %v16190_v20  ;;  %v16341_v20 = vld [vmem:[#allocation6 + $0x628] ss:$16 sps:$4 sm:$0xff]  }
0x1184   : > { %12692 = vmatpush1.bf16.msra.mxu0 %v16188_v14  ;;  %v16343_v14 = vld [vmem:[#allocation6 + $0x62c] ss:$16 sps:$4 sm:$0xff]  }
0x1185   : > { %12693 = vmatprep.subr.bf16.mxu0 %v16193_v42  ;;  %v16242_v42 = vld [vmem:[#allocation6 + $0x100] ss:$16 sps:$4 sm:$0xff]  }
0x1188   : > { %12694 = vmatpush1.bf16.msra.mxu0 %v16191_v29  ;;  %v16247_v29 = vld [vmem:[#allocation6 + $0x124] ss:$16 sps:$4 sm:$0xff]  }
0x1189   : > { %12695 = vmatprep.subr.bf16.mxu0 %v16196_v10  ;;  %v16347_v10 = vld [vmem:[#allocation6 + $0x648] ss:$16 sps:$4 sm:$0xff]  }
0x118c   : > { %12696 = vmatpush1.bf16.msra.mxu0 %v16194_v58  ;;  %v16349_v58 = vld [vmem:[#allocation6 + $0x64c] ss:$16 sps:$4 sm:$0xff]  }
0x118d   : > { %12697 = vmatprep.subr.bf16.mxu0 %v16199_v57  ;;  %v16245_v57 = vld [vmem:[#allocation6 + $0x120] ss:$16 sps:$4 sm:$0xff]  }
0x1190   : > { %12698 = vmatpush1.bf16.msra.mxu0 %v16197_v34  ;;  %v16250_v34 = vld [vmem:[#allocation6 + $0x144] ss:$16 sps:$4 sm:$0xff]  }
0x1191   : > { %12699 = vmatprep.subr.bf16.mxu0 %v16202_v3  ;;  %v16353_v3 = vld [vmem:[#allocation6 + $0x668] ss:$16 sps:$4 sm:$0xff]  }
0x1194   : > { %12700 = vmatpush1.bf16.msra.mxu0 %v16200_v26  ;;  %v16355_v26 = vld [vmem:[#allocation6 + $0x66c] ss:$16 sps:$4 sm:$0xff]  }
0x1195   : > { %12701 = vmatprep.subr.bf16.mxu0 %v16205_v53  ;;  %v16248_v53 = vld [vmem:[#allocation6 + $0x140] ss:$16 sps:$4 sm:$0xff]  }
0x1198   : > { %12702 = vmatpush1.bf16.msra.mxu0 %v16203_v27  ;;  %v16253_v27 = vld [vmem:[#allocation6 + $0x164] ss:$16 sps:$4 sm:$0xff]  }
0x1199   : > { %12703 = vmatprep.subr.bf16.mxu0 %v16208_v62  ;;  %v16359_v62 = vld [vmem:[#allocation6 + $0x688] ss:$16 sps:$4 sm:$0xff]  }
0x119c   : > { %12704 = vmatpush1.bf16.msra.mxu0 %v16206_v36  ;;  %v16361_v36 = vld [vmem:[#allocation6 + $0x68c] ss:$16 sps:$4 sm:$0xff]  }
0x119d   : > { %12705 = vmatprep.subr.bf16.mxu0 %v16211_v25  ;;  %v16251_v25 = vld [vmem:[#allocation6 + $0x160] ss:$16 sps:$4 sm:$0xff]  }
0x119e   : > { %v18366_v56 = vpop.f32.mrb[100].mxu0 }
0x119f   : > { %v15425_v16 = vpop.f32.mrb[101].mxu0 }
0x11a0   : > { %12706 = vmatpush1.bf16.msra.mxu0 %v16209_v11  ;;  %v10769_v50 = vpop.f32.mrb[102].mxu0  ;;  %v16256_v11 = vld [vmem:[#allocation6 + $0x184] ss:$16 sps:$4 sm:$0xff]   ;;  %v16367_v16 = vld [vmem:[#allocation6 + $0x6ac] ss:$16 sps:$4 sm:$0xff]  }
0x11a1   : > { %v15426_v22 = vpop.f32.mrb[103].mxu0  ;;  %12707 = vmatprep.subr.bf16.mxu0 %v16214_v7  ;;  %v16365_v7 = vld [vmem:[#allocation6 + $0x6a8] ss:$16 sps:$4 sm:$0xff]   ;;  %v16254_v50 = vld [vmem:[#allocation6 + $0x180] ss:$16 sps:$4 sm:$0xff]  }
0x11a2   : > { %v16371_v22 = vld [vmem:[#allocation6 + $0x6c8] ss:$16 sps:$4 sm:$0xff]  }
0x11a4   : > { %12708 = vmatpush1.bf16.msra.mxu0 %v16212_v17  ;;  %v16259_v17 = vld [vmem:[#allocation6 + $0x1a4] ss:$16 sps:$4 sm:$0xff]  }
0x11a5   : > { %12709 = vmatprep.subr.bf16.mxu0 %v16217_v2  ;;  %v16373_v2 = vld [vmem:[#allocation6 + $0x6cc] ss:$16 sps:$4 sm:$0xff]  }
0x11a8   : > { %12710 = vmatpush1.bf16.msra.mxu0 %v16215_v28  ;;  %v16257_v28 = vld [vmem:[#allocation6 + $0x1a0] ss:$16 sps:$4 sm:$0xff]  }
0x11a9   : > { %12720 = vmatprep.subr.bf16.mxu0 %v16337_v37  ;;  %v16427_v37 = vld [vmem:[#allocation6 + $0x7ec] ss:$16 sps:$4 sm:$0xff]  }
0x11ab   : > { %12712 = vmatmul.mubr.bf16.vlgmr.msra.gmra.mrb[108].mxu0 %v18370_v35 }
0x11ac   : > { %12721 = vmatpush1.bf16.msra.mxu0 %v16335_v5  ;;  %v16286_v5 = vld [vmem:[#allocation6 + $0x2c4] ss:$16 sps:$4 sm:$0xff]  }
0x11ad   : > { %12722 = vmatprep.subr.bf16.mxu0 %v16343_v14  ;;  %v16287_v14 = vld [vmem:[#allocation6 + $0x2e0] ss:$16 sps:$4 sm:$0xff]  }
0x11b0   : > { %12723 = vmatpush1.bf16.msra.mxu0 %v16341_v20  ;;  %v16289_v20 = vld [vmem:[#allocation6 + $0x2e4] ss:$16 sps:$4 sm:$0xff]  }
0x11b1   : > { %12724 = vmatprep.subr.bf16.mxu0 %v16349_v58  ;;  %v16293_v58 = vld [vmem:[#allocation6 + $0x320] ss:$16 sps:$4 sm:$0xff]  }
0x11b4   : > { %12725 = vmatpush1.bf16.msra.mxu0 %v16347_v10  ;;  %v16295_v10 = vld [vmem:[#allocation6 + $0x324] ss:$16 sps:$4 sm:$0xff]  }
0x11b5   : > { %12726 = vmatprep.subr.bf16.mxu0 %v16355_v26  ;;  %v16299_v26 = vld [vmem:[#allocation6 + $0x360] ss:$16 sps:$4 sm:$0xff]  }
0x11b8   : > { %12727 = vmatpush1.bf16.msra.mxu0 %v16353_v3  ;;  %v16301_v3 = vld [vmem:[#allocation6 + $0x364] ss:$16 sps:$4 sm:$0xff]  }
0x11b9   : > { %12728 = vmatprep.subr.bf16.mxu0 %v16361_v36  ;;  %v16305_v36 = vld [vmem:[#allocation6 + $0x3a0] ss:$16 sps:$4 sm:$0xff]  }
0x11bc   : > { %12729 = vmatpush1.bf16.msra.mxu0 %v16359_v62  ;;  %v16307_v62 = vld [vmem:[#allocation6 + $0x3a4] ss:$16 sps:$4 sm:$0xff]  }
0x11bd   : > { %12730 = vmatprep.subr.bf16.mxu0 %v16367_v16  ;;  %v16311_v16 = vld [vmem:[#allocation6 + $0x3e0] ss:$16 sps:$4 sm:$0xff]  }
0x11be   : > { %v10806_v44 = vpop.f32.mrb[104].mxu0 }
0x11bf   : > { %v10807_v63 = vadd.f32 %v10806_v44, %v17989_v33  ;;  %v15437_v52 = vpop.f32.mrb[105].mxu0  ;;  %v16262_v44 = vld [vmem:[#allocation6 + $0x1c4] ss:$16 sps:$4 sm:$0xff]  }
0x11c0   : > { %v10809_v38 = vpop.f32.mrb[106].mxu0  ;;  %12731 = vmatpush1.bf16.msra.mxu0 %v16365_v7  ;;  %v16379_v52 = vld [vmem:[#allocation6 + $0x6ec] ss:$16 sps:$4 sm:$0xff]   ;;  %v16313_v7 = vld [vmem:[#allocation6 + $0x3e4] ss:$16 sps:$4 sm:$0xff]  }
0x11c1   : > { %v15438_v31 = vpop.f32.mrb[107].mxu0  ;;  %v10812_v46 = vsel %vm10146_vm4, %v10807_v63, -inf  ;;  %12732 = vmatprep.subr.bf16.mxu0 %v16373_v2  ;;  %v16260_v38 = vld [vmem:[#allocation6 + $0x1c0] ss:$16 sps:$4 sm:$0xff]  }
0x11c2   : > { %10813 = vmax.xlane.f32.xlu0 %v10812_v46  ;;  %v16265_v31 = vld [vmem:[#allocation6 + $0x1e4] ss:$16 sps:$4 sm:$0xff]   ;;  %v16383_v46 = vld [vmem:[#allocation6 + $0x708] ss:$16 sps:$4 sm:$0xff]   ;;  %v16317_v2 = vld [vmem:[#allocation6 + $0x420] ss:$16 sps:$4 sm:$0xff]  }
0x11c4   : > { %12733 = vmatpush1.bf16.msra.mxu0 %v16371_v22  ;;  %v16319_v22 = vld [vmem:[#allocation6 + $0x424] ss:$16 sps:$4 sm:$0xff]  }
0x11c5   : > { %12734 = vmatprep.subr.bf16.mxu0 %v16379_v52  ;;  %v16323_v52 = vld [vmem:[#allocation6 + $0x460] ss:$16 sps:$4 sm:$0xff]  }
0x124f   : > { %v10814_v30 = vpop.xlane.xlu0 %10813 }
0x1250   : > { %v10815_v15 = vsub.f32 %v10807_v63, %v10814_v30  ;;  %v16377_v63 = vld [vmem:[#allocation6 + $0x6e8] ss:$16 sps:$4 sm:$0xff]   ;;  %v16385_v30 = vld [vmem:[#allocation6 + $0x70c] ss:$16 sps:$4 sm:$0xff]  }
0x1251   : > { %12735 = vmatpush1.bf16.msra.mxu0 %v16377_v63  ;;  %v16325_v63 = vld [vmem:[#allocation6 + $0x464] ss:$16 sps:$4 sm:$0xff]  }
0x1252   : > { %v10816_v48 = vmul.f32 1.442695, %v10815_v15  ;;  %12736 = vmatprep.subr.bf16.mxu0 %v16385_v30  ;;  %v16263_v15 = vld [vmem:[#allocation6 + $0x1e0] ss:$16 sps:$4 sm:$0xff]   ;;  %v16334_v30 = vld [vmem:[#allocation6 + $0x4c4] ss:$16 sps:$4 sm:$0xff]  }
0x1254   : > { %16598 = vpow2.f32 %v10816_v48  ;;  %v16268_v48 = vld [vmem:[#allocation6 + $0x204] ss:$16 sps:$4 sm:$0xff]  }
0x1255   : > { %12737 = vmatpush1.bf16.msra.mxu0 %v16383_v46  ;;  %v16331_v46 = vld [vmem:[#allocation6 + $0x4a4] ss:$16 sps:$4 sm:$0xff]  }
0x125e   : > { %v16599_v40 = vpop.eup %16598 }
0x125f   : > { %v10818_v24 = vsel %vm10146_vm4, %v16599_v40, 0.0 }
0x1260   : > { %10819 = vadd.xlane.f32.xlu1 %v10818_v24  ;;  %v16391_v24 = vld [vmem:[#allocation6 + $0x72c] ss:$16 sps:$4 sm:$0xff]  }
0x1261   : > { %12738 = vmatprep.subr.bf16.mxu0 %v16391_v24  ;;  %v16344_v24 = vld [vmem:[#allocation6 + $0x500] ss:$16 sps:$4 sm:$0xff]  }
0x12ed   : > { %v10820_v49 = vpop.xlane.xlu1 %10819 }
0x12ee   : > { %16600 = vrcp.f32 %v10820_v49  ;;  %v16271_v49 = vld [vmem:[#allocation6 + $0x224] ss:$16 sps:$4 sm:$0xff]  }
0x12f8   : > { %v16601_v23 = vpop.eup %16600 }
0x12f9   : > { %v10822_v33 = vmul.f32 %v16601_v23, %v16599_v40  ;;  %v16389_v40 = vld [vmem:[#allocation6 + $0x728] ss:$16 sps:$4 sm:$0xff]   ;;  %v16397_v23 = vld [vmem:[#allocation6 + $0x74c] ss:$16 sps:$4 sm:$0xff]  }
0x12fa   : > { %12739 = vmatpush1.bf16.msra.mxu0 %v16389_v40  ;;  %v16346_v40 = vld [vmem:[#allocation6 + $0x504] ss:$16 sps:$4 sm:$0xff]  }
0x12fb   : > { %v10823_v13 = vpack.c.bf16 %v10822_v33, %v10822_v33  ;;  %v16395_v33 = vld [vmem:[#allocation6 + $0x748] ss:$16 sps:$4 sm:$0xff]   ;;  %12740 = vmatprep.subr.bf16.mxu0 %v16397_v23  ;;  %v16358_v23 = vld [vmem:[#allocation6 + $0x544] ss:$16 sps:$4 sm:$0xff]  }
0x12fd   : > { %15448 = vmatmul.mubr.msk.bf16.vlgmr.msra.gmra.mrb[96].mxu1 %vm10146_vm4, %v10823_v13  ;;  %v16274_v13 = vld [vmem:[#allocation6 + $0x244] ss:$16 sps:$4 sm:$0xff]  }
0x12fe   : > { %12434 = vmatpush1.bf16.msra.mxu1 %v16218_v4  ;;  %12465 = vmatprep.mubr.bf16.mxu1 %v18343_v47  ;;  %v16236_v47 = vld [vmem:[#allocation6 + $0xc0] ss:$16 sps:$4 sm:$0xff]  }
0x12ff   : > { %12435 = vmatprep.subr.bf16.mxu1 %v16223_v43  ;;  %v16269_v4 = vld [vmem:[#allocation6 + $0x220] ss:$16 sps:$4 sm:$0xff]   ;;  %12741 = vmatpush1.bf16.msra.mxu0 %v16395_v33  ;;  %v16401_v43 = vld [vmem:[#allocation6 + $0x768] ss:$16 sps:$4 sm:$0xff]  }
0x1300   : > { %v16356_v33 = vld [vmem:[#allocation6 + $0x540] ss:$16 sps:$4 sm:$0xff]  }
0x1302   : > { %12436 = vmatpush1.bf16.msra.mxu1 %v16221_v51  ;;  %v16403_v51 = vld [vmem:[#allocation6 + $0x76c] ss:$16 sps:$4 sm:$0xff]  }
0x1303   : > { %12437 = vmatprep.subr.bf16.mxu1 %v16226_v59  ;;  %12742 = vmatprep.subr.bf16.mxu0 %v16403_v51  ;;  %v16272_v59 = vld [vmem:[#allocation6 + $0x240] ss:$16 sps:$4 sm:$0xff]  }
0x1304   : > { %12743 = vmatpush1.bf16.msra.mxu0 %v16401_v43  ;;  %v16370_v43 = vld [vmem:[#allocation6 + $0x584] ss:$16 sps:$4 sm:$0xff]   ;;  %v16368_v51 = vld [vmem:[#allocation6 + $0x580] ss:$16 sps:$4 sm:$0xff]  }
0x1306   : > { %12438 = vmatpush1.bf16.msra.mxu1 %v16224_v18  ;;  %v16277_v18 = vld [vmem:[#allocation6 + $0x264] ss:$16 sps:$4 sm:$0xff]  }
0x1307   : > { %12439 = vmatprep.subr.bf16.mxu1 %v16229_v0  ;;  %v16407_v0 = vld [vmem:[#allocation6 + $0x788] ss:$16 sps:$4 sm:$0xff]  }
0x130a   : > { %12440 = vmatpush1.bf16.msra.mxu1 %v16227_v55  ;;  %v16409_v55 = vld [vmem:[#allocation6 + $0x78c] ss:$16 sps:$4 sm:$0xff]  }
0x130b   : > { %12441 = vmatprep.subr.bf16.mxu1 %v16232_v61  ;;  %12744 = vmatprep.subr.bf16.mxu0 %v16409_v55  ;;  %v16280_v61 = vld [vmem:[#allocation6 + $0x284] ss:$16 sps:$4 sm:$0xff]   ;;  %v16380_v55 = vld [vmem:[#allocation6 + $0x5c0] ss:$16 sps:$4 sm:$0xff]  }
0x130c   : > { %12745 = vmatpush1.bf16.msra.mxu0 %v16407_v0  ;;  %v16382_v0 = vld [vmem:[#allocation6 + $0x5c4] ss:$16 sps:$4 sm:$0xff]  }
0x130e   : > { %12442 = vmatpush1.bf16.msra.mxu1 %v16230_v6  ;;  %v16415_v6 = vld [vmem:[#allocation6 + $0x7ac] ss:$16 sps:$4 sm:$0xff]  }
0x130f   : > { %12443 = vmatprep.subr.bf16.mxu1 %v16235_v32  ;;  %12746 = vmatprep.subr.bf16.mxu0 %v16415_v6  ;;  %v16278_v32 = vld [vmem:[#allocation6 + $0x280] ss:$16 sps:$4 sm:$0xff]  }
0x1310   : > { %v16392_v6 = vld [vmem:[#allocation6 + $0x600] ss:$16 sps:$4 sm:$0xff]  }
0x1312   : > { %12444 = vmatpush1.bf16.msra.mxu1 %v16233_v21  ;;  %v16283_v21 = vld [vmem:[#allocation6 + $0x2a4] ss:$16 sps:$4 sm:$0xff]  }
0x1313   : > { %12445 = vmatprep.subr.bf16.mxu1 %v16238_v8  ;;  %v16419_v8 = vld [vmem:[#allocation6 + $0x7c8] ss:$16 sps:$4 sm:$0xff]  }
0x1316   : > { %12446 = vmatpush1.bf16.msra.mxu1 %v16236_v47  ;;  %v16421_v47 = vld [vmem:[#allocation6 + $0x7cc] ss:$16 sps:$4 sm:$0xff]  }
0x1317   : > { %12447 = vmatprep.subr.bf16.mxu1 %v16241_v39  ;;  %v16281_v39 = vld [vmem:[#allocation6 + $0x2a0] ss:$16 sps:$4 sm:$0xff]  }
0x131a   : > { %12448 = vmatpush1.bf16.msra.mxu1 %v16239_v12  ;;  %v16425_v12 = vld [vmem:[#allocation6 + $0x7e8] ss:$16 sps:$4 sm:$0xff]  }
0x131b   : > { %12449 = vmatprep.subr.bf16.mxu1 %v16244_v1  ;;  %v16284_v1 = vld [vmem:[#allocation6 + $0x2c0] ss:$16 sps:$4 sm:$0xff]  }
0x131e   : > { %12450 = vmatpush1.bf16.msra.mxu1 %v16242_v42  ;;  %v16292_v42 = vld [vmem:[#allocation6 + $0x304] ss:$16 sps:$4 sm:$0xff]  }
0x131f   : > { %12451 = vmatprep.subr.bf16.mxu1 %v16247_v29  ;;  %v16290_v29 = vld [vmem:[#allocation6 + $0x300] ss:$16 sps:$4 sm:$0xff]  }
0x1322   : > { %12452 = vmatpush1.bf16.msra.mxu1 %v16245_v57  ;;  %v16298_v57 = vld [vmem:[#allocation6 + $0x344] ss:$16 sps:$4 sm:$0xff]  }
0x1323   : > { %12453 = vmatprep.subr.bf16.mxu1 %v16250_v34  ;;  %v16296_v34 = vld [vmem:[#allocation6 + $0x340] ss:$16 sps:$4 sm:$0xff]  }
0x1326   : > { %12454 = vmatpush1.bf16.msra.mxu1 %v16248_v53  ;;  %v16304_v53 = vld [vmem:[#allocation6 + $0x384] ss:$16 sps:$4 sm:$0xff]  }
0x1327   : > { %12455 = vmatprep.subr.bf16.mxu1 %v16253_v27  ;;  %v16302_v27 = vld [vmem:[#allocation6 + $0x380] ss:$16 sps:$4 sm:$0xff]  }
0x132a   : > { %12456 = vmatpush1.bf16.msra.mxu1 %v16251_v25  ;;  %v16310_v25 = vld [vmem:[#allocation6 + $0x3c4] ss:$16 sps:$4 sm:$0xff]  }
0x132b   : > { %12457 = vmatprep.subr.bf16.mxu1 %v16256_v11  ;;  %v16308_v11 = vld [vmem:[#allocation6 + $0x3c0] ss:$16 sps:$4 sm:$0xff]  }
0x132e   : > { %12458 = vmatpush1.bf16.msra.mxu1 %v16254_v50  ;;  %v16316_v50 = vld [vmem:[#allocation6 + $0x404] ss:$16 sps:$4 sm:$0xff]  }
0x132f   : > { %12459 = vmatprep.subr.bf16.mxu1 %v16259_v17  ;;  %v16314_v17 = vld [vmem:[#allocation6 + $0x400] ss:$16 sps:$4 sm:$0xff]  }
0x1332   : > { %12460 = vmatpush1.bf16.msra.mxu1 %v16257_v28  ;;  %v16322_v28 = vld [vmem:[#allocation6 + $0x444] ss:$16 sps:$4 sm:$0xff]  }
0x1333   : > { %12461 = vmatprep.subr.bf16.mxu1 %v16262_v44  ;;  %v16320_v44 = vld [vmem:[#allocation6 + $0x440] ss:$16 sps:$4 sm:$0xff]  }
0x1336   : > { %12462 = vmatpush1.bf16.msra.mxu1 %v16260_v38  ;;  %v16328_v38 = vld [vmem:[#allocation6 + $0x484] ss:$16 sps:$4 sm:$0xff]  }
0x1337   : > { %12463 = vmatprep.subr.bf16.mxu1 %v16265_v31  ;;  %v16326_v31 = vld [vmem:[#allocation6 + $0x480] ss:$16 sps:$4 sm:$0xff]  }
0x133a   : > { %12464 = vmatpush1.bf16.msra.mxu1 %v16263_v15  ;;  %v16340_v15 = vld [vmem:[#allocation6 + $0x4e4] ss:$16 sps:$4 sm:$0xff]  }
0x133b   : > { %12474 = vmatprep.subr.bf16.mxu1 %v16268_v48  ;;  %v16338_v48 = vld [vmem:[#allocation6 + $0x4e0] ss:$16 sps:$4 sm:$0xff]  }
0x133d   : > { %12466 = vmatmul.mubr.bf16.vlgmr.msra.gmra.mrb[100].mxu1 %v18348_v60  ;;  %v16275_v60 = vld [vmem:[#allocation6 + $0x260] ss:$16 sps:$4 sm:$0xff]  }
0x133e   : > { %12475 = vmatpush1.bf16.msra.mxu1 %v16266_v41  ;;  %12506 = vmatprep.mubr.bf16.mxu1 %v18352_v9  ;;  %v16413_v9 = vld [vmem:[#allocation6 + $0x7a8] ss:$16 sps:$4 sm:$0xff]   ;;  %v16352_v41 = vld [vmem:[#allocation6 + $0x524] ss:$16 sps:$4 sm:$0xff]  }
0x133f   : > { %12476 = vmatprep.subr.bf16.mxu1 %v16271_v49  ;;  %12747 = vmatpush1.bf16.msra.mxu0 %v16413_v9  ;;  %v16350_v49 = vld [vmem:[#allocation6 + $0x520] ss:$16 sps:$4 sm:$0xff]   ;;  %v16394_v9 = vld [vmem:[#allocation6 + $0x604] ss:$16 sps:$4 sm:$0xff]  }
0x1340   : > { %12748 = vmatprep.subr.bf16.mxu0 %v16421_v47  ;;  %v16404_v47 = vld [vmem:[#allocation6 + $0x640] ss:$16 sps:$4 sm:$0xff]  }
0x1342   : > { %12477 = vmatpush1.bf16.msra.mxu1 %v16269_v4  ;;  %v16364_v4 = vld [vmem:[#allocation6 + $0x564] ss:$16 sps:$4 sm:$0xff]  }
0x1343   : > { %12478 = vmatprep.subr.bf16.mxu1 %v16274_v13  ;;  %12749 = vmatpush1.bf16.msra.mxu0 %v16419_v8  ;;  %v16362_v13 = vld [vmem:[#allocation6 + $0x560] ss:$16 sps:$4 sm:$0xff]   ;;  %v16406_v8 = vld [vmem:[#allocation6 + $0x644] ss:$16 sps:$4 sm:$0xff]  }
0x1344   : > { %12750 = vmatprep.subr.bf16.mxu0 %v16427_v37  ;;  %v16418_v37 = vld [vmem:[#allocation6 + $0x684] ss:$16 sps:$4 sm:$0xff]  }
0x1346   : > { %12479 = vmatpush1.bf16.msra.mxu1 %v16272_v59  ;;  %v16376_v59 = vld [vmem:[#allocation6 + $0x5a4] ss:$16 sps:$4 sm:$0xff]  }
0x1347   : > { %12480 = vmatprep.subr.bf16.mxu1 %v16277_v18  ;;  %12751 = vmatpush1.bf16.msra.mxu0 %v16425_v12  ;;  %v16374_v18 = vld [vmem:[#allocation6 + $0x5a0] ss:$16 sps:$4 sm:$0xff]  }
0x1348   : > { %v16416_v12 = vld [vmem:[#allocation6 + $0x680] ss:$16 sps:$4 sm:$0xff]  }
0x134a   : > { %12481 = vmatpush1.bf16.msra.mxu1 %v16275_v60  ;;  %v16388_v60 = vld [vmem:[#allocation6 + $0x5e4] ss:$16 sps:$4 sm:$0xff]  }
0x134b   : > { %12482 = vmatprep.subr.bf16.mxu1 %v16280_v61  ;;  %v16386_v61 = vld [vmem:[#allocation6 + $0x5e0] ss:$16 sps:$4 sm:$0xff]  }
0x134e   : > { %12483 = vmatpush1.bf16.msra.mxu1 %v16278_v32  ;;  %v16400_v32 = vld [vmem:[#allocation6 + $0x624] ss:$16 sps:$4 sm:$0xff]  }
0x134f   : > { %12484 = vmatprep.subr.bf16.mxu1 %v16283_v21  ;;  %v16398_v21 = vld [vmem:[#allocation6 + $0x620] ss:$16 sps:$4 sm:$0xff]  }
0x1352   : > { %12485 = vmatpush1.bf16.msra.mxu1 %v16281_v39  ;;  %v16412_v39 = vld [vmem:[#allocation6 + $0x664] ss:$16 sps:$4 sm:$0xff]  }
0x1353   : > { %12486 = vmatprep.subr.bf16.mxu1 %v16286_v5  ;;  %v16410_v5 = vld [vmem:[#allocation6 + $0x660] ss:$16 sps:$4 sm:$0xff]  }
0x1356   : > { %12487 = vmatpush1.bf16.msra.mxu1 %v16284_v1  ;;  %v16424_v1 = vld [vmem:[#allocation6 + $0x6a4] ss:$16 sps:$4 sm:$0xff]  }
0x1357   : > { %12488 = vmatprep.subr.bf16.mxu1 %v16289_v20  ;;  %v16422_v20 = vld [vmem:[#allocation6 + $0x6a0] ss:$16 sps:$4 sm:$0xff]  }
0x135a   : > { %12489 = vmatpush1.bf16.msra.mxu1 %v16287_v14  ;;  %v16430_v14 = vld [vmem:[#allocation6 + $0x6c4] ss:$16 sps:$4 sm:$0xff]  }
0x135b   : > { %12490 = vmatprep.subr.bf16.mxu1 %v16292_v42 }
0x135e   : > { %12491 = vmatpush1.bf16.msra.mxu1 %v16290_v29 }
0x135f   : > { %12492 = vmatprep.subr.bf16.mxu1 %v16295_v10  ;;  %v10873_v10 = vpack.c.bf16 %v18366_v56, %v18366_v56  ;;  %v16442_v56 = vld [vmem:[#allocation6 + $0x744] ss:$16 sps:$4 sm:$0xff]  }
0x1362   : > { %12493 = vmatpush1.bf16.msra.mxu1 %v16293_v58 }
0x1363   : > { %12494 = vmatprep.subr.bf16.mxu1 %v16298_v57  ;;  %v16428_v57 = vld [vmem:[#allocation6 + $0x6c0] ss:$16 sps:$4 sm:$0xff]  }
0x1366   : > { %12495 = vmatpush1.bf16.msra.mxu1 %v16296_v34 }
0x1367   : > { %12496 = vmatprep.subr.bf16.mxu1 %v16301_v3  ;;  %v16433_v3 = vld [vmem:[#allocation6 + $0x6e4] ss:$16 sps:$4 sm:$0xff]  }
0x136a   : > { %12497 = vmatpush1.bf16.msra.mxu1 %v16299_v26  ;;  %v16431_v26 = vld [vmem:[#allocation6 + $0x6e0] ss:$16 sps:$4 sm:$0xff]  }
0x136b   : > { %12498 = vmatprep.subr.bf16.mxu1 %v16304_v53  ;;  %v16436_v53 = vld [vmem:[#allocation6 + $0x704] ss:$16 sps:$4 sm:$0xff]  }
0x136e   : > { %12499 = vmatpush1.bf16.msra.mxu1 %v16302_v27  ;;  %v16434_v27 = vld [vmem:[#allocation6 + $0x700] ss:$16 sps:$4 sm:$0xff]  }
0x136f   : > { %12500 = vmatprep.subr.bf16.mxu1 %v16307_v62  ;;  %v16439_v62 = vld [vmem:[#allocation6 + $0x724] ss:$16 sps:$4 sm:$0xff]  }
0x1372   : > { %12501 = vmatpush1.bf16.msra.mxu1 %v16305_v36  ;;  %v16437_v36 = vld [vmem:[#allocation6 + $0x720] ss:$16 sps:$4 sm:$0xff]  }
0x1373   : > { %12502 = vmatprep.subr.bf16.mxu1 %v16310_v25  ;;  %v16440_v25 = vld [vmem:[#allocation6 + $0x740] ss:$16 sps:$4 sm:$0xff]  }
0x1376   : > { %12503 = vmatpush1.bf16.msra.mxu1 %v16308_v11  ;;  %v16445_v11 = vld [vmem:[#allocation6 + $0x764] ss:$16 sps:$4 sm:$0xff]  }
0x1377   : > { %12504 = vmatprep.subr.bf16.mxu1 %v16313_v7  ;;  %v16443_v7 = vld [vmem:[#allocation6 + $0x760] ss:$16 sps:$4 sm:$0xff]  }
0x137a   : > { %12505 = vmatpush1.bf16.msra.mxu1 %v16311_v16  ;;  %v16448_v16 = vld [vmem:[#allocation6 + $0x784] ss:$16 sps:$4 sm:$0xff]  }
0x137b   : > { %12515 = vmatprep.subr.bf16.mxu1 %v16316_v50  ;;  %v16446_v50 = vld [vmem:[#allocation6 + $0x780] ss:$16 sps:$4 sm:$0xff]  }
0x137d   : > { %12507 = vmatmul.mubr.bf16.vlgmr.msra.gmra.mrb[100].mxu1 %v18358_v54  ;;  %v16329_v54 = vld [vmem:[#allocation6 + $0x4a0] ss:$16 sps:$4 sm:$0xff]  }
0x137e   : > { %12516 = vmatpush1.bf16.msra.mxu1 %v16314_v17  ;;  %12547 = vmatprep.mubr.bf16.mxu1 %v18362_v19  ;;  %v16332_v19 = vld [vmem:[#allocation6 + $0x4c0] ss:$16 sps:$4 sm:$0xff]   ;;  %v16451_v17 = vld [vmem:[#allocation6 + $0x7a4] ss:$16 sps:$4 sm:$0xff]  }
0x137f   : > { %12517 = vmatprep.subr.bf16.mxu1 %v16319_v22  ;;  %v16449_v22 = vld [vmem:[#allocation6 + $0x7a0] ss:$16 sps:$4 sm:$0xff]  }
0x1382   : > { %12518 = vmatpush1.bf16.msra.mxu1 %v16317_v2  ;;  %v16454_v2 = vld [vmem:[#allocation6 + $0x7c4] ss:$16 sps:$4 sm:$0xff]  }
0x1383   : > { %12519 = vmatprep.subr.bf16.mxu1 %v16322_v28  ;;  %v16452_v28 = vld [vmem:[#allocation6 + $0x7c0] ss:$16 sps:$4 sm:$0xff]  }
0x1386   : > { %12520 = vmatpush1.bf16.msra.mxu1 %v16320_v44  ;;  %v16457_v44 = vld [vmem:[#allocation6 + $0x7e4] ss:$16 sps:$4 sm:$0xff]  }
0x1387   : > { %12521 = vmatprep.subr.bf16.mxu1 %v16325_v63  ;;  %v16455_v63 = vld [vmem:[#allocation6 + $0x7e0] ss:$16 sps:$4 sm:$0xff]  }
0x138a   : > { %12522 = vmatpush1.bf16.msra.mxu1 %v16323_v52  ;;  %v16460_v52 = vld [vmem:[#allocation7 + $0x4] ss:$8 sps:$4 sm:$0xff]  }
0x138b   : > { %12523 = vmatprep.subr.bf16.mxu1 %v16328_v38  ;;  %v16458_v38 = vld [vmem:[#allocation7] ss:$8 sps:$4 sm:$0xff]  }
0x138e   : > { %12524 = vmatpush1.bf16.msra.mxu1 %v16326_v31  ;;  %v16463_v31 = vld [vmem:[#allocation7 + $0x14] ss:$8 sps:$4 sm:$0xff]  }
0x138f   : > { %12525 = vmatprep.subr.bf16.mxu1 %v16331_v46  ;;  %v16461_v46 = vld [vmem:[#allocation7 + $0x10] ss:$8 sps:$4 sm:$0xff]  }
0x1392   : > { %12526 = vmatpush1.bf16.msra.mxu1 %v16329_v54  ;;  %v16466_v54 = vld [vmem:[#allocation7 + $0x24] ss:$8 sps:$4 sm:$0xff]  }
0x1393   : > { %12527 = vmatprep.subr.bf16.mxu1 %v16334_v30  ;;  %v16464_v30 = vld [vmem:[#allocation7 + $0x20] ss:$8 sps:$4 sm:$0xff]  }
0x1396   : > { %12528 = vmatpush1.bf16.msra.mxu1 %v16332_v19  ;;  %v16469_v19 = vld [vmem:[#allocation7 + $0x34] ss:$8 sps:$4 sm:$0xff]  }
0x1397   : > { %12529 = vmatprep.subr.bf16.mxu1 %v16340_v15  ;;  %v16467_v15 = vld [vmem:[#allocation7 + $0x30] ss:$8 sps:$4 sm:$0xff]  }
0x139a   : > { %12530 = vmatpush1.bf16.msra.mxu1 %v16338_v48  ;;  %v16472_v48 = vld [vmem:[#allocation7 + $0x44] ss:$8 sps:$4 sm:$0xff]  }
0x139b   : > { %12531 = vmatprep.subr.bf16.mxu1 %v16346_v40  ;;  %v16470_v40 = vld [vmem:[#allocation7 + $0x40] ss:$8 sps:$4 sm:$0xff]  }
0x139e   : > { %12532 = vmatpush1.bf16.msra.mxu1 %v16344_v24  ;;  %v16475_v24 = vld [vmem:[#allocation7 + $0x54] ss:$8 sps:$4 sm:$0xff]  }
0x139f   : > { %12533 = vmatprep.subr.bf16.mxu1 %v16352_v41  ;;  %v16473_v41 = vld [vmem:[#allocation7 + $0x50] ss:$8 sps:$4 sm:$0xff]  }
0x13a2   : > { %12534 = vmatpush1.bf16.msra.mxu1 %v16350_v49  ;;  %v16476_v49 = vld [vmem:[#allocation7 + $0x60] ss:$8 sps:$4 sm:$0xff]  }
0x13a3   : > { %12535 = vmatprep.subr.bf16.mxu1 %v16358_v23  ;;  %v16478_v23 = vld [vmem:[#allocation7 + $0x64] ss:$8 sps:$4 sm:$0xff]  }
0x13a6   : > { %12536 = vmatpush1.bf16.msra.mxu1 %v16356_v33  ;;  %v16481_v33 = vld [vmem:[#allocation7 + $0x74] ss:$8 sps:$4 sm:$0xff]  }
0x13a7   : > { %12537 = vmatprep.subr.bf16.mxu1 %v16364_v4  ;;  %v16479_v4 = vld [vmem:[#allocation7 + $0x70] ss:$8 sps:$4 sm:$0xff]  }
0x13aa   : > { %12538 = vmatpush1.bf16.msra.mxu1 %v16362_v13  ;;  %v16484_v13 = vld [vmem:[#allocation7 + $0x84] ss:$8 sps:$4 sm:$0xff]  }
0x13ab   : > { %12539 = vmatprep.subr.bf16.mxu1 %v16370_v43  ;;  %v16482_v43 = vld [vmem:[#allocation7 + $0x80] ss:$8 sps:$4 sm:$0xff]  }
0x13ae   : > { %12540 = vmatpush1.bf16.msra.mxu1 %v16368_v51  ;;  %v16487_v51 = vld [vmem:[#allocation7 + $0x94] ss:$8 sps:$4 sm:$0xff]  }
0x13af   : > { %12541 = vmatprep.subr.bf16.mxu1 %v16376_v59  ;;  %v16485_v59 = vld [vmem:[#allocation7 + $0x90] ss:$8 sps:$4 sm:$0xff]  }
0x13b2   : > { %12542 = vmatpush1.bf16.msra.mxu1 %v16374_v18  ;;  %v16490_v18 = vld [vmem:[#allocation7 + $0xa4] ss:$8 sps:$4 sm:$0xff]  }
0x13b3   : > { %12543 = vmatprep.subr.bf16.mxu1 %v16382_v0  ;;  %v16488_v0 = vld [vmem:[#allocation7 + $0xa0] ss:$8 sps:$4 sm:$0xff]  }
0x13b6   : > { %12544 = vmatpush1.bf16.msra.mxu1 %v16380_v55  ;;  %v16493_v55 = vld [vmem:[#allocation7 + $0xb4] ss:$8 sps:$4 sm:$0xff]  }
0x13b7   : > { %12545 = vmatprep.subr.bf16.mxu1 %v16388_v60  ;;  %v16491_v60 = vld [vmem:[#allocation7 + $0xb0] ss:$8 sps:$4 sm:$0xff]  }
0x13ba   : > { %12546 = vmatpush1.bf16.msra.mxu1 %v16386_v61  ;;  %v16496_v61 = vld [vmem:[#allocation7 + $0xc4] ss:$8 sps:$4 sm:$0xff]  }
0x13bb   : > { %12556 = vmatprep.subr.bf16.mxu1 %v16394_v9  ;;  %v16494_v9 = vld [vmem:[#allocation7 + $0xc0] ss:$8 sps:$4 sm:$0xff]  }
0x13bd   : > { %12548 = vmatmul.mubr.bf16.vlgmr.msra.gmra.mrb[100].mxu1 %v18370_v35 }
0x13be   : > { %12557 = vmatpush1.bf16.msra.mxu1 %v16392_v6  ;;  %v16499_v6 = vld [vmem:[#allocation7 + $0xd4] ss:$8 sps:$4 sm:$0xff]  }
0x13bf   : > { %12558 = vmatprep.subr.bf16.mxu1 %v16400_v32  ;;  %v16497_v32 = vld [vmem:[#allocation7 + $0xd0] ss:$8 sps:$4 sm:$0xff]  }
0x13c2   : > { %12559 = vmatpush1.bf16.msra.mxu1 %v16398_v21  ;;  %v16502_v21 = vld [vmem:[#allocation7 + $0xe4] ss:$8 sps:$4 sm:$0xff]  }
0x13c3   : > { %12560 = vmatprep.subr.bf16.mxu1 %v16406_v8  ;;  %v16500_v8 = vld [vmem:[#allocation7 + $0xe0] ss:$8 sps:$4 sm:$0xff]  }
0x13c6   : > { %12561 = vmatpush1.bf16.msra.mxu1 %v16404_v47  ;;  %v16505_v47 = vld [vmem:[#allocation7 + $0xf4] ss:$8 sps:$4 sm:$0xff]  }
0x13c7   : > { %12562 = vmatprep.subr.bf16.mxu1 %v16412_v39  ;;  %v16503_v39 = vld [vmem:[#allocation7 + $0xf0] ss:$8 sps:$4 sm:$0xff]  }
0x13ca   : > { %12563 = vmatpush1.bf16.msra.mxu1 %v16410_v5  ;;  %v16508_v5 = vld [vmem:[#allocation7 + $0x104] ss:$8 sps:$4 sm:$0xff]  }
0x13cb   : > { %12564 = vmatprep.subr.bf16.mxu1 %v16418_v37  ;;  %v16554_v37 = vld [vmem:[#allocation9 + $0x40] sm:$0xff]  }
0x13cc   : > { %15237 = vmatprep.subr.bf16.mxu0 %v16554_v37  ;;  %v16550_v37 = vld [vmem:[#allocation7 + $0x1e4] ss:$8 sps:$4 sm:$0xff]  }
0x13ce   : > { %12565 = vmatpush1.bf16.msra.mxu1 %v16416_v12  ;;  %v16555_v12 = vld [vmem:[#allocation9] sm:$0xff]  }
0x13cf   : > { %12566 = vmatprep.subr.bf16.mxu1 %v16424_v1  ;;  %v16556_v1 = vld [vmem:[#allocation9 + $0x48] sm:$0xff]  }
0x13d0   : > { %v10861_v35 = vpop.f32.mrb[96].mxu1 }
0x13d1   : > { %v10874_v42 = vpack.c.bf16 %v10861_v35, %v10861_v35  ;;  %v15449_v29 = vpop.f32.mrb[97].mxu1  ;;  %v16558_v35 = vld [vmem:[#allocation9 + $0x50] sm:$0xff]  }
0x13d2   : > { %12567 = vmatpush1.bf16.msra.mxu1 %v16422_v20  ;;  %v10864_v58 = vpop.f32.mrb[98].mxu1  ;;  %v16557_v20 = vld [vmem:[#allocation9 + $0x8] sm:$0xff]   ;;  %v16561_v29 = vld [vmem:[#allocation9 + $0x18] sm:$0xff]  }
0x13d3   : > { %v15450_v34 = vpop.f32.mrb[99].mxu1  ;;  %12588 = vmatprep.mubr.bf16.mxu1 %v10874_v42  ;;  %12752 = vmatprep.mubr.bf16.mxu0 %v10874_v42  ;;  %v16560_v42 = vld [vmem:[#allocation9 + $0x58] sm:$0xff]  }
0x13d4   : > { %12568 = vmatprep.subr.bf16.mxu1 %v16430_v14  ;;  %12753 = vmatmul.mubr.bf16.vlgmr.msra.gmra.mrb[108].mxu0 %v10873_v10  ;;  %v16559_v14 = vld [vmem:[#allocation9 + $0x10] sm:$0xff]   ;;  %v16563_v34 = vld [vmem:[#allocation9 + $0x20] sm:$0xff]  }
0x13d5   : > { %15238 = vmatpush3.bf16.msra.mxu0 %v16555_v12  ;;  %v16548_v12 = vld [vmem:[#allocation7 + $0x1e0] ss:$8 sps:$4 sm:$0xff]  }
0x13d6   : > { %12569 = vmatpush1.bf16.msra.mxu1 %v16428_v57  ;;  %15239 = vmatprep.subr.bf16.mxu0 %v16556_v1 }
0x13d7   : > { %12570 = vmatprep.subr.bf16.mxu1 %v16433_v3 }
0x13d9   : > { %15240 = vmatpush3.bf16.msra.mxu0 %v16557_v20  ;;  %v16553_v20 = vld [vmem:[#allocation7 + $0x1f4] ss:$8 sps:$4 sm:$0xff]  }
0x13da   : > { %12571 = vmatpush1.bf16.msra.mxu1 %v16431_v26  ;;  %15241 = vmatprep.subr.bf16.mxu0 %v16558_v35  ;;  %v16564_v26 = vld [vmem:[#allocation9 + $0x68] sm:$0xff]   ;;  %v16551_v35 = vld [vmem:[#allocation7 + $0x1f0] ss:$8 sps:$4 sm:$0xff]  }
0x13db   : > { %12572 = vmatprep.subr.bf16.mxu1 %v16436_v53 }
0x13dd   : > { %15242 = vmatpush3.bf16.msra.mxu0 %v16559_v14 }
0x13de   : > { %12573 = vmatpush1.bf16.msra.mxu1 %v16434_v27  ;;  %15243 = vmatprep.subr.bf16.mxu0 %v16560_v42  ;;  %v16565_v27 = vld [vmem:[#allocation9 + $0x28] sm:$0xff]  }
0x13df   : > { %12574 = vmatprep.subr.bf16.mxu1 %v16439_v62  ;;  %v18387_v62 = vld [vmem:[#allocation13] sm:$0xf] }
0x13e1   : > { %15244 = vmatpush3.bf16.msra.mxu0 %v16561_v29  ;;  %v16566_v29 = vld [vmem:[#allocation9 + $0x70] sm:$0xff]  }
0x13e2   : > { %12575 = vmatpush1.bf16.msra.mxu1 %v16437_v36  ;;  %v11148_v36 = vrot.slane %v18387_v62, %v17591_v45  ;;  %v16511_v45 = vld [vmem:[#allocation7 + $0x114] ss:$8 sps:$4 sm:$0xff]  }
0x13e3   : > { %12576 = vmatprep.subr.bf16.mxu1 %v16442_v56  ;;  %v18649_v56 = vld [vmem:[#allocation30_spill] sm:$0xff] }
0x13e6   : > { %12577 = vmatpush1.bf16.msra.mxu1 %v16440_v25  ;;  %v11136_v25 = vrot.slane %v18387_v62, %v18649_v56 }
0x13e7   : > { %12578 = vmatprep.subr.bf16.mxu1 %v16445_v11  ;;  %v18650_v11 = vld [vmem:[#allocation31_spill] sm:$0xff] }
0x13ea   : > { %12579 = vmatpush1.bf16.msra.mxu1 %v16443_v7  ;;  %v11140_v7 = vrot.slane %v18387_v62, %v18650_v11 }
0x13eb   : > { %12580 = vmatprep.subr.bf16.mxu1 %v16448_v16 }
0x13ee   : > { %12581 = vmatpush1.bf16.msra.mxu1 %v16446_v50 }
0x13ef   : > { %12582 = vmatprep.subr.bf16.mxu1 %v16451_v17 }
0x13f2   : > { %12583 = vmatpush1.bf16.msra.mxu1 %v16449_v22 }
0x13f3   : > { %12584 = vmatprep.subr.bf16.mxu1 %v16454_v2 }
0x13f6   : > { %12585 = vmatpush1.bf16.msra.mxu1 %v16452_v28 }
0x13f7   : > { %12586 = vmatprep.subr.bf16.mxu1 %v16457_v44 }
0x13fa   : > { %12587 = vmatpush1.bf16.msra.mxu1 %v16455_v63 }
0x13fb   : > { %13165 = vmatprep.subr.bf16.mxu1 %v16460_v52 }
0x13fd   : > { %12589 = vmatmul.mubr.bf16.vlgmr.msra.gmra.mrb[100].mxu1 %v10873_v10  ;;  %v16562_v10 = vld [vmem:[#allocation9 + $0x60] sm:$0xff]  }
0x13fe   : > { %13166 = vmatpush1.bf16.msra.mxu1 %v16458_v38  ;;  %15245 = vmatprep.subr.bf16.mxu0 %v16562_v10  ;;  %v16567_v10 = vld [vmem:[#allocation9 + $0x30] sm:$0xff]  }
0x13ff   : > { %13167 = vmatprep.subr.bf16.mxu1 %v16463_v31  ;;  %15246 = vmatpush3.bf16.msra.mxu0 %v16563_v34  ;;  %v16569_v34 = vld [vmem:[#allocation9 + $0x38] sm:$0xff]  }
0x1400   : > { %15247 = vmatprep.subr.bf16.mxu0 %v16564_v26 }
0x1402   : > { %13168 = vmatpush1.bf16.msra.mxu1 %v16461_v46  ;;  %v16506_v46 = vld [vmem:[#allocation7 + $0x100] ss:$8 sps:$4 sm:$0xff]  }
0x1403   : > { %13169 = vmatprep.subr.bf16.mxu1 %v16466_v54  ;;  %15248 = vmatpush3.bf16.msra.mxu0 %v16565_v27 }
0x1404   : > { %15249 = vmatprep.subr.bf16.mxu0 %v16566_v29 }
0x1406   : > { %13170 = vmatpush1.bf16.msra.mxu1 %v16464_v30 }
0x1407   : > { %13171 = vmatprep.subr.bf16.mxu1 %v16469_v19  ;;  %v16509_v19 = vld [vmem:[#allocation7 + $0x110] ss:$8 sps:$4 sm:$0xff]   ;;  %15250 = vmatpush3.bf16.msra.mxu0 %v16567_v10 }
0x140a   : > { %13172 = vmatpush1.bf16.msra.mxu1 %v16467_v15  ;;  %v16514_v15 = vld [vmem:[#allocation7 + $0x124] ss:$8 sps:$4 sm:$0xff]  }
0x140b   : > { %13173 = vmatprep.subr.bf16.mxu1 %v16472_v48  ;;  %v16512_v48 = vld [vmem:[#allocation7 + $0x120] ss:$8 sps:$4 sm:$0xff]  }
0x140e   : > { %13174 = vmatpush1.bf16.msra.mxu1 %v16470_v40  ;;  %v16517_v40 = vld [vmem:[#allocation7 + $0x134] ss:$8 sps:$4 sm:$0xff]  }
0x140f   : > { %13175 = vmatprep.subr.bf16.mxu1 %v16475_v24  ;;  %v16515_v24 = vld [vmem:[#allocation7 + $0x130] ss:$8 sps:$4 sm:$0xff]  }
0x1412   : > { %13176 = vmatpush1.bf16.msra.mxu1 %v16473_v41  ;;  %v16520_v41 = vld [vmem:[#allocation7 + $0x144] ss:$8 sps:$4 sm:$0xff]  }
0x1413   : > { %13177 = vmatprep.subr.bf16.mxu1 %v16478_v23  ;;  %v16523_v23 = vld [vmem:[#allocation7 + $0x154] ss:$8 sps:$4 sm:$0xff]  }
0x1416   : > { %13178 = vmatpush1.bf16.msra.mxu1 %v16476_v49  ;;  %v16518_v49 = vld [vmem:[#allocation7 + $0x140] ss:$8 sps:$4 sm:$0xff]  }
0x1417   : > { %13179 = vmatprep.subr.bf16.mxu1 %v16481_v33  ;;  %v16521_v33 = vld [vmem:[#allocation7 + $0x150] ss:$8 sps:$4 sm:$0xff]  }
0x141a   : > { %13180 = vmatpush1.bf16.msra.mxu1 %v16479_v4  ;;  %v16526_v4 = vld [vmem:[#allocation7 + $0x164] ss:$8 sps:$4 sm:$0xff]  }
0x141b   : > { %13181 = vmatprep.subr.bf16.mxu1 %v16484_v13  ;;  %v16524_v13 = vld [vmem:[#allocation7 + $0x160] ss:$8 sps:$4 sm:$0xff]  }
0x141e   : > { %13182 = vmatpush1.bf16.msra.mxu1 %v16482_v43  ;;  %v16529_v43 = vld [vmem:[#allocation7 + $0x174] ss:$8 sps:$4 sm:$0xff]  }
0x141f   : > { %13183 = vmatprep.subr.bf16.mxu1 %v16487_v51  ;;  %v16527_v51 = vld [vmem:[#allocation7 + $0x170] ss:$8 sps:$4 sm:$0xff]  }
0x1422   : > { %13184 = vmatpush1.bf16.msra.mxu1 %v16485_v59  ;;  %v16532_v59 = vld [vmem:[#allocation7 + $0x184] ss:$8 sps:$4 sm:$0xff]  }
0x1423   : > { %13185 = vmatprep.subr.bf16.mxu1 %v16490_v18  ;;  %v16530_v18 = vld [vmem:[#allocation7 + $0x180] ss:$8 sps:$4 sm:$0xff]  }
0x1426   : > { %13186 = vmatpush1.bf16.msra.mxu1 %v16488_v0  ;;  %v16535_v0 = vld [vmem:[#allocation7 + $0x194] ss:$8 sps:$4 sm:$0xff]  }
0x1427   : > { %13187 = vmatprep.subr.bf16.mxu1 %v16493_v55  ;;  %v16533_v55 = vld [vmem:[#allocation7 + $0x190] ss:$8 sps:$4 sm:$0xff]  }
0x142a   : > { %13188 = vmatpush1.bf16.msra.mxu1 %v16491_v60  ;;  %v16538_v60 = vld [vmem:[#allocation7 + $0x1a4] ss:$8 sps:$4 sm:$0xff]  }
0x142b   : > { %13189 = vmatprep.subr.bf16.mxu1 %v16496_v61  ;;  %v16536_v61 = vld [vmem:[#allocation7 + $0x1a0] ss:$8 sps:$4 sm:$0xff]  }
0x142e   : > { %13190 = vmatpush1.bf16.msra.mxu1 %v16494_v9  ;;  %v16541_v9 = vld [vmem:[#allocation7 + $0x1b4] ss:$8 sps:$4 sm:$0xff]  }
0x142f   : > { %13191 = vmatprep.subr.bf16.mxu1 %v16499_v6  ;;  %v16539_v6 = vld [vmem:[#allocation7 + $0x1b0] ss:$8 sps:$4 sm:$0xff]  }
0x1432   : > { %13192 = vmatpush1.bf16.msra.mxu1 %v16497_v32  ;;  %v16544_v32 = vld [vmem:[#allocation7 + $0x1c4] ss:$8 sps:$4 sm:$0xff]  }
0x1433   : > { %13193 = vmatprep.subr.bf16.mxu1 %v16502_v21  ;;  %v16542_v21 = vld [vmem:[#allocation7 + $0x1c0] ss:$8 sps:$4 sm:$0xff]  }
0x1436   : > { %13194 = vmatpush1.bf16.msra.mxu1 %v16500_v8  ;;  %v16547_v8 = vld [vmem:[#allocation7 + $0x1d4] ss:$8 sps:$4 sm:$0xff]  }
0x1437   : > { %13195 = vmatprep.subr.bf16.mxu1 %v16505_v47  ;;  %v16545_v47 = vld [vmem:[#allocation7 + $0x1d0] ss:$8 sps:$4 sm:$0xff]  }
0x143a   : > { %13196 = vmatpush1.bf16.msra.mxu1 %v16503_v39  ;;  %v18651_v39 = vld [vmem:[#allocation32_spill] sm:$0xff] }
0x143b   : > { %13206 = vmatprep.subr.bf16.mxu1 %v16508_v5  ;;  %v11144_v5 = vrot.slane %v18387_v62, %v18651_v39 }
0x14a7   : > { %v18385_v58 = vpop.f32.mrb[108].mxu0 }
0x14a8   : > { %v12756_v57 = vpop.f32.mrb[109].mxu0  ;;  %v15589_v1 = vadd.f32 %v18385_v58, %v11144_v5 }
0x14a9   : > { %v12758_v3 = vpop.f32.mrb[110].mxu0  ;;  %v15590_v16 = vadd.f32 %v12756_v57, %v11148_v36  ;;  %v16568_v57 = vld [vmem:[#allocation9 + $0x78] sm:$0xff]  }
0x14aa   : > { %v12759_v53 = vpop.f32.mrb[111].mxu0  ;;  %v12763_v14 = vmax.f32 %v15589_v1, 0.0  ;;  %15251 = vmatprep.subr.bf16.mxu0 %v16568_v57  ;;  %v12833_v3 = vld [vmem:[#allocation15] sm:$0x3] }
0x14ab   : > { %v12764_v52 = vmax.f32 %v15590_v16, 0.0  ;;  %15252 = vmatpush3.bf16.msra.mxu0 %v16569_v34  ;;  %v12838_v58 = vrot.slane %v12833_v3, %v18649_v56  ;;  %v12842_v26 = vrot.slane %v12833_v3, %v18650_v11 }
0x14ac   : > { %v12767_v42 = vpack.c.bf16 %v12763_v14, %v12763_v14 }
0x14ad   : > { %v12768_v30 = vpack.c.bf16 %v12764_v52, %v12764_v52 }
0x14d0   : > { %v12590_v50 = vpop.f32.mrb[100].mxu1 }
0x14d1   : > { %v15587_v17 = vadd.f32 %v12590_v50, %v11136_v25  ;;  %v12592_v22 = vpop.f32.mrb[101].mxu1 }
0x14d2   : > { %v15588_v2 = vadd.f32 %v12592_v22, %v11140_v7  ;;  %v12594_v28 = vpop.f32.mrb[102].mxu1 }
0x14d3   : > { %v12761_v44 = vmax.f32 %v15587_v17, 0.0  ;;  %v12595_v63 = vpop.f32.mrb[103].mxu1 }
0x14d4   : > { %v12762_v38 = vmax.f32 %v15588_v2, 0.0 }
0x14d5   : > { %v12765_v54 = vpack.c.bf16 %v12761_v44, %v12761_v44  ;;  %v15138_v44 = vld [vmem:[#allocation16] ss:$0 sm:$0xff] }
0x14d6   : > { %v12766_v31 = vpack.c.bf16 %v12762_v38, %v12762_v38 }
0x14d8   : > { %13197 = vmatprep.mubr.bf16.mxu1 %v12766_v31 }
0x14d9   : > { %13198 = vmatmul.mubr.bf16.vlgmr.msra.gmra.mrb[104].mxu1 %v12765_v54 }
0x14da   : > { %13207 = vmatpush1.bf16.msra.mxu1 %v16506_v46  ;;  %13238 = vmatprep.mubr.bf16.mxu1 %v12768_v30 }
0x14db   : > { %13208 = vmatprep.subr.bf16.mxu1 %v16511_v45 }
0x14de   : > { %13209 = vmatpush1.bf16.msra.mxu1 %v16509_v19 }
0x14df   : > { %13210 = vmatprep.subr.bf16.mxu1 %v16514_v15 }
0x14e2   : > { %13211 = vmatpush1.bf16.msra.mxu1 %v16512_v48 }
0x14e3   : > { %13212 = vmatprep.subr.bf16.mxu1 %v16517_v40 }
0x14e6   : > { %13213 = vmatpush1.bf16.msra.mxu1 %v16515_v24 }
0x14e7   : > { %13214 = vmatprep.subr.bf16.mxu1 %v16520_v41 }
0x14ea   : > { %13215 = vmatpush1.bf16.msra.mxu1 %v16518_v49 }
0x14eb   : > { %13216 = vmatprep.subr.bf16.mxu1 %v16523_v23 }
0x14ee   : > { %13217 = vmatpush1.bf16.msra.mxu1 %v16521_v33 }
0x14ef   : > { %13218 = vmatprep.subr.bf16.mxu1 %v16526_v4 }
0x14f2   : > { %13219 = vmatpush1.bf16.msra.mxu1 %v16524_v13 }
0x14f3   : > { %13220 = vmatprep.subr.bf16.mxu1 %v16529_v43 }
0x14f6   : > { %13221 = vmatpush1.bf16.msra.mxu1 %v16527_v51 }
0x14f7   : > { %13222 = vmatprep.subr.bf16.mxu1 %v16532_v59 }
0x14fa   : > { %13223 = vmatpush1.bf16.msra.mxu1 %v16530_v18 }
0x14fb   : > { %13224 = vmatprep.subr.bf16.mxu1 %v16535_v0 }
0x14fe   : > { %13225 = vmatpush1.bf16.msra.mxu1 %v16533_v55 }
0x14ff   : > { %13226 = vmatprep.subr.bf16.mxu1 %v16538_v60 }
0x1502   : > { %13227 = vmatpush1.bf16.msra.mxu1 %v16536_v61 }
0x1503   : > { %13228 = vmatprep.subr.bf16.mxu1 %v16541_v9 }
0x1506   : > { %13229 = vmatpush1.bf16.msra.mxu1 %v16539_v6 }
0x1507   : > { %13230 = vmatprep.subr.bf16.mxu1 %v16544_v32 }
0x150a   : > { %13231 = vmatpush1.bf16.msra.mxu1 %v16542_v21 }
0x150b   : > { %13232 = vmatprep.subr.bf16.mxu1 %v16547_v8 }
0x150e   : > { %13233 = vmatpush1.bf16.msra.mxu1 %v16545_v47 }
0x150f   : > { %13234 = vmatprep.subr.bf16.mxu1 %v16550_v37 }
0x1512   : > { %13235 = vmatpush1.bf16.msra.mxu1 %v16548_v12 }
0x1513   : > { %13236 = vmatprep.subr.bf16.mxu1 %v16553_v20 }
0x1516   : > { %13237 = vmatpush1.bf16.msra.mxu1 %v16551_v35 }
0x1519   : > { %13239 = vmatmul.mubr.bf16.vlgmr.msra.gmra.mrb[104].mxu1 %v12767_v42 }
0x15ec   : > { %v13240_v53 = vpop.f32.mrb[104].mxu1 }
0x15ed   : > { %v15591_v27 = vadd.f32 %v13240_v53, %v12838_v58  ;;  %v13242_v62 = vpop.f32.mrb[105].mxu1 }
0x15ee   : > { %v15592_v36 = vadd.f32 %v13242_v62, %v12842_v26  ;;  %v13244_v25 = vpop.f32.mrb[106].mxu1 }
0x15ef   : > { %v13247_v7 = vmax.f32 %v15591_v27, 0.0  ;;  %v13245_v16 = vpop.f32.mrb[107].mxu1 }
0x15f0   : > { %v13248_v50 = vmax.f32 %v15592_v36, 0.0 }
0x15f1   : > { %v13249_v22 = vpack.c.bf16 %v13247_v7, %v13247_v7 }
0x15f2   : > { %v13250_v17 = vpack.c.bf16 %v13248_v50, %v13248_v50 }
0x15f4   : > { %13418 = vmatprep.mubr.bf16.mxu0 %v13250_v17 }
0x15f5   : > { %13419 = vmatmul.mubr.bf16.vlgmr.msra.gmra.mrb[112].mxu0 %v13249_v22 }
0x16c8   : > { %v15253_v2 = vpop.f32.mrb[112].mxu0 }
0x16c9   : > { %v15254_v28 = vpop.f32.mrb[113].mxu0 }
0x16ca   : > { %v15255_v63 = vadd.f32 %v15254_v28, %v15253_v2  ;;  %v15256_v56 = vpop.f32.mrb[114].mxu0 }
0x16cb   : > { %v15257_v52 = vpop.f32.mrb[115].mxu0 }
0x16cc   : > { %v13421_v11 = vadd.f32 %v15255_v63, %v15138_v44 }
0x16ce   : > { %13426 = vmax.xlane.f32.xlu0 %v13421_v11 }
0x175b   : > { %v13427_v38 = vpop.xlane.xlu0 %13426 }
0x175c   : > { %v13428_v31 = vsub.f32 %v13421_v11, %v13427_v38 }
0x175e   : > { %v13429_v46 = vmul.f32 1.442695, %v13428_v31 }
0x1760   : > { %16602 = vpow2.f32 %v13429_v46 }
0x176a   : > { %v16603_v54 = vpop.eup %16602 }
0x176b   : > { %13431 = vadd.xlane.f32.xlu1 %v16603_v54 }
0x17f8   : > { %v13432_v45 = vpop.xlane.xlu1 %13431 }
0x17f9   : > { %16604 = vrcp.f32 %v13432_v45 }
0x1803   : > { %v16605_v30 = vpop.eup %16604 }
0x1804   : > { %v13434_v19 = vmul.f32 %v16605_v30, %v16603_v54 }
0x1806   : > { %13435 = vst [vmem:[%s572_s3] sm:$0xff] %v13434_v19 }
0x1807 PF: > { %s18652_s29 = sld [smem:[#allocation24_spill]] }
0x180d   : > { %s28_s21 = sadd.s32 1, %s18652_s29  }
0x180e   : > { %p25_p12 = scmp.ge.s32.totalorder %s28_s21, 4  }
0x1810   :  { %27 = sbr.rel (!%p25_p12) target bundleno = 8 (0x8), region = 142 }
0x1817   :  { %13455 = vsyncpa [#allocation3], 1 }
0x1818   :  { %13457 = vsyncpa [#allocation3 + $0x1], 1 }
0x1819   :  { %13458 = vsyncpa [#allocation5], 1 }
0x181a   :  { %13459 = vsyncpa [#allocation8], 1 }
0x181b   :  { %13460 = vsyncpa [#allocation11], 1 }
0x181c   :  { %13461 = vsyncpa [#allocation14], 1 }
0x181d   :  { %13462 = vsyncpa [#allocation17], 1 }

</bundles_post_ra>
